<compile_context>
chip_gen: v5e
topology: v5e:2x2
jax: 0.10.0
libtpu: 0.0.40
codegen_flags: <defaults>
</compile_context>

<pallas_src>
import functools

import jax
import jax.numpy as jnp
from jax.experimental import pallas as pl
from jax.experimental.pallas import tpu as pltpu


def _round_up(x, m):
    return ((x + m - 1) // m) * m


def _fused_cls_kernel(x_ref, w_ref, bias_ref, mask_ref, o_ref,
                      act_ref, col_ref, *, B, H, W, C, L):
    """One conv3x3 (+ReLU/Sigmoid) layer per grid step, activations VMEM-resident.

    x_ref:    (B, SLAB, C)   zero-bordered, row-flattened input slab
    w_ref:    (1, 9*C, N)    this layer's HWIO-flattened weight (K = 9*C)
    bias_ref: (1, 1, N)      this layer's bias
    mask_ref: (B*M, 1)       1.0 where the row's x-position < W, else 0.0
    o_ref:    (B, M, N)      last-layer output (junk cols / padded lanes kept)
    act_ref:  (B, SLAB, C)   persistent padded activation slab (scratch)
    col_ref:  (B*M, 9*C)     im2col buffer (scratch)
    where P = W + 2, M = H * P, SLAB >= (H + 2) * P + 2.
    """
    P = W + 2
    M = H * P
    l = pl.program_id(0)

    @pl.when(l == 0)
    def _():
        # Slab arrives pre-padded (zero border + zero tail rows), so one full
        # aligned copy both loads the image and initializes every border
        # element used by all five layers.
        act_ref[...] = x_ref[...]

    # im2col: per image, 9 static row-offset strip loads from the flat 2-D
    # slab, stored at sublane/lane-aligned offsets of the col buffer.
    for b in range(B):
        for k in range(9):
            dy, dx = k // 3, k % 3
            col_ref[pl.ds(b * M, M), pl.ds(k * C, C)] = (
                act_ref[b, pl.ds(dy * P + dx, M), :])

    # One long-K MXU matmul for the whole batch-folded layer:
    # (B*M, 9*C) @ (9*C, N), f32 accumulation.
    y = jnp.dot(col_ref[...], w_ref[0], preferred_element_type=jnp.float32)
    y = y + bias_ref[0]

    @pl.when(l < L - 1)
    def _():
        # ReLU; zero the wrap-around junk rows (they land exactly on the
        # slab's zero-border positions) and write the interior back with a
        # single constant-offset store per image.
        y_act = (jnp.maximum(y, 0.0) * mask_ref[...])[:, :C]
        for b in range(B):
            act_ref[b, pl.ds(P + 1, M), :] = y_act[b * M:(b + 1) * M, :]

    @pl.when(l == L - 1)
    def _():
        # Lane-dense full-block store; junk rows / padded channels are
        # sliced off in the wrapper.
        o_ref[...] = jax.nn.sigmoid(y).reshape(B, M, -1).astype(o_ref.dtype)


def _fused_forward_nhwc(x_nhwc, params):
    """x_nhwc: (B, H, W, 256). params: L tuples of ((9*Cin, Cout), (Cout,))."""
    B, H, W, C = x_nhwc.shape
    L = len(params)
    P = W + 2
    M = H * P
    S = (H + 2) * P
    SLAB = _round_up(S + 2, 8)           # covers the largest shifted strip read
    cout = params[-1][0].shape[-1]       # 9 * num_classes
    N = max(C, _round_up(cout, 128))     # uniform lane-padded weight width

    # Stack/pad weights to a uniform (L, 9*C, N) slab so the layer grid axis
    # streams one block per step (overlapping next-layer weight DMA with this
    # layer's compute) instead of landing everything in the prologue.
    w_stack = jnp.stack(
        [jnp.pad(w, ((0, 0), (0, N - w.shape[-1]))) for w, _ in params])
    b_stack = jnp.stack(
        [jnp.pad(b, (0, N - b.shape[0])) for _, b in params]).reshape(L, 1, N)

    # Zero-bordered, row-flattened input slab (implements padding=1 once for
    # every layer); tail rows are zero so shifted strip reads never go OOB.
    x_pad = jnp.pad(x_nhwc, ((0, 0), (1, 1), (1, 1), (0, 0)))
    x_slab = jnp.pad(x_pad.reshape(B, S, C), ((0, 0), (0, SLAB - S), (0, 0)))

    # Rows whose x-position falls in the 2 wrap-around columns are junk.
    x_pos = jnp.tile(jnp.arange(P), B * H)
    mask = (x_pos < W).astype(x_nhwc.dtype).reshape(B * M, 1)

    kernel = functools.partial(_fused_cls_kernel, B=B, H=H, W=W, C=C, L=L)

    out = pl.pallas_call(
        kernel,
        out_shape=jax.ShapeDtypeStruct((B, M, N), x_nhwc.dtype),
        grid_spec=pltpu.PrefetchScalarGridSpec(
            num_scalar_prefetch=0,
            grid=(L,),
            in_specs=[
                pl.BlockSpec((B, SLAB, C), lambda l: (0, 0, 0)),   # input slab
                pl.BlockSpec((1, 9 * C, N), lambda l: (l, 0, 0)),  # layer weight
                pl.BlockSpec((1, 1, N), lambda l: (l, 0, 0)),      # layer bias
                pl.BlockSpec((B * M, 1), lambda l: (0, 0)),        # junk-row mask
            ],
            out_specs=pl.BlockSpec((B, M, N), lambda l: (0, 0, 0)),
            scratch_shapes=[
                pltpu.VMEM((B, SLAB, C), jnp.float32),     # padded act slab
                pltpu.VMEM((B * M, 9 * C), jnp.float32),   # im2col buffer
            ]),
        compiler_params=pltpu.CompilerParams(
            dimension_semantics=("arbitrary",),
            # ~7 MiB working set (2.25 MiB x2 weights, 1.4 MiB col, act/out);
            # 24 MiB leaves headroom yet fits every generation (v7x: 64 MiB).
            vmem_limit_bytes=24 * 1024 * 1024),
    )(x_slab, w_stack, b_stack, mask)

    # Drop the 2 wrap-around columns per row and the padded output channels.
    return out.reshape(B, H, P, N)[:, :, :W, :cout]       # (B, H, W, 9*nc)


def init_params(key, num_classes):
    """Deterministic synthetic params matching ClsModule.__init__ shapes.

    Weights are stored HWIO-flattened as (9*Cin, Cout) so each conv is a
    single K=9*Cin matmul against the im2col buffer.
    """
    chans = [(256, 256)] * 4 + [(256, 9 * num_classes)]
    params = []
    for i, (cin, cout) in enumerate(chans):
        kw, kb = jax.random.split(jax.random.fold_in(key, i))
        w = jax.random.normal(kw, (3, 3, cin, cout), jnp.float32) * 0.02
        b = jax.random.normal(kb, (cout,), jnp.float32) * 0.02
        params.append((w.reshape(9 * cin, cout), b))
    return params


@functools.partial(jax.jit, static_argnums=(2,))
def cls_module_forward(x_nchw, params, num_classes):
    # PyTorch input is NCHW; the kernel runs NHWC.  NHWC already equals the
    # module's permute(0, 2, 3, 1); view(B, -1, nc) is a row-major reshape.
    x = jnp.transpose(x_nchw, (0, 2, 3, 1))
    out = _fused_forward_nhwc(x, params)              # (B, H, W, 9*nc)
    return out.reshape(out.shape[0], -1, num_classes)


def _ref_forward(x_nchw, params, num_classes):
    """Pure-JAX reference (lax conv) to validate the Pallas kernel."""
    x = jnp.transpose(x_nchw, (0, 2, 3, 1))
    acts = ["relu"] * 4 + ["sigmoid"]
    for (w, b), act in zip(params, acts):
        cout = w.shape[-1]
        w_hwio = w.reshape(3, 3, w.shape[0] // 9, cout)
        x = jax.lax.conv_general_dilated(
            x, w_hwio, window_strides=(1, 1), padding="SAME",
            dimension_numbers=("NHWC", "HWIO", "NHWC")) + b
        x = jnp.maximum(x, 0.0) if act == "relu" else jax.nn.sigmoid(x)
    return x.reshape(x.shape[0], -1, num_classes)


if __name__ == "__main__":
    num_classes = 4
    B, C, H, W = 2, 256, 8, 8  # channels fixed at 256 by the module; small spatial
    key = jax.random.PRNGKey(0)
    kx, kp = jax.random.split(key)
    x = jax.random.normal(kx, (B, C, H, W), jnp.float32)
    params = init_params(kp, num_classes)

    out = jax.block_until_ready(cls_module_forward(x, params, num_classes))
    assert out.shape == (B, H * W * 9, num_classes), out.shape

    ref = _ref_forward(x, params, num_classes)
    max_err = float(jnp.max(jnp.abs(out - ref)))
    assert max_err < 1e-3, f"mismatch vs reference: {max_err}"

    print("KERNEL_OK")
</pallas_src>

<mosaic_0001>
module attributes {stable_mosaic.version = 11 : i64} {
  func.func @_fused_cls_kernel(%arg0: i32, %arg1: memref<2x104x256xf32, #tpu.memory_space<vmem>>, %arg2: memref<1x2304x256xf32, #tpu.memory_space<vmem>>, %arg3: memref<1x1x256xf32, #tpu.memory_space<vmem>>, %arg4: memref<160x1xf32, #tpu.memory_space<vmem>>, %arg5: memref<2x80x256xf32, #tpu.memory_space<vmem>>, %arg6: memref<2x104x256xf32, #tpu.memory_space<vmem>>, %arg7: memref<160x2304xf32, #tpu.memory_space<vmem>>) attributes {dimension_semantics = [#tpu.dimension_semantics<arbitrary>], iteration_bounds = array<i64: 5>, scalar_prefetch = 0 : i64, scratch_operands = 2 : i64, tpu.core_type = #tpu.core_type<tc>, window_params = [{pipeline_mode = #tpu.pipeline_mode<synchronous>, transform_indices = @transform_0, window_bounds = array<i64: 2, 104, 256>}, {transform_indices = @transform_1, window_bounds = array<i64: 1, 2304, 256>}, {transform_indices = @transform_2, window_bounds = array<i64: 1, 1, 256>}, {pipeline_mode = #tpu.pipeline_mode<synchronous>, transform_indices = @transform_3, window_bounds = array<i64: 160, 1>}, {pipeline_mode = #tpu.pipeline_mode<synchronous>, transform_indices = @transform_4, window_bounds = array<i64: 2, 80, 256>}]} {
    %c0_i32 = arith.constant 0 : i32
    %0 = arith.cmpi eq, %arg0, %c0_i32 : i32
    %1 = arith.extui %0 : i1 to i32
    %c0_i32_0 = arith.constant 0 : i32
    %2 = arith.cmpi ne, %1, %c0_i32_0 : i32
    scf.if %2 {
      %c0_84 = arith.constant 0 : index
      %c0_85 = arith.constant 0 : index
      %c0_86 = arith.constant 0 : index
      %71 = vector.load %arg1[%c0_84, %c0_85, %c0_86] : memref<2x104x256xf32, #tpu.memory_space<vmem>>, vector<2x104x256xf32>
      %c0_87 = arith.constant 0 : index
      %c0_88 = arith.constant 0 : index
      %c0_89 = arith.constant 0 : index
      %72 = vector.load %arg6[%c0_87, %c0_88, %c0_89] : memref<2x104x256xf32, #tpu.memory_space<vmem>>, vector<2x104x256xf32>
      tpu.vector_store %arg6[%c0_87, %c0_88, %c0_89], %71 {strides = array<i32>} : memref<2x104x256xf32, #tpu.memory_space<vmem>>, vector<2x104x256xf32>,
    } else {
    }
    %c0 = arith.constant 0 : index
    %c0_1 = arith.constant 0 : index
    %c0_2 = arith.constant 0 : index
    %3 = vector.load %arg6[%c0, %c0_1, %c0_2] : memref<2x104x256xf32, #tpu.memory_space<vmem>>, vector<1x80x256xf32>
    %4 = vector.shape_cast %3 : vector<1x80x256xf32> to vector<80x256xf32>
    %c0_3 = arith.constant 0 : index
    %c0_4 = arith.constant 0 : index
    %5 = vector.load %arg7[%c0_3, %c0_4] : memref<160x2304xf32, #tpu.memory_space<vmem>>, vector<80x256xf32>
    tpu.vector_store %arg7[%c0_3, %c0_4], %4 {strides = array<i32>} : memref<160x2304xf32, #tpu.memory_space<vmem>>, vector<80x256xf32>,
    %c0_5 = arith.constant 0 : index
    %c1 = arith.constant 1 : index
    %c0_6 = arith.constant 0 : index
    %6 = vector.load %arg6[%c0_5, %c1, %c0_6] : memref<2x104x256xf32, #tpu.memory_space<vmem>>, vector<1x80x256xf32>
    %7 = vector.shape_cast %6 : vector<1x80x256xf32> to vector<80x256xf32>
    %c0_7 = arith.constant 0 : index
    %c256 = arith.constant 256 : index
    %8 = vector.load %arg7[%c0_7, %c256] : memref<160x2304xf32, #tpu.memory_space<vmem>>, vector<80x256xf32>
    tpu.vector_store %arg7[%c0_7, %c256], %7 {strides = array<i32>} : memref<160x2304xf32, #tpu.memory_space<vmem>>, vector<80x256xf32>,
    %c0_8 = arith.constant 0 : index
    %c2 = arith.constant 2 : index
    %c0_9 = arith.constant 0 : index
    %9 = vector.load %arg6[%c0_8, %c2, %c0_9] : memref<2x104x256xf32, #tpu.memory_space<vmem>>, vector<1x80x256xf32>
    %10 = vector.shape_cast %9 : vector<1x80x256xf32> to vector<80x256xf32>
    %c0_10 = arith.constant 0 : index
    %c512 = arith.constant 512 : index
    %11 = vector.load %arg7[%c0_10, %c512] : memref<160x2304xf32, #tpu.memory_space<vmem>>, vector<80x256xf32>
    tpu.vector_store %arg7[%c0_10, %c512], %10 {strides = array<i32>} : memref<160x2304xf32, #tpu.memory_space<vmem>>, vector<80x256xf32>,
    %c0_11 = arith.constant 0 : index
    %c10 = arith.constant 10 : index
    %c0_12 = arith.constant 0 : index
    %12 = vector.load %arg6[%c0_11, %c10, %c0_12] : memref<2x104x256xf32, #tpu.memory_space<vmem>>, vector<1x80x256xf32>
    %13 = vector.shape_cast %12 : vector<1x80x256xf32> to vector<80x256xf32>
    %c0_13 = arith.constant 0 : index
    %c768 = arith.constant 768 : index
    %14 = vector.load %arg7[%c0_13, %c768] : memref<160x2304xf32, #tpu.memory_space<vmem>>, vector<80x256xf32>
    tpu.vector_store %arg7[%c0_13, %c768], %13 {strides = array<i32>} : memref<160x2304xf32, #tpu.memory_space<vmem>>, vector<80x256xf32>,
    %c0_14 = arith.constant 0 : index
    %c11 = arith.constant 11 : index
    %c0_15 = arith.constant 0 : index
    %15 = vector.load %arg6[%c0_14, %c11, %c0_15] : memref<2x104x256xf32, #tpu.memory_space<vmem>>, vector<1x80x256xf32>
    %16 = vector.shape_cast %15 : vector<1x80x256xf32> to vector<80x256xf32>
    %c0_16 = arith.constant 0 : index
    %c1024 = arith.constant 1024 : index
    %17 = vector.load %arg7[%c0_16, %c1024] : memref<160x2304xf32, #tpu.memory_space<vmem>>, vector<80x256xf32>
    tpu.vector_store %arg7[%c0_16, %c1024], %16 {strides = array<i32>} : memref<160x2304xf32, #tpu.memory_space<vmem>>, vector<80x256xf32>,
    %c0_17 = arith.constant 0 : index
    %c12 = arith.constant 12 : index
    %c0_18 = arith.constant 0 : index
    %18 = vector.load %arg6[%c0_17, %c12, %c0_18] : memref<2x104x256xf32, #tpu.memory_space<vmem>>, vector<1x80x256xf32>
    %19 = vector.shape_cast %18 : vector<1x80x256xf32> to vector<80x256xf32>
    %c0_19 = arith.constant 0 : index
    %c1280 = arith.constant 1280 : index
    %20 = vector.load %arg7[%c0_19, %c1280] : memref<160x2304xf32, #tpu.memory_space<vmem>>, vector<80x256xf32>
    tpu.vector_store %arg7[%c0_19, %c1280], %19 {strides = array<i32>} : memref<160x2304xf32, #tpu.memory_space<vmem>>, vector<80x256xf32>,
    %c0_20 = arith.constant 0 : index
    %c20 = arith.constant 20 : index
    %c0_21 = arith.constant 0 : index
    %21 = vector.load %arg6[%c0_20, %c20, %c0_21] : memref<2x104x256xf32, #tpu.memory_space<vmem>>, vector<1x80x256xf32>
    %22 = vector.shape_cast %21 : vector<1x80x256xf32> to vector<80x256xf32>
    %c0_22 = arith.constant 0 : index
    %c1536 = arith.constant 1536 : index
    %23 = vector.load %arg7[%c0_22, %c1536] : memref<160x2304xf32, #tpu.memory_space<vmem>>, vector<80x256xf32>
    tpu.vector_store %arg7[%c0_22, %c1536], %22 {strides = array<i32>} : memref<160x2304xf32, #tpu.memory_space<vmem>>, vector<80x256xf32>,
    %c0_23 = arith.constant 0 : index
    %c21 = arith.constant 21 : index
    %c0_24 = arith.constant 0 : index
    %24 = vector.load %arg6[%c0_23, %c21, %c0_24] : memref<2x104x256xf32, #tpu.memory_space<vmem>>, vector<1x80x256xf32>
    %25 = vector.shape_cast %24 : vector<1x80x256xf32> to vector<80x256xf32>
    %c0_25 = arith.constant 0 : index
    %c1792 = arith.constant 1792 : index
    %26 = vector.load %arg7[%c0_25, %c1792] : memref<160x2304xf32, #tpu.memory_space<vmem>>, vector<80x256xf32>
    tpu.vector_store %arg7[%c0_25, %c1792], %25 {strides = array<i32>} : memref<160x2304xf32, #tpu.memory_space<vmem>>, vector<80x256xf32>,
    %c0_26 = arith.constant 0 : index
    %c22 = arith.constant 22 : index
    %c0_27 = arith.constant 0 : index
    %27 = vector.load %arg6[%c0_26, %c22, %c0_27] : memref<2x104x256xf32, #tpu.memory_space<vmem>>, vector<1x80x256xf32>
    %28 = vector.shape_cast %27 : vector<1x80x256xf32> to vector<80x256xf32>
    %c0_28 = arith.constant 0 : index
    %c2048 = arith.constant 2048 : index
    %29 = vector.load %arg7[%c0_28, %c2048] : memref<160x2304xf32, #tpu.memory_space<vmem>>, vector<80x256xf32>
    tpu.vector_store %arg7[%c0_28, %c2048], %28 {strides = array<i32>} : memref<160x2304xf32, #tpu.memory_space<vmem>>, vector<80x256xf32>,
    %c1_29 = arith.constant 1 : index
    %c0_30 = arith.constant 0 : index
    %c0_31 = arith.constant 0 : index
    %30 = vector.load %arg6[%c1_29, %c0_30, %c0_31] : memref<2x104x256xf32, #tpu.memory_space<vmem>>, vector<1x80x256xf32>
    %31 = vector.shape_cast %30 : vector<1x80x256xf32> to vector<80x256xf32>
    %c80 = arith.constant 80 : index
    %c0_32 = arith.constant 0 : index
    %32 = vector.load %arg7[%c80, %c0_32] : memref<160x2304xf32, #tpu.memory_space<vmem>>, vector<80x256xf32>
    tpu.vector_store %arg7[%c80, %c0_32], %31 {strides = array<i32>} : memref<160x2304xf32, #tpu.memory_space<vmem>>, vector<80x256xf32>,
    %c1_33 = arith.constant 1 : index
    %c1_34 = arith.constant 1 : index
    %c0_35 = arith.constant 0 : index
    %33 = vector.load %arg6[%c1_33, %c1_34, %c0_35] : memref<2x104x256xf32, #tpu.memory_space<vmem>>, vector<1x80x256xf32>
    %34 = vector.shape_cast %33 : vector<1x80x256xf32> to vector<80x256xf32>
    %c80_36 = arith.constant 80 : index
    %c256_37 = arith.constant 256 : index
    %35 = vector.load %arg7[%c80_36, %c256_37] : memref<160x2304xf32, #tpu.memory_space<vmem>>, vector<80x256xf32>
    tpu.vector_store %arg7[%c80_36, %c256_37], %34 {strides = array<i32>} : memref<160x2304xf32, #tpu.memory_space<vmem>>, vector<80x256xf32>,
    %c1_38 = arith.constant 1 : index
    %c2_39 = arith.constant 2 : index
    %c0_40 = arith.constant 0 : index
    %36 = vector.load %arg6[%c1_38, %c2_39, %c0_40] : memref<2x104x256xf32, #tpu.memory_space<vmem>>, vector<1x80x256xf32>
    %37 = vector.shape_cast %36 : vector<1x80x256xf32> to vector<80x256xf32>
    %c80_41 = arith.constant 80 : index
    %c512_42 = arith.constant 512 : index
    %38 = vector.load %arg7[%c80_41, %c512_42] : memref<160x2304xf32, #tpu.memory_space<vmem>>, vector<80x256xf32>
    tpu.vector_store %arg7[%c80_41, %c512_42], %37 {strides = array<i32>} : memref<160x2304xf32, #tpu.memory_space<vmem>>, vector<80x256xf32>,
    %c1_43 = arith.constant 1 : index
    %c10_44 = arith.constant 10 : index
    %c0_45 = arith.constant 0 : index
    %39 = vector.load %arg6[%c1_43, %c10_44, %c0_45] : memref<2x104x256xf32, #tpu.memory_space<vmem>>, vector<1x80x256xf32>
    %40 = vector.shape_cast %39 : vector<1x80x256xf32> to vector<80x256xf32>
    %c80_46 = arith.constant 80 : index
    %c768_47 = arith.constant 768 : index
    %41 = vector.load %arg7[%c80_46, %c768_47] : memref<160x2304xf32, #tpu.memory_space<vmem>>, vector<80x256xf32>
    tpu.vector_store %arg7[%c80_46, %c768_47], %40 {strides = array<i32>} : memref<160x2304xf32, #tpu.memory_space<vmem>>, vector<80x256xf32>,
    %c1_48 = arith.constant 1 : index
    %c11_49 = arith.constant 11 : index
    %c0_50 = arith.constant 0 : index
    %42 = vector.load %arg6[%c1_48, %c11_49, %c0_50] : memref<2x104x256xf32, #tpu.memory_space<vmem>>, vector<1x80x256xf32>
    %43 = vector.shape_cast %42 : vector<1x80x256xf32> to vector<80x256xf32>
    %c80_51 = arith.constant 80 : index
    %c1024_52 = arith.constant 1024 : index
    %44 = vector.load %arg7[%c80_51, %c1024_52] : memref<160x2304xf32, #tpu.memory_space<vmem>>, vector<80x256xf32>
    tpu.vector_store %arg7[%c80_51, %c1024_52], %43 {strides = array<i32>} : memref<160x2304xf32, #tpu.memory_space<vmem>>, vector<80x256xf32>,
    %c1_53 = arith.constant 1 : index
    %c12_54 = arith.constant 12 : index
    %c0_55 = arith.constant 0 : index
    %45 = vector.load %arg6[%c1_53, %c12_54, %c0_55] : memref<2x104x256xf32, #tpu.memory_space<vmem>>, vector<1x80x256xf32>
    %46 = vector.shape_cast %45 : vector<1x80x256xf32> to vector<80x256xf32>
    %c80_56 = arith.constant 80 : index
    %c1280_57 = arith.constant 1280 : index
    %47 = vector.load %arg7[%c80_56, %c1280_57] : memref<160x2304xf32, #tpu.memory_space<vmem>>, vector<80x256xf32>
    tpu.vector_store %arg7[%c80_56, %c1280_57], %46 {strides = array<i32>} : memref<160x2304xf32, #tpu.memory_space<vmem>>, vector<80x256xf32>,
    %c1_58 = arith.constant 1 : index
    %c20_59 = arith.constant 20 : index
    %c0_60 = arith.constant 0 : index
    %48 = vector.load %arg6[%c1_58, %c20_59, %c0_60] : memref<2x104x256xf32, #tpu.memory_space<vmem>>, vector<1x80x256xf32>
    %49 = vector.shape_cast %48 : vector<1x80x256xf32> to vector<80x256xf32>
    %c80_61 = arith.constant 80 : index
    %c1536_62 = arith.constant 1536 : index
    %50 = vector.load %arg7[%c80_61, %c1536_62] : memref<160x2304xf32, #tpu.memory_space<vmem>>, vector<80x256xf32>
    tpu.vector_store %arg7[%c80_61, %c1536_62], %49 {strides = array<i32>} : memref<160x2304xf32, #tpu.memory_space<vmem>>, vector<80x256xf32>,
    %c1_63 = arith.constant 1 : index
    %c21_64 = arith.constant 21 : index
    %c0_65 = arith.constant 0 : index
    %51 = vector.load %arg6[%c1_63, %c21_64, %c0_65] : memref<2x104x256xf32, #tpu.memory_space<vmem>>, vector<1x80x256xf32>
    %52 = vector.shape_cast %51 : vector<1x80x256xf32> to vector<80x256xf32>
    %c80_66 = arith.constant 80 : index
    %c1792_67 = arith.constant 1792 : index
    %53 = vector.load %arg7[%c80_66, %c1792_67] : memref<160x2304xf32, #tpu.memory_space<vmem>>, vector<80x256xf32>
    tpu.vector_store %arg7[%c80_66, %c1792_67], %52 {strides = array<i32>} : memref<160x2304xf32, #tpu.memory_space<vmem>>, vector<80x256xf32>,
    %c1_68 = arith.constant 1 : index
    %c22_69 = arith.constant 22 : index
    %c0_70 = arith.constant 0 : index
    %54 = vector.load %arg6[%c1_68, %c22_69, %c0_70] : memref<2x104x256xf32, #tpu.memory_space<vmem>>, vector<1x80x256xf32>
    %55 = vector.shape_cast %54 : vector<1x80x256xf32> to vector<80x256xf32>
    %c80_71 = arith.constant 80 : index
    %c2048_72 = arith.constant 2048 : index
    %56 = vector.load %arg7[%c80_71, %c2048_72] : memref<160x2304xf32, #tpu.memory_space<vmem>>, vector<80x256xf32>
    tpu.vector_store %arg7[%c80_71, %c2048_72], %55 {strides = array<i32>} : memref<160x2304xf32, #tpu.memory_space<vmem>>, vector<80x256xf32>,
    %c0_73 = arith.constant 0 : index
    %c0_74 = arith.constant 0 : index
    %57 = vector.load %arg7[%c0_73, %c0_74] : memref<160x2304xf32, #tpu.memory_space<vmem>>, vector<160x2304xf32>
    %c0_75 = arith.constant 0 : index
    %c0_76 = arith.constant 0 : index
    %c0_77 = arith.constant 0 : index
    %58 = vector.load %arg2[%c0_75, %c0_76, %c0_77] : memref<1x2304x256xf32, #tpu.memory_space<vmem>>, vector<1x2304x256xf32>
    %59 = vector.shape_cast %58 : vector<1x2304x256xf32> to vector<2304x256xf32>
    %cst = arith.constant dense<0.000000e+00> : vector<160x256xf32>
    %60 = tpu.matmul %57, %59, %cst {dimension_numbers = #tpu.dot_dimension_numbers<[1], [0], [0], [1], [0, 0, 1, 1], [], []>} : vector<160x2304xf32>, vector<2304x256xf32>, vector<160x256xf32> -> vector<160x256xf32>
    %c0_78 = arith.constant 0 : index
    %c0_79 = arith.constant 0 : index
    %c0_80 = arith.constant 0 : index
    %61 = vector.load %arg3[%c0_78, %c0_79, %c0_80] : memref<1x1x256xf32, #tpu.memory_space<vmem>>, vector<1x1x256xf32>
    %62 = vector.shape_cast %61 : vector<1x1x256xf32> to vector<1x256xf32>
    %63 = vector.broadcast %62 : vector<1x256xf32> to vector<160x256xf32>
    %64 = arith.addf %60, %63 : vector<160x256xf32>
    %c4_i32 = arith.constant 4 : i32
    %65 = arith.cmpi slt, %arg0, %c4_i32 : i32
    %66 = arith.extui %65 : i1 to i32
    %c0_i32_81 = arith.constant 0 : i32
    %67 = arith.cmpi ne, %66, %c0_i32_81 : i32
    scf.if %67 {
      %cst_84 = arith.constant 0.000000e+00 : f32
      %71 = vector.broadcast %cst_84 : f32 to vector<160x256xf32>
      %72 = arith.maximumf %64, %71 : vector<160x256xf32>
      %c0_85 = arith.constant 0 : index
      %c0_86 = arith.constant 0 : index
      %73 = vector.load %arg4[%c0_85, %c0_86] : memref<160x1xf32, #tpu.memory_space<vmem>>, vector<160x1xf32>
      %74 = vector.broadcast %73 : vector<160x1xf32> to vector<160x256xf32>
      %75 = arith.mulf %72, %74 : vector<160x256xf32>
      %76 = vector.extract_strided_slice %75 {offsets = [0, 0], sizes = [80, 256], strides = [1, 1]} : vector<160x256xf32> to vector<80x256xf32>
      %c0_87 = arith.constant 0 : index
      %c11_88 = arith.constant 11 : index
      %c0_89 = arith.constant 0 : index
      %77 = vector.load %arg6[%c0_87, %c11_88, %c0_89] : memref<2x104x256xf32, #tpu.memory_space<vmem>>, vector<1x80x256xf32>
      %78 = vector.shape_cast %77 : vector<1x80x256xf32> to vector<80x256xf32>
      %79 = vector.shape_cast %76 : vector<80x256xf32> to vector<1x80x256xf32>
      tpu.vector_store %arg6[%c0_87, %c11_88, %c0_89], %79 {strides = array<i32>} : memref<2x104x256xf32, #tpu.memory_space<vmem>>, vector<1x80x256xf32>,
      %80 = vector.extract_strided_slice %75 {offsets = [80, 0], sizes = [80, 256], strides = [1, 1]} : vector<160x256xf32> to vector<80x256xf32>
      %c1_90 = arith.constant 1 : index
      %c11_91 = arith.constant 11 : index
      %c0_92 = arith.constant 0 : index
      %81 = vector.load %arg6[%c1_90, %c11_91, %c0_92] : memref<2x104x256xf32, #tpu.memory_space<vmem>>, vector<1x80x256xf32>
      %82 = vector.shape_cast %81 : vector<1x80x256xf32> to vector<80x256xf32>
      %83 = vector.shape_cast %80 : vector<80x256xf32> to vector<1x80x256xf32>
      tpu.vector_store %arg6[%c1_90, %c11_91, %c0_92], %83 {strides = array<i32>} : memref<2x104x256xf32, #tpu.memory_space<vmem>>, vector<1x80x256xf32>,
    } else {
    }
    %c4_i32_82 = arith.constant 4 : i32
    %68 = arith.cmpi eq, %arg0, %c4_i32_82 : i32
    %69 = arith.extui %68 : i1 to i32
    %c0_i32_83 = arith.constant 0 : i32
    %70 = arith.cmpi ne, %69, %c0_i32_83 : i32
    scf.if %70 {
      %71 = arith.negf %64 : vector<160x256xf32>
      %72 = math.exp %71 : vector<160x256xf32>
      %cst_84 = arith.constant 1.000000e+00 : f32
      %73 = vector.broadcast %cst_84 : f32 to vector<160x256xf32>
      %74 = arith.addf %73, %72 : vector<160x256xf32>
      %75 = arith.divf %73, %74 : vector<160x256xf32>
      %76 = vector.shape_cast %75 : vector<160x256xf32> to vector<2x80x256xf32>
      %c0_85 = arith.constant 0 : index
      %c0_86 = arith.constant 0 : index
      %c0_87 = arith.constant 0 : index
      %77 = vector.load %arg5[%c0_85, %c0_86, %c0_87] : memref<2x80x256xf32, #tpu.memory_space<vmem>>, vector<2x80x256xf32>
      tpu.vector_store %arg5[%c0_85, %c0_86, %c0_87], %76 {strides = array<i32>} : memref<2x80x256xf32, #tpu.memory_space<vmem>>, vector<2x80x256xf32>,
    } else {
    }
    return
  }
  func.func @transform_0(%arg0: i32) -> (i32, i32, i32) {
    %c0_i32 = arith.constant 0 : i32
    %c0_i32_0 = arith.constant 0 : i32
    %c0_i32_1 = arith.constant 0 : i32
    %c0_i32_2 = arith.constant 0 : i32
    return %c0_i32, %c0_i32_0, %c0_i32_1 : i32, i32, i32
  }
  func.func @transform_1(%arg0: i32) -> (i32, i32, i32) {
    %c0_i32 = arith.constant 0 : i32
    %c0_i32_0 = arith.constant 0 : i32
    %c0_i32_1 = arith.constant 0 : i32
    return %arg0, %c0_i32, %c0_i32_0 : i32, i32, i32
  }
  func.func @transform_2(%arg0: i32) -> (i32, i32, i32) {
    %c0_i32 = arith.constant 0 : i32
    %c0_i32_0 = arith.constant 0 : i32
    %c0_i32_1 = arith.constant 0 : i32
    return %arg0, %c0_i32, %c0_i32_0 : i32, i32, i32
  }
  func.func @transform_3(%arg0: i32) -> (i32, i32) {
    %c0_i32 = arith.constant 0 : i32
    %c0_i32_0 = arith.constant 0 : i32
    %c0_i32_1 = arith.constant 0 : i32
    return %c0_i32, %c0_i32_0 : i32, i32
  }
  func.func @transform_4(%arg0: i32) -> (i32, i32, i32) {
    %c0_i32 = arith.constant 0 : i32
    %c0_i32_0 = arith.constant 0 : i32
    %c0_i32_1 = arith.constant 0 : i32
    %c0_i32_2 = arith.constant 0 : i32
    return %c0_i32, %c0_i32_0, %c0_i32_1 : i32, i32, i32
  }
}

</mosaic_0001>

<bundles_post_ra>
// kernel: cls_module_forward.1
= control target key start
LH: loop header
LB: loop body
LE: loop exit
PB: predicated region body
PF: predicated region fallthrough
CT: control target
= control target key end

     0   :  { %s7678_s15 = smov 0   ;;  %s11833_s0 = inlined_call_operand.vmem [shape: f32[2,104,256], index: 0, kind: input, shape index: {}]   ;;  %s11834_s1 = inlined_call_operand.vmem [shape: f32[5,2304,256], index: 1, kind: input, shape index: {}]   ;;  %s11835_s2 = inlined_call_operand.vmem [shape: f32[5,1,256], index: 2, kind: input, shape index: {}]   ;;  %s11836_s3 = inlined_call_operand.vmem [shape: f32[160,1], index: 3, kind: input, shape index: {}]   ;;  %s11837_s4 = inlined_call_operand.vmem [shape: f32[2,80,256], index: 4, kind: output, shape index: {}]  }
   0x1 LB: > { %s7684_s16 = sadd.s32 4294967295, %s7650_s15   ;;  %p7380_p0 = scmp.ge.s32.totalorder %s7650_s15, 1  ;;  %s7650_s15 = sphi %s7678_s15, %s14_s15  }
   0x2   : > { %p166_p1 = scmp.lt.s32.totalorder %s7650_s15, 6 }
   0x4   : > { %p167_p2 = pnand %p7380_p0, %p166_p1 }
   0x6   : > { %170 = sbr.rel (%p167_p2) target bundleno = 2035 (0x7f3), region = 36 }
   0xb   : > { %p191_p3 = scmp.lt.s32.totalorder %s7684_s16, 4  ;;  %p7383_p4 = scmp.ne.s32.totalorder %s7684_s16, 0 }
   0xd   : > { %s192_s17 = scalar_select %p191_p3, %s7684_s16, 4 }
   0xe   : > { %203 = sbr.rel (%p7383_p4) target bundleno = 72 (0x48), region = 40 }
   0xf   : > { %s7428_s18 = smul.u32 4608, %s192_s17  ;;  %s7382_s19 = sshll.u32 %s192_s17, 1 }
  0x10   : > { %s7693_s22 = scalar_lea.vmem %s11835_s2, %s7382_s19 }
  0x11   : > { %s7698_s25 = scalar_lea.vmem %s11834_s1, %s7428_s18 }
  0x13   : > { %v204_v0 = vld [vmem:[%s11833_s0] sm:$0xff]  ;;  %v205_v1 = vld [vmem:[%s11833_s0 + $0x8] sm:$0xff]  ;;  %v206_v2 = vld [vmem:[%s11833_s0 + $0x10] sm:$0xff] }
  0x14   : > { %256 = vst [vmem:[#allocation2 + $0xb0] sm:$0xff] %v204_v0  ;;  %v207_v3 = vld [vmem:[%s11833_s0 + $0x18] sm:$0xff]  ;;  %v208_v4 = vld [vmem:[%s11833_s0 + $0x20] sm:$0xff]  ;;  %v209_v5 = vld [vmem:[%s11833_s0 + $0x28] sm:$0xff] }
  0x15   : > { %257 = vst [vmem:[#allocation2 + $0xd0] sm:$0xff] %v205_v1  ;;  %v210_v6 = vld [vmem:[%s11833_s0 + $0x30] sm:$0xff]  ;;  %v211_v7 = vld [vmem:[%s11833_s0 + $0x38] sm:$0xff]  ;;  %v212_v8 = vld [vmem:[%s11833_s0 + $0x40] sm:$0xff] }
  0x16   : > { %258 = vst [vmem:[#allocation2 + $0x10] sm:$0xff] %v206_v2  ;;  %v213_v9 = vld [vmem:[%s11833_s0 + $0x48] sm:$0xff]  ;;  %v214_v10 = vld [vmem:[%s11833_s0 + $0x50] sm:$0xff]  ;;  %v215_v11 = vld [vmem:[%s11833_s0 + $0x58] sm:$0xff] }
  0x17   : > { %259 = vst [vmem:[#allocation2 + $0x48] sm:$0xff] %v207_v3  ;;  %v216_v12 = vld [vmem:[%s11833_s0 + $0x60] sm:$0xff]  ;;  %v217_v13 = vld [vmem:[%s11833_s0 + $0x68] sm:$0xff]  ;;  %v218_v14 = vld [vmem:[%s11833_s0 + $0x70] sm:$0xff] }
  0x18   : > { %260 = vst [vmem:[#allocation2 + $0x160] sm:$0xff] %v208_v4  ;;  %v219_v15 = vld [vmem:[%s11833_s0 + $0x78] sm:$0xff]  ;;  %v220_v16 = vld [vmem:[%s11833_s0 + $0x80] sm:$0xff]  ;;  %v221_v17 = vld [vmem:[%s11833_s0 + $0x88] sm:$0xff] }
  0x19   : > { %261 = vst [vmem:[#allocation2 + $0x128] sm:$0xff] %v209_v5  ;;  %v222_v18 = vld [vmem:[%s11833_s0 + $0x90] sm:$0xff]  ;;  %v223_v19 = vld [vmem:[%s11833_s0 + $0x98] sm:$0xff]  ;;  %v224_v20 = vld [vmem:[%s11833_s0 + $0xa0] sm:$0xff] }
  0x1a   : > { %262 = vst [vmem:[#allocation2 + $0x40] sm:$0xff] %v210_v6  ;;  %v225_v21 = vld [vmem:[%s11833_s0 + $0xa8] sm:$0xff]  ;;  %v226_v22 = vld [vmem:[%s11833_s0 + $0xb0] sm:$0xff]  ;;  %v227_v23 = vld [vmem:[%s11833_s0 + $0xb8] sm:$0xff] }
  0x1b   : > { %263 = vst [vmem:[#allocation2 + $0x178] sm:$0xff] %v211_v7  ;;  %v228_v24 = vld [vmem:[%s11833_s0 + $0xc0] sm:$0xff]  ;;  %v229_v25 = vld [vmem:[%s11833_s0 + $0xc8] sm:$0xff]  ;;  %v230_v26 = vld [vmem:[%s11833_s0 + $0xd0] sm:$0xff] }
  0x1c   : > { %264 = vst [vmem:[#allocation2 + $0x108] sm:$0xff] %v212_v8  ;;  %v231_v27 = vld [vmem:[%s11833_s0 + $0xd8] sm:$0xff]  ;;  %v232_v28 = vld [vmem:[%s11833_s0 + $0xe0] sm:$0xff]  ;;  %v233_v29 = vld [vmem:[%s11833_s0 + $0xe8] sm:$0xff] }
  0x1d   : > { %265 = vst [vmem:[#allocation2 + $0x110] sm:$0xff] %v213_v9  ;;  %v234_v30 = vld [vmem:[%s11833_s0 + $0xf0] sm:$0xff]  ;;  %v235_v31 = vld [vmem:[%s11833_s0 + $0xf8] sm:$0xff]  ;;  %v236_v32 = vld [vmem:[%s11833_s0 + $0x100] sm:$0xff] }
  0x1e   : > { %266 = vst [vmem:[#allocation2 + $0x90] sm:$0xff] %v214_v10  ;;  %v237_v33 = vld [vmem:[%s11833_s0 + $0x108] sm:$0xff]  ;;  %v238_v34 = vld [vmem:[%s11833_s0 + $0x110] sm:$0xff]  ;;  %v239_v35 = vld [vmem:[%s11833_s0 + $0x118] sm:$0xff] }
  0x1f   : > { %267 = vst [vmem:[#allocation2 + $0x118] sm:$0xff] %v215_v11  ;;  %v240_v36 = vld [vmem:[%s11833_s0 + $0x120] sm:$0xff]  ;;  %v241_v37 = vld [vmem:[%s11833_s0 + $0x128] sm:$0xff]  ;;  %v242_v38 = vld [vmem:[%s11833_s0 + $0x130] sm:$0xff] }
  0x20   : > { %268 = vst [vmem:[#allocation2 + $0x148] sm:$0xff] %v216_v12  ;;  %v243_v39 = vld [vmem:[%s11833_s0 + $0x138] sm:$0xff]  ;;  %v244_v40 = vld [vmem:[%s11833_s0 + $0x140] sm:$0xff]  ;;  %v245_v41 = vld [vmem:[%s11833_s0 + $0x148] sm:$0xff] }
  0x21   : > { %269 = vst [vmem:[#allocation2 + $0x100] sm:$0xff] %v217_v13  ;;  %v246_v42 = vld [vmem:[%s11833_s0 + $0x150] sm:$0xff]  ;;  %v247_v43 = vld [vmem:[%s11833_s0 + $0x158] sm:$0xff]  ;;  %v248_v44 = vld [vmem:[%s11833_s0 + $0x160] sm:$0xff] }
  0x22   : > { %270 = vst [vmem:[#allocation2 + $0x58] sm:$0xff] %v218_v14  ;;  %v249_v45 = vld [vmem:[%s11833_s0 + $0x168] sm:$0xff]  ;;  %v250_v46 = vld [vmem:[%s11833_s0 + $0x170] sm:$0xff]  ;;  %v251_v47 = vld [vmem:[%s11833_s0 + $0x178] sm:$0xff] }
  0x23   : > { %271 = vst [vmem:[#allocation2 + $0xd8] sm:$0xff] %v219_v15  ;;  %v252_v48 = vld [vmem:[%s11833_s0 + $0x180] sm:$0xff]  ;;  %v253_v49 = vld [vmem:[%s11833_s0 + $0x188] sm:$0xff]  ;;  %v254_v50 = vld [vmem:[%s11833_s0 + $0x190] sm:$0xff] }
  0x24   : > { %272 = vst [vmem:[#allocation2 + $0x180] sm:$0xff] %v220_v16  ;;  %v255_v51 = vld [vmem:[%s11833_s0 + $0x198] sm:$0xff] }
  0x25   : > { %273 = vst [vmem:[#allocation2 + $0x130] sm:$0xff] %v221_v17 }
  0x26   : > { %274 = vst [vmem:[#allocation2 + $0x138] sm:$0xff] %v222_v18 }
  0x27   : > { %275 = vst [vmem:[#allocation2 + $0x78] sm:$0xff] %v223_v19 }
  0x28   : > { %276 = vst [vmem:[#allocation2 + $0xa0] sm:$0xff] %v224_v20 }
  0x29   : > { %277 = vst [vmem:[#allocation2] sm:$0xff] %v225_v21 }
  0x2a   : > { %278 = vst [vmem:[#allocation2 + $0x20] sm:$0xff] %v226_v22 }
  0x2b   : > { %279 = vst [vmem:[#allocation2 + $0xe0] sm:$0xff] %v227_v23 }
  0x2c   : > { %280 = vst [vmem:[#allocation2 + $0xf0] sm:$0xff] %v228_v24 }
  0x2d   : > { %281 = vst [vmem:[#allocation2 + $0x188] sm:$0xff] %v229_v25 }
  0x2e   : > { %282 = vst [vmem:[#allocation2 + $0xa8] sm:$0xff] %v230_v26 }
  0x2f   : > { %283 = vst [vmem:[#allocation2 + $0x88] sm:$0xff] %v231_v27 }
  0x30   : > { %284 = vst [vmem:[#allocation2 + $0xb8] sm:$0xff] %v232_v28 }
  0x31   : > { %285 = vst [vmem:[#allocation2 + $0x170] sm:$0xff] %v233_v29 }
  0x32   : > { %286 = vst [vmem:[#allocation2 + $0xc0] sm:$0xff] %v234_v30 }
  0x33   : > { %287 = vst [vmem:[#allocation2 + $0x140] sm:$0xff] %v235_v31 }
  0x34   : > { %288 = vst [vmem:[#allocation2 + $0x50] sm:$0xff] %v236_v32 }
  0x35   : > { %289 = vst [vmem:[#allocation2 + $0x168] sm:$0xff] %v237_v33 }
  0x36   : > { %290 = vst [vmem:[#allocation2 + $0x190] sm:$0xff] %v238_v34 }
  0x37   : > { %291 = vst [vmem:[#allocation2 + $0x38] sm:$0xff] %v239_v35 }
  0x38   : > { %292 = vst [vmem:[#allocation2 + $0x60] sm:$0xff] %v240_v36 }
  0x39   : > { %293 = vst [vmem:[#allocation2 + $0x18] sm:$0xff] %v241_v37 }
  0x3a   : > { %294 = vst [vmem:[#allocation2 + $0x158] sm:$0xff] %v242_v38 }
  0x3b   : > { %295 = vst [vmem:[#allocation2 + $0x120] sm:$0xff] %v243_v39 }
  0x3c   : > { %296 = vst [vmem:[#allocation2 + $0x198] sm:$0xff] %v244_v40 }
  0x3d   : > { %297 = vst [vmem:[#allocation2 + $0x68] sm:$0xff] %v245_v41 }
  0x3e   : > { %298 = vst [vmem:[#allocation2 + $0x30] sm:$0xff] %v246_v42 }
  0x3f   : > { %299 = vst [vmem:[#allocation2 + $0xc8] sm:$0xff] %v247_v43 }
  0x40   : > { %300 = vst [vmem:[#allocation2 + $0xf8] sm:$0xff] %v248_v44 }
  0x41   : > { %301 = vst [vmem:[#allocation2 + $0x28] sm:$0xff] %v249_v45 }
  0x42   : > { %302 = vst [vmem:[#allocation2 + $0x8] sm:$0xff] %v250_v46 }
  0x43   : > { %303 = vst [vmem:[#allocation2 + $0x80] sm:$0xff] %v251_v47 }
  0x44   : > { %304 = vst [vmem:[#allocation2 + $0x98] sm:$0xff] %v252_v48 }
  0x45   : > { %305 = vst [vmem:[#allocation2 + $0x150] sm:$0xff] %v253_v49 }
  0x46   : > { %306 = vst [vmem:[#allocation2 + $0xe8] sm:$0xff] %v254_v50 }
  0x47   : > { %307 = vst [vmem:[#allocation2 + $0x70] sm:$0xff] %v255_v51 }
  0x48 PF: > { %v2801_v52 = vld [vmem:[%s7698_s25 + $0xf0] sm:$0xff]  ;;  %v2799_v54 = vld [vmem:[%s7698_s25 + $0xe0] sm:$0xff]  ;;  %v7916_v49 = vld [vmem:[#allocation2 + $0x48] sm:$0xff]  ;;  %vm392_vm0 = vcmask 1046528   ;;  %vm519_vm1 = vcmask 1045504   ;;  %vm772_vm2 = vcmask 1044480  }
  0x49   : > { %v2865_v53 = vld [vmem:[%s7698_s25 + $0x2f0] sm:$0xff]  ;;  %3353 = vmatpush.msra.mxu0 %v2801_v52  ;;  %v2863_v56 = vld [vmem:[%s7698_s25 + $0x2e0] sm:$0xff]  ;;  %vm899_vm3 = vcmask 1043456   ;;  %vm1152_vm4 = vcmask 1042432   ;;  %vm1279_vm5 = vcmask 1041408   ;;  %p7384_p5 = scmp.ge.s32.totalorder %s7684_s16, 4 }
  0x4a   : > { %3507 = vmatpush.msra.mxu2 %v2865_v53  ;;  %v2833_v55 = vld [vmem:[%s7698_s25 + $0x1f0] sm:$0xff]  ;;  %v2831_v59 = vld [vmem:[%s7698_s25 + $0x1e0] sm:$0xff] }
  0x4b   : > { %v2897_v57 = vld [vmem:[%s7698_s25 + $0x3f0] sm:$0xff]  ;;  %3430 = vmatpush.msra.mxu1 %v2833_v55  ;;  %3354 = vmatpush.msra.mxu0 %v2799_v54  ;;  %v2895_v61 = vld [vmem:[%s7698_s25 + $0x3e0] sm:$0xff] }
  0x4c   : > { %3584 = vmatpush.msra.mxu3 %v2897_v57  ;;  %v2797_v58 = vld [vmem:[%s7698_s25 + $0xd0] sm:$0xff]  ;;  %3508 = vmatpush.msra.mxu2 %v2863_v56  ;;  %v2795_v63 = vld [vmem:[%s7698_s25 + $0xc0] sm:$0xff]  ;;  %v397_v57 = vrot.slane %v7916_v49, 1 }
  0x4d   : > { %v2861_v60 = vld [vmem:[%s7698_s25 + $0x2d0] sm:$0xff]  ;;  %3431 = vmatpush.msra.mxu1 %v2831_v59  ;;  %v2859_v0 = vld [vmem:[%s7698_s25 + $0x2c0] sm:$0xff]  ;;  %3355 = vmatpush.msra.mxu0 %v2797_v58 }
  0x4e   : > { %v2829_v62 = vld [vmem:[%s7698_s25 + $0x1d0] sm:$0xff]  ;;  %3585 = vmatpush.msra.mxu3 %v2895_v61  ;;  %3509 = vmatpush.msra.mxu2 %v2861_v60  ;;  %v2827_v2 = vld [vmem:[%s7698_s25 + $0x1c0] sm:$0xff] }
  0x4f   : > { %v2893_v1 = vld [vmem:[%s7698_s25 + $0x3d0] sm:$0xff]  ;;  %v2891_v3 = vld [vmem:[%s7698_s25 + $0x3c0] sm:$0xff]  ;;  %3432 = vmatpush.msra.mxu1 %v2829_v62  ;;  %3356 = vmatpush.msra.mxu0 %v2795_v63 }
  0x50   : > { %3586 = vmatpush.msra.mxu3 %v2893_v1  ;;  %v2793_v4 = vld [vmem:[%s7698_s25 + $0xb0] sm:$0xff]  ;;  %3510 = vmatpush.msra.mxu2 %v2859_v0  ;;  %v2791_v8 = vld [vmem:[%s7698_s25 + $0xa0] sm:$0xff] }
  0x51   : > { %v2857_v5 = vld [vmem:[%s7698_s25 + $0x2b0] sm:$0xff]  ;;  %3433 = vmatpush.msra.mxu1 %v2827_v2  ;;  %v2855_v9 = vld [vmem:[%s7698_s25 + $0x2a0] sm:$0xff]  ;;  %3357 = vmatpush.msra.mxu0 %v2793_v4 }
  0x52   : > { %v2825_v6 = vld [vmem:[%s7698_s25 + $0x1b0] sm:$0xff]  ;;  %3587 = vmatpush.msra.mxu3 %v2891_v3  ;;  %3511 = vmatpush.msra.mxu2 %v2857_v5  ;;  %v2823_v10 = vld [vmem:[%s7698_s25 + $0x1a0] sm:$0xff] }
  0x53   : > { %v2889_v7 = vld [vmem:[%s7698_s25 + $0x3b0] sm:$0xff]  ;;  %v2887_v11 = vld [vmem:[%s7698_s25 + $0x3a0] sm:$0xff]  ;;  %3434 = vmatpush.msra.mxu1 %v2825_v6  ;;  %3358 = vmatpush.msra.mxu0 %v2791_v8  ;;  %v7941_v6 = vld [vmem:[#allocation2 + $0x128] sm:$0xff] }
  0x54   : > { %3588 = vmatpush.msra.mxu3 %v2889_v7  ;;  %v2789_v12 = vld [vmem:[%s7698_s25 + $0x90] sm:$0xff]  ;;  %3512 = vmatpush.msra.mxu2 %v2855_v9  ;;  %v2787_v16 = vld [vmem:[%s7698_s25 + $0x80] sm:$0xff] }
  0x55   : > { %v2853_v13 = vld [vmem:[%s7698_s25 + $0x290] sm:$0xff]  ;;  %3435 = vmatpush.msra.mxu1 %v2823_v10  ;;  %v2851_v17 = vld [vmem:[%s7698_s25 + $0x280] sm:$0xff]  ;;  %3359 = vmatpush.msra.mxu0 %v2789_v12 }
  0x56   : > { %v2821_v14 = vld [vmem:[%s7698_s25 + $0x190] sm:$0xff]  ;;  %3589 = vmatpush.msra.mxu3 %v2887_v11  ;;  %3513 = vmatpush.msra.mxu2 %v2853_v13  ;;  %v2819_v18 = vld [vmem:[%s7698_s25 + $0x180] sm:$0xff]  ;;  %v401_v11 = vrot.slane %v7941_v6, 1 }
  0x57   : > { %v2885_v15 = vld [vmem:[%s7698_s25 + $0x390] sm:$0xff]  ;;  %v2883_v19 = vld [vmem:[%s7698_s25 + $0x380] sm:$0xff]  ;;  %3436 = vmatpush.msra.mxu1 %v2821_v14  ;;  %3360 = vmatpush.msra.mxu0 %v2787_v16 }
  0x58   : > { %3590 = vmatpush.msra.mxu3 %v2885_v15  ;;  %v2785_v20 = vld [vmem:[%s7698_s25 + $0x70] sm:$0xff]  ;;  %3514 = vmatpush.msra.mxu2 %v2851_v17  ;;  %v2783_v24 = vld [vmem:[%s7698_s25 + $0x60] sm:$0xff] }
  0x59   : > { %v2849_v21 = vld [vmem:[%s7698_s25 + $0x270] sm:$0xff]  ;;  %3437 = vmatpush.msra.mxu1 %v2819_v18  ;;  %v2847_v25 = vld [vmem:[%s7698_s25 + $0x260] sm:$0xff]  ;;  %3361 = vmatpush.msra.mxu0 %v2785_v20 }
  0x5a   : > { %v2817_v22 = vld [vmem:[%s7698_s25 + $0x170] sm:$0xff]  ;;  %3591 = vmatpush.msra.mxu3 %v2883_v19  ;;  %3515 = vmatpush.msra.mxu2 %v2849_v21  ;;  %v2815_v26 = vld [vmem:[%s7698_s25 + $0x160] sm:$0xff]  ;;  %v7962_v19 = vsel %vm392_vm0, %v397_v57, %v401_v11 }
  0x5b   : > { %v2881_v23 = vld [vmem:[%s7698_s25 + $0x370] sm:$0xff]  ;;  %v2879_v27 = vld [vmem:[%s7698_s25 + $0x360] sm:$0xff]  ;;  %3438 = vmatpush.msra.mxu1 %v2817_v22  ;;  %3362 = vmatpush.msra.mxu0 %v2783_v24  ;;  %v7966_v22 = vld [vmem:[#allocation2 + $0x178] sm:$0xff] }
  0x5c   : > { %3592 = vmatpush.msra.mxu3 %v2881_v23  ;;  %v2781_v28 = vld [vmem:[%s7698_s25 + $0x50] sm:$0xff]  ;;  %3516 = vmatpush.msra.mxu2 %v2847_v25  ;;  %v2779_v32 = vld [vmem:[%s7698_s25 + $0x40] sm:$0xff] }
  0x5d   : > { %v2845_v29 = vld [vmem:[%s7698_s25 + $0x250] sm:$0xff]  ;;  %3439 = vmatpush.msra.mxu1 %v2815_v26  ;;  %v2843_v33 = vld [vmem:[%s7698_s25 + $0x240] sm:$0xff]  ;;  %3363 = vmatpush.msra.mxu0 %v2781_v28 }
  0x5e   : > { %v2813_v30 = vld [vmem:[%s7698_s25 + $0x150] sm:$0xff]  ;;  %3593 = vmatpush.msra.mxu3 %v2879_v27  ;;  %3517 = vmatpush.msra.mxu2 %v2845_v29  ;;  %v2811_v35 = vld [vmem:[%s7698_s25 + $0x140] sm:$0xff]  ;;  %v405_v29 = vrot.slane %v7966_v22, 1 }
  0x5f   : > { %v2877_v31 = vld [vmem:[%s7698_s25 + $0x350] sm:$0xff]  ;;  %v2875_v36 = vld [vmem:[%s7698_s25 + $0x340] sm:$0xff]  ;;  %3440 = vmatpush.msra.mxu1 %v2813_v30  ;;  %3364 = vmatpush.msra.mxu0 %v2779_v32 }
  0x60   : > { %v2777_v34 = vld [vmem:[%s7698_s25 + $0x30] sm:$0xff]  ;;  %3594 = vmatpush.msra.mxu3 %v2877_v31  ;;  %3518 = vmatpush.msra.mxu2 %v2843_v33  ;;  %v2775_v42 = vld [vmem:[%s7698_s25 + $0x20] sm:$0xff]  ;;  %v7980_v31 = vld [vmem:[#allocation2 + $0x108] sm:$0xff]  ;;  %v7985_v32 = vsel %vm392_vm0, %v401_v11, %v405_v29 }
  0x61   : > { %v2841_v37 = vld [vmem:[%s7698_s25 + $0x230] sm:$0xff]  ;;  %3441 = vmatpush.msra.mxu1 %v2811_v35  ;;  %v2839_v43 = vld [vmem:[%s7698_s25 + $0x220] sm:$0xff]  ;;  %3365 = vmatpush.msra.mxu0 %v2777_v34  ;;  %v407_v33 = vrot.slane %v7980_v31, 1 }
  0x62   : > { %v348_v38 = vld [vmem:[#allocation2 + $0xb0] sm:$0xfe]  ;;  %3595 = vmatpush.msra.mxu3 %v2875_v36  ;;  %v2807_v44 = vld [vmem:[%s7698_s25 + $0x120] sm:$0xff]  ;;  %3519 = vmatpush.msra.mxu2 %v2841_v37 }
  0x63   : > { %v7907_v39 = vld [vmem:[#allocation2 + $0x10] sm:$0xff]  ;;  %v2871_v45 = vld [vmem:[%s7698_s25 + $0x320] sm:$0xff]  ;;  %v393_v46 = vrot.slane %v348_v38, 1  ;;  %3366 = vmatpush.msra.mxu0 %v2775_v42 }
  0x64   : > { %v2809_v40 = vld [vmem:[%s7698_s25 + $0x130] sm:$0xff]  ;;  %v394_v47 = vrot.slane %v7907_v39, 1  ;;  %3520 = vmatpush.msra.mxu2 %v2839_v43  ;;  %v2771_v54 = vld [vmem:[%s7698_s25] sm:$0xff] }
  0x65   : > { %v2873_v41 = vld [vmem:[%s7698_s25 + $0x330] sm:$0xff]  ;;  %3442 = vmatpush.msra.mxu1 %v2809_v40  ;;  %v2835_v55 = vld [vmem:[%s7698_s25 + $0x200] sm:$0xff] }
  0x66   : > { %v349_v48 = vld [vmem:[#allocation2 + $0xd0] sm:$0xfe]  ;;  %3596 = vmatpush.msra.mxu3 %v2873_v41  ;;  %v7926_v59 = vsel %vm392_vm0, %v393_v46, %v394_v47  ;;  %v2803_v61 = vld [vmem:[%s7698_s25 + $0x100] sm:$0xff] }
  0x67   : > { %v2773_v50 = vld [vmem:[%s7698_s25 + $0x10] sm:$0xff]  ;;  %3443 = vmatpush.msra.mxu1 %v2807_v44  ;;  %v396_v56 = vrot.slane %v349_v48, 1  ;;  %v7930_v62 = vld [vmem:[#allocation2 + $0x160] sm:$0xff] }
  0x68   : > { %v2837_v51 = vld [vmem:[%s7698_s25 + $0x210] sm:$0xff]  ;;  %3597 = vmatpush.msra.mxu3 %v2871_v45  ;;  %3367 = vmatpush.msra.mxu0 %v2773_v50  ;;  %v2867_v63 = vld [vmem:[%s7698_s25 + $0x300] sm:$0xff]  ;;  %v399_v5 = vrot.slane %v7930_v62, 1  ;;  %v8008_v45 = vld [vmem:[#allocation2 + $0x118] sm:$0xff] }
  0x69   : > { %v2805_v52 = vld [vmem:[%s7698_s25 + $0x110] sm:$0xff]  ;;  %3521 = vmatpush.msra.mxu2 %v2837_v51  ;;  %v7935_v1 = vsel %vm392_vm0, %v396_v56, %v397_v57  ;;  %v2991_v7 = vld [vmem:[%s7698_s25 + $0x6e0] sm:$0xff]  ;;  %v413_v50 = vrot.slane %v8008_v45, 1 }
  0x6a   : > { %v2869_v53 = vld [vmem:[%s7698_s25 + $0x310] sm:$0xff]  ;;  %3444 = vmatpush.msra.mxu1 %v2805_v52  ;;  %3368 = vmatpush.msra.mxu0 %v2771_v54  ;;  %v2927_v8 = vld [vmem:[%s7698_s25 + $0x4e0] sm:$0xff]  ;;  %v7952_v14 = vsel %vm392_vm0, %v394_v47, %v399_v5  ;;  %v8019_v52 = vld [vmem:[#allocation2 + $0x148] sm:$0xff] }
  0x6b   : > { %v308_v58 = vld [vmem:[#allocation2 + $0xb0] sm:$0xff]  ;;  %3598 = vmatpush.msra.mxu3 %v2869_v53  ;;  %3522 = vmatpush.msra.mxu2 %v2835_v55  ;;  %v3023_v9 = vld [vmem:[%s7698_s25 + $0x7e0] sm:$0xff]  ;;  %v415_v55 = vrot.slane %v8019_v52, 1 }
  0x6c   : > { %v2993_v60 = vld [vmem:[%s7698_s25 + $0x6f0] sm:$0xff]  ;;  %3369 = vmatmul.f32.vlgmr.msra.gmra.mxu0 %v308_v58  ;;  %3523 = vmatmul.f32.vlgmr.msra.gmra.mxu2 %v7926_v59  ;;  %v2959_v10 = vld [vmem:[%s7698_s25 + $0x5e0] sm:$0xff] }
  0x6d   : > { %v309_v0 = vld [vmem:[#allocation2 + $0xd0] sm:$0xff]  ;;  %3815 = vmatpush.msrb.mxu2 %v2993_v60  ;;  %3445 = vmatpush.msra.mxu1 %v2803_v61  ;;  %v7954_v15 = vld [vmem:[#allocation2 + $0x40] sm:$0xff]  ;;  %v8037_v61 = vld [vmem:[#allocation2 + $0x58] sm:$0xff] }
  0x6e   : > { %v2929_v2 = vld [vmem:[%s7698_s25 + $0x4f0] sm:$0xff]  ;;  %3599 = vmatpush.msra.mxu3 %v2867_v63  ;;  %3446 = vmatmul.f32.vlgmr.msra.gmra.mxu1 %v309_v0  ;;  %v2987_v18 = vld [vmem:[%s7698_s25 + $0x6c0] sm:$0xff]  ;;  %v403_v21 = vrot.slane %v7954_v15, 1 }
  0x6f   : > { %v3025_v3 = vld [vmem:[%s7698_s25 + $0x7f0] sm:$0xff]  ;;  %3600 = vmatmul.f32.vlgmr.msra.gmra.mxu3 %v7935_v1  ;;  %3661 = vmatpush.msrb.mxu0 %v2929_v2  ;;  %v2923_v20 = vld [vmem:[%s7698_s25 + $0x4c0] sm:$0xff] }
  0x70   : > { %v2961_v4 = vld [vmem:[%s7698_s25 + $0x5f0] sm:$0xff]  ;;  %3892 = vmatpush.msrb.mxu3 %v3025_v3  ;;  %3816 = vmatpush.msrb.mxu2 %v2991_v7  ;;  %v3019_v23 = vld [vmem:[%s7698_s25 + $0x7c0] sm:$0xff]  ;;  %v7978_v30 = vsel %vm392_vm0, %v399_v5, %v403_v21  ;;  %v7998_v41 = vsel %vm392_vm0, %v403_v21, %v407_v33  ;;  %v419_v3 = vrot.slane %v8037_v61, 1 }
  0x71   : > { %3738 = vmatpush.msrb.mxu1 %v2961_v4  ;;  %v2989_v12 = vld [vmem:[%s7698_s25 + $0x6d0] sm:$0xff]  ;;  %3662 = vmatpush.msrb.mxu0 %v2927_v8  ;;  %v2955_v24 = vld [vmem:[%s7698_s25 + $0x5c0] sm:$0xff]  ;;  %v8047_v4 = vld [vmem:[#allocation2 + $0xd8] sm:$0xff] }
  0x72   : > { %v2925_v13 = vld [vmem:[%s7698_s25 + $0x4d0] sm:$0xff]  ;;  %3893 = vmatpush.msrb.mxu3 %v3023_v9  ;;  %3817 = vmatpush.msrb.mxu2 %v2989_v12  ;;  %v2983_v35 = vld [vmem:[%s7698_s25 + $0x6a0] sm:$0xff]  ;;  %v421_v7 = vrot.slane %v8047_v4, 1  ;;  %v8054_v8 = vsel %vm392_vm0, %v415_v55, %v419_v3 }
  0x73   : > { %3739 = vmatpush.msrb.mxu1 %v2959_v10  ;;  %v3021_v16 = vld [vmem:[%s7698_s25 + $0x7d0] sm:$0xff]  ;;  %3663 = vmatpush.msrb.mxu0 %v2925_v13  ;;  %v2919_v36 = vld [vmem:[%s7698_s25 + $0x4a0] sm:$0xff]  ;;  %12127 = vst [vmem:[#allocation5_spill] sm:$0xff] %v8054_v8 }
  0x74   : > { %v2957_v17 = vld [vmem:[%s7698_s25 + $0x5d0] sm:$0xff]  ;;  %3372 = vmatmul.f32.gmra.mxu0 %v7907_v39  ;;  %3526 = vmatmul.f32.gmra.mxu2 %v7952_v14  ;;  %v3015_v37 = vld [vmem:[%s7698_s25 + $0x7a0] sm:$0xff] }
  0x75   : > { %3894 = vmatpush.msrb.mxu3 %v3021_v16  ;;  %3740 = vmatpush.msrb.mxu1 %v2957_v17  ;;  %v2985_v25 = vld [vmem:[%s7698_s25 + $0x6b0] sm:$0xff]  ;;  %v2951_v40 = vld [vmem:[%s7698_s25 + $0x5a0] sm:$0xff] }
  0x76   : > { %3449 = vmatmul.f32.gmra.mxu1 %v7916_v49  ;;  %3818 = vmatpush.msrb.mxu2 %v2987_v18  ;;  %v2921_v26 = vld [vmem:[%s7698_s25 + $0x4b0] sm:$0xff]  ;;  %v8028_v56 = vld [vmem:[#allocation2 + $0x100] sm:$0xff] }
  0x77   : > { %3603 = vmatmul.f32.gmra.mxu3 %v7962_v19  ;;  %3664 = vmatpush.msrb.mxu0 %v2923_v20  ;;  %v3017_v27 = vld [vmem:[%s7698_s25 + $0x7b0] sm:$0xff]  ;;  %v2979_v57 = vld [vmem:[%s7698_s25 + $0x680] sm:$0xff]  ;;  %v417_v58 = vrot.slane %v8028_v56, 1 }
  0x78   : > { %v2953_v28 = vld [vmem:[%s7698_s25 + $0x5b0] sm:$0xff]  ;;  %3895 = vmatpush.msrb.mxu3 %v3019_v23  ;;  %3741 = vmatpush.msrb.mxu1 %v2955_v24  ;;  %v2915_v0 = vld [vmem:[%s7698_s25 + $0x480] sm:$0xff]  ;;  %v8076_v23 = vld [vmem:[#allocation2 + $0x138] sm:$0xff] }
  0x79   : > { %3819 = vmatpush.msrb.mxu2 %v2985_v25  ;;  %3665 = vmatpush.msrb.mxu0 %v2921_v26  ;;  %v7988_v34 = vld [vmem:[#allocation2 + $0x110] sm:$0xff]  ;;  %v8042_v63 = vsel %vm392_vm0, %v413_v50, %v417_v58  ;;  %v3011_v2 = vld [vmem:[%s7698_s25 + $0x780] sm:$0xff]  ;;  %v8061_v10 = vsel %vm392_vm0, %v417_v58, %v421_v7  ;;  %v427_v25 = vrot.slane %v8076_v23, 1  ;;  %v8084_v26 = vld [vmem:[#allocation2 + $0x78] sm:$0xff] }
  0x7a   : > { %3896 = vmatpush.msrb.mxu3 %v3017_v27  ;;  %3742 = vmatpush.msrb.mxu1 %v2953_v28  ;;  %v409_v38 = vrot.slane %v7988_v34, 1  ;;  %v8000_v42 = vld [vmem:[#allocation2 + $0x90] sm:$0xff]  ;;  %12126 = vst [vmem:[#allocation4_spill] sm:$0xff] %v8042_v63  ;;  %v2947_v5 = vld [vmem:[%s7698_s25 + $0x580] sm:$0xff] }
  0x7b   : > { %3820 = vmatpush.msrb.mxu2 %v2983_v35  ;;  %3666 = vmatpush.msrb.mxu0 %v2919_v36  ;;  %v411_v44 = vrot.slane %v8000_v42, 1  ;;  %v2981_v46 = vld [vmem:[%s7698_s25 + $0x690] sm:$0xff]  ;;  %v8056_v9 = vld [vmem:[#allocation2 + $0x180] sm:$0xff]  ;;  %12128 = vst [vmem:[#allocation6_spill] sm:$0xff] %v8061_v10 }
  0x7c   : > { %3375 = vmatmul.f32.gmra.mxu0 %v7930_v62  ;;  %3529 = vmatmul.f32.gmra.mxu2 %v7978_v30  ;;  %v8005_v43 = vsel %vm392_vm0, %v405_v29, %v409_v38  ;;  %v2917_v47 = vld [vmem:[%s7698_s25 + $0x490] sm:$0xff]  ;;  %v8024_v53 = vsel %vm392_vm0, %v409_v38, %v413_v50  ;;  %v423_v12 = vrot.slane %v8056_v9, 1  ;;  %v2975_v27 = vld [vmem:[%s7698_s25 + $0x660] sm:$0xff] }
  0x7d   : > { %3897 = vmatpush.msrb.mxu3 %v3015_v37  ;;  %3743 = vmatpush.msrb.mxu1 %v2951_v40  ;;  %v3013_v48 = vld [vmem:[%s7698_s25 + $0x790] sm:$0xff]  ;;  %v8017_v51 = vsel %vm392_vm0, %v407_v33, %v411_v44  ;;  %v8035_v60 = vsel %vm392_vm0, %v411_v44, %v415_v55  ;;  %v2911_v28 = vld [vmem:[%s7698_s25 + $0x460] sm:$0xff]  ;;  %v429_v33 = vrot.slane %v8084_v26, 1  ;;  %v1403_v55 = vld [vmem:[#allocation2 + $0xa8] sm:$0xfe] }
  0x7e   : > { %3452 = vmatmul.f32.gmra.mxu1 %v7941_v6  ;;  %3821 = vmatpush.msrb.mxu2 %v2981_v46  ;;  %v2949_v54 = vld [vmem:[%s7698_s25 + $0x590] sm:$0xff]  ;;  %v8074_v21 = vsel %vm392_vm0, %v419_v3, %v423_v12  ;;  %v3007_v29 = vld [vmem:[%s7698_s25 + $0x760] sm:$0xff]  ;;  %v8094_v36 = vsel %vm392_vm0, %v423_v12, %v427_v25 }
  0x7f   : > { %3606 = vmatmul.f32.gmra.mxu3 %v7985_v32  ;;  %3667 = vmatpush.msrb.mxu0 %v2917_v47  ;;  %v2977_v11 = vld [vmem:[%s7698_s25 + $0x670] sm:$0xff]  ;;  %12129 = vst [vmem:[#allocation7_spill] sm:$0xff] %v8074_v21  ;;  %v2943_v35 = vld [vmem:[%s7698_s25 + $0x560] sm:$0xff] }
  0x80   : > { %3898 = vmatpush.msrb.mxu3 %v3013_v48  ;;  %3744 = vmatpush.msrb.mxu1 %v2949_v54  ;;  %v8065_v13 = vld [vmem:[#allocation2 + $0x130] sm:$0xff]  ;;  %12131 = vst [vmem:[#allocation9_spill] sm:$0xff] %v8094_v36  ;;  %v368_v37 = vld [vmem:[#allocation2 + $0xa0] sm:$0x1] }
  0x81   : > { %3822 = vmatpush.msrb.mxu2 %v2979_v57  ;;  %3668 = vmatpush.msrb.mxu0 %v2915_v0  ;;  %v2913_v16 = vld [vmem:[%s7698_s25 + $0x470] sm:$0xff]  ;;  %v425_v20 = vrot.slane %v8065_v13, 1  ;;  %v431_v40 = vrot.slane %v368_v37, 1  ;;  %v369_v44 = vld [vmem:[#allocation2] sm:$0x1]  ;;  %v1405_v57 = vld [vmem:[#allocation2 + $0xb8] sm:$0xff] }
  0x82   : > { %3899 = vmatpush.msrb.mxu3 %v3011_v2  ;;  %3745 = vmatpush.msrb.mxu1 %v2947_v5  ;;  %v3009_v17 = vld [vmem:[%s7698_s25 + $0x770] sm:$0xff]  ;;  %v433_v50 = vrot.slane %v369_v44, 1  ;;  %v1447_v2 = vrot.slane %v1403_v55, 1  ;;  %v1448_v3 = vrot.slane %v1405_v57, 1  ;;  %v1404_v5 = vld [vmem:[#allocation2 + $0x88] sm:$0xfe] }
  0x83   : > { %3823 = vmatpush.msrb.mxu2 %v2977_v11  ;;  %v2945_v18 = vld [vmem:[%s7698_s25 + $0x570] sm:$0xff]  ;;  %3669 = vmatpush.msrb.mxu0 %v2913_v16  ;;  %v8081_v24 = vsel %vm392_vm0, %v421_v7, %v425_v20  ;;  %v8099_v38 = vsel %vm392_vm0, %v425_v20, %v429_v33  ;;  %v8107_v54 = vsel %vm392_vm0, %v427_v25, %v431_v40  ;;  %v2971_v11 = vld [vmem:[%s7698_s25 + $0x640] sm:$0xff]  ;;  %v1450_v12 = vrot.slane %v1404_v5, 1  ;;  %v1364_v25 = vld [vmem:[#allocation2 + $0x88] sm:$0xff] }
  0x84   : > { %3378 = vmatmul.f32.gmra.mxu0 %v7954_v15  ;;  %3532 = vmatmul.f32.gmra.mxu2 %v7998_v41  ;;  %12130 = vst [vmem:[#allocation8_spill] sm:$0xff] %v8081_v24  ;;  %v2973_v46 = vld [vmem:[%s7698_s25 + $0x650] sm:$0xff]  ;;  %v8112_v58 = vsel %vm392_vm0, %v429_v33, %v433_v50  ;;  %v1407_v20 = vld [vmem:[#allocation2 + $0xc0] sm:$0xff]  ;;  %v1410_v55 = vld [vmem:[#allocation2 + $0x168] sm:$0xff] }
  0x85   : > { %3900 = vmatpush.msrb.mxu3 %v3009_v17  ;;  %3746 = vmatpush.msrb.mxu1 %v2945_v18  ;;  %12132 = vst [vmem:[#allocation10_spill] sm:$0xff] %v8099_v38  ;;  %v2909_v47 = vld [vmem:[%s7698_s25 + $0x450] sm:$0xff]  ;;  %v1363_v17 = vld [vmem:[#allocation2 + $0xa8] sm:$0xff]  ;;  %v8119_v18 = vsel %vm392_vm0, %v1447_v2, %v1448_v3  ;;  %v1453_v33 = vrot.slane %v1407_v20, 1  ;;  %v2939_v37 = vld [vmem:[%s7698_s25 + $0x540] sm:$0xff] }
  0x86   : > { %3455 = vmatmul.f32.gmra.mxu1 %v7966_v22  ;;  %3824 = vmatpush.msrb.mxu2 %v2975_v27  ;;  %v3005_v48 = vld [vmem:[%s7698_s25 + $0x750] sm:$0xff]  ;;  %12133 = vst [vmem:[#allocation11_spill] sm:$0xff] %v8107_v54 }
  0x87   : > { %3609 = vmatmul.f32.gmra.mxu3 %v8005_v43  ;;  %3670 = vmatpush.msrb.mxu0 %v2911_v28  ;;  %12134 = vst [vmem:[#allocation12_spill] sm:$0xff] %v8112_v58  ;;  %v2941_v0 = vld [vmem:[%s7698_s25 + $0x550] sm:$0xff]  ;;  %v2907_v28 = vld [vmem:[%s7698_s25 + $0x440] sm:$0xff]  ;;  %v8130_v44 = vsel %vm392_vm0, %v1448_v3, %v1453_v33  ;;  %v1459_v3 = vrot.slane %v1410_v55, 1 }
  0x88   : > { %3901 = vmatpush.msrb.mxu3 %v3007_v29  ;;  %3747 = vmatpush.msrb.mxu1 %v2943_v35  ;;  %v1406_v7 = vld [vmem:[#allocation2 + $0x170] sm:$0xff]  ;;  %12135 = vst [vmem:[#allocation13_spill] sm:$0xff] %v8119_v18  ;;  %v3003_v29 = vld [vmem:[%s7698_s25 + $0x740] sm:$0xff] }
  0x89   : > { %3825 = vmatpush.msrb.mxu2 %v2973_v46  ;;  %3671 = vmatpush.msrb.mxu0 %v2909_v47  ;;  %v1451_v16 = vrot.slane %v1406_v7, 1  ;;  %v1408_v35 = vld [vmem:[#allocation2 + $0x140] sm:$0xff]  ;;  %12137 = vst [vmem:[#allocation15_spill] sm:$0xff] %v8130_v44  ;;  %v1409_v46 = vld [vmem:[#allocation2 + $0x50] sm:$0xff] }
  0x8a   : > { %3902 = vmatpush.msrb.mxu3 %v3005_v48  ;;  %3748 = vmatpush.msrb.mxu1 %v2941_v0  ;;  %v1455_v40 = vrot.slane %v1408_v35, 1  ;;  %v2969_v48 = vld [vmem:[%s7698_s25 + $0x630] sm:$0xff]  ;;  %v1457_v50 = vrot.slane %v1409_v46, 1 }
  0x8b   : > { %3826 = vmatpush.msrb.mxu2 %v2971_v11  ;;  %v8123_v27 = vsel %vm392_vm0, %v1450_v12, %v1451_v16  ;;  %3672 = vmatpush.msrb.mxu0 %v2907_v28  ;;  %v2905_v0 = vld [vmem:[%s7698_s25 + $0x430] sm:$0xff]  ;;  %v2903_v28 = vld [vmem:[%s7698_s25 + $0x420] sm:$0xff] }
  0x8c   : > { %3381 = vmatmul.f32.gmra.mxu0 %v7980_v31  ;;  %3535 = vmatmul.f32.gmra.mxu2 %v8017_v51  ;;  %12136 = vst [vmem:[#allocation14_spill] sm:$0xff] %v8123_v27  ;;  %v8134_v47 = vsel %vm392_vm0, %v1451_v16, %v1455_v40  ;;  %v3001_v2 = vld [vmem:[%s7698_s25 + $0x730] sm:$0xff]  ;;  %v1412_v16 = vld [vmem:[#allocation2 + $0x38] sm:$0xff] }
  0x8d   : > { %3903 = vmatpush.msrb.mxu3 %v3003_v29  ;;  %3749 = vmatpush.msrb.mxu1 %v2939_v37  ;;  %12138 = vst [vmem:[#allocation16_spill] sm:$0xff] %v8134_v47  ;;  %v2937_v5 = vld [vmem:[%s7698_s25 + $0x530] sm:$0xff]  ;;  %v2999_v29 = vld [vmem:[%s7698_s25 + $0x720] sm:$0xff] }
  0x8e   : > { %3458 = vmatmul.f32.gmra.mxu1 %v7988_v34  ;;  %3827 = vmatpush.msrb.mxu2 %v2969_v48  ;;  %v1411_v11 = vld [vmem:[#allocation2 + $0x190] sm:$0xff]  ;;  %v2935_v37 = vld [vmem:[%s7698_s25 + $0x520] sm:$0xff]  ;;  %v1414_v48 = vld [vmem:[#allocation2 + $0x18] sm:$0xff] }
  0x8f   : > { %3612 = vmatmul.f32.gmra.mxu3 %v8024_v53  ;;  %3673 = vmatpush.msrb.mxu0 %v2905_v0  ;;  %v1461_v12 = vrot.slane %v1411_v11, 1  ;;  %v2965_v0 = vld [vmem:[%s7698_s25 + $0x610] sm:$0xff] }
  0x90   : > { %3904 = vmatpush.msrb.mxu3 %v3001_v2  ;;  %3750 = vmatpush.msrb.mxu1 %v2937_v5  ;;  %v1415_v5 = vld [vmem:[#allocation2 + $0x158] sm:$0xff] }
  0x91   : > { %3674 = vmatpush.msrb.mxu0 %v2903_v28  ;;  %v1469_v28 = vrot.slane %v1415_v5, 1 }
  0x92   : > { %3905 = vmatpush.msrb.mxu3 %v2999_v29  ;;  %3751 = vmatpush.msrb.mxu1 %v2935_v37  ;;  %v1416_v29 = vld [vmem:[#allocation2 + $0x120] sm:$0xff] }
  0x94   : > { %3384 = vmatmul.f32.gmra.mxu0 %v8000_v42  ;;  %3538 = vmatmul.f32.gmra.mxu2 %v8035_v60 }
  0x96   : > { %3461 = vmatmul.f32.gmra.mxu1 %v8008_v45 }
  0x97   : > { %3615 = vmatmul.f32.gmra.mxu3 %v8042_v63 }
  0x9c   : > { %3387 = vmatmul.f32.gmra.mxu0 %v8019_v52  ;;  %3541 = vmatmul.f32.gmra.mxu2 %v8054_v8 }
  0x9e   : > { %3464 = vmatmul.f32.gmra.mxu1 %v8028_v56 }
  0x9f   : > { %3618 = vmatmul.f32.gmra.mxu3 %v8061_v10 }
  0xa4   : > { %3390 = vmatmul.f32.gmra.mxu0 %v8037_v61  ;;  %3544 = vmatmul.f32.gmra.mxu2 %v8074_v21  ;;  %v1532_v21 = vld [vmem:[#allocation2 + $0x170] sm:$0xff] }
  0xa6   : > { %3467 = vmatmul.f32.gmra.mxu1 %v8047_v4 }
  0xa7   : > { %3621 = vmatmul.f32.gmra.mxu3 %v8081_v24 }
  0xac   : > { %3393 = vmatmul.f32.gmra.mxu0 %v8056_v9  ;;  %3547 = vmatmul.f32.gmra.mxu2 %v8094_v36 }
  0xae   : > { %3470 = vmatmul.f32.gmra.mxu1 %v8065_v13 }
  0xaf   : > { %3624 = vmatmul.f32.gmra.mxu3 %v8099_v38  ;;  %v3135_v38 = vld [vmem:[%s7698_s25 + $0xb60] sm:$0xff] }
  0xb4   : > { %3396 = vmatmul.f32.gmra.mxu0 %v8076_v23  ;;  %3550 = vmatmul.f32.gmra.mxu2 %v8107_v54 }
  0xb6   : > { %3473 = vmatmul.f32.gmra.mxu1 %v8084_v26 }
  0xb7   : > { %3627 = vmatmul.f32.gmra.mxu3 %v8112_v58 }
  0xbc   : > { %3399 = vmatmul.f32.gmra.mxu0 %v1363_v17  ;;  %3553 = vmatmul.f32.gmra.mxu2 %v8119_v18  ;;  %v2967_v17 = vld [vmem:[%s7698_s25 + $0x620] sm:$0xff] }
  0xbd   : > { %3828 = vmatpush.msrb.mxu2 %v2967_v17  ;;  %v2997_v17 = vld [vmem:[%s7698_s25 + $0x710] sm:$0xff]  ;;  %v620_v18 = vld [vmem:[#allocation2 + $0xa0] sm:$0xff] }
  0xbe   : > { %3476 = vmatmul.f32.gmra.mxu1 %v1364_v25  ;;  %v1463_v25 = vrot.slane %v1412_v16, 1  ;;  %3906 = vmatpush.msrb.mxu3 %v2997_v17  ;;  %v2995_v17 = vld [vmem:[%s7698_s25 + $0x700] sm:$0xff] }
  0xbf   : > { %3630 = vmatmul.f32.gmra.mxu3 %v8123_v27  ;;  %3829 = vmatpush.msrb.mxu2 %v2965_v0  ;;  %v3347_v0 = vld [vmem:[%s7693_s22] sm:$0x3] }
  0xc0   : > { %3907 = vmatpush.msrb.mxu3 %v2995_v17  ;;  %v3121_v17 = vld [vmem:[%s7698_s25 + $0xaf0] sm:$0xff] }
  0xc4   : > { %3402 = vmatmul.f32.gmra.mxu0 %v1405_v57  ;;  %3556 = vmatmul.f32.gmra.mxu2 %v8130_v44  ;;  %v8142_v57 = vsel %vm392_vm0, %v1453_v33, %v1457_v50  ;;  %v8153_v33 = vsel %vm392_vm0, %v1457_v50, %v1461_v12  ;;  %v1467_v50 = vrot.slane %v1414_v48, 1  ;;  %v3087_v44 = vld [vmem:[%s7698_s25 + $0x9e0] sm:$0xff] }
  0xc5   : > { %12139 = vst [vmem:[#allocation17_spill] sm:$0xff] %v8142_v57 }
  0xc6   : > { %3479 = vmatmul.f32.gmra.mxu1 %v1406_v7  ;;  %v8146_v7 = vsel %vm392_vm0, %v1455_v40, %v1459_v3  ;;  %12141 = vst [vmem:[#allocation19_spill] sm:$0xff] %v8153_v33 }
  0xc7   : > { %3633 = vmatmul.f32.gmra.mxu3 %v8134_v47  ;;  %12140 = vst [vmem:[#allocation18_spill] sm:$0xff] %v8146_v7  ;;  %v3151_v47 = vld [vmem:[%s7698_s25 + $0xbe0] sm:$0xff] }
  0xcc   : > { %3405 = vmatmul.f32.gmra.mxu0 %v1407_v20  ;;  %3559 = vmatmul.f32.gmra.mxu2 %v8142_v57  ;;  %v1413_v20 = vld [vmem:[#allocation2 + $0x60] sm:$0xff] }
  0xcd   : > { %v1465_v40 = vrot.slane %v1413_v20, 1 }
  0xce   : > { %3482 = vmatmul.f32.gmra.mxu1 %v1408_v35  ;;  %v8158_v35 = vsel %vm392_vm0, %v1459_v3, %v1463_v25  ;;  %v8169_v3 = vsel %vm392_vm0, %v1463_v25, %v1467_v50  ;;  %v2963_v25 = vld [vmem:[%s7698_s25 + $0x600] sm:$0xff] }
  0xcf   : > { %3636 = vmatmul.f32.gmra.mxu3 %v8146_v7  ;;  %12142 = vst [vmem:[#allocation20_spill] sm:$0xff] %v8158_v35  ;;  %v8163_v2 = vsel %vm392_vm0, %v1461_v12, %v1465_v40  ;;  %v1471_v12 = vrot.slane %v1416_v29, 1  ;;  %v8174_v37 = vsel %vm392_vm0, %v1465_v40, %v1469_v28  ;;  %3830 = vmatpush.msrb.mxu2 %v2963_v25  ;;  %v8184_v40 = vperm.slane %v3347_v0, 0  ;;  %v1419_v25 = vld [vmem:[#allocation2 + $0x30] sm:$0xff] }
  0xd0   : > { %12143 = vst [vmem:[#allocation21_spill] sm:$0xff] %v8163_v2 }
  0xd1   : > { %12144 = vst [vmem:[#allocation22_spill] sm:$0xff] %v8169_v3  ;;  %4123 = vmatpush.msra.mxu2 %v3121_v17 }
  0xd2   : > { %12145 = vst [vmem:[#allocation23_spill] sm:$0xff] %v8174_v37 }
  0xd4   : > { %3408 = vmatmul.f32.gmra.mxu0 %v1409_v46  ;;  %3562 = vmatmul.f32.gmra.mxu2 %v8153_v33  ;;  %v2901_v46 = vld [vmem:[%s7698_s25 + $0x410] sm:$0xff] }
  0xd5   : > { %3675 = vmatpush.msrb.mxu0 %v2901_v46  ;;  %v2899_v46 = vld [vmem:[%s7698_s25 + $0x400] sm:$0xff]  ;;  %v3057_v33 = vld [vmem:[%s7698_s25 + $0x8f0] sm:$0xff] }
  0xd6   : > { %3485 = vmatmul.f32.gmra.mxu1 %v1410_v55  ;;  %v2933_v55 = vld [vmem:[%s7698_s25 + $0x510] sm:$0xff] }
  0xd7   : > { %3639 = vmatmul.f32.gmra.mxu3 %v8158_v35  ;;  %3752 = vmatpush.msrb.mxu1 %v2933_v55  ;;  %v1418_v35 = vld [vmem:[#allocation2 + $0x68] sm:$0xff]  ;;  %v2931_v55 = vld [vmem:[%s7698_s25 + $0x500] sm:$0xff] }
  0xd8   : > { %3676 = vmatpush.msrb.mxu0 %v2899_v46 }
  0xd9   : > { %3753 = vmatpush.msrb.mxu1 %v2931_v55  ;;  %v1477_v55 = vrot.slane %v1419_v25, 1 }
  0xda   : > { %3969 = vmatpush.msra.mxu0 %v3057_v33 }
  0xdc   : > { %3411 = vmatmul.f32.gmra.mxu0 %v1411_v11  ;;  %3565 = vmatmul.f32.gmra.mxu2 %v8163_v2  ;;  %v1417_v11 = vld [vmem:[#allocation2 + $0x198] sm:$0xff]  ;;  %v8180_v2 = vsel %vm392_vm0, %v1467_v50, %v1471_v12 }
  0xdd   : > { %12146 = vst [vmem:[#allocation24_spill] sm:$0xff] %v8180_v2 }
  0xde   : > { %3488 = vmatmul.f32.gmra.mxu1 %v1412_v16  ;;  %v1473_v16 = vrot.slane %v1417_v11, 1 }
  0xdf   : > { %3642 = vmatmul.f32.gmra.mxu3 %v8169_v3 }
  0xe0   : > { %v8189_v50 = vsel %vm392_vm0, %v1469_v28, %v1473_v16 }
  0xe1   : > { %12147 = vst [vmem:[#allocation25_spill] sm:$0xff] %v8189_v50 }
  0xe4   : > { %3414 = vmatmul.f32.gmra.mxu0 %v1413_v20  ;;  %3568 = vmatmul.f32.gmra.mxu2 %v8174_v37  ;;  %v1475_v20 = vrot.slane %v1418_v35, 1 }
  0xe6   : > { %3491 = vmatmul.f32.gmra.mxu1 %v1414_v48  ;;  %v8194_v0 = vsel %vm392_vm0, %v1471_v12, %v1475_v20 }
  0xe7   : > { %3645 = vmatmul.f32.gmra.mxu3 %v8180_v2  ;;  %12148 = vst [vmem:[#allocation26_spill] sm:$0xff] %v8194_v0  ;;  %v1420_v2 = vld [vmem:[#allocation2 + $0xc8] sm:$0xff] }
  0xe8   : > { %v1479_v57 = vrot.slane %v1420_v2, 1 }
  0xe9   : > { %v3370_v37 = vpop.f32.mrf.mxu0 }
  0xea   : > { %v3371_v3 = vadd.f32 %v3370_v37, %v8184_v40  ;;  %v3153_v37 = vld [vmem:[%s7698_s25 + $0xbf0] sm:$0xff]  ;;  %v8209_v33 = vsel %vm392_vm0, %v1475_v20, %v1479_v57 }
  0xeb   : > { %v3447_v46 = vpop.f32.mrf.mxu1  ;;  %4200 = vmatpush.msra.mxu3 %v3153_v37  ;;  %12150 = vst [vmem:[#allocation28_spill] sm:$0xff] %v8209_v33 }
  0xec   : > { %v3448_v48 = vadd.f32 %v3447_v46, %v3371_v3  ;;  %3417 = vmatmul.f32.gmra.mxu0 %v1415_v5  ;;  %3571 = vmatmul.f32.gmra.mxu2 %v8189_v50  ;;  %v3089_v5 = vld [vmem:[%s7698_s25 + $0x9f0] sm:$0xff]  ;;  %v8202_v46 = vsel %vm392_vm0, %v1473_v16, %v1477_v55 }
  0xed   : > { %12149 = vst [vmem:[#allocation27_spill] sm:$0xff] %v8202_v46  ;;  %4046 = vmatpush.msra.mxu1 %v3089_v5  ;;  %v3119_v5 = vld [vmem:[%s7698_s25 + $0xae0] sm:$0xff]  ;;  %4201 = vmatpush.msra.mxu3 %v3151_v47 }
  0xee   : > { %3494 = vmatmul.f32.gmra.mxu1 %v1416_v29  ;;  %v1421_v29 = vld [vmem:[#allocation2 + $0xf8] sm:$0xff]  ;;  %4124 = vmatpush.msra.mxu2 %v3119_v5  ;;  %v1424_v5 = vld [vmem:[#allocation2 + $0x80] sm:$0x1] }
  0xef   : > { %3648 = vmatmul.f32.gmra.mxu3 %v8194_v0  ;;  %v3524_v28 = vpop.f32.mrf.mxu2  ;;  %v1481_v16 = vrot.slane %v1421_v29, 1  ;;  %4047 = vmatpush.msra.mxu1 %v3087_v44  ;;  %v602_v44 = vld [vmem:[#allocation2 + $0x10] sm:$0xfc] }
  0xf0   : > { %v3525_v7 = vadd.f32 %v3524_v28, %v3448_v48  ;;  %v1422_v28 = vld [vmem:[#allocation2 + $0x28] sm:$0xff] }
  0xf1   : > { %v3373_v3 = vpop.f32.mrf.mxu0 }
  0xf2   : > { %v3374_v12 = vadd.f32 %v3373_v3, %v8184_v40  ;;  %v3601_v17 = vpop.f32.mrf.mxu3 }
  0xf3   : > { %v8205_v0 = vadd.f32 %v3601_v17, %v3525_v7  ;;  %v3450_v50 = vpop.f32.mrf.mxu1  ;;  %v1483_v7 = vrot.slane %v1422_v28, 1  ;;  %v3055_v17 = vld [vmem:[%s7698_s25 + $0x8e0] sm:$0xff] }
  0xf4   : > { %v3451_v48 = vadd.f32 %v3450_v50, %v3374_v12  ;;  %3420 = vmatmul.f32.gmra.mxu0 %v1417_v11  ;;  %3574 = vmatmul.f32.gmra.mxu2 %v8202_v46  ;;  %v8216_v11 = vsel %vm392_vm0, %v1477_v55, %v1481_v16 }
  0xf5   : > { %12151 = vst [vmem:[#allocation29_spill] sm:$0xff] %v8216_v11  ;;  %3970 = vmatpush.msra.mxu0 %v3055_v17  ;;  %v1487_v17 = vrot.slane %v1424_v5, 1 }
  0xf6   : > { %3497 = vmatmul.f32.gmra.mxu1 %v1418_v35  ;;  %v1423_v35 = vld [vmem:[#allocation2 + $0x8] sm:$0x1] }
  0xf7   : > { %3651 = vmatmul.f32.gmra.mxu3 %v8209_v33  ;;  %v3527_v37 = vpop.f32.mrf.mxu2  ;;  %v1485_v55 = vrot.slane %v1423_v35, 1 }
  0xf8   : > { %v3528_v3 = vadd.f32 %v3527_v37, %v3451_v48  ;;  %v8224_v37 = vsel %vm392_vm0, %v1479_v57, %v1483_v7 }
  0xf9   : > { %v3376_v50 = vpop.f32.mrf.mxu0  ;;  %12152 = vst [vmem:[#allocation30_spill] sm:$0xff] %v8224_v37 }
  0xfa   : > { %v3377_v20 = vadd.f32 %v3376_v50, %v8184_v40  ;;  %v3604_v12 = vpop.f32.mrf.mxu3  ;;  %v3117_v50 = vld [vmem:[%s7698_s25 + $0xad0] sm:$0xff] }
  0xfb   : > { %v8219_v33 = vadd.f32 %v3604_v12, %v3528_v3  ;;  %v3453_v46 = vpop.f32.mrf.mxu1  ;;  %4125 = vmatpush.msra.mxu2 %v3117_v50  ;;  %v646_v50 = vrot.slane %v602_v44, 2 }
  0xfc   : > { %v3454_v48 = vadd.f32 %v3453_v46, %v3377_v20  ;;  %3423 = vmatmul.f32.gmra.mxu0 %v1419_v25  ;;  %3577 = vmatmul.f32.gmra.mxu2 %v8216_v11  ;;  %v8229_v25 = vsel %vm392_vm0, %v1481_v16, %v1485_v55  ;;  %v475_v20 = vld [vmem:[#allocation2 + $0xb0] sm:$0xfc] }
  0xfd   : > { %12153 = vst [vmem:[#allocation31_spill] sm:$0xff] %v8229_v25  ;;  %v3053_v11 = vld [vmem:[%s7698_s25 + $0x8d0] sm:$0xff]  ;;  %v520_v5 = vrot.slane %v475_v20, 2 }
  0xfe   : > { %3500 = vmatmul.f32.gmra.mxu1 %v1420_v2  ;;  %v476_v16 = vld [vmem:[#allocation2 + $0xd0] sm:$0xfc]  ;;  %3971 = vmatpush.msra.mxu0 %v3053_v11 }
  0xff   : > { %3654 = vmatmul.f32.gmra.mxu3 %v8224_v37  ;;  %v3530_v47 = vpop.f32.mrf.mxu2  ;;  %v3149_v37 = vld [vmem:[%s7698_s25 + $0xbd0] sm:$0xff] }
 0x100   : > { %v3531_v3 = vadd.f32 %v3530_v47, %v3454_v48  ;;  %v8238_v48 = vsel %vm392_vm0, %v1483_v7, %v1487_v17  ;;  %v3085_v55 = vld [vmem:[%s7698_s25 + $0x9d0] sm:$0xff]  ;;  %v521_v47 = vrot.slane %v7907_v39, 2  ;;  %4202 = vmatpush.msra.mxu3 %v3149_v37  ;;  %v524_v7 = vrot.slane %v7916_v49, 2 }
 0x101   : > { %v3379_v12 = vpop.f32.mrf.mxu0  ;;  %12154 = vst [vmem:[#allocation32_spill] sm:$0xff] %v8238_v48  ;;  %4048 = vmatpush.msra.mxu1 %v3085_v55  ;;  %v650_v39 = vrot.slane %v7941_v6, 2  ;;  %v3051_v55 = vld [vmem:[%s7698_s25 + $0x8c0] sm:$0xff] }
 0x102   : > { %v3380_v57 = vadd.f32 %v3379_v12, %v8184_v40  ;;  %v3607_v46 = vpop.f32.mrf.mxu3  ;;  %v647_v12 = vrot.slane %v7930_v62, 2  ;;  %v8247_v11 = vsel %vm519_vm1, %v520_v5, %v521_v47  ;;  %v3147_v5 = vld [vmem:[%s7698_s25 + $0xbc0] sm:$0xff]  ;;  %3972 = vmatpush.msra.mxu0 %v3051_v55  ;;  %v656_v55 = vrot.slane %v7980_v31, 2 }
 0x103   : > { %v8232_v35 = vadd.f32 %v3607_v46, %v3531_v3  ;;  %v3456_v2 = vpop.f32.mrf.mxu1  ;;  %v603_v3 = vld [vmem:[#allocation2 + $0x48] sm:$0xfc]  ;;  %4203 = vmatpush.msra.mxu3 %v3147_v5 }
 0x104   : > { %v3457_v27 = vadd.f32 %v3456_v2, %v3380_v57  ;;  %3426 = vmatmul.f32.gmra.mxu0 %v1421_v29  ;;  %3580 = vmatmul.f32.gmra.mxu2 %v8229_v25  ;;  %v523_v57 = vrot.slane %v476_v16, 2  ;;  %v649_v46 = vrot.slane %v603_v3, 2  ;;  %v3115_v2 = vld [vmem:[%s7698_s25 + $0xac0] sm:$0xff]  ;;  %v493_v25 = vld [vmem:[#allocation2 + $0x138] sm:$0xff] }
 0x105   : > { %4126 = vmatpush.msra.mxu2 %v3115_v2 }
 0x106   : > { %3503 = vmatmul.f32.gmra.mxu1 %v1422_v28  ;;  %v8250_v28 = vsel %vm519_vm1, %v646_v50, %v647_v12  ;;  %v8262_v6 = vsel %vm519_vm1, %v649_v46, %v650_v39  ;;  %v652_v50 = vrot.slane %v7954_v15, 2 }
 0x107   : > { %3657 = vmatmul.f32.gmra.mxu3 %v8238_v48  ;;  %v3533_v29 = vpop.f32.mrf.mxu2  ;;  %12155 = vst [vmem:[#allocation33_spill] sm:$0xff] %v8250_v28 }
 0x108   : > { %v3534_v17 = vadd.f32 %v3533_v29, %v3457_v27  ;;  %v8256_v27 = vsel %vm519_vm1, %v523_v57, %v524_v7  ;;  %12156 = vst [vmem:[#allocation34_spill] sm:$0xff] %v8262_v6  ;;  %v3083_v29 = vld [vmem:[%s7698_s25 + $0x9c0] sm:$0xff]  ;;  %v8275_v15 = vsel %vm519_vm1, %v647_v12, %v652_v50 }
 0x109   : > { %v3382_v62 = vpop.f32.mrf.mxu0  ;;  %4049 = vmatpush.msra.mxu1 %v3083_v29 }
 0x10a   : > { %v3383_v37 = vadd.f32 %v3382_v62, %v8184_v40  ;;  %v3610_v20 = vpop.f32.mrf.mxu3  ;;  %v8272_v62 = vsel %vm519_vm1, %v521_v47, %v647_v12  ;;  %v3113_v12 = vld [vmem:[%s7698_s25 + $0xab0] sm:$0xff] }
 0x10b   : > { %v8253_v44 = vadd.f32 %v3610_v20, %v3534_v17  ;;  %v3459_v49 = vpop.f32.mrf.mxu1  ;;  %v654_v17 = vrot.slane %v7966_v22, 2  ;;  %4127 = vmatpush.msra.mxu2 %v3113_v12 }
 0x10c   : > { %v3460_v16 = vadd.f32 %v3459_v49, %v3383_v37  ;;  %3677 = vmatmul.f32.vlgmr.msrb.gmra.mxu0 %v8247_v11  ;;  %3831 = vmatmul.f32.vlgmr.msrb.gmra.mxu2 %v8250_v28  ;;  %v3079_v28 = vld [vmem:[%s7698_s25 + $0x9a0] sm:$0xff] }
 0x10d   : > { %v8286_v47 = vsel %vm519_vm1, %v650_v39, %v654_v17 }
 0x10e   : > { %3754 = vmatmul.f32.vlgmr.msrb.gmra.mxu1 %v8256_v27 }
 0x10f   : > { %3908 = vmatmul.f32.vlgmr.msrb.gmra.mxu3 %v8262_v6  ;;  %v3536_v3 = vpop.f32.mrf.mxu2 }
 0x110   : > { %v3537_v57 = vadd.f32 %v3536_v3, %v3460_v16  ;;  %v8281_v16 = vsel %vm519_vm1, %v524_v7, %v650_v39  ;;  %v3049_v7 = vld [vmem:[%s7698_s25 + $0x8b0] sm:$0xff] }
 0x111   : > { %v3385_v46 = vpop.f32.mrf.mxu0  ;;  %v3145_v3 = vld [vmem:[%s7698_s25 + $0xbb0] sm:$0xff]  ;;  %3973 = vmatpush.msra.mxu0 %v3049_v7  ;;  %v3111_v7 = vld [vmem:[%s7698_s25 + $0xaa0] sm:$0xff] }
 0x112   : > { %v3386_v37 = vadd.f32 %v3385_v46, %v8184_v40  ;;  %v3613_v20 = vpop.f32.mrf.mxu3  ;;  %4204 = vmatpush.msra.mxu3 %v3145_v3  ;;  %v3081_v46 = vld [vmem:[%s7698_s25 + $0x9b0] sm:$0xff]  ;;  %4128 = vmatpush.msra.mxu2 %v3111_v7 }
 0x113   : > { %v8278_v49 = vadd.f32 %v3613_v20, %v3537_v57  ;;  %v3462_v2 = vpop.f32.mrf.mxu1  ;;  %v658_v57 = vrot.slane %v7988_v34, 2  ;;  %4050 = vmatpush.msra.mxu1 %v3081_v46  ;;  %v3047_v46 = vld [vmem:[%s7698_s25 + $0x8a0] sm:$0xff] }
 0x114   : > { %v3463_v22 = vadd.f32 %v3462_v2, %v3386_v37  ;;  %3680 = vmatmul.f32.gmra.mxu0 %v8272_v62  ;;  %3834 = vmatmul.f32.gmra.mxu2 %v8275_v15  ;;  %v8297_v37 = vsel %vm519_vm1, %v652_v50, %v656_v55  ;;  %v660_v50 = vrot.slane %v8000_v42, 2 }
 0x115   : > { %v8305_v34 = vsel %vm519_vm1, %v654_v17, %v658_v57  ;;  %3974 = vmatpush.msra.mxu0 %v3047_v46  ;;  %4051 = vmatpush.msra.mxu1 %v3079_v28 }
 0x116   : > { %3757 = vmatmul.f32.gmra.mxu1 %v8281_v16 }
 0x117   : > { %3911 = vmatmul.f32.gmra.mxu3 %v8286_v47  ;;  %v3539_v5 = vpop.f32.mrf.mxu2 }
 0x118   : > { %v3540_v29 = vadd.f32 %v3539_v5, %v3463_v22 }
 0x119   : > { %v3388_v39 = vpop.f32.mrf.mxu0 }
 0x11a   : > { %v3389_v31 = vadd.f32 %v3388_v39, %v8184_v40  ;;  %v3616_v20 = vpop.f32.mrf.mxu3  ;;  %v3143_v39 = vld [vmem:[%s7698_s25 + $0xba0] sm:$0xff] }
 0x11b   : > { %v8300_v2 = vadd.f32 %v3616_v20, %v3540_v29  ;;  %v3465_v12 = vpop.f32.mrf.mxu1  ;;  %v662_v29 = vrot.slane %v8008_v45, 2  ;;  %v8315_v20 = vsel %vm519_vm1, %v656_v55, %v660_v50  ;;  %4205 = vmatpush.msra.mxu3 %v3143_v39  ;;  %v664_v55 = vrot.slane %v8019_v52, 2 }
 0x11c   : > { %v3466_v22 = vadd.f32 %v3465_v12, %v3389_v31  ;;  %3683 = vmatmul.f32.gmra.mxu0 %v8275_v15  ;;  %3837 = vmatmul.f32.gmra.mxu2 %v8297_v37 }
 0x11d   : > { %v8324_v45 = vsel %vm519_vm1, %v658_v57, %v662_v29  ;;  %v8332_v39 = vsel %vm519_vm1, %v660_v50, %v664_v55  ;;  %v668_v50 = vrot.slane %v8037_v61, 2 }
 0x11e   : > { %3760 = vmatmul.f32.gmra.mxu1 %v8286_v47 }
 0x11f   : > { %3914 = vmatmul.f32.gmra.mxu3 %v8305_v34  ;;  %v3542_v5 = vpop.f32.mrf.mxu2 }
 0x120   : > { %v3543_v3 = vadd.f32 %v3542_v5, %v3466_v22 }
 0x121   : > { %v3391_v31 = vpop.f32.mrf.mxu0 }
 0x122   : > { %v3392_v42 = vadd.f32 %v3391_v31, %v8184_v40  ;;  %v3619_v17 = vpop.f32.mrf.mxu3 }
 0x123   : > { %v8318_v12 = vadd.f32 %v3619_v17, %v3543_v3  ;;  %v3468_v6 = vpop.f32.mrf.mxu1  ;;  %v3109_v3 = vld [vmem:[%s7698_s25 + $0xa90] sm:$0xff] }
 0x124   : > { %v3469_v22 = vadd.f32 %v3468_v6, %v3392_v42  ;;  %3686 = vmatmul.f32.gmra.mxu0 %v8297_v37  ;;  %3840 = vmatmul.f32.gmra.mxu2 %v8315_v20  ;;  %v666_v6 = vrot.slane %v8028_v56, 2  ;;  %v3045_v42 = vld [vmem:[%s7698_s25 + $0x890] sm:$0xff] }
 0x125   : > { %4129 = vmatpush.msra.mxu2 %v3109_v3  ;;  %v3141_v17 = vld [vmem:[%s7698_s25 + $0xb90] sm:$0xff]  ;;  %3975 = vmatpush.msra.mxu0 %v3045_v42  ;;  %v670_v3 = vrot.slane %v8047_v4, 2  ;;  %v3107_v42 = vld [vmem:[%s7698_s25 + $0xa80] sm:$0xff] }
 0x126   : > { %3763 = vmatmul.f32.gmra.mxu1 %v8305_v34  ;;  %v8342_v56 = vsel %vm519_vm1, %v662_v29, %v666_v6  ;;  %4206 = vmatpush.msra.mxu3 %v3141_v17  ;;  %v8350_v29 = vsel %vm519_vm1, %v664_v55, %v668_v50  ;;  %v3043_v4 = vld [vmem:[%s7698_s25 + $0x880] sm:$0xff]  ;;  %v8364_v55 = vrot.slane %v8056_v9, 2 }
 0x127   : > { %3917 = vmatmul.f32.gmra.mxu3 %v8324_v45  ;;  %v3545_v5 = vpop.f32.mrf.mxu2  ;;  %12157 = vst [vmem:[#allocation35_spill] sm:$0xff] %v8342_v56  ;;  %4130 = vmatpush.msra.mxu2 %v3107_v42 }
 0x128   : > { %v3546_v7 = vadd.f32 %v3545_v5, %v3469_v22  ;;  %v3077_v22 = vld [vmem:[%s7698_s25 + $0x990] sm:$0xff]  ;;  %12158 = vst [vmem:[#allocation36_spill] sm:$0xff] %v8350_v29  ;;  %3976 = vmatpush.msra.mxu0 %v3043_v4  ;;  %v8374_v9 = vsel %vm519_vm1, %v668_v50, %v8364_v55  ;;  %v676_v50 = vrot.slane %v8076_v23, 2 }
 0x129   : > { %v3394_v46 = vpop.f32.mrf.mxu0  ;;  %4052 = vmatpush.msra.mxu1 %v3077_v22  ;;  %v3139_v22 = vld [vmem:[%s7698_s25 + $0xb80] sm:$0xff]  ;;  %12160 = vst [vmem:[#allocation38_spill] sm:$0xff] %v8374_v9 }
 0x12a   : > { %v3395_v57 = vadd.f32 %v3394_v46, %v8184_v40  ;;  %v3622_v52 = vpop.f32.mrf.mxu3  ;;  %4207 = vmatpush.msra.mxu3 %v3139_v22 }
 0x12b   : > { %v8335_v31 = vadd.f32 %v3622_v52, %v3546_v7  ;;  %v3471_v28 = vpop.f32.mrf.mxu1 }
 0x12c   : > { %v3472_v48 = vadd.f32 %v3471_v28, %v3395_v57  ;;  %3689 = vmatmul.f32.gmra.mxu0 %v8315_v20  ;;  %3843 = vmatmul.f32.gmra.mxu2 %v8332_v39 }
 0x12e   : > { %3766 = vmatmul.f32.gmra.mxu1 %v8324_v45 }
 0x12f   : > { %3920 = vmatmul.f32.gmra.mxu3 %v8342_v56  ;;  %v3548_v5 = vpop.f32.mrf.mxu2 }
 0x130   : > { %v3549_v7 = vadd.f32 %v3548_v5, %v3472_v48  ;;  %v8359_v48 = vsel %vm519_vm1, %v666_v6, %v670_v3 }
 0x131   : > { %v3397_v46 = vpop.f32.mrf.mxu0  ;;  %12159 = vst [vmem:[#allocation37_spill] sm:$0xff] %v8359_v48 }
 0x132   : > { %v3398_v57 = vadd.f32 %v3397_v46, %v8184_v40  ;;  %v3625_v61 = vpop.f32.mrf.mxu3 }
 0x133   : > { %v8353_v52 = vadd.f32 %v3625_v61, %v3549_v7  ;;  %v3474_v28 = vpop.f32.mrf.mxu1  ;;  %v3075_v7 = vld [vmem:[%s7698_s25 + $0x980] sm:$0xff] }
 0x134   : > { %v3475_v17 = vadd.f32 %v3474_v28, %v3398_v57  ;;  %3692 = vmatmul.f32.gmra.mxu0 %v8332_v39  ;;  %3846 = vmatmul.f32.gmra.mxu2 %v8350_v29  ;;  %v8370_v57 = vrot.slane %v8065_v13, 2 }
 0x135   : > { %4053 = vmatpush.msra.mxu1 %v3075_v7  ;;  %v3041_v7 = vld [vmem:[%s7698_s25 + $0x870] sm:$0xff] }
 0x136   : > { %3769 = vmatmul.f32.gmra.mxu1 %v8342_v56  ;;  %v8383_v13 = vsel %vm519_vm1, %v670_v3, %v8370_v57  ;;  %3977 = vmatpush.msra.mxu0 %v3041_v7  ;;  %v8395_v3 = vsel %vm519_vm1, %v8364_v55, %v676_v50  ;;  %v494_v7 = vld [vmem:[#allocation2 + $0x78] sm:$0xff] }
 0x137   : > { %3923 = vmatmul.f32.gmra.mxu3 %v8359_v48  ;;  %v3551_v5 = vpop.f32.mrf.mxu2  ;;  %12161 = vst [vmem:[#allocation39_spill] sm:$0xff] %v8383_v13 }
 0x138   : > { %v3552_v46 = vadd.f32 %v3551_v5, %v3475_v17  ;;  %v3105_v17 = vld [vmem:[%s7698_s25 + $0xa70] sm:$0xff]  ;;  %12162 = vst [vmem:[#allocation40_spill] sm:$0xff] %v8395_v3 }
 0x139   : > { %v3400_v6 = vpop.f32.mrf.mxu0  ;;  %4131 = vmatpush.msra.mxu2 %v3105_v17 }
 0x13a   : > { %v3401_v61 = vadd.f32 %v3400_v6, %v8184_v40  ;;  %v3628_v28 = vpop.f32.mrf.mxu3 }
 0x13b   : > { %v8377_v42 = vadd.f32 %v3628_v28, %v3552_v46  ;;  %v3477_v4 = vpop.f32.mrf.mxu1  ;;  %v3137_v46 = vld [vmem:[%s7698_s25 + $0xb70] sm:$0xff] }
 0x13c   : > { %v3478_v22 = vadd.f32 %v3477_v4, %v3401_v61  ;;  %3695 = vmatmul.f32.gmra.mxu0 %v8350_v29  ;;  %3849 = vmatmul.f32.gmra.mxu2 %v8374_v9  ;;  %v678_v61 = vrot.slane %v8084_v26, 2  ;;  %v3073_v28 = vld [vmem:[%s7698_s25 + $0x970] sm:$0xff] }
 0x13d   : > { %4208 = vmatpush.msra.mxu3 %v3137_v46  ;;  %4054 = vmatpush.msra.mxu1 %v3073_v28  ;;  %v554_v46 = vrot.slane %v493_v25, 2  ;;  %v680_v28 = vrot.slane %v620_v18, 2 }
 0x13e   : > { %3772 = vmatmul.f32.gmra.mxu1 %v8359_v48  ;;  %v8404_v26 = vsel %vm519_vm1, %v8370_v57, %v678_v61  ;;  %v3069_v48 = vld [vmem:[%s7698_s25 + $0x950] sm:$0xff] }
 0x13f   : > { %3926 = vmatmul.f32.gmra.mxu3 %v8383_v13  ;;  %v3554_v5 = vpop.f32.mrf.mxu2  ;;  %12163 = vst [vmem:[#allocation41_spill] sm:$0xff] %v8404_v26  ;;  %v8413_v24 = vsel %vm519_vm1, %v8364_v55, %v554_v46  ;;  %v8416_v18 = vsel %vm519_vm1, %v676_v50, %v680_v28 }
 0x140   : > { %v3555_v6 = vadd.f32 %v3554_v5, %v3478_v22  ;;  %12164 = vst [vmem:[#allocation42_spill] sm:$0xff] %v8413_v24  ;;  %4209 = vmatpush.msra.mxu3 %v3135_v38 }
 0x141   : > { %v3403_v4 = vpop.f32.mrf.mxu0  ;;  %12165 = vst [vmem:[#allocation43_spill] sm:$0xff] %v8416_v18 }
 0x142   : > { %v3404_v23 = vadd.f32 %v3403_v4, %v8184_v40  ;;  %v3631_v17 = vpop.f32.mrf.mxu3  ;;  %v621_v4 = vld [vmem:[#allocation2] sm:$0xff] }
 0x143   : > { %v8398_v58 = vadd.f32 %v3631_v17, %v3555_v6  ;;  %v3480_v22 = vpop.f32.mrf.mxu1  ;;  %v3103_v17 = vld [vmem:[%s7698_s25 + $0xa60] sm:$0xff]  ;;  %v682_v54 = vrot.slane %v621_v4, 2 }
 0x144   : > { %v3481_v5 = vadd.f32 %v3480_v22, %v3404_v23  ;;  %3698 = vmatmul.f32.gmra.mxu0 %v8374_v9  ;;  %3852 = vmatmul.f32.gmra.mxu2 %v8395_v3  ;;  %v556_v23 = vrot.slane %v494_v7, 2  ;;  %v3039_v3 = vld [vmem:[%s7698_s25 + $0x860] sm:$0xff] }
 0x145   : > { %4132 = vmatpush.msra.mxu2 %v3103_v17  ;;  %3978 = vmatpush.msra.mxu0 %v3039_v3  ;;  %v8429_v38 = vsel %vm519_vm1, %v678_v61, %v682_v54 }
 0x146   : > { %3775 = vmatmul.f32.gmra.mxu1 %v8383_v13  ;;  %v8423_v17 = vsel %vm519_vm1, %v8370_v57, %v556_v23  ;;  %v3071_v13 = vld [vmem:[%s7698_s25 + $0x960] sm:$0xff]  ;;  %12167 = vst [vmem:[#allocation45_spill] sm:$0xff] %v8429_v38 }
 0x147   : > { %3929 = vmatmul.f32.gmra.mxu3 %v8404_v26  ;;  %v3557_v6 = vpop.f32.mrf.mxu2  ;;  %v495_v26 = vld [vmem:[#allocation2 + $0xa0] sm:$0x3]  ;;  %12166 = vst [vmem:[#allocation44_spill] sm:$0xff] %v8423_v17  ;;  %4055 = vmatpush.msra.mxu1 %v3071_v13 }
 0x148   : > { %v3558_v22 = vadd.f32 %v3557_v6, %v3481_v5  ;;  %v622_v5 = vld [vmem:[#allocation2 + $0x20] sm:$0x3]  ;;  %v558_v50 = vrot.slane %v495_v26, 2 }
 0x149   : > { %v3406_v36 = vpop.f32.mrf.mxu0  ;;  %v684_v3 = vrot.slane %v622_v5, 2  ;;  %v1529_v5 = vld [vmem:[#allocation2 + $0xa8] sm:$0xfc]  ;;  %4056 = vmatpush.msra.mxu1 %v3069_v48 }
 0x14a   : > { %v3407_v25 = vadd.f32 %v3406_v36, %v8184_v40  ;;  %v3634_v7 = vpop.f32.mrf.mxu3  ;;  %v496_v36 = vld [vmem:[#allocation2] sm:$0x3]  ;;  %v8435_v61 = vsel %vm519_vm1, %v554_v46, %v558_v50  ;;  %v3037_v46 = vld [vmem:[%s7698_s25 + $0x850] sm:$0xff] }
 0x14b   : > { %v8419_v4 = vadd.f32 %v3634_v7, %v3558_v22  ;;  %v3483_v6 = vpop.f32.mrf.mxu1  ;;  %v623_v22 = vld [vmem:[#allocation2 + $0xe0] sm:$0x3]  ;;  %v560_v7 = vrot.slane %v496_v36, 2  ;;  %12168 = vst [vmem:[#allocation46_spill] sm:$0xff] %v8435_v61  ;;  %v8438_v26 = vsel %vm519_vm1, %v680_v28, %v684_v3  ;;  %v3133_v50 = vld [vmem:[%s7698_s25 + $0xb50] sm:$0xff]  ;;  %v1573_v3 = vrot.slane %v1529_v5, 2  ;;  %3979 = vmatpush.msra.mxu0 %v3037_v46 }
 0x14c   : > { %v3484_v55 = vadd.f32 %v3483_v6, %v3407_v25  ;;  %3701 = vmatmul.f32.gmra.mxu0 %v8413_v24  ;;  %3855 = vmatmul.f32.gmra.mxu2 %v8416_v18  ;;  %v686_v25 = vrot.slane %v623_v22, 2  ;;  %v3101_v6 = vld [vmem:[%s7698_s25 + $0xa50] sm:$0xff]  ;;  %12169 = vst [vmem:[#allocation47_spill] sm:$0xff] %v8438_v26  ;;  %v1657_v36 = vld [vmem:[#allocation2 + $0xc0] sm:$0xff] }
 0x14d   : > { %4133 = vmatpush.msra.mxu2 %v3101_v6  ;;  %v8446_v24 = vsel %vm519_vm1, %v556_v23, %v560_v7  ;;  %v1530_v6 = vld [vmem:[#allocation2 + $0x88] sm:$0xfc]  ;;  %v1700_v10 = vrot.slane %v1657_v36, 2  ;;  %v1656_v23 = vld [vmem:[#allocation2 + $0x170] sm:$0xfc]  ;;  %v1658_v7 = vld [vmem:[#allocation2 + $0x140] sm:$0xff]  ;;  %4210 = vmatpush.msra.mxu3 %v3133_v50 }
 0x14e   : > { %3778 = vmatmul.f32.gmra.mxu1 %v8423_v17  ;;  %12170 = vst [vmem:[#allocation48_spill] sm:$0xff] %v8446_v24 }
 0x14f   : > { %3932 = vmatmul.f32.gmra.mxu3 %v8429_v38  ;;  %v3560_v57 = vpop.f32.mrf.mxu2  ;;  %v8441_v38 = vld [vmem:[#allocation2 + $0xb8] sm:$0xff] }
 0x150   : > { %v3561_v9 = vadd.f32 %v3560_v57, %v3484_v55  ;;  %v1655_v55 = vld [vmem:[#allocation2 + $0xb8] sm:$0xfc] }
 0x151   : > { %v3409_v18 = vpop.f32.mrf.mxu0 }
 0x152   : > { %v3410_v13 = vadd.f32 %v3409_v18, %v8184_v40  ;;  %v3637_v17 = vpop.f32.mrf.mxu3  ;;  %v8453_v18 = vsel %vm519_vm1, %v682_v54, %v686_v25  ;;  %v1576_v54 = vrot.slane %v1530_v6, 2  ;;  %v1577_v25 = vrot.slane %v1532_v21, 2 }
 0x153   : > { %v8443_v22 = vadd.f32 %v3637_v17, %v3561_v9  ;;  %v3486_v57 = vpop.f32.mrf.mxu1  ;;  %12171 = vst [vmem:[#allocation49_spill] sm:$0xff] %v8453_v18  ;;  %v1574_v9 = vrot.slane %v8441_v38, 2  ;;  %v1699_v17 = vrot.slane %v1655_v55, 2 }
 0x154   : > { %v3487_v28 = vadd.f32 %v3486_v57, %v3410_v13  ;;  %3704 = vmatmul.f32.gmra.mxu0 %v8435_v61  ;;  %3858 = vmatmul.f32.gmra.mxu2 %v8438_v26  ;;  %v1702_v57 = vrot.slane %v1656_v23, 2  ;;  %v1703_v26 = vrot.slane %v1658_v7, 2  ;;  %v8469_v48 = vsel %vm519_vm1, %v1576_v54, %v1577_v25  ;;  %v3131_v23 = vld [vmem:[%s7698_s25 + $0xb40] sm:$0xff] }
 0x155   : > { %v8460_v55 = vsel %vm519_vm1, %v1573_v3, %v1574_v9  ;;  %v8463_v36 = vsel %vm519_vm1, %v1699_v17, %v1700_v10  ;;  %12174 = vst [vmem:[#allocation52_spill] sm:$0xff] %v8469_v48  ;;  %v3035_v17 = vld [vmem:[%s7698_s25 + $0x840] sm:$0xff]  ;;  %4211 = vmatpush.msra.mxu3 %v3131_v23 }
 0x156   : > { %3781 = vmatmul.f32.gmra.mxu1 %v8446_v24  ;;  %12172 = vst [vmem:[#allocation50_spill] sm:$0xff] %v8460_v55  ;;  %v8475_v3 = vsel %vm519_vm1, %v1702_v57, %v1703_v26  ;;  %3980 = vmatpush.msra.mxu0 %v3035_v17  ;;  %v8483_v57 = vsel %vm519_vm1, %v1574_v9, %v1700_v10  ;;  %v1661_v17 = vld [vmem:[#allocation2 + $0x190] sm:$0xff]  ;;  %v3063_v61 = vld [vmem:[%s7698_s25 + $0x920] sm:$0xff] }
 0x157   : > { %3935 = vmatmul.f32.gmra.mxu3 %v8453_v18  ;;  %v3563_v13 = vpop.f32.mrf.mxu2  ;;  %12173 = vst [vmem:[#allocation51_spill] sm:$0xff] %v8463_v36  ;;  %v1659_v18 = vld [vmem:[#allocation2 + $0x50] sm:$0xff] }
 0x158   : > { %v3564_v5 = vadd.f32 %v3563_v13, %v3487_v28  ;;  %v3099_v28 = vld [vmem:[%s7698_s25 + $0xa40] sm:$0xff]  ;;  %12175 = vst [vmem:[#allocation53_spill] sm:$0xff] %v8475_v3  ;;  %v1705_v7 = vrot.slane %v1659_v18, 2  ;;  %v1660_v13 = vld [vmem:[#allocation2 + $0x168] sm:$0xff]  ;;  %v3097_v9 = vld [vmem:[%s7698_s25 + $0xa30] sm:$0xff] }
 0x159   : > { %v3412_v38 = vpop.f32.mrf.mxu0  ;;  %4134 = vmatpush.msra.mxu2 %v3099_v28  ;;  %12176 = vst [vmem:[#allocation54_spill] sm:$0xff] %v8483_v57 }
 0x15a   : > { %v3413_v46 = vadd.f32 %v3412_v38, %v8184_v40  ;;  %v3640_v50 = vpop.f32.mrf.mxu3  ;;  %v8486_v18 = vsel %vm519_vm1, %v1700_v10, %v1705_v7 }
 0x15b   : > { %v8466_v24 = vadd.f32 %v3640_v50, %v3564_v5  ;;  %v3489_v21 = vpop.f32.mrf.mxu1  ;;  %v3067_v5 = vld [vmem:[%s7698_s25 + $0x940] sm:$0xff]  ;;  %12177 = vst [vmem:[#allocation55_spill] sm:$0xff] %v8486_v18  ;;  %4135 = vmatpush.msra.mxu2 %v3097_v9 }
 0x15c   : > { %v3490_v6 = vadd.f32 %v3489_v21, %v3413_v46  ;;  %3707 = vmatmul.f32.gmra.mxu0 %v8460_v55  ;;  %3861 = vmatmul.f32.gmra.mxu2 %v8463_v36  ;;  %v1707_v46 = vrot.slane %v1660_v13, 2 }
 0x15d   : > { %4057 = vmatpush.msra.mxu1 %v3067_v5  ;;  %v1662_v5 = vld [vmem:[#allocation2 + $0x38] sm:$0xff] }
 0x15e   : > { %3784 = vmatmul.f32.gmra.mxu1 %v8469_v48  ;;  %v8497_v10 = vsel %vm519_vm1, %v1703_v26, %v1707_v46 }
 0x15f   : > { %3938 = vmatmul.f32.gmra.mxu3 %v8475_v3  ;;  %v3566_v54 = vpop.f32.mrf.mxu2  ;;  %12179 = vst [vmem:[#allocation57_spill] sm:$0xff] %v8497_v10 }
 0x160   : > { %v3567_v38 = vadd.f32 %v3566_v54, %v3490_v6  ;;  %v8492_v6 = vsel %vm519_vm1, %v1577_v25, %v1703_v26  ;;  %v1709_v54 = vrot.slane %v1661_v17, 2  ;;  %v3033_v25 = vld [vmem:[%s7698_s25 + $0x830] sm:$0xff] }
 0x161   : > { %v3415_v50 = vpop.f32.mrf.mxu0  ;;  %12178 = vst [vmem:[#allocation56_spill] sm:$0xff] %v8492_v6  ;;  %3981 = vmatpush.msra.mxu0 %v3033_v25  ;;  %v3095_v25 = vld [vmem:[%s7698_s25 + $0xa20] sm:$0xff] }
 0x162   : > { %v3416_v21 = vadd.f32 %v3415_v50, %v8184_v40  ;;  %v3643_v28 = vpop.f32.mrf.mxu3  ;;  %v3129_v50 = vld [vmem:[%s7698_s25 + $0xb30] sm:$0xff]  ;;  %v8506_v26 = vsel %vm519_vm1, %v1705_v7, %v1709_v54  ;;  %4136 = vmatpush.msra.mxu2 %v3095_v25 }
 0x163   : > { %v8489_v23 = vadd.f32 %v3643_v28, %v3567_v38  ;;  %v3492_v3 = vpop.f32.mrf.mxu1  ;;  %4212 = vmatpush.msra.mxu3 %v3129_v50  ;;  %v3065_v28 = vld [vmem:[%s7698_s25 + $0x930] sm:$0xff]  ;;  %12180 = vst [vmem:[#allocation58_spill] sm:$0xff] %v8506_v26 }
 0x164   : > { %v3493_v13 = vadd.f32 %v3492_v3, %v3416_v21  ;;  %3710 = vmatmul.f32.gmra.mxu0 %v8483_v57  ;;  %3864 = vmatmul.f32.gmra.mxu2 %v8486_v18  ;;  %v1711_v21 = vrot.slane %v1662_v5, 2 }
 0x165   : > { %4058 = vmatpush.msra.mxu1 %v3065_v28  ;;  %v3127_v28 = vld [vmem:[%s7698_s25 + $0xb20] sm:$0xff] }
 0x166   : > { %3787 = vmatmul.f32.gmra.mxu1 %v8492_v6  ;;  %v1663_v6 = vld [vmem:[#allocation2 + $0x60] sm:$0xff]  ;;  %v8514_v5 = vsel %vm519_vm1, %v1707_v46, %v1711_v21  ;;  %4213 = vmatpush.msra.mxu3 %v3127_v28 }
 0x167   : > { %3941 = vmatmul.f32.gmra.mxu3 %v8497_v10  ;;  %v3569_v38 = vpop.f32.mrf.mxu2  ;;  %12181 = vst [vmem:[#allocation59_spill] sm:$0xff] %v8514_v5  ;;  %v1713_v7 = vrot.slane %v1663_v6, 2  ;;  %4059 = vmatpush.msra.mxu1 %v3063_v61 }
 0x168   : > { %v3570_v3 = vadd.f32 %v3569_v38, %v3493_v13  ;;  %v1664_v38 = vld [vmem:[#allocation2 + $0x18] sm:$0xff] }
 0x169   : > { %v3418_v36 = vpop.f32.mrf.mxu0 }
 0x16a   : > { %v3419_v17 = vadd.f32 %v3418_v36, %v8184_v40  ;;  %v3646_v9 = vpop.f32.mrf.mxu3 }
 0x16b   : > { %v8509_v57 = vadd.f32 %v3646_v9, %v3570_v3  ;;  %v3495_v48 = vpop.f32.mrf.mxu1  ;;  %v1715_v3 = vrot.slane %v1664_v38, 2  ;;  %v8522_v9 = vsel %vm519_vm1, %v1709_v54, %v1713_v7 }
 0x16c   : > { %v3496_v13 = vadd.f32 %v3495_v48, %v3419_v17  ;;  %3713 = vmatmul.f32.gmra.mxu0 %v8486_v18  ;;  %3867 = vmatmul.f32.gmra.mxu2 %v8506_v26  ;;  %v3031_v48 = vld [vmem:[%s7698_s25 + $0x820] sm:$0xff]  ;;  %12182 = vst [vmem:[#allocation60_spill] sm:$0xff] %v8522_v9 }
 0x16d   : > { %3982 = vmatpush.msra.mxu0 %v3031_v48  ;;  %v8531_v38 = vsel %vm519_vm1, %v1711_v21, %v1715_v3 }
 0x16e   : > { %3790 = vmatmul.f32.gmra.mxu1 %v8497_v10  ;;  %v1665_v10 = vld [vmem:[#allocation2 + $0x158] sm:$0xff]  ;;  %12183 = vst [vmem:[#allocation61_spill] sm:$0xff] %v8531_v38 }
 0x16f   : > { %3944 = vmatmul.f32.gmra.mxu3 %v8514_v5  ;;  %v3572_v36 = vpop.f32.mrf.mxu2  ;;  %v1717_v54 = vrot.slane %v1665_v10, 2 }
 0x170   : > { %v3573_v50 = vadd.f32 %v3572_v36, %v3496_v13  ;;  %v1666_v36 = vld [vmem:[#allocation2 + $0x120] sm:$0xff] }
 0x171   : > { %v3421_v17 = vpop.f32.mrf.mxu0  ;;  %v1719_v48 = vrot.slane %v1666_v36, 2 }
 0x172   : > { %v3422_v46 = vadd.f32 %v3421_v17, %v8184_v40  ;;  %v3649_v6 = vpop.f32.mrf.mxu3  ;;  %v8537_v17 = vsel %vm519_vm1, %v1713_v7, %v1717_v54  ;;  %v3061_v7 = vld [vmem:[%s7698_s25 + $0x910] sm:$0xff] }
 0x173   : > { %v8525_v18 = vadd.f32 %v3649_v6, %v3573_v50  ;;  %v3498_v55 = vpop.f32.mrf.mxu1  ;;  %12184 = vst [vmem:[#allocation62_spill] sm:$0xff] %v8537_v17  ;;  %4060 = vmatpush.msra.mxu1 %v3061_v7  ;;  %v3027_v7 = vld [vmem:[%s7698_s25 + $0x800] sm:$0xff] }
 0x174   : > { %v3499_v13 = vadd.f32 %v3498_v55, %v3422_v46  ;;  %3716 = vmatmul.f32.gmra.mxu0 %v8506_v26  ;;  %3870 = vmatmul.f32.gmra.mxu2 %v8522_v9  ;;  %v3093_v55 = vld [vmem:[%s7698_s25 + $0xa10] sm:$0xff]  ;;  %v1667_v46 = vld [vmem:[#allocation2 + $0x198] sm:$0xff] }
 0x175   : > { %4137 = vmatpush.msra.mxu2 %v3093_v55  ;;  %v3125_v26 = vld [vmem:[%s7698_s25 + $0xb10] sm:$0xff]  ;;  %v1721_v36 = vrot.slane %v1667_v46, 2 }
 0x176   : > { %3793 = vmatmul.f32.gmra.mxu1 %v8514_v5  ;;  %v3029_v5 = vld [vmem:[%s7698_s25 + $0x810] sm:$0xff]  ;;  %4214 = vmatpush.msra.mxu3 %v3125_v26 }
 0x177   : > { %3947 = vmatmul.f32.gmra.mxu3 %v8531_v38  ;;  %v3575_v25 = vpop.f32.mrf.mxu2  ;;  %3983 = vmatpush.msra.mxu0 %v3029_v5 }
 0x178   : > { %v3576_v50 = vadd.f32 %v3575_v25, %v3499_v13  ;;  %v8547_v13 = vsel %vm519_vm1, %v1715_v3, %v1719_v48  ;;  %v1668_v25 = vld [vmem:[#allocation2 + $0x68] sm:$0xff]  ;;  %v8553_v3 = vsel %vm519_vm1, %v1717_v54, %v1721_v36  ;;  %v3123_v54 = vld [vmem:[%s7698_s25 + $0xb00] sm:$0xff] }
 0x179   : > { %v3424_v28 = vpop.f32.mrf.mxu0  ;;  %12185 = vst [vmem:[#allocation63_spill] sm:$0xff] %v8547_v13  ;;  %3984 = vmatpush.msra.mxu0 %v3027_v7  ;;  %4215 = vmatpush.msra.mxu3 %v3123_v54 }
 0x17a   : > { %v3425_v10 = vadd.f32 %v3424_v28, %v8184_v40  ;;  %v3652_v21 = vpop.f32.mrf.mxu3  ;;  %v1723_v28 = vrot.slane %v1668_v25, 2  ;;  %12186 = vst [vmem:[#allocation64_spill] sm:$0xff] %v8553_v3 }
 0x17b   : > { %v8540_v61 = vadd.f32 %v3652_v21, %v3576_v50  ;;  %v3501_v6 = vpop.f32.mrf.mxu1 }
 0x17c   : > { %v3502_v29 = vadd.f32 %v3501_v6, %v3425_v10  ;;  %3719 = vmatmul.f32.gmra.mxu0 %v8522_v9  ;;  %3873 = vmatmul.f32.gmra.mxu2 %v8537_v17  ;;  %v1669_v6 = vld [vmem:[#allocation2 + $0x30] sm:$0xff] }
 0x17d   : > { %v1725_v25 = vrot.slane %v1669_v6, 2  ;;  %v1671_v6 = vld [vmem:[#allocation2 + $0xf8] sm:$0xff] }
 0x17e   : > { %3796 = vmatmul.f32.gmra.mxu1 %v8531_v38  ;;  %v3091_v38 = vld [vmem:[%s7698_s25 + $0xa00] sm:$0xff] }
 0x17f   : > { %3950 = vmatmul.f32.gmra.mxu3 %v8547_v13  ;;  %v3578_v50 = vpop.f32.mrf.mxu2  ;;  %4138 = vmatpush.msra.mxu2 %v3091_v38 }
 0x180   : > { %v3579_v55 = vadd.f32 %v3578_v50, %v3502_v29  ;;  %v8562_v29 = vsel %vm519_vm1, %v1719_v48, %v1723_v28  ;;  %v1670_v50 = vld [vmem:[#allocation2 + $0xc8] sm:$0xff]  ;;  %v8570_v48 = vsel %vm519_vm1, %v1721_v36, %v1725_v25  ;;  %v8581_v36 = vrot.slane %v1671_v6, 2 }
 0x181   : > { %v3427_v10 = vpop.f32.mrf.mxu0  ;;  %12187 = vst [vmem:[#allocation65_spill] sm:$0xff] %v8562_v29 }
 0x182   : > { %v3428_v21 = vadd.f32 %v3427_v10, %v8184_v40  ;;  %v3655_v46 = vpop.f32.mrf.mxu3  ;;  %12188 = vst [vmem:[#allocation66_spill] sm:$0xff] %v8570_v48  ;;  %v8592_v6 = vsel %vm519_vm1, %v1725_v25, %v8581_v36 }
 0x183   : > { %v8556_v5 = vadd.f32 %v3655_v46, %v3579_v55  ;;  %v3504_v26 = vpop.f32.mrf.mxu1  ;;  %v3059_v55 = vld [vmem:[%s7698_s25 + $0x900] sm:$0xff]  ;;  %12190 = vst [vmem:[#allocation68_spill] sm:$0xff] %v8592_v6 }
 0x184   : > { %v3505_v9 = vadd.f32 %v3504_v26, %v3428_v21  ;;  %3722 = vmatmul.f32.gmra.mxu0 %v8537_v17  ;;  %3876 = vmatmul.f32.gmra.mxu2 %v8553_v3  ;;  %v1727_v21 = vrot.slane %v1670_v50, 2  ;;  %v3249_v50 = vld [vmem:[%s7698_s25 + $0xef0] sm:$0xff] }
 0x185   : > { %4061 = vmatpush.msra.mxu1 %v3059_v55  ;;  %4431 = vmatpush.msrb.mxu2 %v3249_v50  ;;  %v1673_v50 = vld [vmem:[#allocation2 + $0x8] sm:$0xff] }
 0x186   : > { %3799 = vmatmul.f32.gmra.mxu1 %v8547_v13  ;;  %v1733_v25 = vrot.slane %v1673_v50, 2 }
 0x187   : > { %3953 = vmatmul.f32.gmra.mxu3 %v8562_v29  ;;  %v3581_v40 = vpop.f32.mrf.mxu2 }
 0x188   : > { %v3582_v10 = vadd.f32 %v3581_v40, %v3505_v9  ;;  %v8578_v9 = vsel %vm519_vm1, %v1723_v28, %v1727_v21  ;;  %v1672_v40 = vld [vmem:[#allocation2 + $0x28] sm:$0xff]  ;;  %v3217_v28 = vld [vmem:[%s7698_s25 + $0xdf0] sm:$0xff] }
 0x189   : > { %v3678_v46 = vpop.f32.mrf.mxu0  ;;  %12189 = vst [vmem:[#allocation67_spill] sm:$0xff] %v8578_v9  ;;  %4354 = vmatpush.msrb.mxu1 %v3217_v28  ;;  %v3183_v28 = vld [vmem:[%s7698_s25 + $0xce0] sm:$0xff] }
 0x18a   : > { %v3658_v26 = vpop.f32.mrf.mxu3  ;;  %v3679_v38 = vadd.f32 %v3678_v46, %v8205_v0  ;;  %v3281_v46 = vld [vmem:[%s7698_s25 + $0xff0] sm:$0xff] }
 0x18b   : > { %v8573_v7 = vadd.f32 %v3658_v26, %v3582_v10  ;;  %v3755_v54 = vpop.f32.mrf.mxu1  ;;  %v3185_v10 = vld [vmem:[%s7698_s25 + $0xcf0] sm:$0xff]  ;;  %4508 = vmatpush.msrb.mxu3 %v3281_v46 }
 0x18c   : > { %3725 = vmatmul.f32.gmra.mxu0 %v8553_v3  ;;  %3879 = vmatmul.f32.gmra.mxu2 %v8570_v48  ;;  %v3756_v55 = vadd.f32 %v3755_v54, %v3679_v38  ;;  %v8587_v3 = vrot.slane %v1672_v40, 2 }
 0x18d   : > { %4277 = vmatpush.msrb.mxu0 %v3185_v10 }
 0x18e   : > { %3802 = vmatmul.f32.gmra.mxu1 %v8562_v29 }
 0x18f   : > { %3956 = vmatmul.f32.gmra.mxu3 %v8578_v9  ;;  %v3832_v0 = vpop.f32.mrf.mxu2  ;;  %4278 = vmatpush.msrb.mxu0 %v3183_v28 }
 0x190   : > { %v3833_v26 = vadd.f32 %v3832_v0, %v3756_v55  ;;  %v8601_v55 = vsel %vm519_vm1, %v1727_v21, %v8587_v3  ;;  %v1674_v0 = vld [vmem:[#allocation2 + $0x80] sm:$0xff]  ;;  %v8610_v21 = vsel %vm519_vm1, %v8581_v36, %v1733_v25 }
 0x191   : > { %v3681_v13 = vpop.f32.mrf.mxu0  ;;  %12191 = vst [vmem:[#allocation69_spill] sm:$0xff] %v8601_v55 }
 0x192   : > { %v3682_v38 = vadd.f32 %v3681_v13, %v8219_v33  ;;  %v3909_v54 = vpop.f32.mrf.mxu3  ;;  %v3247_v13 = vld [vmem:[%s7698_s25 + $0xee0] sm:$0xff]  ;;  %12192 = vst [vmem:[#allocation70_spill] sm:$0xff] %v8610_v21 }
 0x193   : > { %v8595_v29 = vadd.f32 %v3909_v54, %v3833_v26  ;;  %v3758_v40 = vpop.f32.mrf.mxu1  ;;  %v1735_v26 = vrot.slane %v1674_v0, 2  ;;  %4432 = vmatpush.msrb.mxu2 %v3247_v13  ;;  %v3279_v54 = vld [vmem:[%s7698_s25 + $0xfe0] sm:$0xff] }
 0x194   : > { %3728 = vmatmul.f32.gmra.mxu0 %v8570_v48  ;;  %3882 = vmatmul.f32.gmra.mxu2 %v8592_v6  ;;  %v3759_v10 = vadd.f32 %v3758_v40, %v3682_v38  ;;  %v1549_v40 = vld [vmem:[#allocation2 + $0x8] sm:$0x3] }
 0x195   : > { %4509 = vmatpush.msrb.mxu3 %v3279_v54  ;;  %v8620_v0 = vsel %vm519_vm1, %v8587_v3, %v1735_v26  ;;  %v1611_v13 = vrot.slane %v1549_v40, 2  ;;  %v728_v40 = vld [vmem:[#allocation2 + $0x10] sm:$0xf8] }
 0x196   : > { %3805 = vmatmul.f32.gmra.mxu1 %v8578_v9  ;;  %v1675_v9 = vld [vmem:[#allocation2 + $0x98] sm:$0x3]  ;;  %12193 = vst [vmem:[#allocation71_spill] sm:$0xff] %v8620_v0 }
 0x197   : > { %3959 = vmatmul.f32.gmra.mxu3 %v8601_v55  ;;  %v3835_v33 = vpop.f32.mrf.mxu2  ;;  %v1737_v28 = vrot.slane %v1675_v9, 2  ;;  %v8627_v63 = vsel %vm519_vm1, %v8581_v36, %v1611_v13  ;;  %v3181_v36 = vld [vmem:[%s7698_s25 + $0xcd0] sm:$0xff] }
 0x198   : > { %v3836_v46 = vadd.f32 %v3835_v33, %v3759_v10  ;;  %v3215_v10 = vld [vmem:[%s7698_s25 + $0xde0] sm:$0xff]  ;;  %12194 = vst [vmem:[#allocation72_spill] sm:$0xff] %v8627_v63  ;;  %v3277_v13 = vld [vmem:[%s7698_s25 + $0xfd0] sm:$0xff]  ;;  %4279 = vmatpush.msrb.mxu0 %v3181_v36 }
 0x199   : > { %v3684_v48 = vpop.f32.mrf.mxu0  ;;  %v1550_v33 = vld [vmem:[#allocation2 + $0x80] sm:$0x3]  ;;  %4355 = vmatpush.msrb.mxu1 %v3215_v10  ;;  %v8630_v9 = vsel %vm519_vm1, %v1733_v25, %v1737_v28  ;;  %v3213_v25 = vld [vmem:[%s7698_s25 + $0xdd0] sm:$0xff]  ;;  %v773_v28 = vrot.slane %v728_v40, 3  ;;  %4510 = vmatpush.msrb.mxu3 %v3277_v13 }
 0x19a   : > { %v3685_v38 = vadd.f32 %v3684_v48, %v8232_v35  ;;  %v3912_v50 = vpop.f32.mrf.mxu3  ;;  %v1676_v35 = vld [vmem:[#allocation2 + $0x150] sm:$0x3]  ;;  %v1613_v54 = vrot.slane %v1550_v33, 2  ;;  %12195 = vst [vmem:[#allocation73_spill] sm:$0xff] %v8630_v9  ;;  %v8633_v10 = vld [vmem:[#allocation2 + $0x160] sm:$0xff] }
 0x19b   : > { %v8613_v17 = vadd.f32 %v3912_v50, %v3836_v46  ;;  %v3761_v8 = vpop.f32.mrf.mxu1  ;;  %v855_v33 = vld [vmem:[#allocation2 + $0x10] sm:$0xf0]  ;;  %4356 = vmatpush.msrb.mxu1 %v3213_v25 }
 0x19c   : > { %3731 = vmatmul.f32.gmra.mxu0 %v8592_v6  ;;  %3885 = vmatmul.f32.gmra.mxu2 %v8610_v21  ;;  %v3762_v48 = vadd.f32 %v3761_v8, %v3685_v38  ;;  %v1739_v21 = vrot.slane %v1676_v35, 2  ;;  %v3245_v6 = vld [vmem:[%s7698_s25 + $0xed0] sm:$0xff] }
 0x19d   : > { %4433 = vmatpush.msrb.mxu2 %v3245_v6  ;;  %v8648_v6 = vld [vmem:[#allocation2 + $0x128] sm:$0xff] }
 0x19e   : > { %3808 = vmatmul.f32.gmra.mxu1 %v8601_v55  ;;  %v777_v40 = vrot.slane %v8648_v6, 3 }
 0x19f   : > { %3962 = vmatmul.f32.gmra.mxu3 %v8620_v0  ;;  %v3838_v46 = vpop.f32.mrf.mxu2 }
 0x1a0   : > { %v3839_v50 = vadd.f32 %v3838_v46, %v3762_v48  ;;  %v8639_v46 = vsel %vm519_vm1, %v8587_v3, %v1613_v54  ;;  %v901_v3 = vrot.slane %v8633_v10, 4  ;;  %v856_v54 = vld [vmem:[#allocation2 + $0x48] sm:$0xf0] }
 0x1a1   : > { %v3687_v56 = vpop.f32.mrf.mxu0  ;;  %12196 = vst [vmem:[#allocation74_spill] sm:$0xff] %v8639_v46 }
 0x1a2   : > { %v3688_v8 = vadd.f32 %v3687_v56, %v8253_v44  ;;  %v3915_v38 = vpop.f32.mrf.mxu3  ;;  %v8646_v44 = vsel %vm519_vm1, %v1735_v26, %v1739_v21  ;;  %v729_v56 = vld [vmem:[#allocation2 + $0x48] sm:$0xf8] }
 0x1a3   : > { %v8635_v48 = vadd.f32 %v3915_v38, %v3839_v50  ;;  %v3764_v35 = vpop.f32.mrf.mxu1  ;;  %12197 = vst [vmem:[#allocation75_spill] sm:$0xff] %v8646_v44  ;;  %v774_v50 = vrot.slane %v8633_v10, 3  ;;  %v900_v38 = vrot.slane %v855_v33, 4  ;;  %v776_v21 = vrot.slane %v729_v56, 3  ;;  %v732_v56 = vld [vmem:[#allocation2 + $0x40] sm:$0xff] }
 0x1a4   : > { %3734 = vmatmul.f32.gmra.mxu0 %v8627_v63  ;;  %3888 = vmatmul.f32.gmra.mxu2 %v8630_v9  ;;  %v3765_v0 = vadd.f32 %v3764_v35, %v3688_v8  ;;  %v903_v33 = vrot.slane %v856_v54, 4  ;;  %v904_v10 = vrot.slane %v8648_v6, 4  ;;  %v3243_v54 = vld [vmem:[%s7698_s25 + $0xec0] sm:$0xff] }
 0x1a5   : > { %v8658_v8 = vsel %vm772_vm2, %v773_v28, %v774_v50  ;;  %v8661_v35 = vsel %vm899_vm3, %v900_v38, %v901_v3  ;;  %v733_v28 = vld [vmem:[#allocation2 + $0x178] sm:$0xff]  ;;  %v3179_v38 = vld [vmem:[%s7698_s25 + $0xcc0] sm:$0xff]  ;;  %4434 = vmatpush.msrb.mxu2 %v3243_v54  ;;  %v734_v54 = vld [vmem:[#allocation2 + $0x108] sm:$0xff] }
 0x1a6   : > { %3811 = vmatmul.f32.gmra.mxu1 %v8639_v46  ;;  %12198 = vst [vmem:[#allocation76_spill] sm:$0xff] %v8658_v8  ;;  %v8673_v6 = vsel %vm899_vm3, %v903_v33, %v904_v10  ;;  %4280 = vmatpush.msrb.mxu0 %v3179_v38  ;;  %v908_v33 = vrot.slane %v733_v28, 4 }
 0x1a7   : > { %3965 = vmatmul.f32.gmra.mxu3 %v8646_v44  ;;  %v3841_v26 = vpop.f32.mrf.mxu2  ;;  %12199 = vst [vmem:[#allocation77_spill] sm:$0xff] %v8661_v35 }
 0x1a8   : > { %v3842_v9 = vadd.f32 %v3841_v26, %v3765_v0  ;;  %v8667_v0 = vsel %vm772_vm2, %v776_v21, %v777_v40  ;;  %12201 = vst [vmem:[#allocation79_spill] sm:$0xff] %v8673_v6  ;;  %v779_v26 = vrot.slane %v732_v56, 3  ;;  %v781_v21 = vrot.slane %v733_v28, 3 }
 0x1a9   : > { %v3690_v36 = vpop.f32.mrf.mxu0  ;;  %12200 = vst [vmem:[#allocation78_spill] sm:$0xff] %v8667_v0 }
 0x1aa   : > { %v3691_v13 = vadd.f32 %v3690_v36, %v8278_v49  ;;  %v3918_v44 = vpop.f32.mrf.mxu3  ;;  %v3275_v49 = vld [vmem:[%s7698_s25 + $0xfc0] sm:$0xff]  ;;  %v906_v36 = vrot.slane %v732_v56, 4  ;;  %v8681_v55 = vsel %vm772_vm2, %v774_v50, %v779_v26  ;;  %v8695_v50 = vsel %vm899_vm3, %v904_v10, %v908_v33  ;;  %v3209_v10 = vld [vmem:[%s7698_s25 + $0xdb0] sm:$0xff] }
 0x1ab   : > { %v8664_v46 = vadd.f32 %v3918_v44, %v3842_v9  ;;  %v3767_v25 = vpop.f32.mrf.mxu1  ;;  %4511 = vmatpush.msrb.mxu3 %v3275_v49  ;;  %12202 = vst [vmem:[#allocation80_spill] sm:$0xff] %v8681_v55 }
 0x1ac   : > { %3985 = vmatmul.f32.vlgmr.msra.gmra.mxu0 %v8658_v8  ;;  %4139 = vmatmul.f32.vlgmr.msra.gmra.mxu2 %v8661_v35  ;;  %v3768_v9 = vadd.f32 %v3767_v25, %v3691_v13  ;;  %v3211_v8 = vld [vmem:[%s7698_s25 + $0xdc0] sm:$0xff]  ;;  %v8684_v56 = vsel %vm899_vm3, %v901_v3, %v906_v36  ;;  %12205 = vst [vmem:[#allocation83_spill] sm:$0xff] %v8695_v50  ;;  %v735_v3 = vld [vmem:[#allocation2 + $0x110] sm:$0xff] }
 0x1ad   : > { %4357 = vmatpush.msrb.mxu1 %v3211_v8  ;;  %12203 = vst [vmem:[#allocation81_spill] sm:$0xff] %v8684_v56  ;;  %v910_v8 = vrot.slane %v734_v54, 4  ;;  %v785_v28 = vrot.slane %v735_v3, 3 }
 0x1ae   : > { %4062 = vmatmul.f32.vlgmr.msra.gmra.mxu1 %v8667_v0 }
 0x1af   : > { %4216 = vmatmul.f32.vlgmr.msra.gmra.mxu3 %v8673_v6  ;;  %v3844_v44 = vpop.f32.mrf.mxu2  ;;  %4358 = vmatpush.msrb.mxu1 %v3209_v10 }
 0x1b0   : > { %v3845_v35 = vadd.f32 %v3844_v44, %v3768_v9  ;;  %v8690_v9 = vsel %vm772_vm2, %v777_v40, %v781_v21  ;;  %v3177_v44 = vld [vmem:[%s7698_s25 + $0xcb0] sm:$0xff] }
 0x1b1   : > { %v3693_v63 = vpop.f32.mrf.mxu0  ;;  %12204 = vst [vmem:[#allocation82_spill] sm:$0xff] %v8690_v9  ;;  %4281 = vmatpush.msrb.mxu0 %v3177_v44  ;;  %v3239_v44 = vld [vmem:[%s7698_s25 + $0xea0] sm:$0xff] }
 0x1b2   : > { %v3694_v13 = vadd.f32 %v3693_v63, %v8300_v2  ;;  %v3921_v25 = vpop.f32.mrf.mxu3  ;;  %v3241_v63 = vld [vmem:[%s7698_s25 + $0xeb0] sm:$0xff]  ;;  %v783_v2 = vrot.slane %v734_v54, 3  ;;  %v8707_v54 = vsel %vm899_vm3, %v906_v36, %v910_v8  ;;  %v737_v36 = vld [vmem:[#allocation2 + $0x118] sm:$0xff] }
 0x1b3   : > { %v8687_v38 = vadd.f32 %v3921_v25, %v3845_v35  ;;  %v3770_v49 = vpop.f32.mrf.mxu1  ;;  %4435 = vmatpush.msrb.mxu2 %v3241_v63  ;;  %v3273_v25 = vld [vmem:[%s7698_s25 + $0xfb0] sm:$0xff]  ;;  %12207 = vst [vmem:[#allocation85_spill] sm:$0xff] %v8707_v54  ;;  %v916_v10 = vrot.slane %v737_v36, 4 }
 0x1b4   : > { %3988 = vmatmul.f32.gmra.mxu0 %v8681_v55  ;;  %4142 = vmatmul.f32.gmra.mxu2 %v8684_v56  ;;  %v3771_v35 = vadd.f32 %v3770_v49, %v3694_v13  ;;  %v912_v56 = vrot.slane %v735_v3, 4  ;;  %v8704_v0 = vsel %vm772_vm2, %v779_v26, %v783_v2  ;;  %v736_v63 = vld [vmem:[#allocation2 + $0x90] sm:$0xff]  ;;  %v8713_v3 = vsel %vm772_vm2, %v781_v21, %v785_v28 }
 0x1b5   : > { %4512 = vmatpush.msrb.mxu3 %v3273_v25  ;;  %12206 = vst [vmem:[#allocation84_spill] sm:$0xff] %v8704_v0  ;;  %v789_v21 = vrot.slane %v737_v36, 3  ;;  %4436 = vmatpush.msrb.mxu2 %v3239_v44 }
 0x1b6   : > { %4065 = vmatmul.f32.gmra.mxu1 %v8690_v9  ;;  %12208 = vst [vmem:[#allocation86_spill] sm:$0xff] %v8713_v3  ;;  %v8718_v26 = vsel %vm899_vm3, %v908_v33, %v912_v56 }
 0x1b7   : > { %4219 = vmatmul.f32.gmra.mxu3 %v8695_v50  ;;  %v3847_v40 = vpop.f32.mrf.mxu2  ;;  %12209 = vst [vmem:[#allocation87_spill] sm:$0xff] %v8718_v26  ;;  %v8735_v36 = vsel %vm772_vm2, %v785_v28, %v789_v21 }
 0x1b8   : > { %v3848_v6 = vadd.f32 %v3847_v40, %v3771_v35  ;;  %12212 = vst [vmem:[#allocation90_spill] sm:$0xff] %v8735_v36 }
 0x1b9   : > { %v3696_v55 = vpop.f32.mrf.mxu0 }
 0x1ba   : > { %v3697_v13 = vadd.f32 %v3696_v55, %v8318_v12  ;;  %v3924_v49 = vpop.f32.mrf.mxu3  ;;  %v787_v12 = vrot.slane %v736_v63, 3  ;;  %v914_v55 = vrot.slane %v736_v63, 4 }
 0x1bb   : > { %v8710_v50 = vadd.f32 %v3924_v49, %v3848_v6  ;;  %v3773_v35 = vpop.f32.mrf.mxu1  ;;  %v3175_v49 = vld [vmem:[%s7698_s25 + $0xca0] sm:$0xff] }
 0x1bc   : > { %3991 = vmatmul.f32.gmra.mxu0 %v8704_v0  ;;  %4145 = vmatmul.f32.gmra.mxu2 %v8707_v54  ;;  %v3774_v40 = vadd.f32 %v3773_v35, %v3697_v13  ;;  %v3271_v54 = vld [vmem:[%s7698_s25 + $0xfa0] sm:$0xff]  ;;  %v8726_v33 = vsel %vm772_vm2, %v783_v2, %v787_v12  ;;  %v8729_v63 = vsel %vm899_vm3, %v910_v8, %v914_v55 }
 0x1bd   : > { %12210 = vst [vmem:[#allocation88_spill] sm:$0xff] %v8726_v33  ;;  %4282 = vmatpush.msrb.mxu0 %v3175_v49  ;;  %4513 = vmatpush.msrb.mxu3 %v3271_v54  ;;  %v8741_v2 = vsel %vm899_vm3, %v912_v56, %v916_v10  ;;  %v739_v8 = vld [vmem:[#allocation2 + $0x100] sm:$0xff] }
 0x1be   : > { %4068 = vmatmul.f32.gmra.mxu1 %v8713_v3  ;;  %12211 = vst [vmem:[#allocation89_spill] sm:$0xff] %v8729_v63  ;;  %v793_v44 = vrot.slane %v739_v8, 3  ;;  %v920_v49 = vrot.slane %v739_v8, 4  ;;  %v3173_v8 = vld [vmem:[%s7698_s25 + $0xc90] sm:$0xff] }
 0x1bf   : > { %4222 = vmatmul.f32.gmra.mxu3 %v8718_v26  ;;  %v3850_v6 = vpop.f32.mrf.mxu2  ;;  %v738_v26 = vld [vmem:[#allocation2 + $0x148] sm:$0xff]  ;;  %12213 = vst [vmem:[#allocation91_spill] sm:$0xff] %v8741_v2  ;;  %4283 = vmatpush.msrb.mxu0 %v3173_v8  ;;  %v742_v8 = vld [vmem:[#allocation2 + $0x180] sm:$0xff] }
 0x1c0   : > { %v3851_v25 = vadd.f32 %v3850_v6, %v3774_v40  ;;  %v3207_v6 = vld [vmem:[%s7698_s25 + $0xda0] sm:$0xff]  ;;  %v791_v54 = vrot.slane %v738_v26, 3 }
 0x1c1   : > { %v3699_v0 = vpop.f32.mrf.mxu0  ;;  %4359 = vmatpush.msrb.mxu1 %v3207_v6  ;;  %v740_v6 = vld [vmem:[#allocation2 + $0x58] sm:$0xff] }
 0x1c2   : > { %v3700_v13 = vadd.f32 %v3699_v0, %v8335_v31  ;;  %v3927_v35 = vpop.f32.mrf.mxu3  ;;  %v918_v31 = vrot.slane %v738_v26, 4  ;;  %v8747_v56 = vsel %vm772_vm2, %v787_v12, %v791_v54  ;;  %v8763_v12 = vsel %vm899_vm3, %v916_v10, %v920_v49 }
 0x1c3   : > { %v8732_v3 = vadd.f32 %v3927_v35, %v3851_v25  ;;  %v3776_v40 = vpop.f32.mrf.mxu1  ;;  %v3237_v35 = vld [vmem:[%s7698_s25 + $0xe90] sm:$0xff]  ;;  %12214 = vst [vmem:[#allocation92_spill] sm:$0xff] %v8747_v56 }
 0x1c4   : > { %3994 = vmatmul.f32.gmra.mxu0 %v8726_v33  ;;  %4148 = vmatmul.f32.gmra.mxu2 %v8729_v63  ;;  %v3777_v0 = vadd.f32 %v3776_v40, %v3700_v13  ;;  %v8750_v26 = vsel %vm899_vm3, %v914_v55, %v918_v31  ;;  %12217 = vst [vmem:[#allocation95_spill] sm:$0xff] %v8763_v12  ;;  %v741_v55 = vld [vmem:[#allocation2 + $0xd8] sm:$0xff] }
 0x1c5   : > { %12215 = vst [vmem:[#allocation93_spill] sm:$0xff] %v8750_v26  ;;  %4437 = vmatpush.msrb.mxu2 %v3237_v35  ;;  %v3205_v35 = vld [vmem:[%s7698_s25 + $0xd90] sm:$0xff] }
 0x1c6   : > { %4071 = vmatmul.f32.gmra.mxu1 %v8735_v36 }
 0x1c7   : > { %4225 = vmatmul.f32.gmra.mxu3 %v8741_v2  ;;  %v3853_v28 = vpop.f32.mrf.mxu2  ;;  %4360 = vmatpush.msrb.mxu1 %v3205_v35 }
 0x1c8   : > { %v3854_v25 = vadd.f32 %v3853_v28, %v3777_v0  ;;  %v8756_v0 = vsel %vm772_vm2, %v789_v21, %v793_v44  ;;  %v3269_v28 = vld [vmem:[%s7698_s25 + $0xf90] sm:$0xff] }
 0x1c9   : > { %v3702_v63 = vpop.f32.mrf.mxu0  ;;  %12216 = vst [vmem:[#allocation94_spill] sm:$0xff] %v8756_v0  ;;  %4514 = vmatpush.msrb.mxu3 %v3269_v28 }
 0x1ca   : > { %v3703_v13 = vadd.f32 %v3702_v63, %v8353_v52  ;;  %v3930_v40 = vpop.f32.mrf.mxu3  ;;  %v795_v52 = vrot.slane %v740_v6, 3  ;;  %v922_v63 = vrot.slane %v740_v6, 4 }
 0x1cb   : > { %v8753_v2 = vadd.f32 %v3930_v40, %v3854_v25  ;;  %v3779_v36 = vpop.f32.mrf.mxu1  ;;  %v797_v40 = vrot.slane %v741_v55, 3 }
 0x1cc   : > { %3997 = vmatmul.f32.gmra.mxu0 %v8747_v56  ;;  %4151 = vmatmul.f32.gmra.mxu2 %v8750_v26  ;;  %v3780_v25 = vadd.f32 %v3779_v36, %v3703_v13  ;;  %v924_v26 = vrot.slane %v741_v55, 4  ;;  %v8769_v33 = vsel %vm772_vm2, %v791_v54, %v795_v52  ;;  %v8772_v6 = vsel %vm899_vm3, %v918_v31, %v922_v63  ;;  %v743_v31 = vld [vmem:[#allocation2 + $0x130] sm:$0xff]  ;;  %v3171_v55 = vld [vmem:[%s7698_s25 + $0xc80] sm:$0xff] }
 0x1cd   : > { %12218 = vst [vmem:[#allocation96_spill] sm:$0xff] %v8769_v33  ;;  %v8778_v35 = vsel %vm772_vm2, %v793_v44, %v797_v40  ;;  %4284 = vmatpush.msrb.mxu0 %v3171_v55 }
 0x1ce   : > { %4074 = vmatmul.f32.gmra.mxu1 %v8756_v0  ;;  %12219 = vst [vmem:[#allocation97_spill] sm:$0xff] %v8772_v6  ;;  %v8784_v54 = vsel %vm899_vm3, %v920_v49, %v924_v26  ;;  %v928_v49 = vrot.slane %v743_v31, 4 }
 0x1cf   : > { %4228 = vmatmul.f32.gmra.mxu3 %v8763_v12  ;;  %v3856_v21 = vpop.f32.mrf.mxu2  ;;  %12220 = vst [vmem:[#allocation98_spill] sm:$0xff] %v8778_v35 }
 0x1d0   : > { %v3857_v56 = vadd.f32 %v3856_v21, %v3780_v25  ;;  %v3235_v25 = vld [vmem:[%s7698_s25 + $0xe80] sm:$0xff]  ;;  %12221 = vst [vmem:[#allocation99_spill] sm:$0xff] %v8784_v54  ;;  %v799_v21 = vrot.slane %v742_v8, 3 }
 0x1d1   : > { %v3705_v10 = vpop.f32.mrf.mxu0  ;;  %4438 = vmatpush.msrb.mxu2 %v3235_v25  ;;  %v744_v25 = vld [vmem:[#allocation2 + $0x138] sm:$0xff] }
 0x1d2   : > { %v3706_v36 = vadd.f32 %v3705_v10, %v8377_v42  ;;  %v3933_v13 = vpop.f32.mrf.mxu3  ;;  %v3267_v42 = vld [vmem:[%s7698_s25 + $0xf80] sm:$0xff]  ;;  %v926_v10 = vrot.slane %v742_v8, 4  ;;  %v8792_v9 = vsel %vm772_vm2, %v795_v52, %v799_v21  ;;  %v745_v52 = vld [vmem:[#allocation2 + $0x78] sm:$0xff] }
 0x1d3   : > { %v8775_v28 = vadd.f32 %v3933_v13, %v3857_v56  ;;  %v3782_v12 = vpop.f32.mrf.mxu1  ;;  %4515 = vmatpush.msrb.mxu3 %v3267_v42  ;;  %v801_v13 = vrot.slane %v743_v31, 3  ;;  %12222 = vst [vmem:[#allocation100_spill] sm:$0xff] %v8792_v9  ;;  %v805_v31 = vrot.slane %v745_v52, 3 }
 0x1d4   : > { %4000 = vmatmul.f32.gmra.mxu0 %v8769_v33  ;;  %4154 = vmatmul.f32.gmra.mxu2 %v8772_v6  ;;  %v3783_v56 = vadd.f32 %v3782_v12, %v3706_v36  ;;  %v3203_v33 = vld [vmem:[%s7698_s25 + $0xd80] sm:$0xff]  ;;  %v8795_v8 = vsel %vm899_vm3, %v922_v63, %v926_v10  ;;  %v930_v63 = vrot.slane %v744_v25, 4 }
 0x1d5   : > { %4361 = vmatpush.msrb.mxu1 %v3203_v33  ;;  %12223 = vst [vmem:[#allocation101_spill] sm:$0xff] %v8795_v8  ;;  %v8806_v33 = vsel %vm899_vm3, %v924_v26, %v928_v49  ;;  %v3201_v26 = vld [vmem:[%s7698_s25 + $0xd70] sm:$0xff] }
 0x1d6   : > { %4077 = vmatmul.f32.gmra.mxu1 %v8778_v35  ;;  %12225 = vst [vmem:[#allocation103_spill] sm:$0xff] %v8806_v33 }
 0x1d7   : > { %4231 = vmatmul.f32.gmra.mxu3 %v8784_v54  ;;  %v3859_v44 = vpop.f32.mrf.mxu2  ;;  %4362 = vmatpush.msrb.mxu1 %v3201_v26 }
 0x1d8   : > { %v3860_v6 = vadd.f32 %v3859_v44, %v3783_v56  ;;  %v8801_v56 = vsel %vm772_vm2, %v797_v40, %v801_v13  ;;  %v3169_v44 = vld [vmem:[%s7698_s25 + $0xc70] sm:$0xff] }
 0x1d9   : > { %v3708_v0 = vpop.f32.mrf.mxu0  ;;  %12224 = vst [vmem:[#allocation102_spill] sm:$0xff] %v8801_v56  ;;  %4285 = vmatpush.msrb.mxu0 %v3169_v44  ;;  %v3231_v44 = vld [vmem:[%s7698_s25 + $0xe60] sm:$0xff] }
 0x1da   : > { %v3709_v12 = vadd.f32 %v3708_v0, %v8398_v58  ;;  %v3936_v36 = vpop.f32.mrf.mxu3  ;;  %v3233_v58 = vld [vmem:[%s7698_s25 + $0xe70] sm:$0xff]  ;;  %v803_v0 = vrot.slane %v744_v25, 3  ;;  %v8818_v25 = vsel %vm899_vm3, %v926_v10, %v930_v63  ;;  %v747_v10 = vld [vmem:[#allocation2] sm:$0xff] }
 0x1db   : > { %v8798_v55 = vadd.f32 %v3936_v36, %v3860_v6  ;;  %v3785_v42 = vpop.f32.mrf.mxu1  ;;  %4439 = vmatpush.msrb.mxu2 %v3233_v58  ;;  %v3265_v36 = vld [vmem:[%s7698_s25 + $0xf70] sm:$0xff]  ;;  %12227 = vst [vmem:[#allocation105_spill] sm:$0xff] %v8818_v25  ;;  %v746_v58 = vld [vmem:[#allocation2 + $0xa0] sm:$0xff]  ;;  %v936_v26 = vrot.slane %v747_v10, 4 }
 0x1dc   : > { %4003 = vmatmul.f32.gmra.mxu0 %v8792_v9  ;;  %4157 = vmatmul.f32.gmra.mxu2 %v8795_v8  ;;  %v3786_v6 = vadd.f32 %v3785_v42, %v3709_v12  ;;  %v932_v8 = vrot.slane %v745_v52, 4  ;;  %v8815_v35 = vsel %vm772_vm2, %v799_v21, %v803_v0  ;;  %v8824_v52 = vsel %vm772_vm2, %v801_v13, %v805_v31 }
 0x1dd   : > { %4516 = vmatpush.msrb.mxu3 %v3265_v36  ;;  %12226 = vst [vmem:[#allocation104_spill] sm:$0xff] %v8815_v35  ;;  %v809_v13 = vrot.slane %v747_v10, 3  ;;  %4440 = vmatpush.msrb.mxu2 %v3231_v44  ;;  %v3199_v44 = vld [vmem:[%s7698_s25 + $0xd60] sm:$0xff] }
 0x1de   : > { %4080 = vmatmul.f32.gmra.mxu1 %v8801_v56  ;;  %12228 = vst [vmem:[#allocation106_spill] sm:$0xff] %v8824_v52  ;;  %v8829_v21 = vsel %vm899_vm3, %v928_v49, %v932_v8 }
 0x1df   : > { %4234 = vmatmul.f32.gmra.mxu3 %v8806_v33  ;;  %v3862_v40 = vpop.f32.mrf.mxu2  ;;  %12229 = vst [vmem:[#allocation107_spill] sm:$0xff] %v8829_v21  ;;  %4363 = vmatpush.msrb.mxu1 %v3199_v44  ;;  %v8864_v44 = vld [vmem:[#allocation2 + $0xc0] sm:$0xff] }
 0x1e0   : > { %v3863_v54 = vadd.f32 %v3862_v40, %v3786_v6 }
 0x1e1   : > { %v3711_v9 = vpop.f32.mrf.mxu0 }
 0x1e2   : > { %v3712_v12 = vadd.f32 %v3711_v9, %v8419_v4  ;;  %v3939_v42 = vpop.f32.mrf.mxu3  ;;  %v807_v4 = vrot.slane %v746_v58, 3  ;;  %v934_v9 = vrot.slane %v746_v58, 4 }
 0x1e3   : > { %v8821_v33 = vadd.f32 %v3939_v42, %v3863_v54  ;;  %v3788_v6 = vpop.f32.mrf.mxu1  ;;  %v3167_v42 = vld [vmem:[%s7698_s25 + $0xc60] sm:$0xff] }
 0x1e4   : > { %4006 = vmatmul.f32.gmra.mxu0 %v8815_v35  ;;  %4160 = vmatmul.f32.gmra.mxu2 %v8818_v25  ;;  %v3789_v40 = vadd.f32 %v3788_v6, %v3712_v12  ;;  %v3263_v25 = vld [vmem:[%s7698_s25 + $0xf60] sm:$0xff]  ;;  %v8837_v49 = vsel %vm772_vm2, %v803_v0, %v807_v4  ;;  %v8840_v58 = vsel %vm899_vm3, %v930_v63, %v934_v9 }
 0x1e5   : > { %12230 = vst [vmem:[#allocation108_spill] sm:$0xff] %v8837_v49  ;;  %4286 = vmatpush.msrb.mxu0 %v3167_v42  ;;  %4517 = vmatpush.msrb.mxu3 %v3263_v25  ;;  %v8852_v0 = vsel %vm899_vm3, %v932_v8, %v936_v26  ;;  %v749_v63 = vld [vmem:[#allocation2 + $0xe0] sm:$0x7] }
 0x1e6   : > { %4083 = vmatmul.f32.gmra.mxu1 %v8824_v52  ;;  %12231 = vst [vmem:[#allocation109_spill] sm:$0xff] %v8840_v58  ;;  %v875_v52 = vld [vmem:[#allocation2 + $0x20] sm:$0xf]  ;;  %v813_v42 = vrot.slane %v749_v63, 3  ;;  %v1907_v63 = vld [vmem:[#allocation2 + $0xb8] sm:$0xf0] }
 0x1e7   : > { %4237 = vmatmul.f32.gmra.mxu3 %v8829_v21  ;;  %v3865_v54 = vpop.f32.mrf.mxu2  ;;  %v748_v21 = vld [vmem:[#allocation2 + $0x20] sm:$0x7]  ;;  %12233 = vst [vmem:[#allocation111_spill] sm:$0xff] %v8852_v0 }
 0x1e8   : > { %v3866_v36 = vadd.f32 %v3865_v54, %v3789_v40  ;;  %v8846_v54 = vsel %vm772_vm2, %v805_v31, %v809_v13  ;;  %v876_v25 = vld [vmem:[#allocation2 + $0xe0] sm:$0xf] }
 0x1e9   : > { %v3714_v35 = vpop.f32.mrf.mxu0  ;;  %12232 = vst [vmem:[#allocation110_spill] sm:$0xff] %v8846_v54 }
 0x1ea   : > { %v3715_v12 = vadd.f32 %v3714_v35, %v8443_v22  ;;  %v3942_v6 = vpop.f32.mrf.mxu3  ;;  %v811_v22 = vrot.slane %v748_v21, 3  ;;  %v938_v35 = vrot.slane %v875_v52, 4 }
 0x1eb   : > { %v8843_v40 = vadd.f32 %v3942_v6, %v3866_v36  ;;  %v3791_v10 = vpop.f32.mrf.mxu1 }
 0x1ec   : > { %4009 = vmatmul.f32.gmra.mxu0 %v8837_v49  ;;  %4163 = vmatmul.f32.gmra.mxu2 %v8840_v58  ;;  %v3792_v36 = vadd.f32 %v3791_v10, %v3715_v12  ;;  %v940_v49 = vrot.slane %v876_v25, 4  ;;  %v3229_v58 = vld [vmem:[%s7698_s25 + $0xe50] sm:$0xff]  ;;  %v8858_v8 = vsel %vm772_vm2, %v807_v4, %v811_v22  ;;  %v8861_v52 = vsel %vm899_vm3, %v934_v9, %v938_v35  ;;  %v1781_v10 = vld [vmem:[#allocation2 + $0xb8] sm:$0xf8] }
 0x1ed   : > { %12234 = vst [vmem:[#allocation112_spill] sm:$0xff] %v8858_v8  ;;  %4441 = vmatpush.msrb.mxu2 %v3229_v58  ;;  %v3165_v4 = vld [vmem:[%s7698_s25 + $0xc50] sm:$0xff]  ;;  %v1825_v35 = vrot.slane %v1781_v10, 3 }
 0x1ee   : > { %4086 = vmatmul.f32.gmra.mxu1 %v8846_v54  ;;  %12235 = vst [vmem:[#allocation113_spill] sm:$0xff] %v8861_v52  ;;  %v3261_v22 = vld [vmem:[%s7698_s25 + $0xf50] sm:$0xff]  ;;  %v8876_v9 = vsel %vm899_vm3, %v936_v26, %v940_v49  ;;  %4287 = vmatpush.msrb.mxu0 %v3165_v4 }
 0x1ef   : > { %4240 = vmatmul.f32.gmra.mxu3 %v8852_v0  ;;  %v3868_v31 = vpop.f32.mrf.mxu2  ;;  %12237 = vst [vmem:[#allocation115_spill] sm:$0xff] %v8876_v9  ;;  %v3197_v58 = vld [vmem:[%s7698_s25 + $0xd50] sm:$0xff]  ;;  %v1952_v0 = vrot.slane %v8864_v44, 4 }
 0x1f0   : > { %v3869_v6 = vadd.f32 %v3868_v31, %v3792_v36  ;;  %v8869_v31 = vsel %vm772_vm2, %v809_v13, %v813_v42  ;;  %v1908_v13 = vld [vmem:[#allocation2 + $0x170] sm:$0xf0]  ;;  %4518 = vmatpush.msrb.mxu3 %v3261_v22  ;;  %4364 = vmatpush.msrb.mxu1 %v3197_v58  ;;  %v3227_v58 = vld [vmem:[%s7698_s25 + $0xe40] sm:$0xff] }
 0x1f1   : > { %v3717_v56 = vpop.f32.mrf.mxu0  ;;  %12236 = vst [vmem:[#allocation114_spill] sm:$0xff] %v8869_v31  ;;  %v1954_v10 = vrot.slane %v1908_v13, 4  ;;  %v1785_v22 = vld [vmem:[#allocation2 + $0x50] sm:$0xff]  ;;  %4442 = vmatpush.msrb.mxu2 %v3227_v58 }
 0x1f2   : > { %v3718_v21 = vadd.f32 %v3717_v56, %v8466_v24  ;;  %v3945_v12 = vpop.f32.mrf.mxu3  ;;  %v1782_v24 = vld [vmem:[#allocation2 + $0x170] sm:$0xf8]  ;;  %v1784_v56 = vld [vmem:[#allocation2 + $0x140] sm:$0xff]  ;;  %v1831_v13 = vrot.slane %v1785_v22, 3 }
 0x1f3   : > { %v8866_v36 = vadd.f32 %v3945_v12, %v3869_v6  ;;  %v3794_v25 = vpop.f32.mrf.mxu1  ;;  %v1826_v6 = vrot.slane %v8864_v44, 3  ;;  %v1951_v12 = vrot.slane %v1907_v63, 4  ;;  %v1828_v26 = vrot.slane %v1782_v24, 3  ;;  %v1787_v58 = vld [vmem:[#allocation2 + $0x190] sm:$0xff] }
 0x1f4   : > { %4012 = vmatmul.f32.gmra.mxu0 %v8858_v8  ;;  %4166 = vmatmul.f32.gmra.mxu2 %v8861_v52  ;;  %v3795_v42 = vadd.f32 %v3794_v25, %v3718_v21  ;;  %v1829_v49 = vrot.slane %v1784_v56, 3  ;;  %v1955_v54 = vrot.slane %v1784_v56, 4 }
 0x1f5   : > { %v8884_v44 = vsel %vm772_vm2, %v1825_v35, %v1826_v6  ;;  %v8887_v21 = vsel %vm899_vm3, %v1951_v12, %v1952_v0  ;;  %v1786_v35 = vld [vmem:[#allocation2 + $0x168] sm:$0xff]  ;;  %v3163_v12 = vld [vmem:[%s7698_s25 + $0xc40] sm:$0xff] }
 0x1f6   : > { %4089 = vmatmul.f32.gmra.mxu1 %v8869_v31  ;;  %12238 = vst [vmem:[#allocation116_spill] sm:$0xff] %v8884_v44  ;;  %v8899_v56 = vsel %vm899_vm3, %v1954_v10, %v1955_v54  ;;  %4288 = vmatpush.msrb.mxu0 %v3163_v12  ;;  %v1959_v10 = vrot.slane %v1786_v35, 4  ;;  %v8907_v31 = vsel %vm772_vm2, %v1826_v6, %v1831_v13 }
 0x1f7   : > { %4243 = vmatmul.f32.gmra.mxu3 %v8876_v9  ;;  %v3871_v52 = vpop.f32.mrf.mxu2  ;;  %12239 = vst [vmem:[#allocation117_spill] sm:$0xff] %v8887_v21 }
 0x1f8   : > { %v3872_v8 = vadd.f32 %v3871_v52, %v3795_v42  ;;  %v8893_v52 = vsel %vm772_vm2, %v1828_v26, %v1829_v49  ;;  %12241 = vst [vmem:[#allocation119_spill] sm:$0xff] %v8899_v56  ;;  %v1957_v42 = vrot.slane %v1785_v22, 4  ;;  %v8921_v6 = vsel %vm899_vm3, %v1955_v54, %v1959_v10  ;;  %v3193_v54 = vld [vmem:[%s7698_s25 + $0xd30] sm:$0xff] }
 0x1f9   : > { %v3720_v63 = vpop.f32.mrf.mxu0  ;;  %12240 = vst [vmem:[#allocation118_spill] sm:$0xff] %v8893_v52 }
 0x1fa   : > { %v3721_v25 = vadd.f32 %v3720_v63, %v8489_v23  ;;  %v3948_v4 = vpop.f32.mrf.mxu3  ;;  %v3259_v23 = vld [vmem:[%s7698_s25 + $0xf40] sm:$0xff]  ;;  %v1833_v63 = vrot.slane %v1786_v35, 3  ;;  %12242 = vst [vmem:[#allocation120_spill] sm:$0xff] %v8907_v31  ;;  %v8910_v22 = vsel %vm899_vm3, %v1952_v0, %v1957_v42  ;;  %v1788_v0 = vld [vmem:[#allocation2 + $0x38] sm:$0xff]  ;;  %v1961_v35 = vrot.slane %v1787_v58, 4 }
 0x1fb   : > { %v8890_v9 = vadd.f32 %v3948_v4, %v3872_v8  ;;  %v3797_v24 = vpop.f32.mrf.mxu1  ;;  %4519 = vmatpush.msrb.mxu3 %v3259_v23  ;;  %v3195_v4 = vld [vmem:[%s7698_s25 + $0xd40] sm:$0xff]  ;;  %12243 = vst [vmem:[#allocation121_spill] sm:$0xff] %v8910_v22 }
 0x1fc   : > { %4015 = vmatmul.f32.gmra.mxu0 %v8884_v44  ;;  %4169 = vmatmul.f32.gmra.mxu2 %v8887_v21  ;;  %v3798_v8 = vadd.f32 %v3797_v24, %v3721_v25  ;;  %12245 = vst [vmem:[#allocation123_spill] sm:$0xff] %v8921_v6 }
 0x1fd   : > { %4365 = vmatpush.msrb.mxu1 %v3195_v4  ;;  %v3161_v4 = vld [vmem:[%s7698_s25 + $0xc30] sm:$0xff] }
 0x1fe   : > { %4092 = vmatmul.f32.gmra.mxu1 %v8893_v52  ;;  %4289 = vmatpush.msrb.mxu0 %v3161_v4  ;;  %v3223_v4 = vld [vmem:[%s7698_s25 + $0xe20] sm:$0xff] }
 0x1ff   : > { %4246 = vmatmul.f32.gmra.mxu3 %v8899_v56  ;;  %v3874_v26 = vpop.f32.mrf.mxu2  ;;  %4366 = vmatpush.msrb.mxu1 %v3193_v54 }
 0x200   : > { %v3875_v21 = vadd.f32 %v3874_v26, %v3798_v8  ;;  %v8916_v8 = vsel %vm772_vm2, %v1829_v49, %v1833_v63  ;;  %v1837_v26 = vrot.slane %v1788_v0, 3 }
 0x201   : > { %v3723_v44 = vpop.f32.mrf.mxu0  ;;  %12244 = vst [vmem:[#allocation122_spill] sm:$0xff] %v8916_v8 }
 0x202   : > { %v3724_v25 = vadd.f32 %v3723_v44, %v8509_v57  ;;  %v3951_v24 = vpop.f32.mrf.mxu3  ;;  %v3225_v57 = vld [vmem:[%s7698_s25 + $0xe30] sm:$0xff]  ;;  %v1835_v44 = vrot.slane %v1787_v58, 3  ;;  %v8933_v58 = vsel %vm899_vm3, %v1957_v42, %v1961_v35  ;;  %v1790_v42 = vld [vmem:[#allocation2 + $0x18] sm:$0xff] }
 0x203   : > { %v8913_v12 = vadd.f32 %v3951_v24, %v3875_v21  ;;  %v3800_v23 = vpop.f32.mrf.mxu1  ;;  %4443 = vmatpush.msrb.mxu2 %v3225_v57  ;;  %v3257_v24 = vld [vmem:[%s7698_s25 + $0xf30] sm:$0xff]  ;;  %12247 = vst [vmem:[#allocation125_spill] sm:$0xff] %v8933_v58  ;;  %v1789_v57 = vld [vmem:[#allocation2 + $0x60] sm:$0xff]  ;;  %v1967_v54 = vrot.slane %v1790_v42, 4 }
 0x204   : > { %4018 = vmatmul.f32.gmra.mxu0 %v8907_v31  ;;  %4172 = vmatmul.f32.gmra.mxu2 %v8910_v22  ;;  %v3801_v21 = vadd.f32 %v3800_v23, %v3724_v25  ;;  %v1963_v22 = vrot.slane %v1788_v0, 4  ;;  %v8930_v52 = vsel %vm772_vm2, %v1831_v13, %v1835_v44  ;;  %v8939_v0 = vsel %vm772_vm2, %v1833_v63, %v1837_v26 }
 0x205   : > { %4520 = vmatpush.msrb.mxu3 %v3257_v24  ;;  %12246 = vst [vmem:[#allocation124_spill] sm:$0xff] %v8930_v52  ;;  %v1841_v63 = vrot.slane %v1790_v42, 3  ;;  %4444 = vmatpush.msrb.mxu2 %v3223_v4 }
 0x206   : > { %4095 = vmatmul.f32.gmra.mxu1 %v8916_v8  ;;  %12248 = vst [vmem:[#allocation126_spill] sm:$0xff] %v8939_v0  ;;  %v8944_v13 = vsel %vm899_vm3, %v1959_v10, %v1963_v22 }
 0x207   : > { %4249 = vmatmul.f32.gmra.mxu3 %v8921_v6  ;;  %v3877_v49 = vpop.f32.mrf.mxu2  ;;  %12249 = vst [vmem:[#allocation127_spill] sm:$0xff] %v8944_v13  ;;  %v8961_v42 = vsel %vm772_vm2, %v1837_v26, %v1841_v63 }
 0x208   : > { %v3878_v56 = vadd.f32 %v3877_v49, %v3801_v21  ;;  %12252 = vst [vmem:[#allocation130_spill] sm:$0xff] %v8961_v42 }
 0x209   : > { %v3726_v31 = vpop.f32.mrf.mxu0 }
 0x20a   : > { %v3727_v25 = vadd.f32 %v3726_v31, %v8525_v18  ;;  %v3954_v23 = vpop.f32.mrf.mxu3  ;;  %v1839_v18 = vrot.slane %v1789_v57, 3  ;;  %v1965_v31 = vrot.slane %v1789_v57, 4 }
 0x20b   : > { %v8936_v6 = vadd.f32 %v3954_v23, %v3878_v56  ;;  %v3803_v21 = vpop.f32.mrf.mxu1  ;;  %v3159_v23 = vld [vmem:[%s7698_s25 + $0xc20] sm:$0xff] }
 0x20c   : > { %4021 = vmatmul.f32.gmra.mxu0 %v8930_v52  ;;  %4175 = vmatmul.f32.gmra.mxu2 %v8933_v58  ;;  %v3804_v49 = vadd.f32 %v3803_v21, %v3727_v25  ;;  %v3255_v58 = vld [vmem:[%s7698_s25 + $0xf20] sm:$0xff]  ;;  %v8952_v10 = vsel %vm772_vm2, %v1835_v44, %v1839_v18  ;;  %v8955_v57 = vsel %vm899_vm3, %v1961_v35, %v1965_v31 }
 0x20d   : > { %12250 = vst [vmem:[#allocation128_spill] sm:$0xff] %v8952_v10  ;;  %4290 = vmatpush.msrb.mxu0 %v3159_v23  ;;  %4521 = vmatpush.msrb.mxu3 %v3255_v58  ;;  %v8967_v44 = vsel %vm899_vm3, %v1963_v22, %v1967_v54  ;;  %v1792_v35 = vld [vmem:[#allocation2 + $0x120] sm:$0xff] }
 0x20e   : > { %4098 = vmatmul.f32.gmra.mxu1 %v8939_v0  ;;  %12251 = vst [vmem:[#allocation129_spill] sm:$0xff] %v8955_v57  ;;  %v1845_v4 = vrot.slane %v1792_v35, 3  ;;  %v1971_v23 = vrot.slane %v1792_v35, 4  ;;  %v3157_v35 = vld [vmem:[%s7698_s25 + $0xc10] sm:$0xff] }
 0x20f   : > { %4252 = vmatmul.f32.gmra.mxu3 %v8944_v13  ;;  %v3880_v56 = vpop.f32.mrf.mxu2  ;;  %v1791_v13 = vld [vmem:[#allocation2 + $0x158] sm:$0xff]  ;;  %12253 = vst [vmem:[#allocation131_spill] sm:$0xff] %v8967_v44  ;;  %4291 = vmatpush.msrb.mxu0 %v3157_v35  ;;  %v1795_v35 = vld [vmem:[#allocation2 + $0x30] sm:$0xff] }
 0x210   : > { %v3881_v24 = vadd.f32 %v3880_v56, %v3804_v49  ;;  %v3191_v56 = vld [vmem:[%s7698_s25 + $0xd20] sm:$0xff]  ;;  %v1843_v58 = vrot.slane %v1791_v13, 3 }
 0x211   : > { %v3729_v52 = vpop.f32.mrf.mxu0  ;;  %4367 = vmatpush.msrb.mxu1 %v3191_v56  ;;  %v1793_v56 = vld [vmem:[#allocation2 + $0x198] sm:$0xff] }
 0x212   : > { %v3730_v25 = vadd.f32 %v3729_v52, %v8540_v61  ;;  %v3957_v21 = vpop.f32.mrf.mxu3  ;;  %v1969_v61 = vrot.slane %v1791_v13, 4  ;;  %v8973_v22 = vsel %vm772_vm2, %v1839_v18, %v1843_v58  ;;  %v8989_v18 = vsel %vm899_vm3, %v1967_v54, %v1971_v23 }
 0x213   : > { %v8958_v0 = vadd.f32 %v3957_v21, %v3881_v24  ;;  %v3806_v49 = vpop.f32.mrf.mxu1  ;;  %v3221_v21 = vld [vmem:[%s7698_s25 + $0xe10] sm:$0xff]  ;;  %12254 = vst [vmem:[#allocation132_spill] sm:$0xff] %v8973_v22 }
 0x214   : > { %4024 = vmatmul.f32.gmra.mxu0 %v8952_v10  ;;  %4178 = vmatmul.f32.gmra.mxu2 %v8955_v57  ;;  %v3807_v52 = vadd.f32 %v3806_v49, %v3730_v25  ;;  %v8976_v13 = vsel %vm899_vm3, %v1965_v31, %v1969_v61  ;;  %12257 = vst [vmem:[#allocation135_spill] sm:$0xff] %v8989_v18  ;;  %v1794_v31 = vld [vmem:[#allocation2 + $0x68] sm:$0xff] }
 0x215   : > { %12255 = vst [vmem:[#allocation133_spill] sm:$0xff] %v8976_v13  ;;  %4445 = vmatpush.msrb.mxu2 %v3221_v21  ;;  %v3189_v21 = vld [vmem:[%s7698_s25 + $0xd10] sm:$0xff] }
 0x216   : > { %4101 = vmatmul.f32.gmra.mxu1 %v8961_v42 }
 0x217   : > { %4255 = vmatmul.f32.gmra.mxu3 %v8967_v44  ;;  %v3883_v26 = vpop.f32.mrf.mxu2  ;;  %4368 = vmatpush.msrb.mxu1 %v3189_v21 }
 0x218   : > { %v3884_v24 = vadd.f32 %v3883_v26, %v3807_v52  ;;  %v8982_v52 = vsel %vm772_vm2, %v1841_v63, %v1845_v4  ;;  %v3253_v26 = vld [vmem:[%s7698_s25 + $0xf10] sm:$0xff] }
 0x219   : > { %v3732_v57 = vpop.f32.mrf.mxu0  ;;  %12256 = vst [vmem:[#allocation134_spill] sm:$0xff] %v8982_v52  ;;  %4522 = vmatpush.msrb.mxu3 %v3253_v26 }
 0x21a   : > { %v3733_v25 = vadd.f32 %v3732_v57, %v8556_v5  ;;  %v3960_v49 = vpop.f32.mrf.mxu3  ;;  %v1847_v5 = vrot.slane %v1793_v56, 3  ;;  %v1973_v57 = vrot.slane %v1793_v56, 4 }
 0x21b   : > { %v8979_v44 = vadd.f32 %v3960_v49, %v3884_v24  ;;  %v3809_v42 = vpop.f32.mrf.mxu1  ;;  %v1849_v49 = vrot.slane %v1794_v31, 3 }
 0x21c   : > { %4027 = vmatmul.f32.gmra.mxu0 %v8973_v22  ;;  %4181 = vmatmul.f32.gmra.mxu2 %v8976_v13  ;;  %v3810_v24 = vadd.f32 %v3809_v42, %v3733_v25  ;;  %v1975_v13 = vrot.slane %v1794_v31, 4  ;;  %v8995_v10 = vsel %vm772_vm2, %v1843_v58, %v1847_v5  ;;  %v8998_v56 = vsel %vm899_vm3, %v1969_v61, %v1973_v57  ;;  %v1796_v61 = vld [vmem:[#allocation2 + $0xc8] sm:$0xff]  ;;  %v3155_v31 = vld [vmem:[%s7698_s25 + $0xc00] sm:$0xff] }
 0x21d   : > { %12258 = vst [vmem:[#allocation136_spill] sm:$0xff] %v8995_v10  ;;  %v9004_v21 = vsel %vm772_vm2, %v1845_v4, %v1849_v49  ;;  %4292 = vmatpush.msrb.mxu0 %v3155_v31 }
 0x21e   : > { %4104 = vmatmul.f32.gmra.mxu1 %v8982_v52  ;;  %12259 = vst [vmem:[#allocation137_spill] sm:$0xff] %v8998_v56  ;;  %v9010_v58 = vsel %vm899_vm3, %v1971_v23, %v1975_v13  ;;  %v1979_v23 = vrot.slane %v1796_v61, 4 }
 0x21f   : > { %4258 = vmatmul.f32.gmra.mxu3 %v8989_v18  ;;  %v3886_v63 = vpop.f32.mrf.mxu2  ;;  %12260 = vst [vmem:[#allocation138_spill] sm:$0xff] %v9004_v21 }
 0x220   : > { %v3887_v22 = vadd.f32 %v3886_v63, %v3810_v24  ;;  %v3219_v24 = vld [vmem:[%s7698_s25 + $0xe00] sm:$0xff]  ;;  %12261 = vst [vmem:[#allocation139_spill] sm:$0xff] %v9010_v58  ;;  %v1851_v63 = vrot.slane %v1795_v35, 3 }
 0x221   : > { %v3735_v54 = vpop.f32.mrf.mxu0  ;;  %4446 = vmatpush.msrb.mxu2 %v3219_v24  ;;  %v1797_v24 = vld [vmem:[#allocation2 + $0xf8] sm:$0xff] }
 0x222   : > { %v3736_v42 = vadd.f32 %v3735_v54, %v8573_v7  ;;  %v3963_v25 = vpop.f32.mrf.mxu3  ;;  %v3251_v7 = vld [vmem:[%s7698_s25 + $0xf00] sm:$0xff]  ;;  %v1977_v54 = vrot.slane %v1795_v35, 4  ;;  %v9018_v8 = vsel %vm772_vm2, %v1847_v5, %v1851_v63  ;;  %v1798_v5 = vld [vmem:[#allocation2 + $0x28] sm:$0xff] }
 0x223   : > { %v9001_v26 = vadd.f32 %v3963_v25, %v3887_v22  ;;  %v3812_v18 = vpop.f32.mrf.mxu1  ;;  %4523 = vmatpush.msrb.mxu3 %v3251_v7  ;;  %v1853_v25 = vrot.slane %v1796_v61, 3  ;;  %12262 = vst [vmem:[#allocation140_spill] sm:$0xff] %v9018_v8  ;;  %v1857_v61 = vrot.slane %v1798_v5, 3 }
 0x224   : > { %4030 = vmatmul.f32.gmra.mxu0 %v8995_v10  ;;  %4184 = vmatmul.f32.gmra.mxu2 %v8998_v56  ;;  %v3813_v22 = vadd.f32 %v3812_v18, %v3736_v42  ;;  %v3187_v10 = vld [vmem:[%s7698_s25 + $0xd00] sm:$0xff]  ;;  %v9021_v35 = vsel %vm899_vm3, %v1973_v57, %v1977_v54  ;;  %v2802_v57 = vld [vmem:[%s7698_s25 + $0xf8] sm:$0xff] }
 0x225   : > { %4369 = vmatpush.msrb.mxu1 %v3187_v10  ;;  %12263 = vst [vmem:[#allocation141_spill] sm:$0xff] %v9021_v35  ;;  %v9032_v10 = vsel %vm899_vm3, %v1975_v13, %v1979_v23  ;;  %4739 = vmatpush.msra.mxu2 %v2802_v57  ;;  %v3345_v13 = vld [vmem:[%s7698_s25 + $0x11f0] sm:$0xff]  ;;  %v1799_v57 = vld [vmem:[#allocation2 + $0x8] sm:$0xff] }
 0x226   : > { %4107 = vmatmul.f32.gmra.mxu1 %v9004_v21  ;;  %12265 = vst [vmem:[#allocation143_spill] sm:$0xff] %v9032_v10 }
 0x227   : > { %4261 = vmatmul.f32.gmra.mxu3 %v9010_v58  ;;  %v3889_v4 = vpop.f32.mrf.mxu2  ;;  %4662 = vmatpush.msra.mxu1 %v3345_v13 }
 0x228   : > { %v3890_v56 = vadd.f32 %v3889_v4, %v3813_v22  ;;  %v9027_v22 = vsel %vm772_vm2, %v1849_v49, %v1853_v25  ;;  %v3313_v4 = vld [vmem:[%s7698_s25 + $0x10f0] sm:$0xff] }
 0x229   : > { %v3986_v52 = vpop.f32.mrf.mxu0  ;;  %12264 = vst [vmem:[#allocation142_spill] sm:$0xff] %v9027_v22  ;;  %4585 = vmatpush.msra.mxu0 %v3313_v4  ;;  %v2800_v4 = vld [vmem:[%s7698_s25 + $0xe8] sm:$0xff] }
 0x22a   : > { %v3966_v18 = vpop.f32.mrf.mxu3  ;;  %v3987_v42 = vadd.f32 %v3986_v52, %v8595_v29  ;;  %v1855_v29 = vrot.slane %v1797_v24, 3  ;;  %v1981_v52 = vrot.slane %v1797_v24, 4  ;;  %4740 = vmatpush.msra.mxu2 %v2800_v4  ;;  %v3343_v4 = vld [vmem:[%s7698_s25 + $0x11e0] sm:$0xff] }
 0x22b   : > { %v9024_v31 = vadd.f32 %v3966_v18, %v3890_v56  ;;  %v4063_v7 = vpop.f32.mrf.mxu1  ;;  %v2834_v18 = vld [vmem:[%s7698_s25 + $0x1f8] sm:$0xff]  ;;  %4663 = vmatpush.msra.mxu1 %v3343_v4  ;;  %v9090_v4 = vld [vmem:[#allocation2 + $0x40] sm:$0xff] }
 0x22c   : > { %4033 = vmatmul.f32.gmra.mxu0 %v9018_v8  ;;  %4187 = vmatmul.f32.gmra.mxu2 %v9021_v35  ;;  %v4064_v56 = vadd.f32 %v4063_v7, %v3987_v42  ;;  %v1983_v35 = vrot.slane %v1798_v5, 4  ;;  %v9041_v21 = vsel %vm772_vm2, %v1851_v63, %v1855_v29  ;;  %v9044_v24 = vsel %vm899_vm3, %v1977_v54, %v1981_v52  ;;  %v1800_v54 = vld [vmem:[#allocation2 + $0x80] sm:$0xff] }
 0x22d   : > { %4816 = vmatpush.msra.mxu3 %v2834_v18  ;;  %12266 = vst [vmem:[#allocation144_spill] sm:$0xff] %v9041_v21  ;;  %v9050_v5 = vsel %vm772_vm2, %v1853_v25, %v1857_v61  ;;  %v1861_v25 = vrot.slane %v1800_v54, 3  ;;  %v1987_v13 = vrot.slane %v1800_v54, 4 }
 0x22e   : > { %4110 = vmatmul.f32.gmra.mxu1 %v9027_v22  ;;  %12267 = vst [vmem:[#allocation145_spill] sm:$0xff] %v9044_v24  ;;  %v9055_v63 = vsel %vm899_vm3, %v1979_v23, %v1983_v35 }
 0x22f   : > { %4264 = vmatmul.f32.gmra.mxu3 %v9032_v10  ;;  %v4140_v49 = vpop.f32.mrf.mxu2  ;;  %12268 = vst [vmem:[#allocation146_spill] sm:$0xff] %v9050_v5 }
 0x230   : > { %v4141_v58 = vadd.f32 %v4140_v49, %v4064_v56  ;;  %12269 = vst [vmem:[#allocation147_spill] sm:$0xff] %v9055_v63 }
 0x231   : > { %v3989_v8 = vpop.f32.mrf.mxu0 }
 0x232   : > { %v3990_v42 = vadd.f32 %v3989_v8, %v8613_v17  ;;  %v4217_v7 = vpop.f32.mrf.mxu3  ;;  %v1859_v17 = vrot.slane %v1799_v57, 3  ;;  %v1985_v8 = vrot.slane %v1799_v57, 4 }
 0x233   : > { %v9047_v10 = vadd.f32 %v4217_v7, %v4141_v58  ;;  %v4066_v56 = vpop.f32.mrf.mxu1  ;;  %v3311_v7 = vld [vmem:[%s7698_s25 + $0x10e0] sm:$0xff] }
 0x234   : > { %4036 = vmatmul.f32.gmra.mxu0 %v9041_v21  ;;  %4190 = vmatmul.f32.gmra.mxu2 %v9044_v24  ;;  %v4067_v49 = vadd.f32 %v4066_v56, %v3990_v42  ;;  %v2832_v24 = vld [vmem:[%s7698_s25 + $0x1e8] sm:$0xff]  ;;  %v9063_v23 = vsel %vm772_vm2, %v1855_v29, %v1859_v17  ;;  %v9066_v57 = vsel %vm899_vm3, %v1981_v52, %v1985_v8  ;;  %v1802_v52 = vld [vmem:[#allocation2 + $0x150] sm:$0x7] }
 0x235   : > { %12270 = vst [vmem:[#allocation148_spill] sm:$0xff] %v9063_v23  ;;  %4586 = vmatpush.msra.mxu0 %v3311_v7  ;;  %4817 = vmatpush.msra.mxu3 %v2832_v24  ;;  %v9078_v29 = vsel %vm899_vm3, %v1983_v35, %v1987_v13  ;;  %v1928_v24 = vld [vmem:[#allocation2 + $0x150] sm:$0xf]  ;;  %v1865_v7 = vrot.slane %v1802_v52, 3  ;;  %v1108_v52 = vld [vmem:[#allocation2 + $0x160] sm:$0xe0] }
 0x236   : > { %4113 = vmatmul.f32.gmra.mxu1 %v9050_v5  ;;  %12271 = vst [vmem:[#allocation149_spill] sm:$0xff] %v9066_v57  ;;  %v1927_v5 = vld [vmem:[#allocation2 + $0x98] sm:$0xf] }
 0x237   : > { %4267 = vmatmul.f32.gmra.mxu3 %v9055_v63  ;;  %v4143_v58 = vpop.f32.mrf.mxu2  ;;  %v1801_v63 = vld [vmem:[#allocation2 + $0x98] sm:$0x7]  ;;  %12273 = vst [vmem:[#allocation151_spill] sm:$0xff] %v9078_v29 }
 0x238   : > { %v4144_v18 = vadd.f32 %v4143_v58, %v4067_v49  ;;  %v9072_v58 = vsel %vm772_vm2, %v1857_v61, %v1861_v25 }
 0x239   : > { %v3992_v21 = vpop.f32.mrf.mxu0  ;;  %12272 = vst [vmem:[#allocation150_spill] sm:$0xff] %v9072_v58 }
 0x23a   : > { %v3993_v42 = vadd.f32 %v3992_v21, %v8635_v48  ;;  %v4220_v56 = vpop.f32.mrf.mxu3  ;;  %v1863_v48 = vrot.slane %v1801_v63, 3  ;;  %v1989_v21 = vrot.slane %v1927_v5, 4 }
 0x23b   : > { %v9069_v49 = vadd.f32 %v4220_v56, %v4144_v18  ;;  %v4069_v54 = vpop.f32.mrf.mxu1 }
 0x23c   : > { %4039 = vmatmul.f32.gmra.mxu0 %v9063_v23  ;;  %4193 = vmatmul.f32.gmra.mxu2 %v9066_v57  ;;  %v4070_v18 = vadd.f32 %v4069_v54, %v3993_v42  ;;  %v1991_v23 = vrot.slane %v1928_v24, 4  ;;  %v2798_v57 = vld [vmem:[%s7698_s25 + $0xd8] sm:$0xff]  ;;  %v9084_v35 = vsel %vm772_vm2, %v1859_v17, %v1863_v48  ;;  %v9087_v5 = vsel %vm899_vm3, %v1985_v8, %v1989_v21  ;;  %v982_v54 = vld [vmem:[#allocation2 + $0x160] sm:$0xf0]  ;;  %v3309_v17 = vld [vmem:[%s7698_s25 + $0x10d0] sm:$0xff] }
 0x23d   : > { %12274 = vst [vmem:[#allocation152_spill] sm:$0xff] %v9084_v35  ;;  %4741 = vmatpush.msra.mxu2 %v2798_v57  ;;  %v2830_v48 = vld [vmem:[%s7698_s25 + $0x1d8] sm:$0xff]  ;;  %v3341_v57 = vld [vmem:[%s7698_s25 + $0x11d0] sm:$0xff]  ;;  %v1026_v21 = vrot.slane %v982_v54, 4  ;;  %4587 = vmatpush.msra.mxu0 %v3309_v17 }
 0x23e   : > { %4116 = vmatmul.f32.gmra.mxu1 %v9072_v58  ;;  %12275 = vst [vmem:[#allocation153_spill] sm:$0xff] %v9087_v5  ;;  %v9102_v8 = vsel %vm899_vm3, %v1987_v13, %v1991_v23  ;;  %4818 = vmatpush.msra.mxu3 %v2830_v48 }
 0x23f   : > { %4270 = vmatmul.f32.gmra.mxu3 %v9078_v29  ;;  %v4146_v61 = vpop.f32.mrf.mxu2  ;;  %12277 = vst [vmem:[#allocation155_spill] sm:$0xff] %v9102_v8  ;;  %4664 = vmatpush.msra.mxu1 %v3341_v57 }
 0x240   : > { %v4147_v56 = vadd.f32 %v4146_v61, %v4070_v18  ;;  %v9095_v61 = vsel %vm772_vm2, %v1861_v25, %v1865_v7  ;;  %v1154_v25 = vrot.slane %v9090_v4, 5  ;;  %v1109_v7 = vld [vmem:[#allocation2 + $0x128] sm:$0xe0] }
 0x241   : > { %v3995_v22 = vpop.f32.mrf.mxu0  ;;  %12276 = vst [vmem:[#allocation154_spill] sm:$0xff] %v9095_v61 }
 0x242   : > { %v3996_v63 = vadd.f32 %v3995_v22, %v8664_v46  ;;  %v4223_v42 = vpop.f32.mrf.mxu3  ;;  %v983_v46 = vld [vmem:[#allocation2 + $0x128] sm:$0xf0]  ;;  %v9104_v22 = vld [vmem:[#allocation2 + $0x178] sm:$0xff] }
 0x243   : > { %v9092_v18 = vadd.f32 %v4223_v42, %v4147_v56  ;;  %v4072_v24 = vpop.f32.mrf.mxu1  ;;  %v1027_v56 = vrot.slane %v9090_v4, 4  ;;  %v1153_v42 = vrot.slane %v1108_v52, 5  ;;  %v1029_v23 = vrot.slane %v983_v46, 4  ;;  %v986_v46 = vld [vmem:[#allocation2 + $0x108] sm:$0xff] }
 0x244   : > { %4042 = vmatmul.f32.gmra.mxu0 %v9084_v35  ;;  %4196 = vmatmul.f32.gmra.mxu2 %v9087_v5  ;;  %v4073_v29 = vadd.f32 %v4072_v24, %v3996_v63  ;;  %v1030_v5 = vrot.slane %v9104_v22, 4  ;;  %v1156_v35 = vrot.slane %v1109_v7, 5  ;;  %v1157_v4 = vrot.slane %v9104_v22, 5  ;;  %v2796_v7 = vld [vmem:[%s7698_s25 + $0xc8] sm:$0xff] }
 0x245   : > { %v9114_v63 = vsel %vm899_vm3, %v1026_v21, %v1027_v56  ;;  %v9117_v24 = vsel %vm1152_vm4, %v1153_v42, %v1154_v25  ;;  %v987_v21 = vld [vmem:[#allocation2 + $0x110] sm:$0xff]  ;;  %v3307_v42 = vld [vmem:[%s7698_s25 + $0x10c0] sm:$0xff]  ;;  %4742 = vmatpush.msra.mxu2 %v2796_v7 }
 0x246   : > { %4119 = vmatmul.f32.gmra.mxu1 %v9095_v61  ;;  %12278 = vst [vmem:[#allocation156_spill] sm:$0xff] %v9114_v63  ;;  %v9129_v22 = vsel %vm1152_vm4, %v1156_v35, %v1157_v4  ;;  %4588 = vmatpush.msra.mxu0 %v3307_v42  ;;  %v1161_v35 = vrot.slane %v987_v21, 5  ;;  %v988_v7 = vld [vmem:[#allocation2 + $0x90] sm:$0xff] }
 0x247   : > { %4273 = vmatmul.f32.gmra.mxu3 %v9102_v8  ;;  %v4149_v13 = vpop.f32.mrf.mxu2  ;;  %12279 = vst [vmem:[#allocation157_spill] sm:$0xff] %v9117_v24 }
 0x248   : > { %v4150_v54 = vadd.f32 %v4149_v13, %v4073_v29  ;;  %v9123_v29 = vsel %vm899_vm3, %v1029_v23, %v1030_v5  ;;  %12281 = vst [vmem:[#allocation159_spill] sm:$0xff] %v9129_v22  ;;  %v1032_v13 = vrot.slane %v986_v46, 4 }
 0x249   : > { %v3998_v52 = vpop.f32.mrf.mxu0  ;;  %12280 = vst [vmem:[#allocation158_spill] sm:$0xff] %v9123_v29 }
 0x24a   : > { %v3999_v17 = vadd.f32 %v3998_v52, %v8687_v38  ;;  %v4226_v48 = vpop.f32.mrf.mxu3  ;;  %v2828_v38 = vld [vmem:[%s7698_s25 + $0x1c8] sm:$0xff]  ;;  %v1159_v52 = vrot.slane %v986_v46, 5  ;;  %v9137_v58 = vsel %vm899_vm3, %v1027_v56, %v1032_v13  ;;  %v9151_v56 = vsel %vm1152_vm4, %v1157_v4, %v1161_v35  ;;  %v3337_v4 = vld [vmem:[%s7698_s25 + $0x11b0] sm:$0xff] }
 0x24b   : > { %v9120_v8 = vadd.f32 %v4226_v48, %v4150_v54  ;;  %v4075_v57 = vpop.f32.mrf.mxu1  ;;  %4819 = vmatpush.msra.mxu3 %v2828_v38  ;;  %v1034_v48 = vrot.slane %v987_v21, 4  ;;  %12282 = vst [vmem:[#allocation160_spill] sm:$0xff] %v9137_v58 }
 0x24c   : > { %4293 = vmatmul.f32.vlgmr.msrb.gmra.mxu0 %v9114_v63  ;;  %4447 = vmatmul.f32.vlgmr.msrb.gmra.mxu2 %v9117_v24  ;;  %v4076_v54 = vadd.f32 %v4075_v57, %v3999_v17  ;;  %v3339_v63 = vld [vmem:[%s7698_s25 + $0x11c0] sm:$0xff]  ;;  %v9140_v46 = vsel %vm1152_vm4, %v1154_v25, %v1159_v52  ;;  %12285 = vst [vmem:[#allocation163_spill] sm:$0xff] %v9151_v56  ;;  %v989_v25 = vld [vmem:[#allocation2 + $0x118] sm:$0xff] }
 0x24d   : > { %4665 = vmatpush.msra.mxu1 %v3339_v63  ;;  %12283 = vst [vmem:[#allocation161_spill] sm:$0xff] %v9140_v46  ;;  %v1163_v63 = vrot.slane %v988_v7, 5  ;;  %v1038_v21 = vrot.slane %v989_v25, 4 }
 0x24e   : > { %4370 = vmatmul.f32.vlgmr.msrb.gmra.mxu1 %v9123_v29 }
 0x24f   : > { %4524 = vmatmul.f32.vlgmr.msrb.gmra.mxu3 %v9129_v22  ;;  %v4152_v23 = vpop.f32.mrf.mxu2  ;;  %4666 = vmatpush.msra.mxu1 %v3337_v4 }
 0x250   : > { %v4153_v24 = vadd.f32 %v4152_v23, %v4076_v54  ;;  %v9146_v54 = vsel %vm899_vm3, %v1030_v5, %v1034_v48  ;;  %v3305_v23 = vld [vmem:[%s7698_s25 + $0x10b0] sm:$0xff] }
 0x251   : > { %v4001_v61 = vpop.f32.mrf.mxu0  ;;  %12284 = vst [vmem:[#allocation162_spill] sm:$0xff] %v9146_v54  ;;  %4589 = vmatpush.msra.mxu0 %v3305_v23  ;;  %v2792_v23 = vld [vmem:[%s7698_s25 + $0xa8] sm:$0xff] }
 0x252   : > { %v4002_v17 = vadd.f32 %v4001_v61, %v8710_v50  ;;  %v4229_v57 = vpop.f32.mrf.mxu3  ;;  %v2794_v50 = vld [vmem:[%s7698_s25 + $0xb8] sm:$0xff]  ;;  %v1036_v61 = vrot.slane %v988_v7, 4  ;;  %v9163_v7 = vsel %vm1152_vm4, %v1159_v52, %v1163_v63  ;;  %v991_v52 = vld [vmem:[#allocation2 + $0x100] sm:$0xff] }
 0x253   : > { %v9143_v42 = vadd.f32 %v4229_v57, %v4153_v24  ;;  %v4078_v38 = vpop.f32.mrf.mxu1  ;;  %4743 = vmatpush.msra.mxu2 %v2794_v50  ;;  %v2826_v57 = vld [vmem:[%s7698_s25 + $0x1b8] sm:$0xff]  ;;  %12287 = vst [vmem:[#allocation165_spill] sm:$0xff] %v9163_v7  ;;  %v990_v50 = vld [vmem:[#allocation2 + $0x148] sm:$0xff]  ;;  %v1169_v4 = vrot.slane %v991_v52, 5 }
 0x254   : > { %4296 = vmatmul.f32.gmra.mxu0 %v9137_v58  ;;  %4450 = vmatmul.f32.gmra.mxu2 %v9140_v46  ;;  %v4079_v24 = vadd.f32 %v4078_v38, %v4002_v17  ;;  %v1165_v46 = vrot.slane %v989_v25, 5  ;;  %v9160_v29 = vsel %vm899_vm3, %v1032_v13, %v1036_v61  ;;  %v9169_v25 = vsel %vm899_vm3, %v1034_v48, %v1038_v21 }
 0x255   : > { %4820 = vmatpush.msra.mxu3 %v2826_v57  ;;  %12286 = vst [vmem:[#allocation164_spill] sm:$0xff] %v9160_v29  ;;  %v1042_v48 = vrot.slane %v991_v52, 4  ;;  %4744 = vmatpush.msra.mxu2 %v2792_v23 }
 0x256   : > { %4373 = vmatmul.f32.gmra.mxu1 %v9146_v54  ;;  %12288 = vst [vmem:[#allocation166_spill] sm:$0xff] %v9169_v25  ;;  %v9174_v13 = vsel %vm1152_vm4, %v1161_v35, %v1165_v46 }
 0x257   : > { %4527 = vmatmul.f32.gmra.mxu3 %v9151_v56  ;;  %v4155_v5 = vpop.f32.mrf.mxu2  ;;  %12289 = vst [vmem:[#allocation167_spill] sm:$0xff] %v9174_v13  ;;  %v9191_v52 = vsel %vm899_vm3, %v1038_v21, %v1042_v48 }
 0x258   : > { %v4156_v22 = vadd.f32 %v4155_v5, %v4079_v24  ;;  %12292 = vst [vmem:[#allocation170_spill] sm:$0xff] %v9191_v52 }
 0x259   : > { %v4004_v58 = vpop.f32.mrf.mxu0 }
 0x25a   : > { %v4005_v17 = vadd.f32 %v4004_v58, %v8732_v3  ;;  %v4232_v38 = vpop.f32.mrf.mxu3  ;;  %v1040_v3 = vrot.slane %v990_v50, 4  ;;  %v1167_v58 = vrot.slane %v990_v50, 5 }
 0x25b   : > { %v9166_v56 = vadd.f32 %v4232_v38, %v4156_v22  ;;  %v4081_v24 = vpop.f32.mrf.mxu1  ;;  %v3303_v38 = vld [vmem:[%s7698_s25 + $0x10a0] sm:$0xff] }
 0x25c   : > { %4299 = vmatmul.f32.gmra.mxu0 %v9160_v29  ;;  %4453 = vmatmul.f32.gmra.mxu2 %v9163_v7  ;;  %v4082_v5 = vadd.f32 %v4081_v24, %v4005_v17  ;;  %v2824_v7 = vld [vmem:[%s7698_s25 + $0x1a8] sm:$0xff]  ;;  %v9182_v35 = vsel %vm899_vm3, %v1036_v61, %v1040_v3  ;;  %v9185_v50 = vsel %vm1152_vm4, %v1163_v63, %v1167_v58  ;;  %v993_v63 = vld [vmem:[#allocation2 + $0xd8] sm:$0xff] }
 0x25d   : > { %12290 = vst [vmem:[#allocation168_spill] sm:$0xff] %v9182_v35  ;;  %4590 = vmatpush.msra.mxu0 %v3303_v38  ;;  %4821 = vmatpush.msra.mxu3 %v2824_v7  ;;  %v9197_v61 = vsel %vm1152_vm4, %v1165_v46, %v1169_v4  ;;  %v1046_v23 = vrot.slane %v993_v63, 4  ;;  %v1173_v38 = vrot.slane %v993_v63, 5  ;;  %v3301_v63 = vld [vmem:[%s7698_s25 + $0x1090] sm:$0xff] }
 0x25e   : > { %4376 = vmatmul.f32.gmra.mxu1 %v9169_v25  ;;  %12291 = vst [vmem:[#allocation169_spill] sm:$0xff] %v9185_v50 }
 0x25f   : > { %4530 = vmatmul.f32.gmra.mxu3 %v9174_v13  ;;  %v4158_v22 = vpop.f32.mrf.mxu2  ;;  %v992_v13 = vld [vmem:[#allocation2 + $0x58] sm:$0xff]  ;;  %12293 = vst [vmem:[#allocation171_spill] sm:$0xff] %v9197_v61  ;;  %4591 = vmatpush.msra.mxu0 %v3301_v63 }
 0x260   : > { %v4159_v57 = vadd.f32 %v4158_v22, %v4082_v5  ;;  %v3335_v22 = vld [vmem:[%s7698_s25 + $0x11a0] sm:$0xff]  ;;  %v1044_v7 = vrot.slane %v992_v13, 4  ;;  %v996_v63 = vld [vmem:[#allocation2 + $0x138] sm:$0xff] }
 0x261   : > { %v4007_v29 = vpop.f32.mrf.mxu0  ;;  %4667 = vmatpush.msra.mxu1 %v3335_v22  ;;  %v994_v22 = vld [vmem:[#allocation2 + $0x180] sm:$0xff] }
 0x262   : > { %v4008_v17 = vadd.f32 %v4007_v29, %v8753_v2  ;;  %v4235_v24 = vpop.f32.mrf.mxu3  ;;  %v1171_v2 = vrot.slane %v992_v13, 5  ;;  %v9203_v46 = vsel %vm899_vm3, %v1040_v3, %v1044_v7  ;;  %v9219_v3 = vsel %vm1152_vm4, %v1169_v4, %v1173_v38 }
 0x263   : > { %v9188_v25 = vadd.f32 %v4235_v24, %v4159_v57  ;;  %v4084_v5 = vpop.f32.mrf.mxu1  ;;  %v2790_v24 = vld [vmem:[%s7698_s25 + $0x98] sm:$0xff]  ;;  %12294 = vst [vmem:[#allocation172_spill] sm:$0xff] %v9203_v46 }
 0x264   : > { %4302 = vmatmul.f32.gmra.mxu0 %v9182_v35  ;;  %4456 = vmatmul.f32.gmra.mxu2 %v9185_v50  ;;  %v4085_v29 = vadd.f32 %v4084_v5, %v4008_v17  ;;  %v9206_v13 = vsel %vm1152_vm4, %v1167_v58, %v1171_v2  ;;  %12297 = vst [vmem:[#allocation175_spill] sm:$0xff] %v9219_v3  ;;  %v995_v58 = vld [vmem:[#allocation2 + $0x130] sm:$0xff] }
 0x265   : > { %12295 = vst [vmem:[#allocation173_spill] sm:$0xff] %v9206_v13  ;;  %4745 = vmatpush.msra.mxu2 %v2790_v24  ;;  %v3333_v24 = vld [vmem:[%s7698_s25 + $0x1190] sm:$0xff] }
 0x266   : > { %4379 = vmatmul.f32.gmra.mxu1 %v9191_v52 }
 0x267   : > { %4533 = vmatmul.f32.gmra.mxu3 %v9197_v61  ;;  %v4161_v21 = vpop.f32.mrf.mxu2  ;;  %4668 = vmatpush.msra.mxu1 %v3333_v24 }
 0x268   : > { %v4162_v57 = vadd.f32 %v4161_v21, %v4085_v29  ;;  %v9212_v29 = vsel %vm899_vm3, %v1042_v48, %v1046_v23  ;;  %v2822_v21 = vld [vmem:[%s7698_s25 + $0x198] sm:$0xff] }
 0x269   : > { %v4010_v50 = vpop.f32.mrf.mxu0  ;;  %12296 = vst [vmem:[#allocation174_spill] sm:$0xff] %v9212_v29  ;;  %4822 = vmatpush.msra.mxu3 %v2822_v21 }
 0x26a   : > { %v4011_v17 = vadd.f32 %v4010_v50, %v8775_v28  ;;  %v4238_v5 = vpop.f32.mrf.mxu3  ;;  %v1048_v28 = vrot.slane %v994_v22, 4  ;;  %v1175_v50 = vrot.slane %v994_v22, 5 }
 0x26b   : > { %v9209_v61 = vadd.f32 %v4238_v5, %v4162_v57  ;;  %v4087_v52 = vpop.f32.mrf.mxu1  ;;  %v1050_v5 = vrot.slane %v995_v58, 4 }
 0x26c   : > { %4305 = vmatmul.f32.gmra.mxu0 %v9203_v46  ;;  %4459 = vmatmul.f32.gmra.mxu2 %v9206_v13  ;;  %v4088_v57 = vadd.f32 %v4087_v52, %v4011_v17  ;;  %v1177_v13 = vrot.slane %v995_v58, 5  ;;  %v9225_v35 = vsel %vm899_vm3, %v1044_v7, %v1048_v28  ;;  %v9228_v22 = vsel %vm1152_vm4, %v1171_v2, %v1175_v50  ;;  %v997_v2 = vld [vmem:[#allocation2 + $0x78] sm:$0xff]  ;;  %v3299_v58 = vld [vmem:[%s7698_s25 + $0x1080] sm:$0xff] }
 0x26d   : > { %12298 = vst [vmem:[#allocation176_spill] sm:$0xff] %v9225_v35  ;;  %v9234_v24 = vsel %vm899_vm3, %v1046_v23, %v1050_v5  ;;  %4592 = vmatpush.msra.mxu0 %v3299_v58 }
 0x26e   : > { %4382 = vmatmul.f32.gmra.mxu1 %v9212_v29  ;;  %12299 = vst [vmem:[#allocation177_spill] sm:$0xff] %v9228_v22  ;;  %v9240_v7 = vsel %vm1152_vm4, %v1173_v38, %v1177_v13  ;;  %v1181_v38 = vrot.slane %v997_v2, 5 }
 0x26f   : > { %4536 = vmatmul.f32.gmra.mxu3 %v9219_v3  ;;  %v4164_v48 = vpop.f32.mrf.mxu2  ;;  %12300 = vst [vmem:[#allocation178_spill] sm:$0xff] %v9234_v24 }
 0x270   : > { %v4165_v46 = vadd.f32 %v4164_v48, %v4088_v57  ;;  %v2788_v57 = vld [vmem:[%s7698_s25 + $0x88] sm:$0xff]  ;;  %12301 = vst [vmem:[#allocation179_spill] sm:$0xff] %v9240_v7  ;;  %v1052_v48 = vrot.slane %v996_v63, 4 }
 0x271   : > { %v4013_v4 = vpop.f32.mrf.mxu0  ;;  %4746 = vmatpush.msra.mxu2 %v2788_v57  ;;  %v998_v57 = vld [vmem:[#allocation2 + $0xa0] sm:$0xff] }
 0x272   : > { %v4014_v52 = vadd.f32 %v4013_v4, %v8798_v55  ;;  %v4241_v17 = vpop.f32.mrf.mxu3  ;;  %v2820_v55 = vld [vmem:[%s7698_s25 + $0x188] sm:$0xff]  ;;  %v1179_v4 = vrot.slane %v996_v63, 5  ;;  %v9248_v54 = vsel %vm899_vm3, %v1048_v28, %v1052_v48  ;;  %v999_v28 = vld [vmem:[#allocation2] sm:$0xff] }
 0x273   : > { %v9231_v21 = vadd.f32 %v4241_v17, %v4165_v46  ;;  %v4090_v3 = vpop.f32.mrf.mxu1  ;;  %4823 = vmatpush.msra.mxu3 %v2820_v55  ;;  %v1054_v17 = vrot.slane %v997_v2, 4  ;;  %12302 = vst [vmem:[#allocation180_spill] sm:$0xff] %v9248_v54  ;;  %v1058_v2 = vrot.slane %v999_v28, 4 }
 0x274   : > { %4308 = vmatmul.f32.gmra.mxu0 %v9225_v35  ;;  %4462 = vmatmul.f32.gmra.mxu2 %v9228_v22  ;;  %v4091_v46 = vadd.f32 %v4090_v3, %v4014_v52  ;;  %v3331_v35 = vld [vmem:[%s7698_s25 + $0x1180] sm:$0xff]  ;;  %v9251_v63 = vsel %vm1152_vm4, %v1175_v50, %v1179_v4  ;;  %v1183_v50 = vrot.slane %v998_v57, 5 }
 0x275   : > { %4669 = vmatpush.msra.mxu1 %v3331_v35  ;;  %12303 = vst [vmem:[#allocation181_spill] sm:$0xff] %v9251_v63  ;;  %v9262_v35 = vsel %vm1152_vm4, %v1177_v13, %v1181_v38  ;;  %v3329_v13 = vld [vmem:[%s7698_s25 + $0x1170] sm:$0xff] }
 0x276   : > { %4385 = vmatmul.f32.gmra.mxu1 %v9234_v24  ;;  %12305 = vst [vmem:[#allocation183_spill] sm:$0xff] %v9262_v35 }
 0x277   : > { %4539 = vmatmul.f32.gmra.mxu3 %v9240_v7  ;;  %v4167_v23 = vpop.f32.mrf.mxu2  ;;  %4670 = vmatpush.msra.mxu1 %v3329_v13 }
 0x278   : > { %v4168_v22 = vadd.f32 %v4167_v23, %v4091_v46  ;;  %v9257_v46 = vsel %vm899_vm3, %v1050_v5, %v1054_v17  ;;  %v3297_v23 = vld [vmem:[%s7698_s25 + $0x1070] sm:$0xff] }
 0x279   : > { %v4016_v29 = vpop.f32.mrf.mxu0  ;;  %12304 = vst [vmem:[#allocation182_spill] sm:$0xff] %v9257_v46  ;;  %4593 = vmatpush.msra.mxu0 %v3297_v23  ;;  %v2784_v23 = vld [vmem:[%s7698_s25 + $0x68] sm:$0xff] }
 0x27a   : > { %v4017_v3 = vadd.f32 %v4016_v29, %v8821_v33  ;;  %v4244_v52 = vpop.f32.mrf.mxu3  ;;  %v2786_v33 = vld [vmem:[%s7698_s25 + $0x78] sm:$0xff]  ;;  %v1056_v29 = vrot.slane %v998_v57, 4  ;;  %v9274_v57 = vsel %vm1152_vm4, %v1179_v4, %v1183_v50  ;;  %v1001_v4 = vld [vmem:[#allocation2 + $0xe0] sm:$0xff] }
 0x27b   : > { %v9254_v58 = vadd.f32 %v4244_v52, %v4168_v22  ;;  %v4093_v55 = vpop.f32.mrf.mxu1  ;;  %4747 = vmatpush.msra.mxu2 %v2786_v33  ;;  %v2818_v52 = vld [vmem:[%s7698_s25 + $0x178] sm:$0xff]  ;;  %12307 = vst [vmem:[#allocation185_spill] sm:$0xff] %v9274_v57  ;;  %v1000_v33 = vld [vmem:[#allocation2 + $0x20] sm:$0xff]  ;;  %v1189_v13 = vrot.slane %v1001_v4, 5 }
 0x27c   : > { %4311 = vmatmul.f32.gmra.mxu0 %v9248_v54  ;;  %4465 = vmatmul.f32.gmra.mxu2 %v9251_v63  ;;  %v4094_v22 = vadd.f32 %v4093_v55, %v4017_v3  ;;  %v1185_v63 = vrot.slane %v999_v28, 5  ;;  %v9271_v24 = vsel %vm899_vm3, %v1052_v48, %v1056_v29  ;;  %v9280_v28 = vsel %vm899_vm3, %v1054_v17, %v1058_v2 }
 0x27d   : > { %4824 = vmatpush.msra.mxu3 %v2818_v52  ;;  %12306 = vst [vmem:[#allocation184_spill] sm:$0xff] %v9271_v24  ;;  %v1062_v17 = vrot.slane %v1001_v4, 4  ;;  %4748 = vmatpush.msra.mxu2 %v2784_v23  ;;  %v3327_v23 = vld [vmem:[%s7698_s25 + $0x1160] sm:$0xff] }
 0x27e   : > { %4388 = vmatmul.f32.gmra.mxu1 %v9257_v46  ;;  %12308 = vst [vmem:[#allocation186_spill] sm:$0xff] %v9280_v28  ;;  %v9285_v48 = vsel %vm1152_vm4, %v1181_v38, %v1185_v63 }
 0x27f   : > { %4542 = vmatmul.f32.gmra.mxu3 %v9262_v35  ;;  %v4170_v5 = vpop.f32.mrf.mxu2  ;;  %12309 = vst [vmem:[#allocation187_spill] sm:$0xff] %v9285_v48  ;;  %4671 = vmatpush.msra.mxu1 %v3327_v23  ;;  %v9320_v23 = vld [vmem:[#allocation2 + $0x50] sm:$0xff] }
 0x280   : > { %v4171_v7 = vadd.f32 %v4170_v5, %v4094_v22 }
 0x281   : > { %v4019_v54 = vpop.f32.mrf.mxu0 }
 0x282   : > { %v4020_v3 = vadd.f32 %v4019_v54, %v8843_v40  ;;  %v4247_v55 = vpop.f32.mrf.mxu3  ;;  %v1060_v40 = vrot.slane %v1000_v33, 4  ;;  %v1187_v54 = vrot.slane %v1000_v33, 5 }
 0x283   : > { %v9277_v35 = vadd.f32 %v4247_v55, %v4171_v7  ;;  %v4096_v22 = vpop.f32.mrf.mxu1  ;;  %v3295_v55 = vld [vmem:[%s7698_s25 + $0x1060] sm:$0xff] }
 0x284   : > { %4314 = vmatmul.f32.gmra.mxu0 %v9271_v24  ;;  %4468 = vmatmul.f32.gmra.mxu2 %v9274_v57  ;;  %v4097_v5 = vadd.f32 %v4096_v22, %v4020_v3  ;;  %v2816_v57 = vld [vmem:[%s7698_s25 + $0x168] sm:$0xff]  ;;  %v9293_v38 = vsel %vm899_vm3, %v1056_v29, %v1060_v40  ;;  %v9296_v33 = vsel %vm1152_vm4, %v1183_v50, %v1187_v54 }
 0x285   : > { %12310 = vst [vmem:[#allocation188_spill] sm:$0xff] %v9293_v38  ;;  %4594 = vmatpush.msra.mxu0 %v3295_v55  ;;  %4825 = vmatpush.msra.mxu3 %v2816_v57  ;;  %v9308_v29 = vsel %vm1152_vm4, %v1185_v63, %v1189_v13  ;;  %v1003_v50 = vld [vmem:[#allocation2 + $0x188] sm:$0xf] }
 0x286   : > { %4391 = vmatmul.f32.gmra.mxu1 %v9280_v28  ;;  %12311 = vst [vmem:[#allocation189_spill] sm:$0xff] %v9296_v33  ;;  %v1128_v28 = vld [vmem:[#allocation2 + $0xf0] sm:$0x1f]  ;;  %v1129_v57 = vld [vmem:[#allocation2 + $0x188] sm:$0x1f]  ;;  %v1066_v55 = vrot.slane %v1003_v50, 4 }
 0x287   : > { %4545 = vmatmul.f32.gmra.mxu3 %v9285_v48  ;;  %v4173_v7 = vpop.f32.mrf.mxu2  ;;  %v1002_v48 = vld [vmem:[#allocation2 + $0xf0] sm:$0xf]  ;;  %12313 = vst [vmem:[#allocation191_spill] sm:$0xff] %v9308_v29  ;;  %v2159_v50 = vld [vmem:[#allocation2 + $0xc0] sm:$0xe0] }
 0x288   : > { %v4174_v52 = vadd.f32 %v4173_v7, %v4097_v5  ;;  %v9302_v7 = vsel %vm899_vm3, %v1058_v2, %v1062_v17 }
 0x289   : > { %v4022_v24 = vpop.f32.mrf.mxu0  ;;  %12312 = vst [vmem:[#allocation190_spill] sm:$0xff] %v9302_v7 }
 0x28a   : > { %v4023_v3 = vadd.f32 %v4022_v24, %v8866_v36  ;;  %v4250_v22 = vpop.f32.mrf.mxu3  ;;  %v1064_v36 = vrot.slane %v1002_v48, 4  ;;  %v1191_v24 = vrot.slane %v1128_v28, 5 }
 0x28b   : > { %v9299_v5 = vadd.f32 %v4250_v22, %v4174_v52  ;;  %v4099_v4 = vpop.f32.mrf.mxu1 }
 0x28c   : > { %4317 = vmatmul.f32.gmra.mxu0 %v9293_v38  ;;  %4471 = vmatmul.f32.gmra.mxu2 %v9296_v33  ;;  %v4100_v52 = vadd.f32 %v4099_v4, %v4023_v3  ;;  %v1193_v38 = vrot.slane %v1129_v57, 5  ;;  %v2782_v33 = vld [vmem:[%s7698_s25 + $0x58] sm:$0xff]  ;;  %v9314_v63 = vsel %vm899_vm3, %v1060_v40, %v1064_v36  ;;  %v9317_v28 = vsel %vm1152_vm4, %v1187_v54, %v1191_v24  ;;  %v2033_v4 = vld [vmem:[#allocation2 + $0xc0] sm:$0xf0]  ;;  %v3293_v40 = vld [vmem:[%s7698_s25 + $0x1050] sm:$0xff] }
 0x28d   : > { %12314 = vst [vmem:[#allocation192_spill] sm:$0xff] %v9314_v63  ;;  %4749 = vmatpush.msra.mxu2 %v2782_v33  ;;  %v2814_v36 = vld [vmem:[%s7698_s25 + $0x158] sm:$0xff]  ;;  %v3325_v33 = vld [vmem:[%s7698_s25 + $0x1150] sm:$0xff]  ;;  %v2077_v24 = vrot.slane %v2033_v4, 4  ;;  %4595 = vmatpush.msra.mxu0 %v3293_v40 }
 0x28e   : > { %4394 = vmatmul.f32.gmra.mxu1 %v9302_v7  ;;  %12315 = vst [vmem:[#allocation193_spill] sm:$0xff] %v9317_v28  ;;  %v9332_v54 = vsel %vm1152_vm4, %v1189_v13, %v1193_v38  ;;  %4826 = vmatpush.msra.mxu3 %v2814_v36  ;;  %v2037_v36 = vld [vmem:[#allocation2 + $0x190] sm:$0xff] }
 0x28f   : > { %4548 = vmatmul.f32.gmra.mxu3 %v9308_v29  ;;  %v4176_v2 = vpop.f32.mrf.mxu2  ;;  %12317 = vst [vmem:[#allocation195_spill] sm:$0xff] %v9332_v54  ;;  %v2204_v29 = vrot.slane %v9320_v23, 5  ;;  %4672 = vmatpush.msra.mxu1 %v3325_v33  ;;  %v2780_v33 = vld [vmem:[%s7698_s25 + $0x48] sm:$0xff] }
 0x290   : > { %v4177_v22 = vadd.f32 %v4176_v2, %v4100_v52  ;;  %v9325_v2 = vsel %vm899_vm3, %v1062_v17, %v1066_v55  ;;  %v2160_v17 = vld [vmem:[#allocation2 + $0x140] sm:$0xe0]  ;;  %4750 = vmatpush.msra.mxu2 %v2780_v33 }
 0x291   : > { %v4025_v46 = vpop.f32.mrf.mxu0  ;;  %12316 = vst [vmem:[#allocation194_spill] sm:$0xff] %v9325_v2  ;;  %v2206_v4 = vrot.slane %v2160_v17, 5  ;;  %v2083_v17 = vrot.slane %v2037_v36, 4  ;;  %v2039_v33 = vld [vmem:[#allocation2 + $0x60] sm:$0xff] }
 0x292   : > { %v4026_v48 = vadd.f32 %v4025_v46, %v8890_v9  ;;  %v4253_v3 = vpop.f32.mrf.mxu3  ;;  %v2034_v9 = vld [vmem:[#allocation2 + $0x140] sm:$0xf0]  ;;  %v2036_v46 = vld [vmem:[#allocation2 + $0x168] sm:$0xff] }
 0x293   : > { %v9322_v52 = vadd.f32 %v4253_v3, %v4177_v22  ;;  %v4102_v57 = vpop.f32.mrf.mxu1  ;;  %v2078_v22 = vrot.slane %v9320_v23, 4  ;;  %v2203_v3 = vrot.slane %v2159_v50, 5  ;;  %v2080_v13 = vrot.slane %v2034_v9, 4 }
 0x294   : > { %4320 = vmatmul.f32.gmra.mxu0 %v9314_v63  ;;  %4474 = vmatmul.f32.gmra.mxu2 %v9317_v28  ;;  %v4103_v55 = vadd.f32 %v4102_v57, %v4026_v48  ;;  %v2081_v38 = vrot.slane %v2036_v46, 4  ;;  %v2207_v7 = vrot.slane %v2036_v46, 5 }
 0x295   : > { %v9340_v23 = vsel %vm899_vm3, %v2077_v24, %v2078_v22  ;;  %v9343_v48 = vsel %vm1152_vm4, %v2203_v3, %v2204_v29  ;;  %v2038_v24 = vld [vmem:[#allocation2 + $0x38] sm:$0xff]  ;;  %v3291_v3 = vld [vmem:[%s7698_s25 + $0x1040] sm:$0xff] }
 0x296   : > { %4397 = vmatmul.f32.gmra.mxu1 %v9325_v2  ;;  %12318 = vst [vmem:[#allocation196_spill] sm:$0xff] %v9340_v23  ;;  %v9355_v46 = vsel %vm1152_vm4, %v2206_v4, %v2207_v7  ;;  %4596 = vmatpush.msra.mxu0 %v3291_v3  ;;  %v2211_v4 = vrot.slane %v2038_v24, 5  ;;  %v9363_v2 = vsel %vm899_vm3, %v2078_v22, %v2083_v17 }
 0x297   : > { %4551 = vmatmul.f32.gmra.mxu3 %v9332_v54  ;;  %v4179_v28 = vpop.f32.mrf.mxu2  ;;  %12319 = vst [vmem:[#allocation197_spill] sm:$0xff] %v9343_v48 }
 0x298   : > { %v4180_v63 = vadd.f32 %v4179_v28, %v4103_v55  ;;  %v9349_v28 = vsel %vm899_vm3, %v2080_v13, %v2081_v38  ;;  %12321 = vst [vmem:[#allocation199_spill] sm:$0xff] %v9355_v46  ;;  %v2209_v55 = vrot.slane %v2037_v36, 5  ;;  %v9377_v22 = vsel %vm1152_vm4, %v2207_v7, %v2211_v4  ;;  %v3321_v7 = vld [vmem:[%s7698_s25 + $0x1130] sm:$0xff] }
 0x299   : > { %v4028_v50 = vpop.f32.mrf.mxu0  ;;  %12320 = vst [vmem:[#allocation198_spill] sm:$0xff] %v9349_v28 }
 0x29a   : > { %v4029_v57 = vadd.f32 %v4028_v50, %v8913_v12  ;;  %v4256_v40 = vpop.f32.mrf.mxu3  ;;  %v2812_v12 = vld [vmem:[%s7698_s25 + $0x148] sm:$0xff]  ;;  %v2085_v50 = vrot.slane %v2038_v24, 4  ;;  %12322 = vst [vmem:[#allocation200_spill] sm:$0xff] %v9363_v2  ;;  %v9366_v36 = vsel %vm1152_vm4, %v2204_v29, %v2209_v55  ;;  %v2040_v29 = vld [vmem:[#allocation2 + $0x18] sm:$0xff]  ;;  %v2213_v24 = vrot.slane %v2039_v33, 5 }
 0x29b   : > { %v9346_v54 = vadd.f32 %v4256_v40, %v4180_v63  ;;  %v4105_v9 = vpop.f32.mrf.mxu1  ;;  %4827 = vmatpush.msra.mxu3 %v2812_v12  ;;  %v3323_v40 = vld [vmem:[%s7698_s25 + $0x1140] sm:$0xff]  ;;  %12323 = vst [vmem:[#allocation201_spill] sm:$0xff] %v9366_v36 }
 0x29c   : > { %4323 = vmatmul.f32.gmra.mxu0 %v9340_v23  ;;  %4477 = vmatmul.f32.gmra.mxu2 %v9343_v48  ;;  %v4106_v63 = vadd.f32 %v4105_v9, %v4029_v57  ;;  %12325 = vst [vmem:[#allocation203_spill] sm:$0xff] %v9377_v22 }
 0x29d   : > { %4673 = vmatpush.msra.mxu1 %v3323_v40  ;;  %v3289_v40 = vld [vmem:[%s7698_s25 + $0x1030] sm:$0xff] }
 0x29e   : > { %4400 = vmatmul.f32.gmra.mxu1 %v9349_v28  ;;  %4597 = vmatpush.msra.mxu0 %v3289_v40  ;;  %v2776_v40 = vld [vmem:[%s7698_s25 + $0x28] sm:$0xff] }
 0x29f   : > { %4554 = vmatmul.f32.gmra.mxu3 %v9355_v46  ;;  %v4182_v13 = vpop.f32.mrf.mxu2  ;;  %4674 = vmatpush.msra.mxu1 %v3321_v7 }
 0x2a0   : > { %v4183_v48 = vadd.f32 %v4182_v13, %v4106_v63  ;;  %v9372_v63 = vsel %vm899_vm3, %v2081_v38, %v2085_v50  ;;  %v2089_v13 = vrot.slane %v2040_v29, 4 }
 0x2a1   : > { %v4031_v23 = vpop.f32.mrf.mxu0  ;;  %12324 = vst [vmem:[#allocation202_spill] sm:$0xff] %v9372_v63 }
 0x2a2   : > { %v4032_v57 = vadd.f32 %v4031_v23, %v8936_v6  ;;  %v4259_v9 = vpop.f32.mrf.mxu3  ;;  %v2778_v6 = vld [vmem:[%s7698_s25 + $0x38] sm:$0xff]  ;;  %v2087_v23 = vrot.slane %v2039_v33, 4  ;;  %v9389_v33 = vsel %vm1152_vm4, %v2209_v55, %v2213_v24  ;;  %v2042_v55 = vld [vmem:[#allocation2 + $0x120] sm:$0xff] }
 0x2a3   : > { %v9369_v3 = vadd.f32 %v4259_v9, %v4183_v48  ;;  %v4108_v12 = vpop.f32.mrf.mxu1  ;;  %4751 = vmatpush.msra.mxu2 %v2778_v6  ;;  %v2810_v9 = vld [vmem:[%s7698_s25 + $0x138] sm:$0xff]  ;;  %12327 = vst [vmem:[#allocation205_spill] sm:$0xff] %v9389_v33  ;;  %v2219_v7 = vrot.slane %v2042_v55, 5 }
 0x2a4   : > { %4326 = vmatmul.f32.gmra.mxu0 %v9363_v2  ;;  %4480 = vmatmul.f32.gmra.mxu2 %v9366_v36  ;;  %v4109_v48 = vadd.f32 %v4108_v12, %v4032_v57  ;;  %v2215_v36 = vrot.slane %v2040_v29, 5  ;;  %v9386_v28 = vsel %vm899_vm3, %v2083_v17, %v2087_v23  ;;  %v2041_v6 = vld [vmem:[#allocation2 + $0x158] sm:$0xff]  ;;  %v9395_v29 = vsel %vm899_vm3, %v2085_v50, %v2089_v13 }
 0x2a5   : > { %4828 = vmatpush.msra.mxu3 %v2810_v9  ;;  %12326 = vst [vmem:[#allocation204_spill] sm:$0xff] %v9386_v28  ;;  %v2093_v50 = vrot.slane %v2042_v55, 4  ;;  %4752 = vmatpush.msra.mxu2 %v2776_v40 }
 0x2a6   : > { %4403 = vmatmul.f32.gmra.mxu1 %v9372_v63  ;;  %12328 = vst [vmem:[#allocation206_spill] sm:$0xff] %v9395_v29  ;;  %v9400_v17 = vsel %vm1152_vm4, %v2211_v4, %v2215_v36 }
 0x2a7   : > { %4557 = vmatmul.f32.gmra.mxu3 %v9377_v22  ;;  %v4185_v38 = vpop.f32.mrf.mxu2  ;;  %12329 = vst [vmem:[#allocation207_spill] sm:$0xff] %v9400_v17  ;;  %v9417_v55 = vsel %vm899_vm3, %v2089_v13, %v2093_v50 }
 0x2a8   : > { %v4186_v46 = vadd.f32 %v4185_v38, %v4109_v48  ;;  %12332 = vst [vmem:[#allocation210_spill] sm:$0xff] %v9417_v55 }
 0x2a9   : > { %v4034_v2 = vpop.f32.mrf.mxu0 }
 0x2aa   : > { %v4035_v57 = vadd.f32 %v4034_v2, %v8958_v0  ;;  %v4262_v12 = vpop.f32.mrf.mxu3  ;;  %v2091_v0 = vrot.slane %v2041_v6, 4  ;;  %v2217_v2 = vrot.slane %v2041_v6, 5 }
 0x2ab   : > { %v9392_v22 = vadd.f32 %v4262_v12, %v4186_v46  ;;  %v4111_v48 = vpop.f32.mrf.mxu1  ;;  %v3287_v12 = vld [vmem:[%s7698_s25 + $0x1020] sm:$0xff] }
 0x2ac   : > { %4329 = vmatmul.f32.gmra.mxu0 %v9386_v28  ;;  %4483 = vmatmul.f32.gmra.mxu2 %v9389_v33  ;;  %v4112_v38 = vadd.f32 %v4111_v48, %v4035_v57  ;;  %v2808_v33 = vld [vmem:[%s7698_s25 + $0x128] sm:$0xff]  ;;  %v9408_v4 = vsel %vm899_vm3, %v2087_v23, %v2091_v0  ;;  %v9411_v6 = vsel %vm1152_vm4, %v2213_v24, %v2217_v2 }
 0x2ad   : > { %12330 = vst [vmem:[#allocation208_spill] sm:$0xff] %v9408_v4  ;;  %4598 = vmatpush.msra.mxu0 %v3287_v12  ;;  %4829 = vmatpush.msra.mxu3 %v2808_v33  ;;  %v9423_v23 = vsel %vm1152_vm4, %v2215_v36, %v2219_v7  ;;  %v2044_v24 = vld [vmem:[#allocation2 + $0x68] sm:$0xff] }
 0x2ae   : > { %4406 = vmatmul.f32.gmra.mxu1 %v9395_v29  ;;  %12331 = vst [vmem:[#allocation209_spill] sm:$0xff] %v9411_v6  ;;  %v2097_v40 = vrot.slane %v2044_v24, 4  ;;  %v2223_v12 = vrot.slane %v2044_v24, 5  ;;  %v3285_v24 = vld [vmem:[%s7698_s25 + $0x1010] sm:$0xff] }
 0x2af   : > { %4560 = vmatmul.f32.gmra.mxu3 %v9400_v17  ;;  %v4188_v46 = vpop.f32.mrf.mxu2  ;;  %v2043_v17 = vld [vmem:[#allocation2 + $0x198] sm:$0xff]  ;;  %12333 = vst [vmem:[#allocation211_spill] sm:$0xff] %v9423_v23  ;;  %4599 = vmatpush.msra.mxu0 %v3285_v24 }
 0x2b0   : > { %v4189_v9 = vadd.f32 %v4188_v46, %v4112_v38  ;;  %v3319_v46 = vld [vmem:[%s7698_s25 + $0x1120] sm:$0xff]  ;;  %v2095_v33 = vrot.slane %v2043_v17, 4  ;;  %v2047_v24 = vld [vmem:[#allocation2 + $0xf8] sm:$0xff] }
 0x2b1   : > { %v4037_v28 = vpop.f32.mrf.mxu0  ;;  %4675 = vmatpush.msra.mxu1 %v3319_v46  ;;  %v2045_v46 = vld [vmem:[#allocation2 + $0x30] sm:$0xff] }
 0x2b2   : > { %v4038_v57 = vadd.f32 %v4037_v28, %v8979_v44  ;;  %v4265_v48 = vpop.f32.mrf.mxu3  ;;  %v2221_v44 = vrot.slane %v2043_v17, 5  ;;  %v9429_v36 = vsel %vm899_vm3, %v2091_v0, %v2095_v33  ;;  %v9445_v0 = vsel %vm1152_vm4, %v2219_v7, %v2223_v12 }
 0x2b3   : > { %v9414_v29 = vadd.f32 %v4265_v48, %v4189_v9  ;;  %v4114_v38 = vpop.f32.mrf.mxu1  ;;  %v2774_v48 = vld [vmem:[%s7698_s25 + $0x18] sm:$0xff]  ;;  %12334 = vst [vmem:[#allocation212_spill] sm:$0xff] %v9429_v36 }
 0x2b4   : > { %4332 = vmatmul.f32.gmra.mxu0 %v9408_v4  ;;  %4486 = vmatmul.f32.gmra.mxu2 %v9411_v6  ;;  %v4115_v28 = vadd.f32 %v4114_v38, %v4038_v57  ;;  %v9432_v17 = vsel %vm1152_vm4, %v2217_v2, %v2221_v44  ;;  %12337 = vst [vmem:[#allocation215_spill] sm:$0xff] %v9445_v0  ;;  %v2046_v2 = vld [vmem:[#allocation2 + $0xc8] sm:$0xff] }
 0x2b5   : > { %12335 = vst [vmem:[#allocation213_spill] sm:$0xff] %v9432_v17  ;;  %4753 = vmatpush.msra.mxu2 %v2774_v48  ;;  %v3317_v48 = vld [vmem:[%s7698_s25 + $0x1110] sm:$0xff] }
 0x2b6   : > { %4409 = vmatmul.f32.gmra.mxu1 %v9417_v55 }
 0x2b7   : > { %4563 = vmatmul.f32.gmra.mxu3 %v9423_v23  ;;  %v4191_v13 = vpop.f32.mrf.mxu2  ;;  %4676 = vmatpush.msra.mxu1 %v3317_v48 }
 0x2b8   : > { %v4192_v9 = vadd.f32 %v4191_v13, %v4115_v28  ;;  %v9438_v28 = vsel %vm899_vm3, %v2093_v50, %v2097_v40  ;;  %v2806_v13 = vld [vmem:[%s7698_s25 + $0x118] sm:$0xff] }
 0x2b9   : > { %v4040_v6 = vpop.f32.mrf.mxu0  ;;  %12336 = vst [vmem:[#allocation214_spill] sm:$0xff] %v9438_v28  ;;  %4830 = vmatpush.msra.mxu3 %v2806_v13 }
 0x2ba   : > { %v4041_v57 = vadd.f32 %v4040_v6, %v9001_v26  ;;  %v4268_v38 = vpop.f32.mrf.mxu3  ;;  %v2099_v26 = vrot.slane %v2045_v46, 4  ;;  %v2225_v6 = vrot.slane %v2045_v46, 5 }
 0x2bb   : > { %v9435_v23 = vadd.f32 %v4268_v38, %v4192_v9  ;;  %v4117_v55 = vpop.f32.mrf.mxu1  ;;  %v2101_v38 = vrot.slane %v2046_v2, 4 }
 0x2bc   : > { %4335 = vmatmul.f32.gmra.mxu0 %v9429_v36  ;;  %4489 = vmatmul.f32.gmra.mxu2 %v9432_v17  ;;  %v4118_v9 = vadd.f32 %v4117_v55, %v4041_v57  ;;  %v2227_v17 = vrot.slane %v2046_v2, 5  ;;  %v9451_v4 = vsel %vm899_vm3, %v2095_v33, %v2099_v26  ;;  %v9454_v46 = vsel %vm1152_vm4, %v2221_v44, %v2225_v6  ;;  %v2048_v44 = vld [vmem:[#allocation2 + $0x28] sm:$0xff]  ;;  %v3283_v2 = vld [vmem:[%s7698_s25 + $0x1000] sm:$0xff] }
 0x2bd   : > { %12338 = vst [vmem:[#allocation216_spill] sm:$0xff] %v9451_v4  ;;  %v9460_v48 = vsel %vm899_vm3, %v2097_v40, %v2101_v38  ;;  %4600 = vmatpush.msra.mxu0 %v3283_v2 }
 0x2be   : > { %4412 = vmatmul.f32.gmra.mxu1 %v9438_v28  ;;  %12339 = vst [vmem:[#allocation217_spill] sm:$0xff] %v9454_v46  ;;  %v9466_v33 = vsel %vm1152_vm4, %v2223_v12, %v2227_v17  ;;  %v2231_v12 = vrot.slane %v2048_v44, 5 }
 0x2bf   : > { %4566 = vmatmul.f32.gmra.mxu3 %v9445_v0  ;;  %v4194_v50 = vpop.f32.mrf.mxu2  ;;  %12340 = vst [vmem:[#allocation218_spill] sm:$0xff] %v9460_v48 }
 0x2c0   : > { %v4195_v36 = vadd.f32 %v4194_v50, %v4118_v9  ;;  %v2772_v9 = vld [vmem:[%s7698_s25 + $0x8] sm:$0xff]  ;;  %12341 = vst [vmem:[#allocation219_spill] sm:$0xff] %v9466_v33  ;;  %v2103_v50 = vrot.slane %v2047_v24, 4 }
 0x2c1   : > { %v4043_v7 = vpop.f32.mrf.mxu0  ;;  %4754 = vmatpush.msra.mxu2 %v2772_v9  ;;  %v2049_v9 = vld [vmem:[#allocation2 + $0x8] sm:$0xff] }
 0x2c2   : > { %v4044_v55 = vadd.f32 %v4043_v7, %v9024_v31  ;;  %v4271_v57 = vpop.f32.mrf.mxu3  ;;  %v2804_v31 = vld [vmem:[%s7698_s25 + $0x108] sm:$0xff]  ;;  %v2229_v7 = vrot.slane %v2047_v24, 5  ;;  %v9474_v63 = vsel %vm899_vm3, %v2099_v26, %v2103_v50  ;;  %v2050_v26 = vld [vmem:[#allocation2 + $0x80] sm:$0xff] }
 0x2c3   : > { %v9457_v13 = vadd.f32 %v4271_v57, %v4195_v36  ;;  %v4120_v0 = vpop.f32.mrf.mxu1  ;;  %4831 = vmatpush.msra.mxu3 %v2804_v31  ;;  %v2105_v57 = vrot.slane %v2048_v44, 4  ;;  %12342 = vst [vmem:[#allocation220_spill] sm:$0xff] %v9474_v63  ;;  %v2109_v44 = vrot.slane %v2050_v26, 4 }
 0x2c4   : > { %4338 = vmatmul.f32.gmra.mxu0 %v9451_v4  ;;  %4492 = vmatmul.f32.gmra.mxu2 %v9454_v46  ;;  %v4121_v36 = vadd.f32 %v4120_v0, %v4044_v55  ;;  %v3315_v4 = vld [vmem:[%s7698_s25 + $0x1100] sm:$0xff]  ;;  %v9477_v24 = vsel %vm1152_vm4, %v2225_v6, %v2229_v7  ;;  %v2930_v6 = vld [vmem:[%s7698_s25 + $0x4f8] sm:$0xff] }
 0x2c5   : > { %4677 = vmatpush.msra.mxu1 %v3315_v4  ;;  %12343 = vst [vmem:[#allocation221_spill] sm:$0xff] %v9477_v24  ;;  %v9488_v4 = vsel %vm1152_vm4, %v2227_v17, %v2231_v12  ;;  %5047 = vmatpush.msrb.mxu2 %v2930_v6  ;;  %v2898_v17 = vld [vmem:[%s7698_s25 + $0x3f8] sm:$0xff] }
 0x2c6   : > { %4415 = vmatmul.f32.gmra.mxu1 %v9460_v48  ;;  %12345 = vst [vmem:[#allocation223_spill] sm:$0xff] %v9488_v4  ;;  %v2051_v6 = vld [vmem:[#allocation2 + $0x98] sm:$0xff] }
 0x2c7   : > { %4569 = vmatmul.f32.gmra.mxu3 %v9466_v33  ;;  %v4197_v40 = vpop.f32.mrf.mxu2  ;;  %4970 = vmatpush.msrb.mxu1 %v2898_v17 }
 0x2c8   : > { %v4198_v46 = vadd.f32 %v4197_v40, %v4121_v36  ;;  %v9483_v36 = vsel %vm899_vm3, %v2101_v38, %v2105_v57  ;;  %v2866_v40 = vld [vmem:[%s7698_s25 + $0x2f8] sm:$0xff] }
 0x2c9   : > { %v4294_v28 = vpop.f32.mrf.mxu0  ;;  %12344 = vst [vmem:[#allocation222_spill] sm:$0xff] %v9483_v36  ;;  %4893 = vmatpush.msrb.mxu0 %v2866_v40  ;;  %v2928_v40 = vld [vmem:[%s7698_s25 + $0x4e8] sm:$0xff] }
 0x2ca   : > { %v4274_v0 = vpop.f32.mrf.mxu3  ;;  %v4295_v55 = vadd.f32 %v4294_v28, %v9047_v10  ;;  %v2107_v10 = vrot.slane %v2049_v9, 4  ;;  %v2233_v28 = vrot.slane %v2049_v9, 5  ;;  %5048 = vmatpush.msrb.mxu2 %v2928_v40  ;;  %v2896_v40 = vld [vmem:[%s7698_s25 + $0x3e8] sm:$0xff] }
 0x2cb   : > { %v9480_v2 = vadd.f32 %v4274_v0, %v4198_v46  ;;  %v4371_v31 = vpop.f32.mrf.mxu1  ;;  %v2962_v0 = vld [vmem:[%s7698_s25 + $0x5f8] sm:$0xff]  ;;  %4971 = vmatpush.msrb.mxu1 %v2896_v40  ;;  %v1237_v40 = vld [vmem:[#allocation2 + $0x40] sm:$0xff] }
 0x2cc   : > { %4341 = vmatmul.f32.gmra.mxu0 %v9474_v63  ;;  %4495 = vmatmul.f32.gmra.mxu2 %v9477_v24  ;;  %v4372_v46 = vadd.f32 %v4371_v31, %v4295_v55  ;;  %v2235_v24 = vrot.slane %v2050_v26, 5  ;;  %v9497_v48 = vsel %vm899_vm3, %v2103_v50, %v2107_v10  ;;  %v9500_v9 = vsel %vm1152_vm4, %v2229_v7, %v2233_v28  ;;  %v2052_v7 = vld [vmem:[#allocation2 + $0x150] sm:$0xff] }
 0x2cd   : > { %5124 = vmatpush.msrb.mxu3 %v2962_v0  ;;  %12346 = vst [vmem:[#allocation224_spill] sm:$0xff] %v9497_v48  ;;  %v9506_v26 = vsel %vm899_vm3, %v2105_v57, %v2109_v44  ;;  %v2113_v57 = vrot.slane %v2052_v7, 4  ;;  %v2239_v17 = vrot.slane %v2052_v7, 5 }
 0x2ce   : > { %4418 = vmatmul.f32.gmra.mxu1 %v9483_v36  ;;  %12347 = vst [vmem:[#allocation225_spill] sm:$0xff] %v9500_v9  ;;  %v9511_v50 = vsel %vm1152_vm4, %v2231_v12, %v2235_v24 }
 0x2cf   : > { %4572 = vmatmul.f32.gmra.mxu3 %v9488_v4  ;;  %v4448_v38 = vpop.f32.mrf.mxu2  ;;  %12348 = vst [vmem:[#allocation226_spill] sm:$0xff] %v9506_v26 }
 0x2d0   : > { %v4449_v33 = vadd.f32 %v4448_v38, %v4372_v46  ;;  %12349 = vst [vmem:[#allocation227_spill] sm:$0xff] %v9511_v50 }
 0x2d1   : > { %v4297_v63 = vpop.f32.mrf.mxu0 }
 0x2d2   : > { %v4298_v55 = vadd.f32 %v4297_v63, %v9069_v49  ;;  %v4525_v31 = vpop.f32.mrf.mxu3  ;;  %v2111_v49 = vrot.slane %v2051_v6, 4  ;;  %v2237_v63 = vrot.slane %v2051_v6, 5 }
 0x2d3   : > { %v9503_v4 = vadd.f32 %v4525_v31, %v4449_v33  ;;  %v4374_v46 = vpop.f32.mrf.mxu1  ;;  %v2864_v31 = vld [vmem:[%s7698_s25 + $0x2e8] sm:$0xff] }
 0x2d4   : > { %4344 = vmatmul.f32.gmra.mxu0 %v9497_v48  ;;  %4498 = vmatmul.f32.gmra.mxu2 %v9500_v9  ;;  %v4375_v38 = vadd.f32 %v4374_v46, %v4298_v55  ;;  %v2960_v9 = vld [vmem:[%s7698_s25 + $0x5e8] sm:$0xff]  ;;  %v9519_v12 = vsel %vm899_vm3, %v2107_v10, %v2111_v49  ;;  %v9522_v6 = vsel %vm1152_vm4, %v2233_v28, %v2237_v63  ;;  %v2054_v28 = vld [vmem:[#allocation2 + $0x70] sm:$0xf] }
 0x2d5   : > { %12350 = vst [vmem:[#allocation228_spill] sm:$0xff] %v9519_v12  ;;  %4894 = vmatpush.msrb.mxu0 %v2864_v31  ;;  %5125 = vmatpush.msrb.mxu3 %v2960_v9  ;;  %v9534_v10 = vsel %vm1152_vm4, %v2235_v24, %v2239_v17  ;;  %v2180_v9 = vld [vmem:[#allocation2 + $0x70] sm:$0x1f]  ;;  %v2117_v31 = vrot.slane %v2054_v28, 4 }
 0x2d6   : > { %4421 = vmatmul.f32.gmra.mxu1 %v9506_v26  ;;  %12351 = vst [vmem:[#allocation229_spill] sm:$0xff] %v9522_v6  ;;  %v2179_v26 = vld [vmem:[#allocation2 + $0xe8] sm:$0x1f] }
 0x2d7   : > { %4575 = vmatmul.f32.gmra.mxu3 %v9511_v50  ;;  %v4451_v33 = vpop.f32.mrf.mxu2  ;;  %v2053_v50 = vld [vmem:[#allocation2 + $0xe8] sm:$0xf]  ;;  %12352 = vst [vmem:[#allocation230_spill] sm:$0xff] %v9534_v10 }
 0x2d8   : > { %v4452_v0 = vadd.f32 %v4451_v33, %v4375_v38  ;;  %v9528_v33 = vsel %vm899_vm3, %v2109_v44, %v2113_v57 }
 0x2d9   : > { %v4300_v48 = vpop.f32.mrf.mxu0 }
 0x2da   : > { %v4301_v55 = vadd.f32 %v4300_v48, %v9092_v18  ;;  %v4528_v46 = vpop.f32.mrf.mxu3  ;;  %v2115_v18 = vrot.slane %v2053_v50, 4  ;;  %v2241_v48 = vrot.slane %v2179_v26, 5 }
 0x2db   : > { %v9525_v38 = vadd.f32 %v4528_v46, %v4452_v0  ;;  %v4377_v7 = vpop.f32.mrf.mxu1 }
 0x2dc   : > { %4347 = vmatmul.f32.gmra.mxu0 %v9519_v12  ;;  %4501 = vmatmul.f32.gmra.mxu2 %v9522_v6  ;;  %v4378_v0 = vadd.f32 %v4377_v7, %v4301_v55  ;;  %v2243_v12 = vrot.slane %v2180_v9, 5  ;;  %v2926_v6 = vld [vmem:[%s7698_s25 + $0x4d8] sm:$0xff]  ;;  %v9540_v24 = vsel %vm899_vm3, %v2111_v49, %v2115_v18  ;;  %v9543_v26 = vsel %vm1152_vm4, %v2237_v63, %v2241_v48  ;;  %v1235_v7 = vld [vmem:[#allocation2 + $0x160] sm:$0xc0]  ;;  %v1236_v63 = vld [vmem:[#allocation2 + $0x128] sm:$0xc0] }
 0x2dd   : > { %12353 = vst [vmem:[#allocation231_spill] sm:$0xff] %v9543_v26  ;;  %5049 = vmatpush.msrb.mxu2 %v2926_v6  ;;  %v9549_v9 = vsel %vm899_vm3, %v2113_v57, %v2117_v31  ;;  %v1280_v6 = vrot.slane %v1235_v7, 6  ;;  %v1281_v18 = vrot.slane %v1237_v40, 6  ;;  %v1283_v31 = vrot.slane %v1236_v63, 6  ;;  %v1239_v40 = vld [vmem:[#allocation2 + $0x108] sm:$0xff] }
 0x2de   : > { %4424 = vmatmul.f32.gmra.mxu1 %v9528_v33  ;;  %v9556_v49 = vsel %vm1152_vm4, %v2239_v17, %v2243_v12  ;;  %v2924_v63 = vld [vmem:[%s7698_s25 + $0x4c8] sm:$0xff] }
 0x2df   : > { %4578 = vmatmul.f32.gmra.mxu3 %v9534_v10  ;;  %v4454_v44 = vpop.f32.mrf.mxu2  ;;  %12354 = vst [vmem:[#allocation232_spill] sm:$0xff] %v9556_v49  ;;  %5050 = vmatpush.msrb.mxu2 %v2924_v63 }
 0x2e0   : > { %v4455_v46 = vadd.f32 %v4454_v44, %v4378_v0  ;;  %v2862_v0 = vld [vmem:[%s7698_s25 + $0x2d8] sm:$0xff] }
 0x2e1   : > { %v4303_v36 = vpop.f32.mrf.mxu0  ;;  %v2958_v44 = vld [vmem:[%s7698_s25 + $0x5d8] sm:$0xff]  ;;  %4895 = vmatpush.msrb.mxu0 %v2862_v0 }
 0x2e2   : > { %v4304_v50 = vadd.f32 %v4303_v36, %v9120_v8  ;;  %v4531_v55 = vpop.f32.mrf.mxu3  ;;  %v1238_v8 = vld [vmem:[#allocation2 + $0x178] sm:$0xff]  ;;  %5126 = vmatpush.msrb.mxu3 %v2958_v44 }
 0x2e3   : > { %v9546_v10 = vadd.f32 %v4531_v55, %v4455_v46  ;;  %v4380_v28 = vpop.f32.mrf.mxu1  ;;  %v2894_v36 = vld [vmem:[%s7698_s25 + $0x3d8] sm:$0xff]  ;;  %v1284_v46 = vrot.slane %v1238_v8, 6  ;;  %v9562_v55 = vsel %vm1279_vm5, %v1280_v6, %v1281_v18  ;;  %v7438_v8 = vld [vmem:[#allocation2 + $0xb0] sm:$0xff]  ;;  %v2956_v6 = vld [vmem:[%s7698_s25 + $0x5c8] sm:$0xff] }
 0x2e4   : > { %4350 = vmatmul.f32.gmra.mxu0 %v9540_v24  ;;  %4504 = vmatmul.f32.gmra.mxu2 %v9543_v26  ;;  %v4381_v48 = vadd.f32 %v4380_v28, %v4304_v50  ;;  %12355 = vst [vmem:[#allocation233_spill] sm:$0xff] %v9562_v55 }
 0x2e5   : > { %4972 = vmatpush.msrb.mxu1 %v2894_v36  ;;  %v9568_v44 = vsel %vm1279_vm5, %v1283_v31, %v1284_v46  ;;  %v1240_v36 = vld [vmem:[#allocation2 + $0x110] sm:$0xff]  ;;  %5127 = vmatpush.msrb.mxu3 %v2956_v6 }
 0x2e6   : > { %4427 = vmatmul.f32.gmra.mxu1 %v9549_v9  ;;  %12356 = vst [vmem:[#allocation234_spill] sm:$0xff] %v9568_v44 }
 0x2e7   : > { %4581 = vmatmul.f32.gmra.mxu3 %v9556_v49  ;;  %v4457_v57 = vpop.f32.mrf.mxu2 }
 0x2e8   : > { %v4458_v17 = vadd.f32 %v4457_v57, %v4381_v48  ;;  %v2860_v48 = vld [vmem:[%s7698_s25 + $0x2c8] sm:$0xff]  ;;  %v1286_v57 = vrot.slane %v1239_v40, 6 }
 0x2e9   : > { %v4306_v12 = vpop.f32.mrf.mxu0  ;;  %4896 = vmatpush.msrb.mxu0 %v2860_v48  ;;  %v1241_v48 = vld [vmem:[#allocation2 + $0x90] sm:$0xff] }
 0x2ea   : > { %v4307_v7 = vadd.f32 %v4306_v12, %v9143_v42  ;;  %v4534_v50 = vpop.f32.mrf.mxu3  ;;  %v1288_v12 = vrot.slane %v1240_v36, 6  ;;  %v7440_v36 = vld [vmem:[#allocation2 + $0x10] sm:$0xff] }
 0x2eb   : > { %v9565_v28 = vadd.f32 %v4534_v50, %v4458_v17  ;;  %v4383_v0 = vpop.f32.mrf.mxu1  ;;  %v7439_v17 = vld [vmem:[#allocation2 + $0xd0] sm:$0xff]  ;;  %v2892_v50 = vld [vmem:[%s7698_s25 + $0x3c8] sm:$0xff] }
 0x2ec   : > { %4601 = vmatmul.f32.vlgmr.msra.gmra.mxu0 %v9562_v55  ;;  %4755 = vmatmul.f32.vlgmr.msra.gmra.mxu2 %v7438_v8  ;;  %v4384_v42 = vadd.f32 %v4383_v0, %v4307_v7  ;;  %v9577_v8 = vsel %vm1279_vm5, %v1281_v18, %v1286_v57  ;;  %v9583_v6 = vsel %vm1279_vm5, %v1284_v46, %v1288_v12  ;;  %v2922_v18 = vld [vmem:[%s7698_s25 + $0x4b8] sm:$0xff] }
 0x2ed   : > { %4973 = vmatpush.msrb.mxu1 %v2892_v50  ;;  %12357 = vst [vmem:[#allocation235_spill] sm:$0xff] %v9577_v8  ;;  %5051 = vmatpush.msrb.mxu2 %v2922_v18  ;;  %v2858_v50 = vld [vmem:[%s7698_s25 + $0x2b8] sm:$0xff] }
 0x2ee   : > { %4678 = vmatmul.f32.vlgmr.msra.gmra.mxu1 %v9568_v44  ;;  %12358 = vst [vmem:[#allocation236_spill] sm:$0xff] %v9583_v6  ;;  %4897 = vmatpush.msrb.mxu0 %v2858_v50 }
 0x2ef   : > { %4832 = vmatmul.f32.vlgmr.msra.gmra.mxu3 %v7439_v17  ;;  %v4460_v31 = vpop.f32.mrf.mxu2  ;;  %v1290_v17 = vrot.slane %v1241_v48, 6 }
 0x2f0   : > { %v4461_v49 = vadd.f32 %v4460_v31, %v4384_v42  ;;  %v1242_v42 = vld [vmem:[#allocation2 + $0x118] sm:$0xff] }
 0x2f1   : > { %v4309_v26 = vpop.f32.mrf.mxu0  ;;  %v1292_v31 = vrot.slane %v1242_v42, 6 }
 0x2f2   : > { %v4310_v40 = vadd.f32 %v4309_v26, %v9166_v56  ;;  %v4537_v63 = vpop.f32.mrf.mxu3  ;;  %v7441_v26 = vld [vmem:[#allocation2 + $0x48] sm:$0xff] }
 0x2f3   : > { %v9580_v7 = vadd.f32 %v4537_v63, %v4461_v49  ;;  %v4386_v0 = vpop.f32.mrf.mxu1  ;;  %v2954_v63 = vld [vmem:[%s7698_s25 + $0x5b8] sm:$0xff]  ;;  %v9598_v42 = vsel %vm1279_vm5, %v1288_v12, %v1292_v31  ;;  %v2856_v12 = vld [vmem:[%s7698_s25 + $0x2a8] sm:$0xff] }
 0x2f4   : > { %4604 = vmatmul.f32.gmra.mxu0 %v9577_v8  ;;  %4758 = vmatmul.f32.gmra.mxu2 %v7440_v36  ;;  %v4387_v56 = vadd.f32 %v4386_v0, %v4310_v40  ;;  %v2890_v8 = vld [vmem:[%s7698_s25 + $0x3b8] sm:$0xff]  ;;  %v9592_v36 = vsel %vm1279_vm5, %v1286_v57, %v1290_v17  ;;  %v1243_v0 = vld [vmem:[#allocation2 + $0x148] sm:$0xff]  ;;  %12360 = vst [vmem:[#allocation238_spill] sm:$0xff] %v9598_v42  ;;  %v1244_v57 = vld [vmem:[#allocation2 + $0x100] sm:$0xff] }
 0x2f5   : > { %5128 = vmatpush.msrb.mxu3 %v2954_v63  ;;  %12359 = vst [vmem:[#allocation237_spill] sm:$0xff] %v9592_v36  ;;  %4974 = vmatpush.msrb.mxu1 %v2890_v8  ;;  %v1296_v50 = vrot.slane %v1244_v57, 6  ;;  %v2920_v63 = vld [vmem:[%s7698_s25 + $0x4a8] sm:$0xff] }
 0x2f6   : > { %4681 = vmatmul.f32.gmra.mxu1 %v9583_v6  ;;  %5052 = vmatpush.msrb.mxu2 %v2920_v63 }
 0x2f7   : > { %4835 = vmatmul.f32.gmra.mxu3 %v7441_v26  ;;  %v4463_v49 = vpop.f32.mrf.mxu2  ;;  %4898 = vmatpush.msrb.mxu0 %v2856_v12  ;;  %v9612_v57 = vsel %vm1279_vm5, %v1292_v31, %v1296_v50  ;;  %v2918_v31 = vld [vmem:[%s7698_s25 + $0x498] sm:$0xff] }
 0x2f8   : > { %v4464_v46 = vadd.f32 %v4463_v49, %v4387_v56  ;;  %v7442_v56 = vld [vmem:[#allocation2 + $0x160] sm:$0xff]  ;;  %v1294_v49 = vrot.slane %v1243_v0, 6  ;;  %12362 = vst [vmem:[#allocation240_spill] sm:$0xff] %v9612_v57  ;;  %5053 = vmatpush.msrb.mxu2 %v2918_v31 }
 0x2f9   : > { %v4312_v44 = vpop.f32.mrf.mxu0 }
 0x2fa   : > { %v4313_v48 = vadd.f32 %v4312_v44, %v9188_v25  ;;  %v4540_v40 = vpop.f32.mrf.mxu3  ;;  %v7443_v25 = vld [vmem:[#allocation2 + $0x128] sm:$0xff] }
 0x2fb   : > { %v9595_v18 = vadd.f32 %v4540_v40, %v4464_v46  ;;  %v4389_v26 = vpop.f32.mrf.mxu1  ;;  %v2952_v40 = vld [vmem:[%s7698_s25 + $0x5a8] sm:$0xff] }
 0x2fc   : > { %4607 = vmatmul.f32.gmra.mxu0 %v9592_v36  ;;  %4761 = vmatmul.f32.gmra.mxu2 %v7442_v56  ;;  %v4390_v8 = vadd.f32 %v4389_v26, %v4313_v48  ;;  %v9606_v36 = vsel %vm1279_vm5, %v1290_v17, %v1294_v49  ;;  %v1245_v26 = vld [vmem:[#allocation2 + $0x58] sm:$0xff] }
 0x2fd   : > { %12361 = vst [vmem:[#allocation239_spill] sm:$0xff] %v9606_v36  ;;  %5129 = vmatpush.msrb.mxu3 %v2952_v40  ;;  %v1246_v17 = vld [vmem:[#allocation2 + $0xd8] sm:$0xff]  ;;  %v1298_v63 = vrot.slane %v1245_v26, 6 }
 0x2fe   : > { %4684 = vmatmul.f32.gmra.mxu1 %v9598_v42 }
 0x2ff   : > { %4838 = vmatmul.f32.gmra.mxu3 %v7443_v25  ;;  %v4466_v44 = vpop.f32.mrf.mxu2 }
 0x300   : > { %v4467_v46 = vadd.f32 %v4466_v44, %v4390_v8  ;;  %v2888_v8 = vld [vmem:[%s7698_s25 + $0x3a8] sm:$0xff]  ;;  %v7444_v44 = vld [vmem:[#allocation2 + $0x40] sm:$0xff] }
 0x301   : > { %v4315_v6 = vpop.f32.mrf.mxu0  ;;  %4975 = vmatpush.msrb.mxu1 %v2888_v8 }
 0x302   : > { %v4316_v48 = vadd.f32 %v4315_v6, %v9209_v61  ;;  %v4543_v0 = vpop.f32.mrf.mxu3  ;;  %v7445_v61 = vld [vmem:[#allocation2 + $0x178] sm:$0xff] }
 0x303   : > { %v9609_v56 = vadd.f32 %v4543_v0, %v4467_v46  ;;  %v4392_v25 = vpop.f32.mrf.mxu1  ;;  %v1300_v46 = vrot.slane %v1246_v17, 6  ;;  %v2950_v17 = vld [vmem:[%s7698_s25 + $0x598] sm:$0xff] }
 0x304   : > { %4610 = vmatmul.f32.gmra.mxu0 %v9606_v36  ;;  %4764 = vmatmul.f32.gmra.mxu2 %v7444_v44  ;;  %v4393_v12 = vadd.f32 %v4392_v25, %v4316_v48  ;;  %v9619_v36 = vsel %vm1279_vm5, %v1294_v49, %v1298_v63  ;;  %v1247_v48 = vld [vmem:[#allocation2 + $0x180] sm:$0xff]  ;;  %v2886_v49 = vld [vmem:[%s7698_s25 + $0x398] sm:$0xff] }
 0x305   : > { %12363 = vst [vmem:[#allocation241_spill] sm:$0xff] %v9619_v36  ;;  %v1302_v42 = vrot.slane %v1247_v48, 6  ;;  %5130 = vmatpush.msrb.mxu3 %v2950_v17  ;;  %4976 = vmatpush.msrb.mxu1 %v2886_v49  ;;  %v1249_v17 = vld [vmem:[#allocation2 + $0x138] sm:$0xff] }
 0x306   : > { %4687 = vmatmul.f32.gmra.mxu1 %v9612_v57  ;;  %v9625_v57 = vsel %vm1279_vm5, %v1296_v50, %v1300_v46  ;;  %v1250_v49 = vld [vmem:[#allocation2 + $0x78] sm:$0xff] }
 0x307   : > { %4841 = vmatmul.f32.gmra.mxu3 %v7445_v61  ;;  %v4469_v6 = vpop.f32.mrf.mxu2  ;;  %12364 = vst [vmem:[#allocation242_spill] sm:$0xff] %v9625_v57  ;;  %v2854_v61 = vld [vmem:[%s7698_s25 + $0x298] sm:$0xff] }
 0x308   : > { %v4470_v40 = vadd.f32 %v4469_v6, %v4393_v12  ;;  %v7446_v12 = vld [vmem:[#allocation2 + $0x108] sm:$0xff]  ;;  %v1248_v6 = vld [vmem:[#allocation2 + $0x130] sm:$0xff]  ;;  %4899 = vmatpush.msrb.mxu0 %v2854_v61 }
 0x309   : > { %v4318_v0 = vpop.f32.mrf.mxu0  ;;  %v1304_v50 = vrot.slane %v1248_v6, 6  ;;  %v7448_v6 = vld [vmem:[#allocation2 + $0x90] sm:$0xff] }
 0x30a   : > { %v4319_v26 = vadd.f32 %v4318_v0, %v9231_v21  ;;  %v4546_v8 = vpop.f32.mrf.mxu3 }
 0x30b   : > { %v9622_v25 = vadd.f32 %v4546_v8, %v4470_v40  ;;  %v4395_v44 = vpop.f32.mrf.mxu1  ;;  %v7447_v40 = vld [vmem:[#allocation2 + $0x110] sm:$0xff] }
 0x30c   : > { %4613 = vmatmul.f32.gmra.mxu0 %v9619_v36  ;;  %4767 = vmatmul.f32.gmra.mxu2 %v7446_v12  ;;  %v4396_v21 = vadd.f32 %v4395_v44, %v4319_v26  ;;  %v9633_v12 = vsel %vm1279_vm5, %v1298_v63, %v1302_v42  ;;  %v2948_v63 = vld [vmem:[%s7698_s25 + $0x588] sm:$0xff] }
 0x30d   : > { %12365 = vst [vmem:[#allocation243_spill] sm:$0xff] %v9633_v12  ;;  %5131 = vmatpush.msrb.mxu3 %v2948_v63 }
 0x30e   : > { %4690 = vmatmul.f32.gmra.mxu1 %v9625_v57  ;;  %v9639_v57 = vsel %vm1279_vm5, %v1300_v46, %v1304_v50 }
 0x30f   : > { %4844 = vmatmul.f32.gmra.mxu3 %v7447_v40  ;;  %v4472_v31 = vpop.f32.mrf.mxu2  ;;  %12366 = vst [vmem:[#allocation244_spill] sm:$0xff] %v9639_v57  ;;  %v2916_v40 = vld [vmem:[%s7698_s25 + $0x488] sm:$0xff] }
 0x310   : > { %v4473_v0 = vadd.f32 %v4472_v31, %v4396_v21  ;;  %v2852_v21 = vld [vmem:[%s7698_s25 + $0x288] sm:$0xff]  ;;  %v1306_v31 = vrot.slane %v1249_v17, 6  ;;  %5054 = vmatpush.msrb.mxu2 %v2916_v40 }
 0x311   : > { %v4321_v8 = vpop.f32.mrf.mxu0  ;;  %4900 = vmatpush.msrb.mxu0 %v2852_v21  ;;  %v1251_v21 = vld [vmem:[#allocation2 + $0xa0] sm:$0xff] }
 0x312   : > { %v4322_v48 = vadd.f32 %v4321_v8, %v9254_v58  ;;  %v4549_v61 = vpop.f32.mrf.mxu3  ;;  %v1308_v8 = vrot.slane %v1250_v49, 6  ;;  %v7450_v49 = vld [vmem:[#allocation2 + $0x148] sm:$0xff] }
 0x313   : > { %v9636_v26 = vadd.f32 %v4549_v61, %v4473_v0  ;;  %v4398_v44 = vpop.f32.mrf.mxu1  ;;  %v7449_v0 = vld [vmem:[#allocation2 + $0x118] sm:$0xff]  ;;  %v2884_v61 = vld [vmem:[%s7698_s25 + $0x388] sm:$0xff] }
 0x314   : > { %4616 = vmatmul.f32.gmra.mxu0 %v9633_v12  ;;  %4770 = vmatmul.f32.gmra.mxu2 %v7448_v6  ;;  %v4399_v58 = vadd.f32 %v4398_v44, %v4322_v48  ;;  %v9648_v6 = vsel %vm1279_vm5, %v1302_v42, %v1306_v31  ;;  %v9654_v63 = vsel %vm1279_vm5, %v1304_v50, %v1308_v8  ;;  %v2914_v42 = vld [vmem:[%s7698_s25 + $0x478] sm:$0xff] }
 0x315   : > { %4977 = vmatpush.msrb.mxu1 %v2884_v61  ;;  %12367 = vst [vmem:[#allocation245_spill] sm:$0xff] %v9648_v6  ;;  %5055 = vmatpush.msrb.mxu2 %v2914_v42  ;;  %v2850_v61 = vld [vmem:[%s7698_s25 + $0x278] sm:$0xff] }
 0x316   : > { %4693 = vmatmul.f32.gmra.mxu1 %v9639_v57  ;;  %12368 = vst [vmem:[#allocation246_spill] sm:$0xff] %v9654_v63  ;;  %4901 = vmatpush.msrb.mxu0 %v2850_v61 }
 0x317   : > { %4847 = vmatmul.f32.gmra.mxu3 %v7449_v0  ;;  %v4475_v46 = vpop.f32.mrf.mxu2  ;;  %v1310_v0 = vrot.slane %v1251_v21, 6 }
 0x318   : > { %v4476_v12 = vadd.f32 %v4475_v46, %v4399_v58  ;;  %v1252_v58 = vld [vmem:[#allocation2] sm:$0xff] }
 0x319   : > { %v4324_v36 = vpop.f32.mrf.mxu0  ;;  %v1312_v46 = vrot.slane %v1252_v58, 6 }
 0x31a   : > { %v4325_v17 = vadd.f32 %v4324_v36, %v9277_v35  ;;  %v4552_v40 = vpop.f32.mrf.mxu3  ;;  %v7451_v36 = vld [vmem:[#allocation2 + $0x100] sm:$0xff] }
 0x31b   : > { %v9651_v48 = vadd.f32 %v4552_v40, %v4476_v12  ;;  %v4401_v44 = vpop.f32.mrf.mxu1  ;;  %v2946_v40 = vld [vmem:[%s7698_s25 + $0x578] sm:$0xff]  ;;  %v9669_v58 = vsel %vm1279_vm5, %v1308_v8, %v1312_v46  ;;  %v2848_v8 = vld [vmem:[%s7698_s25 + $0x268] sm:$0xff] }
 0x31c   : > { %4619 = vmatmul.f32.gmra.mxu0 %v9648_v6  ;;  %4773 = vmatmul.f32.gmra.mxu2 %v7450_v49  ;;  %v4402_v35 = vadd.f32 %v4401_v44, %v4325_v17  ;;  %v2882_v6 = vld [vmem:[%s7698_s25 + $0x378] sm:$0xff]  ;;  %v9663_v49 = vsel %vm1279_vm5, %v1306_v31, %v1310_v0  ;;  %v1253_v44 = vld [vmem:[#allocation2 + $0x20] sm:$0xff]  ;;  %12370 = vst [vmem:[#allocation248_spill] sm:$0xff] %v9669_v58 }
 0x31d   : > { %5132 = vmatpush.msrb.mxu3 %v2946_v40  ;;  %12369 = vst [vmem:[#allocation247_spill] sm:$0xff] %v9663_v49  ;;  %4978 = vmatpush.msrb.mxu1 %v2882_v6  ;;  %v1254_v31 = vld [vmem:[#allocation2 + $0xe0] sm:$0xff]  ;;  %v2912_v40 = vld [vmem:[%s7698_s25 + $0x468] sm:$0xff] }
 0x31e   : > { %4696 = vmatmul.f32.gmra.mxu1 %v9654_v63  ;;  %v1316_v61 = vrot.slane %v1254_v31, 6  ;;  %5056 = vmatpush.msrb.mxu2 %v2912_v40 }
 0x31f   : > { %4850 = vmatmul.f32.gmra.mxu3 %v7451_v36  ;;  %v4478_v12 = vpop.f32.mrf.mxu2  ;;  %4902 = vmatpush.msrb.mxu0 %v2848_v8 }
 0x320   : > { %v4479_v50 = vadd.f32 %v4478_v12, %v4402_v35  ;;  %v7452_v35 = vld [vmem:[#allocation2 + $0x58] sm:$0xff]  ;;  %v1314_v12 = vrot.slane %v1253_v44, 6  ;;  %v9683_v31 = vsel %vm1279_vm5, %v1312_v46, %v1316_v61 }
 0x321   : > { %v4327_v57 = vpop.f32.mrf.mxu0  ;;  %12372 = vst [vmem:[#allocation250_spill] sm:$0xff] %v9683_v31  ;;  %v2910_v46 = vld [vmem:[%s7698_s25 + $0x458] sm:$0xff] }
 0x322   : > { %v4328_v21 = vadd.f32 %v4327_v57, %v9299_v5  ;;  %v4555_v17 = vpop.f32.mrf.mxu3  ;;  %v7453_v5 = vld [vmem:[#allocation2 + $0xd8] sm:$0xff]  ;;  %5057 = vmatpush.msrb.mxu2 %v2910_v46 }
 0x323   : > { %v9666_v42 = vadd.f32 %v4555_v17, %v4479_v50  ;;  %v4404_v36 = vpop.f32.mrf.mxu1  ;;  %v2944_v17 = vld [vmem:[%s7698_s25 + $0x568] sm:$0xff]  ;;  %v2878_v46 = vld [vmem:[%s7698_s25 + $0x358] sm:$0xff] }
 0x324   : > { %4622 = vmatmul.f32.gmra.mxu0 %v9663_v49  ;;  %4776 = vmatmul.f32.gmra.mxu2 %v7452_v35  ;;  %v4405_v6 = vadd.f32 %v4404_v36, %v4328_v21  ;;  %v9677_v49 = vsel %vm1279_vm5, %v1310_v0, %v1314_v12  ;;  %v1255_v36 = vld [vmem:[#allocation2 + $0xf0] sm:$0x3f]  ;;  %v1256_v0 = vld [vmem:[#allocation2 + $0x188] sm:$0x3f] }
 0x325   : > { %12371 = vst [vmem:[#allocation249_spill] sm:$0xff] %v9677_v49  ;;  %5133 = vmatpush.msrb.mxu3 %v2944_v17  ;;  %v1318_v40 = vrot.slane %v1255_v36, 6 }
 0x326   : > { %4699 = vmatmul.f32.gmra.mxu1 %v9669_v58 }
 0x327   : > { %4853 = vmatmul.f32.gmra.mxu3 %v7453_v5  ;;  %v4481_v57 = vpop.f32.mrf.mxu2  ;;  %v9690_v58 = vsel %vm1279_vm5, %v1314_v12, %v1318_v40  ;;  %v2286_v12 = vld [vmem:[#allocation2 + $0x140] sm:$0xc0]  ;;  %v2288_v40 = vld [vmem:[#allocation2 + $0x168] sm:$0xff] }
 0x328   : > { %v4482_v50 = vadd.f32 %v4481_v57, %v4405_v6  ;;  %v2880_v6 = vld [vmem:[%s7698_s25 + $0x368] sm:$0xff]  ;;  %v7454_v57 = vld [vmem:[#allocation2 + $0x180] sm:$0xff]  ;;  %12373 = vst [vmem:[#allocation251_spill] sm:$0xff] %v9690_v58 }
 0x329   : > { %v4330_v63 = vpop.f32.mrf.mxu0  ;;  %4979 = vmatpush.msrb.mxu1 %v2880_v6 }
 0x32a   : > { %v4331_v21 = vadd.f32 %v4330_v63, %v9322_v52  ;;  %v4558_v44 = vpop.f32.mrf.mxu3  ;;  %v7455_v52 = vld [vmem:[#allocation2 + $0x130] sm:$0xff] }
 0x32b   : > { %v9680_v35 = vadd.f32 %v4558_v44, %v4482_v50  ;;  %v4407_v5 = vpop.f32.mrf.mxu1  ;;  %v1320_v50 = vrot.slane %v1256_v0, 6  ;;  %v2846_v0 = vld [vmem:[%s7698_s25 + $0x258] sm:$0xff]  ;;  %4980 = vmatpush.msrb.mxu1 %v2878_v46 }
 0x32c   : > { %4625 = vmatmul.f32.gmra.mxu0 %v9677_v49  ;;  %4779 = vmatmul.f32.gmra.mxu2 %v7454_v57  ;;  %v4408_v8 = vadd.f32 %v4407_v5, %v4331_v21  ;;  %v2285_v21 = vld [vmem:[#allocation2 + $0xc0] sm:$0xc0]  ;;  %v2287_v5 = vld [vmem:[#allocation2 + $0x50] sm:$0xff]  ;;  %v2290_v46 = vld [vmem:[#allocation2 + $0x38] sm:$0xff] }
 0x32d   : > { %v2329_v49 = vrot.slane %v2285_v21, 6  ;;  %4903 = vmatpush.msrb.mxu0 %v2846_v0 }
 0x32e   : > { %4702 = vmatmul.f32.gmra.mxu1 %v9683_v31 }
 0x32f   : > { %4856 = vmatmul.f32.gmra.mxu3 %v7455_v52  ;;  %v4484_v63 = vpop.f32.mrf.mxu2  ;;  %v9696_v52 = vsel %vm1279_vm5, %v1316_v61, %v1320_v50  ;;  %v2332_v50 = vrot.slane %v2286_v12, 6  ;;  %v2908_v12 = vld [vmem:[%s7698_s25 + $0x448] sm:$0xff] }
 0x330   : > { %v4485_v17 = vadd.f32 %v4484_v63, %v4408_v8  ;;  %12374 = vst [vmem:[#allocation252_spill] sm:$0xff] %v9696_v52  ;;  %v2942_v8 = vld [vmem:[%s7698_s25 + $0x558] sm:$0xff]  ;;  %5058 = vmatpush.msrb.mxu2 %v2908_v12 }
 0x331   : > { %v4333_v44 = vpop.f32.mrf.mxu0  ;;  %v7456_v63 = vld [vmem:[#allocation2 + $0x138] sm:$0xff]  ;;  %5134 = vmatpush.msrb.mxu3 %v2942_v8 }
 0x332   : > { %v4334_v36 = vadd.f32 %v4333_v44, %v9346_v54  ;;  %v4561_v6 = vpop.f32.mrf.mxu3  ;;  %v2330_v54 = vrot.slane %v2287_v5, 6 }
 0x333   : > { %v9693_v57 = vadd.f32 %v4561_v6, %v4485_v17  ;;  %v4410_v31 = vpop.f32.mrf.mxu1  ;;  %v7457_v17 = vld [vmem:[#allocation2 + $0x78] sm:$0xff]  ;;  %v2333_v6 = vrot.slane %v2288_v40, 6  ;;  %v7458_v40 = vld [vmem:[#allocation2 + $0xa8] sm:$0xff] }
 0x334   : > { %4628 = vmatmul.f32.gmra.mxu0 %v9690_v58  ;;  %4782 = vmatmul.f32.gmra.mxu2 %v7456_v63  ;;  %v4411_v44 = vadd.f32 %v4410_v31, %v4334_v36  ;;  %v9704_v55 = vsel %vm1279_vm5, %v2329_v49, %v2330_v54  ;;  %v2289_v31 = vld [vmem:[#allocation2 + $0x190] sm:$0xff]  ;;  %v2940_v49 = vld [vmem:[%s7698_s25 + $0x548] sm:$0xff] }
 0x335   : > { %12375 = vst [vmem:[#allocation253_spill] sm:$0xff] %v9704_v55  ;;  %v9710_v8 = vsel %vm1279_vm5, %v2332_v50, %v2333_v6  ;;  %5135 = vmatpush.msrb.mxu3 %v2940_v49  ;;  %v2337_v50 = vrot.slane %v2290_v46, 6  ;;  %v7460_v46 = vld [vmem:[#allocation2 + $0xb8] sm:$0xff] }
 0x336   : > { %4705 = vmatmul.f32.gmra.mxu1 %v9696_v52  ;;  %12376 = vst [vmem:[#allocation254_spill] sm:$0xff] %v9710_v8  ;;  %v12473_v52 = vld [vmem:[#allocation33_spill] sm:$0xff] }
 0x337   : > { %4859 = vmatmul.f32.gmra.mxu3 %v7457_v17  ;;  %v4487_v61 = vpop.f32.mrf.mxu2  ;;  %v2335_v17 = vrot.slane %v2289_v31, 6  ;;  %v9725_v49 = vsel %vm1279_vm5, %v2333_v6, %v2337_v50 }
 0x338   : > { %v4488_v63 = vadd.f32 %v4487_v61, %v4411_v44  ;;  %v2844_v44 = vld [vmem:[%s7698_s25 + $0x248] sm:$0xff]  ;;  %12378 = vst [vmem:[#allocation256_spill] sm:$0xff] %v9725_v49 }
 0x339   : > { %v4336_v58 = vpop.f32.mrf.mxu0  ;;  %4904 = vmatpush.msrb.mxu0 %v2844_v44  ;;  %v2291_v44 = vld [vmem:[#allocation2 + $0x60] sm:$0xff] }
 0x33a   : > { %v4337_v21 = vadd.f32 %v4336_v58, %v9369_v3  ;;  %v4564_v5 = vpop.f32.mrf.mxu3  ;;  %v7459_v58 = vld [vmem:[#allocation2 + $0x88] sm:$0xff] }
 0x33b   : > { %v9707_v36 = vadd.f32 %v4564_v5, %v4488_v63  ;;  %v4413_v0 = vpop.f32.mrf.mxu1  ;;  %v2876_v63 = vld [vmem:[%s7698_s25 + $0x348] sm:$0xff] }
 0x33c   : > { %4631 = vmatmul.f32.gmra.mxu0 %v9704_v55  ;;  %4785 = vmatmul.f32.gmra.mxu2 %v7458_v40  ;;  %v4414_v3 = vadd.f32 %v4413_v0, %v4337_v21  ;;  %v9719_v40 = vsel %vm1279_vm5, %v2330_v54, %v2335_v17  ;;  %v2906_v54 = vld [vmem:[%s7698_s25 + $0x438] sm:$0xff] }
 0x33d   : > { %4981 = vmatpush.msrb.mxu1 %v2876_v63  ;;  %12377 = vst [vmem:[#allocation255_spill] sm:$0xff] %v9719_v40  ;;  %5059 = vmatpush.msrb.mxu2 %v2906_v54 }
 0x33e   : > { %4708 = vmatmul.f32.gmra.mxu1 %v9710_v8 }
 0x33f   : > { %4862 = vmatmul.f32.gmra.mxu3 %v7459_v58  ;;  %v4490_v61 = vpop.f32.mrf.mxu2  ;;  %v2339_v58 = vrot.slane %v2291_v44, 6 }
 0x340   : > { %v4491_v5 = vadd.f32 %v4490_v61, %v4414_v3  ;;  %v2292_v3 = vld [vmem:[#allocation2 + $0x18] sm:$0xff] }
 0x341   : > { %v4339_v55 = vpop.f32.mrf.mxu0  ;;  %v2341_v63 = vrot.slane %v2292_v3, 6 }
 0x342   : > { %v4340_v31 = vadd.f32 %v4339_v55, %v9392_v22  ;;  %v4567_v12 = vpop.f32.mrf.mxu3  ;;  %v7461_v55 = vld [vmem:[#allocation2 + $0x170] sm:$0xff] }
 0x343   : > { %v9722_v21 = vadd.f32 %v4567_v12, %v4491_v5  ;;  %v4416_v0 = vpop.f32.mrf.mxu1  ;;  %v2842_v5 = vld [vmem:[%s7698_s25 + $0x238] sm:$0xff]  ;;  %v9740_v3 = vsel %vm1279_vm5, %v2337_v50, %v2341_v63  ;;  %v2840_v50 = vld [vmem:[%s7698_s25 + $0x228] sm:$0xff] }
 0x344   : > { %4634 = vmatmul.f32.gmra.mxu0 %v9719_v40  ;;  %4788 = vmatmul.f32.gmra.mxu2 %v7460_v46  ;;  %v4417_v22 = vadd.f32 %v4416_v0, %v4340_v31  ;;  %v2938_v12 = vld [vmem:[%s7698_s25 + $0x538] sm:$0xff]  ;;  %v9734_v46 = vsel %vm1279_vm5, %v2335_v17, %v2339_v58  ;;  %12380 = vst [vmem:[#allocation258_spill] sm:$0xff] %v9740_v3  ;;  %v2294_v17 = vld [vmem:[#allocation2 + $0x120] sm:$0xff] }
 0x345   : > { %4905 = vmatpush.msrb.mxu0 %v2842_v5  ;;  %5136 = vmatpush.msrb.mxu3 %v2938_v12  ;;  %v2874_v40 = vld [vmem:[%s7698_s25 + $0x338] sm:$0xff]  ;;  %12379 = vst [vmem:[#allocation257_spill] sm:$0xff] %v9734_v46  ;;  %v2345_v5 = vrot.slane %v2294_v17, 6  ;;  %v2904_v12 = vld [vmem:[%s7698_s25 + $0x428] sm:$0xff] }
 0x346   : > { %4711 = vmatmul.f32.gmra.mxu1 %v9725_v49  ;;  %v2293_v0 = vld [vmem:[#allocation2 + $0x158] sm:$0xff]  ;;  %5060 = vmatpush.msrb.mxu2 %v2904_v12 }
 0x347   : > { %4865 = vmatmul.f32.gmra.mxu3 %v7461_v55  ;;  %v4493_v61 = vpop.f32.mrf.mxu2  ;;  %4982 = vmatpush.msrb.mxu1 %v2874_v40  ;;  %v9754_v17 = vsel %vm1279_vm5, %v2341_v63, %v2345_v5  ;;  %v2902_v63 = vld [vmem:[%s7698_s25 + $0x418] sm:$0xff] }
 0x348   : > { %v4494_v6 = vadd.f32 %v4493_v61, %v4417_v22  ;;  %v7462_v22 = vld [vmem:[#allocation2 + $0xc0] sm:$0xff]  ;;  %v2343_v61 = vrot.slane %v2293_v0, 6  ;;  %4906 = vmatpush.msrb.mxu0 %v2840_v50  ;;  %12382 = vst [vmem:[#allocation260_spill] sm:$0xff] %v9754_v17  ;;  %5061 = vmatpush.msrb.mxu2 %v2902_v63 }
 0x349   : > { %v4342_v8 = vpop.f32.mrf.mxu0 }
 0x34a   : > { %v4343_v44 = vadd.f32 %v4342_v8, %v9414_v29  ;;  %v4570_v31 = vpop.f32.mrf.mxu3  ;;  %v7463_v29 = vld [vmem:[#allocation2 + $0x140] sm:$0xff] }
 0x34b   : > { %v9737_v54 = vadd.f32 %v4570_v31, %v4494_v6  ;;  %v4419_v55 = vpop.f32.mrf.mxu1  ;;  %v2936_v31 = vld [vmem:[%s7698_s25 + $0x528] sm:$0xff] }
 0x34c   : > { %4637 = vmatmul.f32.gmra.mxu0 %v9734_v46  ;;  %4791 = vmatmul.f32.gmra.mxu2 %v7462_v22  ;;  %v4420_v40 = vadd.f32 %v4419_v55, %v4343_v44  ;;  %v9748_v46 = vsel %vm1279_vm5, %v2339_v58, %v2343_v61  ;;  %v2295_v55 = vld [vmem:[#allocation2 + $0x198] sm:$0xff]  ;;  %v2296_v58 = vld [vmem:[#allocation2 + $0x68] sm:$0xff] }
 0x34d   : > { %12381 = vst [vmem:[#allocation259_spill] sm:$0xff] %v9748_v46  ;;  %5137 = vmatpush.msrb.mxu3 %v2936_v31  ;;  %v2347_v12 = vrot.slane %v2295_v55, 6 }
 0x34e   : > { %4714 = vmatmul.f32.gmra.mxu1 %v9740_v3 }
 0x34f   : > { %4868 = vmatmul.f32.gmra.mxu3 %v7463_v29  ;;  %v4496_v8 = vpop.f32.mrf.mxu2 }
 0x350   : > { %v4497_v6 = vadd.f32 %v4496_v8, %v4420_v40  ;;  %v2872_v40 = vld [vmem:[%s7698_s25 + $0x328] sm:$0xff]  ;;  %v7464_v8 = vld [vmem:[#allocation2 + $0x50] sm:$0xff] }
 0x351   : > { %v4345_v49 = vpop.f32.mrf.mxu0  ;;  %4983 = vmatpush.msrb.mxu1 %v2872_v40 }
 0x352   : > { %v4346_v44 = vadd.f32 %v4345_v49, %v9435_v23  ;;  %v4573_v0 = vpop.f32.mrf.mxu3  ;;  %v7465_v23 = vld [vmem:[#allocation2 + $0x168] sm:$0xff] }
 0x353   : > { %v9751_v22 = vadd.f32 %v4573_v0, %v4497_v6  ;;  %v4422_v29 = vpop.f32.mrf.mxu1  ;;  %v2349_v6 = vrot.slane %v2296_v58, 6  ;;  %v2934_v58 = vld [vmem:[%s7698_s25 + $0x518] sm:$0xff] }
 0x354   : > { %4640 = vmatmul.f32.gmra.mxu0 %v9748_v46  ;;  %4794 = vmatmul.f32.gmra.mxu2 %v7464_v8  ;;  %v4423_v50 = vadd.f32 %v4422_v29, %v4346_v44  ;;  %v9761_v46 = vsel %vm1279_vm5, %v2343_v61, %v2347_v12  ;;  %v2297_v44 = vld [vmem:[#allocation2 + $0x30] sm:$0xff]  ;;  %v2870_v61 = vld [vmem:[%s7698_s25 + $0x318] sm:$0xff] }
 0x355   : > { %12383 = vst [vmem:[#allocation261_spill] sm:$0xff] %v9761_v46  ;;  %v2351_v3 = vrot.slane %v2297_v44, 6  ;;  %5138 = vmatpush.msrb.mxu3 %v2934_v58  ;;  %4984 = vmatpush.msrb.mxu1 %v2870_v61  ;;  %v2299_v58 = vld [vmem:[#allocation2 + $0xf8] sm:$0xff]  ;;  %v2300_v61 = vld [vmem:[#allocation2 + $0x28] sm:$0xff] }
 0x356   : > { %4717 = vmatmul.f32.gmra.mxu1 %v9754_v17  ;;  %v9767_v17 = vsel %vm1279_vm5, %v2345_v5, %v2349_v6 }
 0x357   : > { %4871 = vmatmul.f32.gmra.mxu3 %v7465_v23  ;;  %v4499_v49 = vpop.f32.mrf.mxu2  ;;  %12384 = vst [vmem:[#allocation262_spill] sm:$0xff] %v9767_v17  ;;  %v2838_v23 = vld [vmem:[%s7698_s25 + $0x218] sm:$0xff] }
 0x358   : > { %v4500_v31 = vadd.f32 %v4499_v49, %v4423_v50  ;;  %v7466_v50 = vld [vmem:[#allocation2 + $0x190] sm:$0xff]  ;;  %v2298_v49 = vld [vmem:[#allocation2 + $0xc8] sm:$0xff]  ;;  %4907 = vmatpush.msrb.mxu0 %v2838_v23 }
 0x359   : > { %v4348_v0 = vpop.f32.mrf.mxu0  ;;  %v2353_v5 = vrot.slane %v2298_v49, 6  ;;  %v7468_v49 = vld [vmem:[#allocation2 + $0x60] sm:$0xff] }
 0x35a   : > { %v4349_v55 = vadd.f32 %v4348_v0, %v9457_v13  ;;  %v4576_v40 = vpop.f32.mrf.mxu3 }
 0x35b   : > { %v9764_v29 = vadd.f32 %v4576_v40, %v4500_v31  ;;  %v4425_v8 = vpop.f32.mrf.mxu1  ;;  %v7467_v31 = vld [vmem:[#allocation2 + $0x38] sm:$0xff] }
 0x35c   : > { %4643 = vmatmul.f32.gmra.mxu0 %v9761_v46  ;;  %4797 = vmatmul.f32.gmra.mxu2 %v7466_v50  ;;  %v4426_v13 = vadd.f32 %v4425_v8, %v4349_v55  ;;  %v9775_v50 = vsel %vm1279_vm5, %v2347_v12, %v2351_v3  ;;  %v2932_v12 = vld [vmem:[%s7698_s25 + $0x508] sm:$0xff] }
 0x35d   : > { %12385 = vst [vmem:[#allocation263_spill] sm:$0xff] %v9775_v50  ;;  %5139 = vmatpush.msrb.mxu3 %v2932_v12 }
 0x35e   : > { %4720 = vmatmul.f32.gmra.mxu1 %v9767_v17  ;;  %v9781_v17 = vsel %vm1279_vm5, %v2349_v6, %v2353_v5 }
 0x35f   : > { %4874 = vmatmul.f32.gmra.mxu3 %v7467_v31  ;;  %v4502_v63 = vpop.f32.mrf.mxu2  ;;  %12386 = vst [vmem:[#allocation264_spill] sm:$0xff] %v9781_v17  ;;  %v2900_v31 = vld [vmem:[%s7698_s25 + $0x408] sm:$0xff] }
 0x360   : > { %v4503_v0 = vadd.f32 %v4502_v63, %v4426_v13  ;;  %v2836_v13 = vld [vmem:[%s7698_s25 + $0x208] sm:$0xff]  ;;  %v2355_v63 = vrot.slane %v2299_v58, 6  ;;  %5062 = vmatpush.msrb.mxu2 %v2900_v31 }
 0x361   : > { %v4351_v40 = vpop.f32.mrf.mxu0  ;;  %4908 = vmatpush.msrb.mxu0 %v2836_v13 }
 0x362   : > { %v4352_v44 = vadd.f32 %v4351_v40, %v9480_v2  ;;  %v4579_v23 = vpop.f32.mrf.mxu3  ;;  %v2357_v40 = vrot.slane %v2300_v61, 6  ;;  %v9790_v46 = vsel %vm1279_vm5, %v2351_v3, %v2355_v63  ;;  %v7471_v3 = vld [vmem:[%s7693_s22] sm:$0x3] }
 0x363   : > { %v9778_v55 = vadd.f32 %v4579_v23, %v4503_v0  ;;  %v4428_v8 = vpop.f32.mrf.mxu1  ;;  %v7469_v0 = vld [vmem:[#allocation2 + $0x18] sm:$0xff]  ;;  %v2868_v23 = vld [vmem:[%s7698_s25 + $0x308] sm:$0xff]  ;;  %12387 = vst [vmem:[#allocation265_spill] sm:$0xff] %v9790_v46 }
 0x364   : > { %4646 = vmatmul.f32.gmra.mxu0 %v9775_v50  ;;  %4800 = vmatmul.f32.gmra.mxu2 %v7468_v49  ;;  %v4429_v2 = vadd.f32 %v4428_v8, %v4352_v44  ;;  %v2301_v44 = vld [vmem:[#allocation2 + $0x8] sm:$0xff]  ;;  %v9796_v12 = vsel %vm1279_vm5, %v2353_v5, %v2357_v40  ;;  %v7472_v5 = vld [vmem:[#allocation2 + $0x120] sm:$0xff] }
 0x365   : > { %4985 = vmatpush.msrb.mxu1 %v2868_v23  ;;  %12388 = vst [vmem:[#allocation266_spill] sm:$0xff] %v9796_v12 }
 0x366   : > { %4723 = vmatmul.f32.gmra.mxu1 %v9781_v17  ;;  %v3214_v17 = vld [vmem:[%s7698_s25 + $0xdd8] sm:$0xff] }
 0x367   : > { %4877 = vmatmul.f32.gmra.mxu3 %v7469_v0  ;;  %v4505_v6 = vpop.f32.mrf.mxu2  ;;  %v9802_v0 = vperm.slane %v7471_v3, 1 }
 0x368   : > { %v4506_v50 = vadd.f32 %v4505_v6, %v4429_v2  ;;  %v7470_v2 = vld [vmem:[#allocation2 + $0x158] sm:$0xff] }
 0x369   : > { %v4602_v49 = vpop.f32.mrf.mxu0  ;;  %v3058_v6 = vld [vmem:[%s7698_s25 + $0x8f8] sm:$0xff] }
 0x36a   : > { %v4582_v58 = vpop.f32.mrf.mxu3  ;;  %v4603_v31 = vadd.f32 %v4602_v49, %v9503_v4  ;;  %v2302_v4 = vld [vmem:[#allocation2 + $0x80] sm:$0xff]  ;;  %5355 = vmatpush.msra.mxu2 %v3058_v6 }
 0x36b   : > { %v9793_v8 = vadd.f32 %v4582_v58, %v4506_v50  ;;  %v4679_v13 = vpop.f32.mrf.mxu1  ;;  %v2359_v50 = vrot.slane %v2301_v44, 6  ;;  %v2361_v49 = vrot.slane %v2302_v4, 6  ;;  %v2994_v58 = vld [vmem:[%s7698_s25 + $0x6f8] sm:$0xff] }
 0x36c   : > { %v9798_v61 = vadd.f32 %v4679_v13, %v4603_v31  ;;  %4649 = vmatmul.f32.gmra.mxu0 %v9790_v46  ;;  %4803 = vmatmul.f32.gmra.mxu2 %v7470_v2  ;;  %v3090_v31 = vld [vmem:[%s7698_s25 + $0x9f8] sm:$0xff] }
 0x36d   : > { %5201 = vmatpush.msra.mxu0 %v2994_v58  ;;  %5432 = vmatpush.msra.mxu3 %v3090_v31  ;;  %v3026_v2 = vld [vmem:[%s7698_s25 + $0x7f8] sm:$0xff]  ;;  %v9811_v3 = vsel %vm1279_vm5, %v2355_v63, %v2359_v50  ;;  %v9817_v4 = vsel %vm1279_vm5, %v2357_v40, %v2361_v49  ;;  %v3056_v40 = vld [vmem:[%s7698_s25 + $0x8e8] sm:$0xff] }
 0x36e   : > { %12389 = vst [vmem:[#allocation267_spill] sm:$0xff] %v9798_v61  ;;  %4726 = vmatmul.f32.gmra.mxu1 %v9796_v12  ;;  %v7473_v58 = vld [vmem:[#allocation2 + $0x198] sm:$0xff]  ;;  %5356 = vmatpush.msra.mxu2 %v3056_v40 }
 0x36f   : > { %4880 = vmatmul.f32.gmra.mxu3 %v7472_v5  ;;  %v4756_v23 = vpop.f32.mrf.mxu2  ;;  %12390 = vst [vmem:[#allocation268_spill] sm:$0xff] %v9811_v3  ;;  %5278 = vmatpush.msra.mxu1 %v3026_v2  ;;  %v7474_v63 = vld [vmem:[#allocation2 + $0x98] sm:$0xff] }
 0x370   : > { %v4757_v13 = vadd.f32 %v4756_v23, %v9802_v0  ;;  %12391 = vst [vmem:[#allocation269_spill] sm:$0xff] %v9817_v4  ;;  %v2363_v31 = vrot.slane %v7474_v63, 6 }
 0x371   : > { %v4605_v61 = vpop.f32.mrf.mxu0 }
 0x372   : > { %v4606_v44 = vadd.f32 %v4605_v61, %v9525_v38  ;;  %v4833_v6 = vpop.f32.mrf.mxu3  ;;  %v7475_v38 = vld [vmem:[#allocation2 + $0x68] sm:$0xff] }
 0x373   : > { %v9814_v12 = vadd.f32 %v4833_v6, %v4757_v13  ;;  %v4682_v5 = vpop.f32.mrf.mxu1  ;;  %v7476_v13 = vld [vmem:[#allocation2 + $0x150] sm:$0xff] }
 0x374   : > { %v9819_v23 = vadd.f32 %v4682_v5, %v4606_v44  ;;  %4652 = vmatmul.f32.gmra.mxu0 %v9811_v3  ;;  %4806 = vmatmul.f32.gmra.mxu2 %v7473_v58  ;;  %v2365_v2 = vrot.slane %v7476_v13, 6  ;;  %v2992_v44 = vld [vmem:[%s7698_s25 + $0x6e8] sm:$0xff]  ;;  %v9828_v3 = vsel %vm1279_vm5, %v2359_v50, %v2363_v31  ;;  %v7477_v50 = vld [vmem:[#allocation2 + $0x30] sm:$0xff] }
 0x375   : > { %v3088_v5 = vld [vmem:[%s7698_s25 + $0x9e8] sm:$0xff]  ;;  %12393 = vst [vmem:[#allocation271_spill] sm:$0xff] %v9828_v3  ;;  %5202 = vmatpush.msra.mxu0 %v2992_v44  ;;  %v2306_v44 = vld [vmem:[#allocation2 + $0x70] sm:$0x3f] }
 0x376   : > { %12392 = vst [vmem:[#allocation270_spill] sm:$0xff] %v9819_v23  ;;  %4729 = vmatmul.f32.gmra.mxu1 %v9817_v4  ;;  %5433 = vmatpush.msra.mxu3 %v3088_v5  ;;  %v9834_v46 = vsel %vm1279_vm5, %v2361_v49, %v2365_v2 }
 0x377   : > { %4883 = vmatmul.f32.gmra.mxu3 %v7475_v38  ;;  %v4759_v61 = vpop.f32.mrf.mxu2  ;;  %v2305_v38 = vld [vmem:[#allocation2 + $0xe8] sm:$0x3f]  ;;  %12394 = vst [vmem:[#allocation272_spill] sm:$0xff] %v9834_v46 }
 0x378   : > { %v4760_v6 = vadd.f32 %v4759_v61, %v9802_v0  ;;  %v3024_v61 = vld [vmem:[%s7698_s25 + $0x7e8] sm:$0xff]  ;;  %v2367_v5 = vrot.slane %v2305_v38, 6 }
 0x379   : > { %v4608_v23 = vpop.f32.mrf.mxu0  ;;  %5279 = vmatpush.msra.mxu1 %v3024_v61 }
 0x37a   : > { %v4609_v58 = vadd.f32 %v4608_v23, %v9546_v10  ;;  %v4836_v63 = vpop.f32.mrf.mxu3  ;;  %v7478_v10 = vld [vmem:[#allocation2 + $0xc8] sm:$0xff] }
 0x37b   : > { %v9831_v4 = vadd.f32 %v4836_v63, %v4760_v6  ;;  %v4685_v13 = vpop.f32.mrf.mxu1  ;;  %v2369_v6 = vrot.slane %v2306_v44, 6  ;;  %v3086_v44 = vld [vmem:[%s7698_s25 + $0x9d8] sm:$0xff] }
 0x37c   : > { %v9837_v40 = vadd.f32 %v4685_v13, %v4609_v58  ;;  %4655 = vmatmul.f32.gmra.mxu0 %v9828_v3  ;;  %4809 = vmatmul.f32.gmra.mxu2 %v7477_v50  ;;  %v3054_v58 = vld [vmem:[%s7698_s25 + $0x8d8] sm:$0xff]  ;;  %v9844_v13 = vsel %vm1279_vm5, %v2363_v31, %v2367_v5 }
 0x37d   : > { %12396 = vst [vmem:[#allocation274_spill] sm:$0xff] %v9844_v13  ;;  %5357 = vmatpush.msra.mxu2 %v3054_v58  ;;  %v3022_v31 = vld [vmem:[%s7698_s25 + $0x7d8] sm:$0xff]  ;;  %5434 = vmatpush.msra.mxu3 %v3086_v44  ;;  %v3084_v44 = vld [vmem:[%s7698_s25 + $0x9c8] sm:$0xff] }
 0x37e   : > { %12395 = vst [vmem:[#allocation273_spill] sm:$0xff] %v9837_v40  ;;  %4732 = vmatmul.f32.gmra.mxu1 %v9834_v46  ;;  %v9850_v46 = vsel %vm1279_vm5, %v2365_v2, %v2369_v6 }
 0x37f   : > { %4886 = vmatmul.f32.gmra.mxu3 %v7478_v10  ;;  %v4762_v23 = vpop.f32.mrf.mxu2  ;;  %12397 = vst [vmem:[#allocation275_spill] sm:$0xff] %v9850_v46  ;;  %v2990_v10 = vld [vmem:[%s7698_s25 + $0x6d8] sm:$0xff]  ;;  %5280 = vmatpush.msra.mxu1 %v3022_v31 }
 0x380   : > { %v4763_v49 = vadd.f32 %v4762_v23, %v9802_v0  ;;  %v7479_v23 = vld [vmem:[#allocation2 + $0xf8] sm:$0xff]  ;;  %5203 = vmatpush.msra.mxu0 %v2990_v10  ;;  %v2988_v10 = vld [vmem:[%s7698_s25 + $0x6c8] sm:$0xff]  ;;  %5435 = vmatpush.msra.mxu3 %v3084_v44 }
 0x381   : > { %v4611_v63 = vpop.f32.mrf.mxu0 }
 0x382   : > { %v4612_v38 = vadd.f32 %v4611_v63, %v9565_v28  ;;  %v4839_v61 = vpop.f32.mrf.mxu3  ;;  %v7480_v28 = vld [vmem:[#allocation2 + $0x28] sm:$0xff]  ;;  %5204 = vmatpush.msra.mxu0 %v2988_v10 }
 0x383   : > { %v9847_v50 = vadd.f32 %v4839_v61, %v4763_v49  ;;  %v4688_v40 = vpop.f32.mrf.mxu1 }
 0x384   : > { %v9854_v3 = vadd.f32 %v4688_v40, %v4612_v38  ;;  %4658 = vmatmul.f32.gmra.mxu0 %v9844_v13  ;;  %4812 = vmatmul.f32.gmra.mxu2 %v7479_v23  ;;  %v3052_v38 = vld [vmem:[%s7698_s25 + $0x8c8] sm:$0xff]  ;;  %v3118_v13 = vld [vmem:[%s7698_s25 + $0xad8] sm:$0xff] }
 0x385   : > { %5358 = vmatpush.msra.mxu2 %v3052_v38  ;;  %v3020_v23 = vld [vmem:[%s7698_s25 + $0x7c8] sm:$0xff] }
 0x386   : > { %12398 = vst [vmem:[#allocation276_spill] sm:$0xff] %v9854_v3  ;;  %4735 = vmatmul.f32.gmra.mxu1 %v9850_v46 }
 0x387   : > { %4889 = vmatmul.f32.gmra.mxu3 %v7480_v28  ;;  %v4765_v2 = vpop.f32.mrf.mxu2  ;;  %5281 = vmatpush.msra.mxu1 %v3020_v23 }
 0x388   : > { %v4766_v5 = vadd.f32 %v4765_v2, %v9802_v0 }
 0x389   : > { %v4614_v40 = vpop.f32.mrf.mxu0 }
 0x38a   : > { %v4615_v6 = vadd.f32 %v4614_v40, %v9580_v7  ;;  %v4842_v49 = vpop.f32.mrf.mxu3 }
 0x38b   : > { %v9861_v58 = vadd.f32 %v4842_v49, %v4766_v5  ;;  %v4691_v63 = vpop.f32.mrf.mxu1 }
 0x38c   : > { %v9864_v61 = vadd.f32 %v4691_v63, %v4615_v6  ;;  %4909 = vmatmul.f32.vlgmr.msrb.gmra.mxu0 %v7926_v59  ;;  %5063 = vmatmul.f32.vlgmr.msrb.gmra.mxu2 %v8247_v11  ;;  %v2986_v6 = vld [vmem:[%s7698_s25 + $0x6b8] sm:$0xff] }
 0x38d   : > { %5205 = vmatpush.msra.mxu0 %v2986_v6  ;;  %v3018_v63 = vld [vmem:[%s7698_s25 + $0x7b8] sm:$0xff] }
 0x38e   : > { %12399 = vst [vmem:[#allocation277_spill] sm:$0xff] %v9864_v61  ;;  %4986 = vmatmul.f32.vlgmr.msrb.gmra.mxu1 %v7935_v1  ;;  %v3050_v1 = vld [vmem:[%s7698_s25 + $0x8b8] sm:$0xff]  ;;  %v12466_v61 = vld [vmem:[#allocation68_spill] sm:$0xff] }
 0x38f   : > { %5140 = vmatmul.f32.vlgmr.msrb.gmra.mxu3 %v8256_v27  ;;  %v4768_v7 = vpop.f32.mrf.mxu2  ;;  %5359 = vmatpush.msra.mxu2 %v3050_v1  ;;  %v3046_v6 = vld [vmem:[%s7698_s25 + $0x898] sm:$0xff] }
 0x390   : > { %v4769_v31 = vadd.f32 %v4768_v7, %v9802_v0  ;;  %5282 = vmatpush.msra.mxu1 %v3018_v63  ;;  %v3048_v7 = vld [vmem:[%s7698_s25 + $0x8a8] sm:$0xff] }
 0x391   : > { %v4617_v59 = vpop.f32.mrf.mxu0  ;;  %5360 = vmatpush.msra.mxu2 %v3048_v7 }
 0x392   : > { %v4618_v11 = vadd.f32 %v4617_v59, %v9595_v18  ;;  %v4845_v28 = vpop.f32.mrf.mxu3  ;;  %v3082_v18 = vld [vmem:[%s7698_s25 + $0x9b8] sm:$0xff] }
 0x393   : > { %v9875_v2 = vadd.f32 %v4845_v28, %v4769_v31  ;;  %v4694_v5 = vpop.f32.mrf.mxu1  ;;  %5436 = vmatpush.msra.mxu3 %v3082_v18  ;;  %v3080_v31 = vld [vmem:[%s7698_s25 + $0x9a8] sm:$0xff]  ;;  %5361 = vmatpush.msra.mxu2 %v3046_v6 }
 0x394   : > { %v9877_v40 = vadd.f32 %v4694_v5, %v4618_v11  ;;  %4912 = vmatmul.f32.gmra.mxu0 %v7952_v14  ;;  %5066 = vmatmul.f32.gmra.mxu2 %v8272_v62 }
 0x395   : > { %5437 = vmatpush.msra.mxu3 %v3080_v31 }
 0x396   : > { %12400 = vst [vmem:[#allocation278_spill] sm:$0xff] %v9877_v40  ;;  %4989 = vmatmul.f32.gmra.mxu1 %v7962_v19 }
 0x397   : > { %5143 = vmatmul.f32.gmra.mxu3 %v8281_v16  ;;  %v4771_v27 = vpop.f32.mrf.mxu2 }
 0x398   : > { %v4772_v49 = vadd.f32 %v4771_v27, %v9802_v0 }
 0x399   : > { %v4620_v38 = vpop.f32.mrf.mxu0 }
 0x39a   : > { %v4621_v14 = vadd.f32 %v4620_v38, %v9609_v56  ;;  %v4848_v62 = vpop.f32.mrf.mxu3  ;;  %v2984_v56 = vld [vmem:[%s7698_s25 + $0x6a8] sm:$0xff] }
 0x39b   : > { %v9889_v10 = vadd.f32 %v4848_v62, %v4772_v49  ;;  %v4697_v19 = vpop.f32.mrf.mxu1  ;;  %5206 = vmatpush.msra.mxu0 %v2984_v56  ;;  %v3078_v62 = vld [vmem:[%s7698_s25 + $0x998] sm:$0xff] }
 0x39c   : > { %v9891_v16 = vadd.f32 %v4697_v19, %v4621_v14  ;;  %4915 = vmatmul.f32.gmra.mxu0 %v7978_v30  ;;  %5069 = vmatmul.f32.gmra.mxu2 %v8275_v15  ;;  %v2982_v14 = vld [vmem:[%s7698_s25 + $0x698] sm:$0xff] }
 0x39d   : > { %5207 = vmatpush.msra.mxu0 %v2982_v14  ;;  %5438 = vmatpush.msra.mxu3 %v3078_v62  ;;  %v12408_v14 = vld [vmem:[#allocation5_spill] sm:$0xff]  ;;  %v12409_v62 = vld [vmem:[#allocation36_spill] sm:$0xff] }
 0x39e   : > { %12401 = vst [vmem:[#allocation279_spill] sm:$0xff] %v9891_v16  ;;  %4992 = vmatmul.f32.gmra.mxu1 %v7985_v32  ;;  %v3016_v32 = vld [vmem:[%s7698_s25 + $0x7a8] sm:$0xff] }
 0x39f   : > { %5146 = vmatmul.f32.gmra.mxu3 %v8286_v47  ;;  %v4774_v44 = vpop.f32.mrf.mxu2  ;;  %5283 = vmatpush.msra.mxu1 %v3016_v32  ;;  %v3060_v16 = vld [vmem:[%s7698_s25 + $0x908] sm:$0xff] }
 0x3a0   : > { %v4775_v23 = vadd.f32 %v4774_v44, %v9802_v0 }
 0x3a1   : > { %v4623_v59 = vpop.f32.mrf.mxu0 }
 0x3a2   : > { %v4624_v30 = vadd.f32 %v4623_v59, %v9622_v25  ;;  %v4851_v11 = vpop.f32.mrf.mxu3  ;;  %v3044_v59 = vld [vmem:[%s7698_s25 + $0x888] sm:$0xff] }
 0x3a3   : > { %v9902_v28 = vadd.f32 %v4851_v11, %v4775_v23  ;;  %v4700_v5 = vpop.f32.mrf.mxu1  ;;  %v3076_v11 = vld [vmem:[%s7698_s25 + $0x988] sm:$0xff]  ;;  %5362 = vmatpush.msra.mxu2 %v3044_v59 }
 0x3a4   : > { %v9905_v1 = vadd.f32 %v4700_v5, %v4624_v30  ;;  %4918 = vmatmul.f32.gmra.mxu0 %v7998_v41  ;;  %5072 = vmatmul.f32.gmra.mxu2 %v8297_v37  ;;  %v12405_v5 = vld [vmem:[#allocation4_spill] sm:$0xff] }
 0x3a5   : > { %5439 = vmatpush.msra.mxu3 %v3076_v11 }
 0x3a6   : > { %12402 = vst [vmem:[#allocation280_spill] sm:$0xff] %v9905_v1  ;;  %4995 = vmatmul.f32.gmra.mxu1 %v8005_v43  ;;  %v3014_v43 = vld [vmem:[%s7698_s25 + $0x798] sm:$0xff]  ;;  %v12459_v1 = vld [vmem:[#allocation26_spill] sm:$0xff] }
 0x3a7   : > { %5149 = vmatmul.f32.gmra.mxu3 %v8305_v34  ;;  %v4777_v25 = vpop.f32.mrf.mxu2  ;;  %5284 = vmatpush.msra.mxu1 %v3014_v43  ;;  %v3042_v43 = vld [vmem:[%s7698_s25 + $0x878] sm:$0xff] }
 0x3a8   : > { %v4778_v27 = vadd.f32 %v4777_v25, %v9802_v0  ;;  %v3012_v25 = vld [vmem:[%s7698_s25 + $0x788] sm:$0xff]  ;;  %5363 = vmatpush.msra.mxu2 %v3042_v43 }
 0x3a9   : > { %v4626_v18 = vpop.f32.mrf.mxu0  ;;  %5285 = vmatpush.msra.mxu1 %v3012_v25 }
 0x3aa   : > { %v4627_v49 = vadd.f32 %v4626_v18, %v9636_v26  ;;  %v4854_v63 = vpop.f32.mrf.mxu3 }
 0x3ab   : > { %v9914_v38 = vadd.f32 %v4854_v63, %v4778_v27  ;;  %v4703_v41 = vpop.f32.mrf.mxu1 }
 0x3ac   : > { %v9918_v19 = vadd.f32 %v4703_v41, %v4627_v49  ;;  %4921 = vmatmul.f32.gmra.mxu0 %v8017_v51  ;;  %5075 = vmatmul.f32.gmra.mxu2 %v8315_v20 }
 0x3ae   : > { %12403 = vst [vmem:[#allocation281_spill] sm:$0xff] %v9918_v19  ;;  %4998 = vmatmul.f32.gmra.mxu1 %v8024_v53  ;;  %v2980_v53 = vld [vmem:[%s7698_s25 + $0x688] sm:$0xff]  ;;  %v3218_v19 = vld [vmem:[%s7698_s25 + $0xdf8] sm:$0xff] }
 0x3af   : > { %5152 = vmatmul.f32.gmra.mxu3 %v8324_v45  ;;  %v4780_v26 = vpop.f32.mrf.mxu2  ;;  %5208 = vmatpush.msra.mxu0 %v2980_v53 }
 0x3b0   : > { %v4781_v44 = vadd.f32 %v4780_v26, %v9802_v0  ;;  %v12410_v26 = vld [vmem:[#allocation6_spill] sm:$0xff] }
 0x3b1   : > { %v4629_v7 = vpop.f32.mrf.mxu0 }
 0x3b2   : > { %v4630_v23 = vadd.f32 %v4629_v7, %v9651_v48  ;;  %v4857_v51 = vpop.f32.mrf.mxu3  ;;  %v12406_v48 = vld [vmem:[#allocation35_spill] sm:$0xff] }
 0x3b3   : > { %v9927_v56 = vadd.f32 %v4857_v51, %v4781_v44  ;;  %v4706_v31 = vpop.f32.mrf.mxu1  ;;  %v12411_v44 = vld [vmem:[#allocation37_spill] sm:$0xff] }
 0x3b4   : > { %v9930_v30 = vadd.f32 %v4706_v31, %v4630_v23  ;;  %4924 = vmatmul.f32.gmra.mxu0 %v8035_v60  ;;  %5078 = vmatmul.f32.gmra.mxu2 %v8332_v39  ;;  %v2978_v23 = vld [vmem:[%s7698_s25 + $0x678] sm:$0xff] }
 0x3b5   : > { %5209 = vmatpush.msra.mxu0 %v2978_v23  ;;  %v3010_v31 = vld [vmem:[%s7698_s25 + $0x778] sm:$0xff] }
 0x3b6   : > { %12404 = vst [vmem:[#allocation282_spill] sm:$0xff] %v9930_v30  ;;  %5001 = vmatmul.f32.gmra.mxu1 %v12405_v5  ;;  %v12449_v30 = vld [vmem:[#allocation60_spill] sm:$0xff] }
 0x3b7   : > { %5155 = vmatmul.f32.gmra.mxu3 %v12406_v48  ;;  %v4783_v32 = vpop.f32.mrf.mxu2  ;;  %5286 = vmatpush.msra.mxu1 %v3010_v31 }
 0x3b8   : > { %v4784_v27 = vadd.f32 %v4783_v32, %v9802_v0 }
 0x3b9   : > { %v4632_v60 = vpop.f32.mrf.mxu0 }
 0x3ba   : > { %v4633_v6 = vadd.f32 %v4632_v60, %v9666_v42  ;;  %v4860_v18 = vpop.f32.mrf.mxu3  ;;  %v3074_v42 = vld [vmem:[%s7698_s25 + $0x978] sm:$0xff]  ;;  %v12414_v60 = vld [vmem:[#allocation38_spill] sm:$0xff] }
 0x3bb   : > { %v9941_v49 = vadd.f32 %v4860_v18, %v4784_v27  ;;  %v4709_v63 = vpop.f32.mrf.mxu1  ;;  %5440 = vmatpush.msra.mxu3 %v3074_v42  ;;  %v12413_v27 = vld [vmem:[#allocation7_spill] sm:$0xff] }
 0x3bc   : > { %v9943_v41 = vadd.f32 %v4709_v63, %v4633_v6  ;;  %4927 = vmatmul.f32.gmra.mxu0 %v12408_v14  ;;  %5081 = vmatmul.f32.gmra.mxu2 %v12409_v62  ;;  %v12415_v6 = vld [vmem:[#allocation8_spill] sm:$0xff]  ;;  %v12416_v18 = vld [vmem:[#allocation39_spill] sm:$0xff]  ;;  %v3040_v14 = vld [vmem:[%s7698_s25 + $0x868] sm:$0xff] }
 0x3bd   : > { %5364 = vmatpush.msra.mxu2 %v3040_v14  ;;  %v3038_v14 = vld [vmem:[%s7698_s25 + $0x858] sm:$0xff] }
 0x3be   : > { %12407 = vst [vmem:[#allocation4_spill] sm:$0xff] %v9943_v41  ;;  %5004 = vmatmul.f32.gmra.mxu1 %v12410_v26  ;;  %v3072_v26 = vld [vmem:[%s7698_s25 + $0x968] sm:$0xff]  ;;  %v2998_v41 = vld [vmem:[%s7698_s25 + $0x718] sm:$0xff] }
 0x3bf   : > { %5158 = vmatmul.f32.gmra.mxu3 %v12411_v44  ;;  %v4786_v7 = vpop.f32.mrf.mxu2  ;;  %5365 = vmatpush.msra.mxu2 %v3038_v14 }
 0x3c0   : > { %v4787_v51 = vadd.f32 %v4786_v7, %v9802_v0  ;;  %5441 = vmatpush.msra.mxu3 %v3072_v26 }
 0x3c1   : > { %v4635_v59 = vpop.f32.mrf.mxu0 }
 0x3c2   : > { %v4636_v53 = vadd.f32 %v4635_v59, %v9680_v35  ;;  %v4863_v11 = vpop.f32.mrf.mxu3  ;;  %v2976_v35 = vld [vmem:[%s7698_s25 + $0x668] sm:$0xff] }
 0x3c3   : > { %v9955_v5 = vadd.f32 %v4863_v11, %v4787_v51  ;;  %v4712_v32 = vpop.f32.mrf.mxu1  ;;  %5210 = vmatpush.msra.mxu0 %v2976_v35  ;;  %v3008_v59 = vld [vmem:[%s7698_s25 + $0x768] sm:$0xff] }
 0x3c4   : > { %v9957_v25 = vadd.f32 %v4712_v32, %v4636_v53  ;;  %4930 = vmatmul.f32.gmra.mxu0 %v12413_v27  ;;  %5084 = vmatmul.f32.gmra.mxu2 %v12414_v60  ;;  %v12418_v11 = vld [vmem:[#allocation9_spill] sm:$0xff]  ;;  %v12419_v32 = vld [vmem:[#allocation42_spill] sm:$0xff] }
 0x3c5   : > { %5287 = vmatpush.msra.mxu1 %v3008_v59  ;;  %v12420_v27 = vld [vmem:[#allocation10_spill] sm:$0xff] }
 0x3c6   : > { %12412 = vst [vmem:[#allocation35_spill] sm:$0xff] %v9957_v25  ;;  %5007 = vmatmul.f32.gmra.mxu1 %v12415_v6  ;;  %v12421_v6 = vld [vmem:[#allocation44_spill] sm:$0xff]  ;;  %v2964_v25 = vld [vmem:[%s7698_s25 + $0x608] sm:$0xff] }
 0x3c7   : > { %5161 = vmatmul.f32.gmra.mxu3 %v12416_v18  ;;  %v4789_v63 = vpop.f32.mrf.mxu2 }
 0x3c8   : > { %v4790_v43 = vadd.f32 %v4789_v63, %v9802_v0 }
 0x3c9   : > { %v4638_v7 = vpop.f32.mrf.mxu0 }
 0x3ca   : > { %v4639_v23 = vadd.f32 %v4638_v7, %v9693_v57  ;;  %v4866_v42 = vpop.f32.mrf.mxu3 }
 0x3cb   : > { %v9968_v51 = vadd.f32 %v4866_v42, %v4790_v43  ;;  %v4715_v31 = vpop.f32.mrf.mxu1  ;;  %v2974_v42 = vld [vmem:[%s7698_s25 + $0x658] sm:$0xff] }
 0x3cc   : > { %v9971_v53 = vadd.f32 %v4715_v31, %v4639_v23  ;;  %4933 = vmatmul.f32.gmra.mxu0 %v12418_v11  ;;  %5087 = vmatmul.f32.gmra.mxu2 %v12419_v32  ;;  %v3070_v31 = vld [vmem:[%s7698_s25 + $0x958] sm:$0xff]  ;;  %v12424_v32 = vld [vmem:[#allocation46_spill] sm:$0xff] }
 0x3cd   : > { %v12423_v11 = vld [vmem:[#allocation11_spill] sm:$0xff]  ;;  %5211 = vmatpush.msra.mxu0 %v2974_v42  ;;  %5442 = vmatpush.msra.mxu3 %v3070_v31  ;;  %v3036_v42 = vld [vmem:[%s7698_s25 + $0x848] sm:$0xff] }
 0x3ce   : > { %12417 = vst [vmem:[#allocation5_spill] sm:$0xff] %v9971_v53  ;;  %5010 = vmatmul.f32.gmra.mxu1 %v12420_v27  ;;  %v3006_v27 = vld [vmem:[%s7698_s25 + $0x758] sm:$0xff]  ;;  %v12428_v31 = vld [vmem:[#allocation13_spill] sm:$0xff]  ;;  %5366 = vmatpush.msra.mxu2 %v3036_v42 }
 0x3cf   : > { %5164 = vmatmul.f32.gmra.mxu3 %v12421_v6  ;;  %v4792_v57 = vpop.f32.mrf.mxu2  ;;  %v12425_v6 = vld [vmem:[#allocation12_spill] sm:$0xff]  ;;  %5288 = vmatpush.msra.mxu1 %v3006_v27  ;;  %v12430_v27 = vld [vmem:[#allocation14_spill] sm:$0xff]  ;;  %v2970_v53 = vld [vmem:[%s7698_s25 + $0x638] sm:$0xff] }
 0x3d0   : > { %v4793_v63 = vadd.f32 %v4792_v57, %v9802_v0 }
 0x3d1   : > { %v4641_v43 = vpop.f32.mrf.mxu0 }
 0x3d2   : > { %v4642_v35 = vadd.f32 %v4641_v43, %v9707_v36  ;;  %v4869_v26 = vpop.f32.mrf.mxu3  ;;  %v12426_v36 = vld [vmem:[#allocation48_spill] sm:$0xff] }
 0x3d3   : > { %v9980_v7 = vadd.f32 %v4869_v26, %v4793_v63  ;;  %v4718_v23 = vpop.f32.mrf.mxu1 }
 0x3d4   : > { %v9984_v59 = vadd.f32 %v4718_v23, %v4642_v35  ;;  %4936 = vmatmul.f32.gmra.mxu0 %v12423_v11  ;;  %5090 = vmatmul.f32.gmra.mxu2 %v12424_v32  ;;  %v12429_v32 = vld [vmem:[#allocation50_spill] sm:$0xff] }
 0x3d6   : > { %12422 = vst [vmem:[#allocation36_spill] sm:$0xff] %v9984_v59  ;;  %5013 = vmatmul.f32.gmra.mxu1 %v12425_v6  ;;  %v2972_v6 = vld [vmem:[%s7698_s25 + $0x648] sm:$0xff]  ;;  %v12443_v59 = vld [vmem:[#allocation19_spill] sm:$0xff] }
 0x3d7   : > { %5167 = vmatmul.f32.gmra.mxu3 %v12426_v36  ;;  %v4795_v57 = vpop.f32.mrf.mxu2  ;;  %v3068_v36 = vld [vmem:[%s7698_s25 + $0x948] sm:$0xff]  ;;  %5212 = vmatpush.msra.mxu0 %v2972_v6  ;;  %v12433_v6 = vld [vmem:[#allocation15_spill] sm:$0xff] }
 0x3d8   : > { %v4796_v63 = vadd.f32 %v4795_v57, %v9802_v0  ;;  %5443 = vmatpush.msra.mxu3 %v3068_v36  ;;  %v12434_v36 = vld [vmem:[#allocation54_spill] sm:$0xff] }
 0x3d9   : > { %v4644_v14 = vpop.f32.mrf.mxu0  ;;  %5213 = vmatpush.msra.mxu0 %v2970_v53  ;;  %v12441_v53 = vld [vmem:[#allocation57_spill] sm:$0xff] }
 0x3da   : > { %v4645_v43 = vadd.f32 %v4644_v14, %v9722_v21  ;;  %v4872_v35 = vpop.f32.mrf.mxu3  ;;  %v12431_v21 = vld [vmem:[#allocation52_spill] sm:$0xff] }
 0x3db   : > { %v9993_v26 = vadd.f32 %v4872_v35, %v4796_v63  ;;  %v4721_v23 = vpop.f32.mrf.mxu1  ;;  %v3004_v63 = vld [vmem:[%s7698_s25 + $0x748] sm:$0xff] }
 0x3dc   : > { %v9996_v11 = vadd.f32 %v4721_v23, %v4645_v43  ;;  %4939 = vmatmul.f32.gmra.mxu0 %v12428_v31  ;;  %5093 = vmatmul.f32.gmra.mxu2 %v12429_v32 }
 0x3dd   : > { %5289 = vmatpush.msra.mxu1 %v3004_v63 }
 0x3de   : > { %12427 = vst [vmem:[#allocation6_spill] sm:$0xff] %v9996_v11  ;;  %5016 = vmatmul.f32.gmra.mxu1 %v12430_v27  ;;  %v3034_v27 = vld [vmem:[%s7698_s25 + $0x838] sm:$0xff] }
 0x3df   : > { %5170 = vmatmul.f32.gmra.mxu3 %v12431_v21  ;;  %v4798_v57 = vpop.f32.mrf.mxu2  ;;  %5367 = vmatpush.msra.mxu2 %v3034_v27  ;;  %v12435_v21 = vld [vmem:[#allocation16_spill] sm:$0xff]  ;;  %v3062_v11 = vld [vmem:[%s7698_s25 + $0x918] sm:$0xff] }
 0x3e0   : > { %v4799_v14 = vadd.f32 %v4798_v57, %v9802_v0  ;;  %v12436_v57 = vld [vmem:[#allocation56_spill] sm:$0xff] }
 0x3e1   : > { %v4647_v43 = vpop.f32.mrf.mxu0 }
 0x3e2   : > { %v4648_v35 = vadd.f32 %v4647_v43, %v9737_v54  ;;  %v4875_v23 = vpop.f32.mrf.mxu3  ;;  %v3066_v54 = vld [vmem:[%s7698_s25 + $0x938] sm:$0xff] }
 0x3e3   : > { %v10007_v42 = vadd.f32 %v4875_v23, %v4799_v14  ;;  %v4724_v31 = vpop.f32.mrf.mxu1  ;;  %5444 = vmatpush.msra.mxu3 %v3066_v54  ;;  %v3002_v14 = vld [vmem:[%s7698_s25 + $0x738] sm:$0xff] }
 0x3e4   : > { %v10009_v32 = vadd.f32 %v4724_v31, %v4648_v35  ;;  %4942 = vmatmul.f32.gmra.mxu0 %v12433_v6  ;;  %5096 = vmatmul.f32.gmra.mxu2 %v12434_v36 }
 0x3e5   : > { %5290 = vmatpush.msra.mxu1 %v3002_v14 }
 0x3e6   : > { %12432 = vst [vmem:[#allocation37_spill] sm:$0xff] %v10009_v32  ;;  %5019 = vmatmul.f32.gmra.mxu1 %v12435_v21  ;;  %v12438_v21 = vld [vmem:[#allocation17_spill] sm:$0xff] }
 0x3e7   : > { %5173 = vmatmul.f32.gmra.mxu3 %v12436_v57  ;;  %v4801_v63 = vpop.f32.mrf.mxu2  ;;  %v12439_v57 = vld [vmem:[#allocation55_spill] sm:$0xff]  ;;  %v3032_v32 = vld [vmem:[%s7698_s25 + $0x828] sm:$0xff] }
 0x3e8   : > { %v4802_v43 = vadd.f32 %v4801_v63, %v9802_v0  ;;  %v12440_v63 = vld [vmem:[#allocation18_spill] sm:$0xff]  ;;  %5368 = vmatpush.msra.mxu2 %v3032_v32 }
 0x3e9   : > { %v4650_v35 = vpop.f32.mrf.mxu0  ;;  %v12444_v32 = vld [vmem:[#allocation58_spill] sm:$0xff] }
 0x3ea   : > { %v4651_v23 = vadd.f32 %v4650_v35, %v9751_v22  ;;  %v4878_v31 = vpop.f32.mrf.mxu3  ;;  %v2968_v22 = vld [vmem:[%s7698_s25 + $0x628] sm:$0xff] }
 0x3eb   : > { %v10021_v6 = vadd.f32 %v4878_v31, %v4802_v43  ;;  %v4727_v36 = vpop.f32.mrf.mxu1  ;;  %v3064_v43 = vld [vmem:[%s7698_s25 + $0x928] sm:$0xff]  ;;  %5214 = vmatpush.msra.mxu0 %v2968_v22  ;;  %v12446_v22 = vld [vmem:[#allocation59_spill] sm:$0xff] }
 0x3ec   : > { %v10023_v27 = vadd.f32 %v4727_v36, %v4651_v23  ;;  %4945 = vmatmul.f32.gmra.mxu0 %v12438_v21  ;;  %5099 = vmatmul.f32.gmra.mxu2 %v12439_v57 }
 0x3ed   : > { %5445 = vmatpush.msra.mxu3 %v3064_v43  ;;  %v3030_v43 = vld [vmem:[%s7698_s25 + $0x818] sm:$0xff] }
 0x3ee   : > { %12437 = vst [vmem:[#allocation7_spill] sm:$0xff] %v10023_v27  ;;  %5022 = vmatmul.f32.gmra.mxu1 %v12440_v63  ;;  %v3000_v63 = vld [vmem:[%s7698_s25 + $0x728] sm:$0xff]  ;;  %5369 = vmatpush.msra.mxu2 %v3030_v43 }
 0x3ef   : > { %5176 = vmatmul.f32.gmra.mxu3 %v12441_v53  ;;  %v4804_v54 = vpop.f32.mrf.mxu2  ;;  %5291 = vmatpush.msra.mxu1 %v3000_v63 }
 0x3f0   : > { %v4805_v14 = vadd.f32 %v4804_v54, %v9802_v0  ;;  %v12445_v54 = vld [vmem:[#allocation20_spill] sm:$0xff]  ;;  %5446 = vmatpush.msra.mxu3 %v3062_v11  ;;  %v12453_v11 = vld [vmem:[#allocation23_spill] sm:$0xff] }
 0x3f1   : > { %v4653_v35 = vpop.f32.mrf.mxu0  ;;  %5292 = vmatpush.msra.mxu1 %v2998_v41  ;;  %v12455_v41 = vld [vmem:[#allocation24_spill] sm:$0xff] }
 0x3f2   : > { %v4654_v23 = vadd.f32 %v4653_v35, %v9764_v29  ;;  %v4881_v31 = vpop.f32.mrf.mxu3  ;;  %5447 = vmatpush.msra.mxu3 %v3060_v16  ;;  %v12458_v16 = vld [vmem:[#allocation64_spill] sm:$0xff] }
 0x3f3   : > { %v10034_v36 = vadd.f32 %v4881_v31, %v4805_v14  ;;  %v4730_v21 = vpop.f32.mrf.mxu1 }
 0x3f4   : > { %v10037_v27 = vadd.f32 %v4730_v21, %v4654_v23  ;;  %4948 = vmatmul.f32.gmra.mxu0 %v12443_v59  ;;  %5102 = vmatmul.f32.gmra.mxu2 %v12444_v32 }
 0x3f5   : > { %5740 = vmatpush.msrb.mxu3 %v3218_v19  ;;  %v12464_v19 = vld [vmem:[#allocation67_spill] sm:$0xff] }
 0x3f6   : > { %12442 = vst [vmem:[#allocation38_spill] sm:$0xff] %v10037_v27  ;;  %5025 = vmatmul.f32.gmra.mxu1 %v12445_v54  ;;  %v2966_v27 = vld [vmem:[%s7698_s25 + $0x618] sm:$0xff]  ;;  %v12448_v54 = vld [vmem:[#allocation21_spill] sm:$0xff] }
 0x3f7   : > { %5179 = vmatmul.f32.gmra.mxu3 %v12446_v22  ;;  %v4807_v29 = vpop.f32.mrf.mxu2  ;;  %5215 = vmatpush.msra.mxu0 %v2966_v27  ;;  %v3028_v27 = vld [vmem:[%s7698_s25 + $0x808] sm:$0xff] }
 0x3f8   : > { %v4808_v14 = vadd.f32 %v4807_v29, %v9802_v0  ;;  %v12450_v29 = vld [vmem:[#allocation22_spill] sm:$0xff]  ;;  %5370 = vmatpush.msra.mxu2 %v3028_v27 }
 0x3f9   : > { %v4656_v35 = vpop.f32.mrf.mxu0  ;;  %5216 = vmatpush.msra.mxu0 %v2964_v25 }
 0x3fa   : > { %v4657_v23 = vadd.f32 %v4656_v35, %v9778_v55  ;;  %v4884_v31 = vpop.f32.mrf.mxu3  ;;  %v12451_v55 = vld [vmem:[#allocation61_spill] sm:$0xff] }
 0x3fb   : > { %v10046_v21 = vadd.f32 %v4884_v31, %v4808_v14  ;;  %v4733_v59 = vpop.f32.mrf.mxu1 }
 0x3fc   : > { %v10050_v63 = vadd.f32 %v4733_v59, %v4657_v23  ;;  %4951 = vmatmul.f32.gmra.mxu0 %v12448_v54  ;;  %5105 = vmatmul.f32.gmra.mxu2 %v12449_v30 }
 0x3fe   : > { %12447 = vst [vmem:[#allocation8_spill] sm:$0xff] %v10050_v63  ;;  %5028 = vmatmul.f32.gmra.mxu1 %v12450_v29  ;;  %v12454_v29 = vld [vmem:[#allocation62_spill] sm:$0xff] }
 0x3ff   : > { %5182 = vmatmul.f32.gmra.mxu3 %v12451_v55  ;;  %v4810_v14 = vpop.f32.mrf.mxu2 }
 0x400   : > { %v4811_v43 = vadd.f32 %v4810_v14, %v9802_v0 }
 0x401   : > { %v4659_v35 = vpop.f32.mrf.mxu0 }
 0x402   : > { %v4660_v23 = vadd.f32 %v4659_v35, %v9793_v8  ;;  %v4887_v31 = vpop.f32.mrf.mxu3  ;;  %v12456_v8 = vld [vmem:[#allocation63_spill] sm:$0xff] }
 0x403   : > { %v10059_v59 = vadd.f32 %v4887_v31, %v4811_v43  ;;  %v4736_v54 = vpop.f32.mrf.mxu1  ;;  %v2996_v43 = vld [vmem:[%s7698_s25 + $0x708] sm:$0xff] }
 0x404   : > { %v10062_v63 = vadd.f32 %v4736_v54, %v4660_v23  ;;  %4954 = vmatmul.f32.gmra.mxu0 %v12453_v11  ;;  %5108 = vmatmul.f32.gmra.mxu2 %v12454_v29  ;;  %v12457_v11 = vld [vmem:[#allocation25_spill] sm:$0xff] }
 0x405   : > { %5293 = vmatpush.msra.mxu1 %v2996_v43  ;;  %v3122_v43 = vld [vmem:[%s7698_s25 + $0xaf8] sm:$0xff] }
 0x406   : > { %12452 = vst [vmem:[#allocation39_spill] sm:$0xff] %v10062_v63  ;;  %5031 = vmatmul.f32.gmra.mxu1 %v12455_v41  ;;  %v3186_v41 = vld [vmem:[%s7698_s25 + $0xcf8] sm:$0xff]  ;;  %5509 = vmatpush.msrb.mxu0 %v3122_v43  ;;  %v3184_v43 = vld [vmem:[%s7698_s25 + $0xce8] sm:$0xff] }
 0x407   : > { %5185 = vmatmul.f32.gmra.mxu3 %v12456_v8  ;;  %v4813_v14 = vpop.f32.mrf.mxu2  ;;  %5663 = vmatpush.msrb.mxu2 %v3186_v41 }
 0x408   : > { %v4814_v35 = vadd.f32 %v4813_v14, %v9802_v0  ;;  %v12460_v0 = vld [vmem:[#allocation65_spill] sm:$0xff] }
 0x409   : > { %v4910_v23 = vpop.f32.mrf.mxu0  ;;  %5664 = vmatpush.msrb.mxu2 %v3184_v43  ;;  %v12468_v43 = vld [vmem:[#allocation69_spill] sm:$0xff] }
 0x40a   : > { %v4890_v31 = vpop.f32.mrf.mxu3  ;;  %v4911_v54 = vadd.f32 %v4910_v23, %v9814_v12  ;;  %v3154_v12 = vld [vmem:[%s7698_s25 + $0xbf8] sm:$0xff] }
 0x40b   : > { %v10073_v27 = vadd.f32 %v4890_v31, %v4814_v35  ;;  %v4987_v25 = vpop.f32.mrf.mxu1  ;;  %5586 = vmatpush.msrb.mxu1 %v3154_v12  ;;  %v3120_v12 = vld [vmem:[%s7698_s25 + $0xae8] sm:$0xff] }
 0x40c   : > { %4957 = vmatmul.f32.gmra.mxu0 %v12457_v11  ;;  %5111 = vmatmul.f32.gmra.mxu2 %v12458_v16  ;;  %v4988_v63 = vadd.f32 %v4987_v25, %v4911_v54  ;;  %v12461_v25 = vld [vmem:[#allocation27_spill] sm:$0xff]  ;;  %v12462_v11 = vld [vmem:[#allocation66_spill] sm:$0xff] }
 0x40d   : > { %5510 = vmatpush.msrb.mxu0 %v3120_v12 }
 0x40e   : > { %5034 = vmatmul.f32.gmra.mxu1 %v12459_v1 }
 0x40f   : > { %5188 = vmatmul.f32.gmra.mxu3 %v12460_v0  ;;  %v5064_v14 = vpop.f32.mrf.mxu2  ;;  %5511 = vmatpush.msrb.mxu0 %v3118_v13  ;;  %v3180_v13 = vld [vmem:[%s7698_s25 + $0xcc8] sm:$0xff] }
 0x410   : > { %v5065_v3 = vadd.f32 %v5064_v14, %v4988_v63  ;;  %v12463_v63 = vld [vmem:[#allocation28_spill] sm:$0xff] }
 0x411   : > { %v4913_v35 = vpop.f32.mrf.mxu0 }
 0x412   : > { %v4914_v23 = vadd.f32 %v4913_v35, %v9831_v4  ;;  %v5141_v31 = vpop.f32.mrf.mxu3  ;;  %v3216_v4 = vld [vmem:[%s7698_s25 + $0xde8] sm:$0xff] }
 0x413   : > { %v10084_v54 = vadd.f32 %v5141_v31, %v5065_v3  ;;  %v4990_v1 = vpop.f32.mrf.mxu1  ;;  %5741 = vmatpush.msrb.mxu3 %v3216_v4  ;;  %v3182_v4 = vld [vmem:[%s7698_s25 + $0xcd8] sm:$0xff] }
 0x414   : > { %4960 = vmatmul.f32.gmra.mxu0 %v12461_v25  ;;  %5114 = vmatmul.f32.gmra.mxu2 %v12462_v11  ;;  %v4991_v41 = vadd.f32 %v4990_v1, %v4914_v23  ;;  %v3152_v1 = vld [vmem:[%s7698_s25 + $0xbe8] sm:$0xff] }
 0x415   : > { %5587 = vmatpush.msrb.mxu1 %v3152_v1  ;;  %5665 = vmatpush.msrb.mxu2 %v3182_v4  ;;  %v12469_v1 = vld [vmem:[#allocation31_spill] sm:$0xff] }
 0x416   : > { %5037 = vmatmul.f32.gmra.mxu1 %v12463_v63  ;;  %v12465_v63 = vld [vmem:[#allocation29_spill] sm:$0xff]  ;;  %5742 = vmatpush.msrb.mxu3 %v3214_v17  ;;  %v12474_v17 = vld [vmem:[#allocation76_spill] sm:$0xff] }
 0x417   : > { %5191 = vmatmul.f32.gmra.mxu3 %v12464_v19  ;;  %v5067_v14 = vpop.f32.mrf.mxu2  ;;  %5666 = vmatpush.msrb.mxu2 %v3180_v13 }
 0x418   : > { %v5068_v40 = vadd.f32 %v5067_v14, %v4991_v41  ;;  %v12467_v14 = vld [vmem:[#allocation30_spill] sm:$0xff] }
 0x419   : > { %v4916_v35 = vpop.f32.mrf.mxu0 }
 0x41a   : > { %v4917_v3 = vadd.f32 %v4916_v35, %v9847_v50  ;;  %v5144_v31 = vpop.f32.mrf.mxu3 }
 0x41b   : > { %v10094_v25 = vadd.f32 %v5144_v31, %v5068_v40  ;;  %v4993_v23 = vpop.f32.mrf.mxu1 }
 0x41c   : > { %4963 = vmatmul.f32.gmra.mxu0 %v12465_v63  ;;  %5117 = vmatmul.f32.gmra.mxu2 %v12466_v61  ;;  %v4994_v41 = vadd.f32 %v4993_v23, %v4917_v3  ;;  %v12470_v3 = vld [vmem:[#allocation72_spill] sm:$0xff]  ;;  %v3150_v23 = vld [vmem:[%s7698_s25 + $0xbd8] sm:$0xff] }
 0x41d   : > { %5588 = vmatpush.msrb.mxu1 %v3150_v23 }
 0x41e   : > { %5040 = vmatmul.f32.gmra.mxu1 %v12467_v14  ;;  %v12471_v14 = vld [vmem:[#allocation32_spill] sm:$0xff] }
 0x41f   : > { %5194 = vmatmul.f32.gmra.mxu3 %v12468_v43  ;;  %v5070_v12 = vpop.f32.mrf.mxu2 }
 0x420   : > { %v5071_v50 = vadd.f32 %v5070_v12, %v4994_v41 }
 0x421   : > { %v4919_v40 = vpop.f32.mrf.mxu0 }
 0x422   : > { %v4920_v35 = vadd.f32 %v4919_v40, %v9861_v58  ;;  %v5147_v31 = vpop.f32.mrf.mxu3  ;;  %v12472_v58 = vld [vmem:[#allocation74_spill] sm:$0xff] }
 0x423   : > { %v10103_v46 = vadd.f32 %v5147_v31, %v5071_v50  ;;  %v4996_v63 = vpop.f32.mrf.mxu1 }
 0x424   : > { %4966 = vmatmul.f32.gmra.mxu0 %v12469_v1  ;;  %5120 = vmatmul.f32.gmra.mxu2 %v12470_v3  ;;  %v4997_v41 = vadd.f32 %v4996_v63, %v4920_v35  ;;  %v3116_v35 = vld [vmem:[%s7698_s25 + $0xac8] sm:$0xff] }
 0x425   : > { %v3212_v63 = vld [vmem:[%s7698_s25 + $0xdc8] sm:$0xff]  ;;  %5512 = vmatpush.msrb.mxu0 %v3116_v35  ;;  %v12478_v35 = vld [vmem:[#allocation82_spill] sm:$0xff] }
 0x426   : > { %5043 = vmatmul.f32.gmra.mxu1 %v12471_v14  ;;  %5743 = vmatpush.msrb.mxu3 %v3212_v63 }
 0x427   : > { %5197 = vmatmul.f32.gmra.mxu3 %v12472_v58  ;;  %v5073_v12 = vpop.f32.mrf.mxu2  ;;  %v3148_v58 = vld [vmem:[%s7698_s25 + $0xbc8] sm:$0xff] }
 0x428   : > { %v5074_v50 = vadd.f32 %v5073_v12, %v4997_v41  ;;  %v12475_v41 = vld [vmem:[#allocation34_spill] sm:$0xff]  ;;  %5589 = vmatpush.msrb.mxu1 %v3148_v58 }
 0x429   : > { %v4922_v4 = vpop.f32.mrf.mxu0 }
 0x42a   : > { %v4923_v40 = vadd.f32 %v4922_v4, %v9875_v2  ;;  %v5150_v31 = vpop.f32.mrf.mxu3  ;;  %v12476_v2 = vld [vmem:[#allocation78_spill] sm:$0xff] }
 0x42b   : > { %v10113_v1 = vadd.f32 %v5150_v31, %v5074_v50  ;;  %v4999_v3 = vpop.f32.mrf.mxu1 }
 0x42c   : > { %5217 = vmatmul.f32.vlgmr.msra.gmra.mxu0 %v12473_v52  ;;  %5371 = vmatmul.f32.vlgmr.msra.gmra.mxu2 %v12474_v17  ;;  %v5000_v23 = vadd.f32 %v4999_v3, %v4923_v40  ;;  %v12477_v40 = vld [vmem:[#allocation80_spill] sm:$0xff]  ;;  %v3178_v3 = vld [vmem:[%s7698_s25 + $0xcb8] sm:$0xff] }
 0x42d   : > { %5667 = vmatpush.msrb.mxu2 %v3178_v3 }
 0x42e   : > { %5294 = vmatmul.f32.vlgmr.msra.gmra.mxu1 %v12475_v41  ;;  %v3210_v41 = vld [vmem:[%s7698_s25 + $0xdb8] sm:$0xff] }
 0x42f   : > { %5448 = vmatmul.f32.vlgmr.msra.gmra.mxu3 %v12476_v2  ;;  %v5076_v14 = vpop.f32.mrf.mxu2  ;;  %v3146_v2 = vld [vmem:[%s7698_s25 + $0xbb8] sm:$0xff] }
 0x430   : > { %v5077_v12 = vadd.f32 %v5076_v14, %v5000_v23  ;;  %v3114_v23 = vld [vmem:[%s7698_s25 + $0xab8] sm:$0xff]  ;;  %5744 = vmatpush.msrb.mxu3 %v3210_v41  ;;  %5590 = vmatpush.msrb.mxu1 %v3146_v2 }
 0x431   : > { %v4925_v52 = vpop.f32.mrf.mxu0  ;;  %5513 = vmatpush.msrb.mxu0 %v3114_v23 }
 0x432   : > { %v4926_v50 = vadd.f32 %v4925_v52, %v9889_v10  ;;  %v5153_v4 = vpop.f32.mrf.mxu3  ;;  %v12479_v52 = vld [vmem:[#allocation84_spill] sm:$0xff] }
 0x433   : > { %v10124_v31 = vadd.f32 %v5153_v4, %v5077_v12  ;;  %v5002_v13 = vpop.f32.mrf.mxu1  ;;  %v12480_v4 = vld [vmem:[#allocation86_spill] sm:$0xff] }
 0x434   : > { %5220 = vmatmul.f32.gmra.mxu0 %v8275_v15  ;;  %5374 = vmatmul.f32.gmra.mxu2 %v12477_v40  ;;  %v5003_v17 = vadd.f32 %v5002_v13, %v4926_v50  ;;  %v3176_v40 = vld [vmem:[%s7698_s25 + $0xca8] sm:$0xff] }
 0x435   : > { %5668 = vmatpush.msrb.mxu2 %v3176_v40  ;;  %v3206_v40 = vld [vmem:[%s7698_s25 + $0xd98] sm:$0xff] }
 0x436   : > { %5297 = vmatmul.f32.gmra.mxu1 %v8286_v47 }
 0x437   : > { %5451 = vmatmul.f32.gmra.mxu3 %v12478_v35  ;;  %v5079_v63 = vpop.f32.mrf.mxu2 }
 0x438   : > { %v5080_v10 = vadd.f32 %v5079_v63, %v5003_v17  ;;  %v3112_v17 = vld [vmem:[%s7698_s25 + $0xaa8] sm:$0xff] }
 0x439   : > { %v4928_v14 = vpop.f32.mrf.mxu0  ;;  %5514 = vmatpush.msrb.mxu0 %v3112_v17 }
 0x43a   : > { %v4929_v15 = vadd.f32 %v4928_v14, %v9902_v28  ;;  %v5156_v58 = vpop.f32.mrf.mxu3  ;;  %v3208_v28 = vld [vmem:[%s7698_s25 + $0xda8] sm:$0xff]  ;;  %v12482_v14 = vld [vmem:[#allocation90_spill] sm:$0xff] }
 0x43b   : > { %v10135_v12 = vadd.f32 %v5156_v58, %v5080_v10  ;;  %v5005_v47 = vpop.f32.mrf.mxu1  ;;  %5745 = vmatpush.msrb.mxu3 %v3208_v28  ;;  %v3144_v10 = vld [vmem:[%s7698_s25 + $0xba8] sm:$0xff]  ;;  %v3174_v58 = vld [vmem:[%s7698_s25 + $0xc98] sm:$0xff] }
 0x43c   : > { %5223 = vmatmul.f32.gmra.mxu0 %v8297_v37  ;;  %5377 = vmatmul.f32.gmra.mxu2 %v12479_v52  ;;  %v5006_v50 = vadd.f32 %v5005_v47, %v4929_v15 }
 0x43d   : > { %5591 = vmatpush.msrb.mxu1 %v3144_v10  ;;  %5669 = vmatpush.msrb.mxu2 %v3174_v58  ;;  %v3140_v58 = vld [vmem:[%s7698_s25 + $0xb88] sm:$0xff] }
 0x43e   : > { %5300 = vmatmul.f32.gmra.mxu1 %v8305_v34  ;;  %v12481_v34 = vld [vmem:[#allocation88_spill] sm:$0xff]  ;;  %5746 = vmatpush.msrb.mxu3 %v3206_v40  ;;  %v3170_v40 = vld [vmem:[%s7698_s25 + $0xc78] sm:$0xff] }
 0x43f   : > { %5454 = vmatmul.f32.gmra.mxu3 %v12480_v4  ;;  %v5082_v13 = vpop.f32.mrf.mxu2 }
 0x440   : > { %v5083_v3 = vadd.f32 %v5082_v13, %v5006_v50  ;;  %v3110_v13 = vld [vmem:[%s7698_s25 + $0xa98] sm:$0xff] }
 0x441   : > { %v4931_v35 = vpop.f32.mrf.mxu0  ;;  %5515 = vmatpush.msrb.mxu0 %v3110_v13 }
 0x442   : > { %v4932_v37 = vadd.f32 %v4931_v35, %v9914_v38  ;;  %v5159_v63 = vpop.f32.mrf.mxu3 }
 0x443   : > { %v10145_v23 = vadd.f32 %v5159_v63, %v5083_v3  ;;  %v5008_v41 = vpop.f32.mrf.mxu1  ;;  %v12483_v3 = vld [vmem:[#allocation92_spill] sm:$0xff] }
 0x444   : > { %5226 = vmatmul.f32.gmra.mxu0 %v8315_v20  ;;  %5380 = vmatmul.f32.gmra.mxu2 %v12481_v34  ;;  %v5009_v2 = vadd.f32 %v5008_v41, %v4932_v37  ;;  %v3172_v34 = vld [vmem:[%s7698_s25 + $0xc88] sm:$0xff] }
 0x445   : > { %5670 = vmatpush.msrb.mxu2 %v3172_v34  ;;  %v12490_v34 = vld [vmem:[#allocation104_spill] sm:$0xff] }
 0x446   : > { %5303 = vmatmul.f32.gmra.mxu1 %v8324_v45  ;;  %v3142_v45 = vld [vmem:[%s7698_s25 + $0xb98] sm:$0xff] }
 0x447   : > { %5457 = vmatmul.f32.gmra.mxu3 %v12482_v14  ;;  %v5085_v15 = vpop.f32.mrf.mxu2  ;;  %5592 = vmatpush.msrb.mxu1 %v3142_v45  ;;  %v3108_v14 = vld [vmem:[%s7698_s25 + $0xa88] sm:$0xff]  ;;  %v12488_v45 = vld [vmem:[#allocation102_spill] sm:$0xff] }
 0x448   : > { %v5086_v38 = vadd.f32 %v5085_v15, %v5009_v2  ;;  %v12485_v2 = vld [vmem:[#allocation96_spill] sm:$0xff]  ;;  %5516 = vmatpush.msrb.mxu0 %v3108_v14  ;;  %5671 = vmatpush.msrb.mxu2 %v3170_v40  ;;  %v12491_v14 = vld [vmem:[#allocation41_spill] sm:$0xff]  ;;  %v12493_v40 = vld [vmem:[#allocation43_spill] sm:$0xff] }
 0x449   : > { %v4934_v47 = vpop.f32.mrf.mxu0  ;;  %5593 = vmatpush.msrb.mxu1 %v3140_v58  ;;  %v3104_v58 = vld [vmem:[%s7698_s25 + $0xa68] sm:$0xff] }
 0x44a   : > { %v4935_v52 = vadd.f32 %v4934_v47, %v9927_v56  ;;  %v5162_v50 = vpop.f32.mrf.mxu3  ;;  %v12484_v56 = vld [vmem:[#allocation94_spill] sm:$0xff] }
 0x44b   : > { %v10154_v4 = vadd.f32 %v5162_v50, %v5086_v38  ;;  %v5011_v20 = vpop.f32.mrf.mxu1 }
 0x44c   : > { %5229 = vmatmul.f32.gmra.mxu0 %v8332_v39  ;;  %5383 = vmatmul.f32.gmra.mxu2 %v12483_v3  ;;  %v5012_v17 = vadd.f32 %v5011_v20, %v4935_v52 }
 0x44e   : > { %5306 = vmatmul.f32.gmra.mxu1 %v12406_v48  ;;  %v3204_v48 = vld [vmem:[%s7698_s25 + $0xd88] sm:$0xff] }
 0x44f   : > { %5460 = vmatmul.f32.gmra.mxu3 %v12484_v56  ;;  %v5088_v28 = vpop.f32.mrf.mxu2  ;;  %v3106_v56 = vld [vmem:[%s7698_s25 + $0xa78] sm:$0xff] }
 0x450   : > { %v5089_v35 = vadd.f32 %v5088_v28, %v5012_v17  ;;  %5747 = vmatpush.msrb.mxu3 %v3204_v48  ;;  %v3202_v28 = vld [vmem:[%s7698_s25 + $0xd78] sm:$0xff]  ;;  %5517 = vmatpush.msrb.mxu0 %v3106_v56  ;;  %v12492_v48 = vld [vmem:[#allocation106_spill] sm:$0xff] }
 0x451   : > { %v4937_v37 = vpop.f32.mrf.mxu0  ;;  %v12496_v56 = vld [vmem:[#allocation110_spill] sm:$0xff] }
 0x452   : > { %v4938_v63 = vadd.f32 %v4937_v37, %v9941_v49  ;;  %v5165_v39 = vpop.f32.mrf.mxu3  ;;  %v12486_v49 = vld [vmem:[#allocation98_spill] sm:$0xff]  ;;  %5748 = vmatpush.msrb.mxu3 %v3202_v28  ;;  %5518 = vmatpush.msrb.mxu0 %v3104_v58 }
 0x453   : > { %v10164_v41 = vadd.f32 %v5165_v39, %v5089_v35  ;;  %v5014_v10 = vpop.f32.mrf.mxu1  ;;  %v3138_v35 = vld [vmem:[%s7698_s25 + $0xb78] sm:$0xff] }
 0x454   : > { %5232 = vmatmul.f32.gmra.mxu0 %v12409_v62  ;;  %5386 = vmatmul.f32.gmra.mxu2 %v12485_v2  ;;  %v5015_v15 = vadd.f32 %v5014_v10, %v4938_v63  ;;  %v12489_v10 = vld [vmem:[#allocation40_spill] sm:$0xff] }
 0x455   : > { %5594 = vmatpush.msrb.mxu1 %v3138_v35 }
 0x456   : > { %5309 = vmatmul.f32.gmra.mxu1 %v12411_v44  ;;  %v12487_v44 = vld [vmem:[#allocation100_spill] sm:$0xff] }
 0x457   : > { %5463 = vmatmul.f32.gmra.mxu3 %v12486_v49  ;;  %v5091_v38 = vpop.f32.mrf.mxu2  ;;  %v3168_v49 = vld [vmem:[%s7698_s25 + $0xc68] sm:$0xff] }
 0x458   : > { %v5092_v47 = vadd.f32 %v5091_v38, %v5015_v15  ;;  %5672 = vmatpush.msrb.mxu2 %v3168_v49  ;;  %v12499_v49 = vld [vmem:[#allocation49_spill] sm:$0xff] }
 0x459   : > { %v4940_v62 = vpop.f32.mrf.mxu0 }
 0x45a   : > { %v4941_v52 = vadd.f32 %v4940_v62, %v9955_v5  ;;  %v5168_v50 = vpop.f32.mrf.mxu3 }
 0x45b   : > { %v10175_v20 = vadd.f32 %v5168_v50, %v5092_v47  ;;  %v5017_v13 = vpop.f32.mrf.mxu1 }
 0x45c   : > { %5235 = vmatmul.f32.gmra.mxu0 %v12414_v60  ;;  %5389 = vmatmul.f32.gmra.mxu2 %v12487_v44  ;;  %v5018_v3 = vadd.f32 %v5017_v13, %v4941_v52  ;;  %v3136_v44 = vld [vmem:[%s7698_s25 + $0xb68] sm:$0xff] }
 0x45d   : > { %5595 = vmatpush.msrb.mxu1 %v3136_v44  ;;  %v3164_v44 = vld [vmem:[%s7698_s25 + $0xc48] sm:$0xff] }
 0x45e   : > { %5312 = vmatmul.f32.gmra.mxu1 %v12416_v18 }
 0x45f   : > { %5466 = vmatmul.f32.gmra.mxu3 %v12488_v45  ;;  %v5094_v17 = vpop.f32.mrf.mxu2 }
 0x460   : > { %v5095_v5 = vadd.f32 %v5094_v17, %v5018_v3  ;;  %v12494_v3 = vld [vmem:[#allocation108_spill] sm:$0xff]  ;;  %v12495_v17 = vld [vmem:[#allocation45_spill] sm:$0xff] }
 0x461   : > { %v4943_v37 = vpop.f32.mrf.mxu0 }
 0x462   : > { %v4944_v60 = vadd.f32 %v4943_v37, %v9968_v51  ;;  %v5171_v63 = vpop.f32.mrf.mxu3  ;;  %v3200_v51 = vld [vmem:[%s7698_s25 + $0xd68] sm:$0xff] }
 0x463   : > { %v10186_v39 = vadd.f32 %v5171_v63, %v5095_v5  ;;  %v5020_v18 = vpop.f32.mrf.mxu1  ;;  %5749 = vmatpush.msrb.mxu3 %v3200_v51  ;;  %v3166_v5 = vld [vmem:[%s7698_s25 + $0xc58] sm:$0xff] }
 0x464   : > { %5238 = vmatmul.f32.gmra.mxu0 %v12489_v10  ;;  %5392 = vmatmul.f32.gmra.mxu2 %v12490_v34  ;;  %v5021_v2 = vadd.f32 %v5020_v18, %v4944_v60  ;;  %v3102_v10 = vld [vmem:[%s7698_s25 + $0xa58] sm:$0xff] }
 0x465   : > { %5673 = vmatpush.msrb.mxu2 %v3166_v5  ;;  %v3198_v34 = vld [vmem:[%s7698_s25 + $0xd58] sm:$0xff]  ;;  %5519 = vmatpush.msrb.mxu0 %v3102_v10  ;;  %v3132_v5 = vld [vmem:[%s7698_s25 + $0xb48] sm:$0xff] }
 0x466   : > { %5315 = vmatmul.f32.gmra.mxu1 %v12491_v14  ;;  %v12498_v14 = vld [vmem:[#allocation112_spill] sm:$0xff]  ;;  %5750 = vmatpush.msrb.mxu3 %v3198_v34 }
 0x467   : > { %5469 = vmatmul.f32.gmra.mxu3 %v12492_v48  ;;  %v5097_v15 = vpop.f32.mrf.mxu2  ;;  %v3134_v48 = vld [vmem:[%s7698_s25 + $0xb58] sm:$0xff]  ;;  %5674 = vmatpush.msrb.mxu2 %v3164_v44 }
 0x468   : > { %v5098_v38 = vadd.f32 %v5097_v15, %v5021_v2  ;;  %v12497_v2 = vld [vmem:[#allocation47_spill] sm:$0xff]  ;;  %5596 = vmatpush.msrb.mxu1 %v3134_v48 }
 0x469   : > { %v4946_v47 = vpop.f32.mrf.mxu0 }
 0x46a   : > { %v4947_v62 = vadd.f32 %v4946_v47, %v9980_v7  ;;  %v5174_v52 = vpop.f32.mrf.mxu3  ;;  %5597 = vmatpush.msrb.mxu1 %v3132_v5 }
 0x46b   : > { %v10196_v50 = vadd.f32 %v5174_v52, %v5098_v38  ;;  %v5023_v13 = vpop.f32.mrf.mxu1 }
 0x46c   : > { %5241 = vmatmul.f32.gmra.mxu0 %v12493_v40  ;;  %5395 = vmatmul.f32.gmra.mxu2 %v12494_v3  ;;  %v5024_v45 = vadd.f32 %v5023_v13, %v4947_v62  ;;  %v12501_v40 = vld [vmem:[#allocation51_spill] sm:$0xff]  ;;  %v12502_v3 = vld [vmem:[#allocation116_spill] sm:$0xff] }
 0x46e   : > { %5318 = vmatmul.f32.gmra.mxu1 %v12495_v17  ;;  %v3196_v17 = vld [vmem:[%s7698_s25 + $0xd48] sm:$0xff] }
 0x46f   : > { %5472 = vmatmul.f32.gmra.mxu3 %v12496_v56  ;;  %v5100_v28 = vpop.f32.mrf.mxu2 }
 0x470   : > { %v5101_v7 = vadd.f32 %v5100_v28, %v5024_v45  ;;  %v3100_v45 = vld [vmem:[%s7698_s25 + $0xa48] sm:$0xff]  ;;  %5751 = vmatpush.msrb.mxu3 %v3196_v17 }
 0x471   : > { %v4949_v35 = vpop.f32.mrf.mxu0  ;;  %5520 = vmatpush.msrb.mxu0 %v3100_v45  ;;  %v12503_v28 = vld [vmem:[#allocation53_spill] sm:$0xff] }
 0x472   : > { %v4950_v37 = vadd.f32 %v4949_v35, %v9993_v26  ;;  %v5177_v60 = vpop.f32.mrf.mxu3  ;;  %v12500_v26 = vld [vmem:[#allocation114_spill] sm:$0xff]  ;;  %v3160_v45 = vld [vmem:[%s7698_s25 + $0xc28] sm:$0xff] }
 0x473   : > { %v10205_v63 = vadd.f32 %v5177_v60, %v5101_v7  ;;  %v5026_v18 = vpop.f32.mrf.mxu1 }
 0x474   : > { %5244 = vmatmul.f32.gmra.mxu0 %v12497_v2  ;;  %5398 = vmatmul.f32.gmra.mxu2 %v12498_v14  ;;  %v5027_v15 = vadd.f32 %v5026_v18, %v4950_v37  ;;  %v12505_v2 = vld [vmem:[#allocation120_spill] sm:$0xff]  ;;  %v3162_v14 = vld [vmem:[%s7698_s25 + $0xc38] sm:$0xff] }
 0x475   : > { %5675 = vmatpush.msrb.mxu2 %v3162_v14 }
 0x476   : > { %5321 = vmatmul.f32.gmra.mxu1 %v12499_v49 }
 0x477   : > { %5475 = vmatmul.f32.gmra.mxu3 %v12500_v26  ;;  %v5103_v38 = vpop.f32.mrf.mxu2  ;;  %v3098_v26 = vld [vmem:[%s7698_s25 + $0xa38] sm:$0xff]  ;;  %5676 = vmatpush.msrb.mxu2 %v3160_v45 }
 0x478   : > { %v5104_v58 = vadd.f32 %v5103_v38, %v5027_v15  ;;  %v12506_v15 = vld [vmem:[#allocation122_spill] sm:$0xff]  ;;  %v3194_v38 = vld [vmem:[%s7698_s25 + $0xd38] sm:$0xff]  ;;  %5521 = vmatpush.msrb.mxu0 %v3098_v26 }
 0x479   : > { %v4952_v51 = vpop.f32.mrf.mxu0  ;;  %5752 = vmatpush.msrb.mxu3 %v3194_v38  ;;  %v3190_v26 = vld [vmem:[%s7698_s25 + $0xd18] sm:$0xff]  ;;  %v12511_v38 = vld [vmem:[#allocation132_spill] sm:$0xff] }
 0x47a   : > { %v4953_v47 = vadd.f32 %v4952_v51, %v10007_v42  ;;  %v5180_v62 = vpop.f32.mrf.mxu3  ;;  %v12504_v42 = vld [vmem:[#allocation118_spill] sm:$0xff] }
 0x47b   : > { %v10215_v52 = vadd.f32 %v5180_v62, %v5104_v58  ;;  %v5029_v13 = vpop.f32.mrf.mxu1  ;;  %v3130_v58 = vld [vmem:[%s7698_s25 + $0xb38] sm:$0xff] }
 0x47c   : > { %5247 = vmatmul.f32.gmra.mxu0 %v12501_v40  ;;  %5401 = vmatmul.f32.gmra.mxu2 %v12502_v3  ;;  %v5030_v56 = vadd.f32 %v5029_v13, %v4953_v47  ;;  %v12507_v13 = vld [vmem:[#allocation124_spill] sm:$0xff]  ;;  %v12508_v40 = vld [vmem:[#allocation126_spill] sm:$0xff] }
 0x47d   : > { %5598 = vmatpush.msrb.mxu1 %v3130_v58 }
 0x47e   : > { %5324 = vmatmul.f32.gmra.mxu1 %v12503_v28 }
 0x47f   : > { %5478 = vmatmul.f32.gmra.mxu3 %v12504_v42  ;;  %v5106_v7 = vpop.f32.mrf.mxu2 }
 0x480   : > { %v5107_v35 = vadd.f32 %v5106_v7, %v5030_v56  ;;  %v3096_v56 = vld [vmem:[%s7698_s25 + $0xa28] sm:$0xff] }
 0x481   : > { %v4955_v37 = vpop.f32.mrf.mxu0  ;;  %5522 = vmatpush.msrb.mxu0 %v3096_v56  ;;  %v3124_v56 = vld [vmem:[%s7698_s25 + $0xb08] sm:$0xff] }
 0x482   : > { %v4956_v60 = vadd.f32 %v4955_v37, %v10021_v6  ;;  %v5183_v18 = vpop.f32.mrf.mxu3 }
 0x483   : > { %v10226_v10 = vadd.f32 %v5183_v18, %v5107_v35  ;;  %v5032_v34 = vpop.f32.mrf.mxu1  ;;  %v3128_v35 = vld [vmem:[%s7698_s25 + $0xb28] sm:$0xff] }
 0x484   : > { %5250 = vmatmul.f32.gmra.mxu0 %v12439_v57  ;;  %5404 = vmatmul.f32.gmra.mxu2 %v12505_v2  ;;  %v5033_v48 = vadd.f32 %v5032_v34, %v4956_v60  ;;  %v12510_v60 = vld [vmem:[#allocation130_spill] sm:$0xff]  ;;  %v3158_v34 = vld [vmem:[%s7698_s25 + $0xc18] sm:$0xff] }
 0x485   : > { %5599 = vmatpush.msrb.mxu1 %v3128_v35  ;;  %5677 = vmatpush.msrb.mxu2 %v3158_v34  ;;  %v3314_v35 = vld [vmem:[%s7698_s25 + $0x10f8] sm:$0xff] }
 0x486   : > { %5327 = vmatmul.f32.gmra.mxu1 %v12441_v53 }
 0x487   : > { %5481 = vmatmul.f32.gmra.mxu3 %v12506_v15  ;;  %v5109_v49 = vpop.f32.mrf.mxu2 }
 0x488   : > { %v5110_v6 = vadd.f32 %v5109_v49, %v5033_v48  ;;  %v3094_v49 = vld [vmem:[%s7698_s25 + $0xa18] sm:$0xff] }
 0x489   : > { %v4958_v51 = vpop.f32.mrf.mxu0  ;;  %5523 = vmatpush.msrb.mxu0 %v3094_v49 }
 0x48a   : > { %v4959_v57 = vadd.f32 %v4958_v51, %v10034_v36  ;;  %v5186_v47 = vpop.f32.mrf.mxu3  ;;  %v3192_v36 = vld [vmem:[%s7698_s25 + $0xd28] sm:$0xff] }
 0x48b   : > { %v10237_v62 = vadd.f32 %v5186_v47, %v5110_v6  ;;  %v5035_v53 = vpop.f32.mrf.mxu1  ;;  %5753 = vmatpush.msrb.mxu3 %v3192_v36 }
 0x48c   : > { %5253 = vmatmul.f32.gmra.mxu0 %v12444_v32  ;;  %5407 = vmatmul.f32.gmra.mxu2 %v12507_v13  ;;  %v5036_v44 = vadd.f32 %v5035_v53, %v4959_v57 }
 0x48d   : > { %5754 = vmatpush.msrb.mxu3 %v3190_v26  ;;  %v12518_v26 = vld [vmem:[#allocation146_spill] sm:$0xff] }
 0x48e   : > { %5330 = vmatmul.f32.gmra.mxu1 %v12446_v22  ;;  %v12509_v22 = vld [vmem:[#allocation128_spill] sm:$0xff] }
 0x48f   : > { %5484 = vmatmul.f32.gmra.mxu3 %v12508_v40  ;;  %v5112_v3 = vpop.f32.mrf.mxu2  ;;  %v12513_v40 = vld [vmem:[#allocation136_spill] sm:$0xff] }
 0x490   : > { %v5113_v17 = vadd.f32 %v5112_v3, %v5036_v44  ;;  %v3156_v44 = vld [vmem:[%s7698_s25 + $0xc08] sm:$0xff] }
 0x491   : > { %v4961_v28 = vpop.f32.mrf.mxu0  ;;  %v3092_v3 = vld [vmem:[%s7698_s25 + $0xa08] sm:$0xff]  ;;  %5678 = vmatpush.msrb.mxu2 %v3156_v44 }
 0x492   : > { %v4962_v32 = vadd.f32 %v4961_v28, %v10046_v21  ;;  %v5189_v42 = vpop.f32.mrf.mxu3  ;;  %5524 = vmatpush.msrb.mxu0 %v3092_v3  ;;  %v12522_v3 = vld [vmem:[#allocation150_spill] sm:$0xff] }
 0x493   : > { %v10247_v7 = vadd.f32 %v5189_v42, %v5113_v17  ;;  %v5038_v5 = vpop.f32.mrf.mxu1  ;;  %5971 = vmatpush.msra.mxu2 %v3314_v35  ;;  %v3278_v35 = vld [vmem:[%s7698_s25 + $0xfd8] sm:$0xff] }
 0x494   : > { %5256 = vmatmul.f32.gmra.mxu0 %v12449_v30  ;;  %5410 = vmatmul.f32.gmra.mxu2 %v12509_v22  ;;  %v5039_v37 = vadd.f32 %v5038_v5, %v4962_v32 }
 0x496   : > { %5333 = vmatmul.f32.gmra.mxu1 %v12451_v55  ;;  %v3126_v55 = vld [vmem:[%s7698_s25 + $0xb18] sm:$0xff] }
 0x497   : > { %5487 = vmatmul.f32.gmra.mxu3 %v12510_v60  ;;  %v5115_v18 = vpop.f32.mrf.mxu2  ;;  %5600 = vmatpush.msrb.mxu1 %v3126_v55  ;;  %v3312_v55 = vld [vmem:[%s7698_s25 + $0x10e8] sm:$0xff] }
 0x498   : > { %v5116_v21 = vadd.f32 %v5115_v18, %v5039_v37  ;;  %v12516_v37 = vld [vmem:[#allocation142_spill] sm:$0xff]  ;;  %v3250_v18 = vld [vmem:[%s7698_s25 + $0xef8] sm:$0xff]  ;;  %5972 = vmatpush.msra.mxu2 %v3312_v55 }
 0x499   : > { %v4964_v2 = vpop.f32.mrf.mxu0  ;;  %5601 = vmatpush.msrb.mxu1 %v3124_v56  ;;  %5817 = vmatpush.msra.mxu0 %v3250_v18  ;;  %v12529_v55 = vld [vmem:[#allocation79_spill] sm:$0xff] }
 0x49a   : > { %v4965_v14 = vadd.f32 %v4964_v2, %v10059_v59  ;;  %v5192_v48 = vpop.f32.mrf.mxu3  ;;  %v12512_v59 = vld [vmem:[#allocation134_spill] sm:$0xff] }
 0x49b   : > { %v10256_v15 = vadd.f32 %v5192_v48, %v5116_v21  ;;  %v5041_v30 = vpop.f32.mrf.mxu1  ;;  %v3346_v21 = vld [vmem:[%s7698_s25 + $0x11f8] sm:$0xff] }
 0x49c   : > { %5259 = vmatmul.f32.gmra.mxu0 %v12454_v29  ;;  %5413 = vmatmul.f32.gmra.mxu2 %v12511_v38  ;;  %v5042_v6 = vadd.f32 %v5041_v30, %v4965_v14  ;;  %v12517_v30 = vld [vmem:[#allocation144_spill] sm:$0xff] }
 0x49e   : > { %5336 = vmatmul.f32.gmra.mxu1 %v12456_v8  ;;  %v3188_v8 = vld [vmem:[%s7698_s25 + $0xd08] sm:$0xff] }
 0x49f   : > { %5490 = vmatmul.f32.gmra.mxu3 %v12512_v59  ;;  %v5118_v58 = vpop.f32.mrf.mxu2  ;;  %v3248_v59 = vld [vmem:[%s7698_s25 + $0xee8] sm:$0xff] }
 0x4a0   : > { %v5119_v51 = vadd.f32 %v5118_v58, %v5042_v6  ;;  %5755 = vmatpush.msrb.mxu3 %v3188_v8  ;;  %5818 = vmatpush.msra.mxu0 %v3248_v59  ;;  %v3276_v59 = vld [vmem:[%s7698_s25 + $0xfc8] sm:$0xff] }
 0x4a1   : > { %v4967_v57 = vpop.f32.mrf.mxu0 }
 0x4a2   : > { %v4968_v47 = vadd.f32 %v4967_v57, %v10073_v27  ;;  %v5195_v29 = vpop.f32.mrf.mxu3  ;;  %v12514_v27 = vld [vmem:[#allocation138_spill] sm:$0xff]  ;;  %6048 = vmatpush.msra.mxu3 %v3346_v21 }
 0x4a3   : > { %v10266_v53 = vadd.f32 %v5195_v29, %v5119_v51  ;;  %v5044_v13 = vpop.f32.mrf.mxu1  ;;  %v3280_v29 = vld [vmem:[%s7698_s25 + $0xfe8] sm:$0xff] }
 0x4a4   : > { %5262 = vmatmul.f32.gmra.mxu0 %v12458_v16  ;;  %5416 = vmatmul.f32.gmra.mxu2 %v12513_v40  ;;  %v5045_v45 = vadd.f32 %v5044_v13, %v4968_v47  ;;  %v12520_v13 = vld [vmem:[#allocation148_spill] sm:$0xff]  ;;  %v12521_v40 = vld [vmem:[#allocation71_spill] sm:$0xff] }
 0x4a6   : > { %5339 = vmatmul.f32.gmra.mxu1 %v12460_v0  ;;  %v12515_v0 = vld [vmem:[#allocation140_spill] sm:$0xff] }
 0x4a7   : > { %5493 = vmatmul.f32.gmra.mxu3 %v12514_v27  ;;  %v5121_v17 = vpop.f32.mrf.mxu2 }
 0x4a8   : > { %v5122_v36 = vadd.f32 %v5121_v17, %v5045_v45  ;;  %v3310_v45 = vld [vmem:[%s7698_s25 + $0x10d8] sm:$0xff] }
 0x4a9   : > { %v5218_v16 = vpop.f32.mrf.mxu0  ;;  %5973 = vmatpush.msra.mxu2 %v3310_v45  ;;  %v3242_v45 = vld [vmem:[%s7698_s25 + $0xeb8] sm:$0xff] }
 0x4aa   : > { %v5198_v28 = vpop.f32.mrf.mxu3  ;;  %v5219_v32 = vadd.f32 %v5218_v16, %v10084_v54  ;;  %v3282_v54 = vld [vmem:[%s7698_s25 + $0xff8] sm:$0xff] }
 0x4ab   : > { %v10277_v42 = vadd.f32 %v5198_v28, %v5122_v36  ;;  %v5295_v5 = vpop.f32.mrf.mxu1  ;;  %5894 = vmatpush.msra.mxu1 %v3282_v54  ;;  %v3246_v28 = vld [vmem:[%s7698_s25 + $0xed8] sm:$0xff] }
 0x4ac   : > { %5265 = vmatmul.f32.gmra.mxu0 %v12462_v11  ;;  %5419 = vmatmul.f32.gmra.mxu2 %v12515_v0  ;;  %v5296_v22 = vadd.f32 %v5295_v5, %v5219_v32  ;;  %v3342_v32 = vld [vmem:[%s7698_s25 + $0x11d8] sm:$0xff]  ;;  %v12523_v5 = vld [vmem:[#allocation73_spill] sm:$0xff]  ;;  %v12524_v0 = vld [vmem:[#allocation152_spill] sm:$0xff] }
 0x4ad   : > { %5895 = vmatpush.msra.mxu1 %v3280_v29  ;;  %5819 = vmatpush.msra.mxu0 %v3246_v28 }
 0x4ae   : > { %5342 = vmatmul.f32.gmra.mxu1 %v12464_v19 }
 0x4af   : > { %5496 = vmatmul.f32.gmra.mxu3 %v12516_v37  ;;  %v5372_v60 = vpop.f32.mrf.mxu2  ;;  %v12525_v37 = vld [vmem:[#allocation75_spill] sm:$0xff]  ;;  %5896 = vmatpush.msra.mxu1 %v3278_v35  ;;  %v12536_v35 = vld [vmem:[#allocation164_spill] sm:$0xff] }
 0x4b0   : > { %v5373_v34 = vadd.f32 %v5372_v60, %v5296_v22 }
 0x4b1   : > { %v5221_v2 = vpop.f32.mrf.mxu0  ;;  %5897 = vmatpush.msra.mxu1 %v3276_v59 }
 0x4b2   : > { %v5222_v11 = vadd.f32 %v5221_v2, %v10094_v25  ;;  %v5449_v14 = vpop.f32.mrf.mxu3  ;;  %v3344_v25 = vld [vmem:[%s7698_s25 + $0x11e8] sm:$0xff] }
 0x4b3   : > { %v10288_v48 = vadd.f32 %v5449_v14, %v5373_v34  ;;  %v5298_v19 = vpop.f32.mrf.mxu1  ;;  %6049 = vmatpush.msra.mxu3 %v3344_v25  ;;  %v3308_v14 = vld [vmem:[%s7698_s25 + $0x10c8] sm:$0xff] }
 0x4b4   : > { %5268 = vmatmul.f32.gmra.mxu0 %v12466_v61  ;;  %5422 = vmatmul.f32.gmra.mxu2 %v12517_v30  ;;  %v5299_v49 = vadd.f32 %v5298_v19, %v5222_v11  ;;  %v12527_v19 = vld [vmem:[#allocation77_spill] sm:$0xff]  ;;  %v12528_v30 = vld [vmem:[#allocation156_spill] sm:$0xff] }
 0x4b5   : > { %6050 = vmatpush.msra.mxu3 %v3342_v32  ;;  %5974 = vmatpush.msra.mxu2 %v3308_v14 }
 0x4b6   : > { %5345 = vmatmul.f32.gmra.mxu1 %v12468_v43  ;;  %v12519_v43 = vld [vmem:[#allocation70_spill] sm:$0xff] }
 0x4b7   : > { %5499 = vmatmul.f32.gmra.mxu3 %v12518_v26  ;;  %v5375_v38 = vpop.f32.mrf.mxu2  ;;  %v3340_v26 = vld [vmem:[%s7698_s25 + $0x11c8] sm:$0xff] }
 0x4b8   : > { %v5376_v6 = vadd.f32 %v5375_v38, %v5299_v49  ;;  %v3244_v49 = vld [vmem:[%s7698_s25 + $0xec8] sm:$0xff]  ;;  %6051 = vmatpush.msra.mxu3 %v3340_v26 }
 0x4b9   : > { %v5224_v58 = vpop.f32.mrf.mxu0  ;;  %5820 = vmatpush.msra.mxu0 %v3244_v49  ;;  %v3272_v49 = vld [vmem:[%s7698_s25 + $0xfa8] sm:$0xff] }
 0x4ba   : > { %v5225_v61 = vadd.f32 %v5224_v58, %v10103_v46  ;;  %v5452_v51 = vpop.f32.mrf.mxu3  ;;  %v12539_v26 = vld [vmem:[#allocation89_spill] sm:$0xff] }
 0x4bb   : > { %v10298_v57 = vadd.f32 %v5452_v51, %v5376_v6  ;;  %v5301_v47 = vpop.f32.mrf.mxu1  ;;  %5821 = vmatpush.msra.mxu0 %v3242_v45  ;;  %v12545_v45 = vld [vmem:[#allocation95_spill] sm:$0xff] }
 0x4bc   : > { %5271 = vmatmul.f32.gmra.mxu0 %v12519_v43  ;;  %5425 = vmatmul.f32.gmra.mxu2 %v12520_v13  ;;  %v5302_v44 = vadd.f32 %v5301_v47, %v5225_v61  ;;  %v12531_v43 = vld [vmem:[#allocation81_spill] sm:$0xff]  ;;  %v12532_v13 = vld [vmem:[#allocation160_spill] sm:$0xff] }
 0x4be   : > { %5348 = vmatmul.f32.gmra.mxu1 %v12521_v40 }
 0x4bf   : > { %5502 = vmatmul.f32.gmra.mxu3 %v12522_v3  ;;  %v5378_v8 = vpop.f32.mrf.mxu2  ;;  %v12533_v3 = vld [vmem:[#allocation83_spill] sm:$0xff] }
 0x4c0   : > { %v5379_v46 = vadd.f32 %v5378_v8, %v5302_v44  ;;  %v3306_v44 = vld [vmem:[%s7698_s25 + $0x10b8] sm:$0xff]  ;;  %v12534_v8 = vld [vmem:[#allocation162_spill] sm:$0xff] }
 0x4c1   : > { %v5227_v27 = vpop.f32.mrf.mxu0  ;;  %5975 = vmatpush.msra.mxu2 %v3306_v44  ;;  %v3334_v44 = vld [vmem:[%s7698_s25 + $0x1198] sm:$0xff] }
 0x4c2   : > { %v5228_v17 = vadd.f32 %v5227_v27, %v10113_v1  ;;  %v5455_v56 = vpop.f32.mrf.mxu3  ;;  %v12526_v1 = vld [vmem:[#allocation154_spill] sm:$0xff]  ;;  %v3338_v27 = vld [vmem:[%s7698_s25 + $0x11b8] sm:$0xff] }
 0x4c3   : > { %v10307_v36 = vadd.f32 %v5455_v56, %v5379_v46  ;;  %v5304_v16 = vpop.f32.mrf.mxu1  ;;  %6052 = vmatpush.msra.mxu3 %v3338_v27 }
 0x4c4   : > { %5274 = vmatmul.f32.gmra.mxu0 %v12523_v5  ;;  %5428 = vmatmul.f32.gmra.mxu2 %v12524_v0  ;;  %v5305_v22 = vadd.f32 %v5304_v16, %v5228_v17  ;;  %v3274_v17 = vld [vmem:[%s7698_s25 + $0xfb8] sm:$0xff]  ;;  %v12535_v0 = vld [vmem:[#allocation85_spill] sm:$0xff] }
 0x4c5   : > { %5898 = vmatpush.msra.mxu1 %v3274_v17 }
 0x4c6   : > { %5351 = vmatmul.f32.gmra.mxu1 %v12525_v37  ;;  %v12537_v37 = vld [vmem:[#allocation87_spill] sm:$0xff] }
 0x4c7   : > { %5505 = vmatmul.f32.gmra.mxu3 %v12526_v1  ;;  %v5381_v60 = vpop.f32.mrf.mxu2  ;;  %v12538_v1 = vld [vmem:[#allocation166_spill] sm:$0xff]  ;;  %5899 = vmatpush.msra.mxu1 %v3272_v49 }
 0x4c8   : > { %v5382_v18 = vadd.f32 %v5381_v60, %v5305_v22 }
 0x4c9   : > { %v5230_v21 = vpop.f32.mrf.mxu0 }
 0x4ca   : > { %v5231_v34 = vadd.f32 %v5230_v21, %v10124_v31  ;;  %v5458_v54 = vpop.f32.mrf.mxu3  ;;  %v12530_v31 = vld [vmem:[#allocation158_spill] sm:$0xff] }
 0x4cb   : > { %v10317_v2 = vadd.f32 %v5458_v54, %v5382_v18  ;;  %v5307_v11 = vpop.f32.mrf.mxu1  ;;  %v3304_v18 = vld [vmem:[%s7698_s25 + $0x10a8] sm:$0xff] }
 0x4cc   : > { %5525 = vmatmul.f32.vlgmr.msrb.gmra.mxu0 %v12527_v19  ;;  %5679 = vmatmul.f32.vlgmr.msrb.gmra.mxu2 %v12528_v30  ;;  %v5308_v38 = vadd.f32 %v5307_v11, %v5231_v34  ;;  %v3240_v34 = vld [vmem:[%s7698_s25 + $0xea8] sm:$0xff] }
 0x4cd   : > { %5976 = vmatpush.msra.mxu2 %v3304_v18  ;;  %5822 = vmatpush.msra.mxu0 %v3240_v34  ;;  %v12549_v18 = vld [vmem:[#allocation99_spill] sm:$0xff]  ;;  %v3268_v34 = vld [vmem:[%s7698_s25 + $0xf88] sm:$0xff] }
 0x4ce   : > { %5602 = vmatmul.f32.vlgmr.msrb.gmra.mxu1 %v12529_v55 }
 0x4cf   : > { %5756 = vmatmul.f32.vlgmr.msrb.gmra.mxu3 %v12530_v31  ;;  %v5384_v6 = vpop.f32.mrf.mxu2  ;;  %v12541_v31 = vld [vmem:[#allocation91_spill] sm:$0xff] }
 0x4d0   : > { %v5385_v25 = vadd.f32 %v5384_v6, %v5308_v38  ;;  %v12540_v38 = vld [vmem:[#allocation168_spill] sm:$0xff]  ;;  %v12542_v6 = vld [vmem:[#allocation170_spill] sm:$0xff] }
 0x4d1   : > { %v5233_v58 = vpop.f32.mrf.mxu0 }
 0x4d2   : > { %v5234_v61 = vadd.f32 %v5233_v58, %v10135_v12  ;;  %v5461_v51 = vpop.f32.mrf.mxu3 }
 0x4d3   : > { %v10328_v47 = vadd.f32 %v5461_v51, %v5385_v25  ;;  %v5310_v29 = vpop.f32.mrf.mxu1  ;;  %v3302_v25 = vld [vmem:[%s7698_s25 + $0x1098] sm:$0xff] }
 0x4d4   : > { %5528 = vmatmul.f32.gmra.mxu0 %v12531_v43  ;;  %5682 = vmatmul.f32.gmra.mxu2 %v12532_v13  ;;  %v5311_v40 = vadd.f32 %v5310_v29, %v5234_v61  ;;  %v3238_v13 = vld [vmem:[%s7698_s25 + $0xe98] sm:$0xff] }
 0x4d5   : > { %5977 = vmatpush.msra.mxu2 %v3302_v25  ;;  %5823 = vmatpush.msra.mxu0 %v3238_v13  ;;  %v3234_v25 = vld [vmem:[%s7698_s25 + $0xe78] sm:$0xff] }
 0x4d6   : > { %5605 = vmatmul.f32.gmra.mxu1 %v12533_v3  ;;  %v12544_v3 = vld [vmem:[#allocation172_spill] sm:$0xff] }
 0x4d7   : > { %5759 = vmatmul.f32.gmra.mxu3 %v12534_v8  ;;  %v5387_v46 = vpop.f32.mrf.mxu2  ;;  %v3270_v8 = vld [vmem:[%s7698_s25 + $0xf98] sm:$0xff] }
 0x4d8   : > { %v5388_v12 = vadd.f32 %v5387_v46, %v5311_v40  ;;  %v12543_v40 = vld [vmem:[#allocation93_spill] sm:$0xff]  ;;  %5900 = vmatpush.msra.mxu1 %v3270_v8  ;;  %v12556_v8 = vld [vmem:[#allocation184_spill] sm:$0xff] }
 0x4d9   : > { %v5236_v56 = vpop.f32.mrf.mxu0 }
 0x4da   : > { %v5237_v16 = vadd.f32 %v5236_v56, %v10145_v23  ;;  %v5464_v28 = vpop.f32.mrf.mxu3  ;;  %v3336_v23 = vld [vmem:[%s7698_s25 + $0x11a8] sm:$0xff]  ;;  %5901 = vmatpush.msra.mxu1 %v3268_v34 }
 0x4db   : > { %v10339_v32 = vadd.f32 %v5464_v28, %v5388_v12  ;;  %v5313_v5 = vpop.f32.mrf.mxu1  ;;  %6053 = vmatpush.msra.mxu3 %v3336_v23 }
 0x4dc   : > { %5531 = vmatmul.f32.gmra.mxu0 %v12535_v0  ;;  %5685 = vmatmul.f32.gmra.mxu2 %v12536_v35  ;;  %v5314_v22 = vadd.f32 %v5313_v5, %v5237_v16  ;;  %v3300_v0 = vld [vmem:[%s7698_s25 + $0x1088] sm:$0xff] }
 0x4dd   : > { %6054 = vmatpush.msra.mxu3 %v3334_v44  ;;  %v12547_v35 = vld [vmem:[#allocation97_spill] sm:$0xff]  ;;  %5978 = vmatpush.msra.mxu2 %v3300_v0 }
 0x4de   : > { %5608 = vmatmul.f32.gmra.mxu1 %v12537_v37  ;;  %v3236_v37 = vld [vmem:[%s7698_s25 + $0xe88] sm:$0xff] }
 0x4df   : > { %5762 = vmatmul.f32.gmra.mxu3 %v12538_v1  ;;  %v5390_v60 = vpop.f32.mrf.mxu2  ;;  %v3332_v1 = vld [vmem:[%s7698_s25 + $0x1188] sm:$0xff]  ;;  %5824 = vmatpush.msra.mxu0 %v3236_v37 }
 0x4e0   : > { %v5391_v21 = vadd.f32 %v5390_v60, %v5314_v22  ;;  %v12548_v22 = vld [vmem:[#allocation176_spill] sm:$0xff]  ;;  %6055 = vmatpush.msra.mxu3 %v3332_v1  ;;  %v3264_v37 = vld [vmem:[%s7698_s25 + $0xf68] sm:$0xff] }
 0x4e1   : > { %v5239_v54 = vpop.f32.mrf.mxu0  ;;  %5825 = vmatpush.msra.mxu0 %v3234_v25  ;;  %v12559_v1 = vld [vmem:[#allocation109_spill] sm:$0xff]  ;;  %v12565_v25 = vld [vmem:[#allocation115_spill] sm:$0xff] }
 0x4e2   : > { %v5240_v11 = vadd.f32 %v5239_v54, %v10154_v4  ;;  %v5467_v14 = vpop.f32.mrf.mxu3 }
 0x4e3   : > { %v10349_v19 = vadd.f32 %v5467_v14, %v5391_v21  ;;  %v5316_v30 = vpop.f32.mrf.mxu1 }
 0x4e4   : > { %5534 = vmatmul.f32.gmra.mxu0 %v12539_v26  ;;  %5688 = vmatmul.f32.gmra.mxu2 %v12540_v38  ;;  %v5317_v55 = vadd.f32 %v5316_v30, %v5240_v11  ;;  %v12551_v26 = vld [vmem:[#allocation101_spill] sm:$0xff]  ;;  %v12552_v38 = vld [vmem:[#allocation180_spill] sm:$0xff] }
 0x4e6   : > { %5611 = vmatmul.f32.gmra.mxu1 %v12541_v31 }
 0x4e7   : > { %5765 = vmatmul.f32.gmra.mxu3 %v12542_v6  ;;  %v5393_v59 = vpop.f32.mrf.mxu2  ;;  %v12553_v6 = vld [vmem:[#allocation103_spill] sm:$0xff] }
 0x4e8   : > { %v5394_v4 = vadd.f32 %v5393_v59, %v5317_v55  ;;  %v3298_v55 = vld [vmem:[%s7698_s25 + $0x1078] sm:$0xff]  ;;  %v12554_v59 = vld [vmem:[#allocation182_spill] sm:$0xff] }
 0x4e9   : > { %v5242_v58 = vpop.f32.mrf.mxu0  ;;  %5979 = vmatpush.msra.mxu2 %v3298_v55  ;;  %v3326_v55 = vld [vmem:[%s7698_s25 + $0x1158] sm:$0xff] }
 0x4ea   : > { %v5243_v61 = vadd.f32 %v5242_v58, %v10164_v41  ;;  %v5470_v51 = vpop.f32.mrf.mxu3  ;;  %v12546_v41 = vld [vmem:[#allocation174_spill] sm:$0xff]  ;;  %v3330_v58 = vld [vmem:[%s7698_s25 + $0x1178] sm:$0xff] }
 0x4eb   : > { %v10358_v29 = vadd.f32 %v5470_v51, %v5394_v4  ;;  %v5319_v43 = vpop.f32.mrf.mxu1  ;;  %6056 = vmatpush.msra.mxu3 %v3330_v58 }
 0x4ec   : > { %5537 = vmatmul.f32.gmra.mxu0 %v12543_v40  ;;  %5691 = vmatmul.f32.gmra.mxu2 %v12544_v3  ;;  %v5320_v46 = vadd.f32 %v5319_v43, %v5243_v61  ;;  %v3266_v61 = vld [vmem:[%s7698_s25 + $0xf78] sm:$0xff]  ;;  %v12555_v3 = vld [vmem:[#allocation105_spill] sm:$0xff] }
 0x4ed   : > { %5902 = vmatpush.msra.mxu1 %v3266_v61 }
 0x4ee   : > { %5614 = vmatmul.f32.gmra.mxu1 %v12545_v45  ;;  %v12557_v45 = vld [vmem:[#allocation107_spill] sm:$0xff] }
 0x4ef   : > { %5768 = vmatmul.f32.gmra.mxu3 %v12546_v41  ;;  %v5396_v27 = vpop.f32.mrf.mxu2  ;;  %v12558_v41 = vld [vmem:[#allocation186_spill] sm:$0xff]  ;;  %5903 = vmatpush.msra.mxu1 %v3264_v37 }
 0x4f0   : > { %v5397_v12 = vadd.f32 %v5396_v27, %v5320_v46 }
 0x4f1   : > { %v5245_v17 = vpop.f32.mrf.mxu0 }
 0x4f2   : > { %v5246_v56 = vadd.f32 %v5245_v17, %v10175_v20  ;;  %v5473_v16 = vpop.f32.mrf.mxu3  ;;  %v12550_v20 = vld [vmem:[#allocation178_spill] sm:$0xff] }
 0x4f3   : > { %v10368_v28 = vadd.f32 %v5473_v16, %v5397_v12  ;;  %v5322_v5 = vpop.f32.mrf.mxu1  ;;  %v3296_v12 = vld [vmem:[%s7698_s25 + $0x1068] sm:$0xff] }
 0x4f4   : > { %5540 = vmatmul.f32.gmra.mxu0 %v12547_v35  ;;  %5694 = vmatmul.f32.gmra.mxu2 %v12548_v22  ;;  %v5323_v60 = vadd.f32 %v5322_v5, %v5246_v56  ;;  %v3232_v56 = vld [vmem:[%s7698_s25 + $0xe68] sm:$0xff] }
 0x4f5   : > { %5980 = vmatpush.msra.mxu2 %v3296_v12  ;;  %5826 = vmatpush.msra.mxu0 %v3232_v56  ;;  %v12569_v12 = vld [vmem:[#allocation119_spill] sm:$0xff]  ;;  %v3260_v56 = vld [vmem:[%s7698_s25 + $0xf48] sm:$0xff] }
 0x4f6   : > { %5617 = vmatmul.f32.gmra.mxu1 %v12549_v18 }
 0x4f7   : > { %5771 = vmatmul.f32.gmra.mxu3 %v12550_v20  ;;  %v5399_v21 = vpop.f32.mrf.mxu2  ;;  %v12561_v20 = vld [vmem:[#allocation111_spill] sm:$0xff] }
 0x4f8   : > { %v5400_v23 = vadd.f32 %v5399_v21, %v5323_v60  ;;  %v12560_v60 = vld [vmem:[#allocation188_spill] sm:$0xff]  ;;  %v12562_v21 = vld [vmem:[#allocation190_spill] sm:$0xff] }
 0x4f9   : > { %v5248_v54 = vpop.f32.mrf.mxu0 }
 0x4fa   : > { %v5249_v11 = vadd.f32 %v5248_v54, %v10186_v39  ;;  %v5476_v14 = vpop.f32.mrf.mxu3 }
 0x4fb   : > { %v10379_v30 = vadd.f32 %v5476_v14, %v5400_v23  ;;  %v5325_v49 = vpop.f32.mrf.mxu1  ;;  %v3294_v23 = vld [vmem:[%s7698_s25 + $0x1058] sm:$0xff] }
 0x4fc   : > { %5543 = vmatmul.f32.gmra.mxu0 %v12551_v26  ;;  %5697 = vmatmul.f32.gmra.mxu2 %v12552_v38  ;;  %v5326_v31 = vadd.f32 %v5325_v49, %v5249_v11  ;;  %v3230_v38 = vld [vmem:[%s7698_s25 + $0xe58] sm:$0xff] }
 0x4fd   : > { %5981 = vmatpush.msra.mxu2 %v3294_v23  ;;  %5827 = vmatpush.msra.mxu0 %v3230_v38  ;;  %v3226_v23 = vld [vmem:[%s7698_s25 + $0xe38] sm:$0xff] }
 0x4fe   : > { %5620 = vmatmul.f32.gmra.mxu1 %v12553_v6  ;;  %v12564_v6 = vld [vmem:[#allocation192_spill] sm:$0xff] }
 0x4ff   : > { %5774 = vmatmul.f32.gmra.mxu3 %v12554_v59  ;;  %v5402_v4 = vpop.f32.mrf.mxu2  ;;  %v3262_v59 = vld [vmem:[%s7698_s25 + $0xf58] sm:$0xff] }
 0x500   : > { %v5403_v39 = vadd.f32 %v5402_v4, %v5326_v31  ;;  %v12563_v31 = vld [vmem:[#allocation113_spill] sm:$0xff]  ;;  %5904 = vmatpush.msra.mxu1 %v3262_v59  ;;  %v12576_v59 = vld [vmem:[#allocation204_spill] sm:$0xff] }
 0x501   : > { %v5251_v51 = vpop.f32.mrf.mxu0 }
 0x502   : > { %v5252_v43 = vadd.f32 %v5251_v51, %v10196_v50  ;;  %v5479_v13 = vpop.f32.mrf.mxu3  ;;  %v3328_v50 = vld [vmem:[%s7698_s25 + $0x1168] sm:$0xff]  ;;  %5905 = vmatpush.msra.mxu1 %v3260_v56 }
 0x503   : > { %v10390_v44 = vadd.f32 %v5479_v13, %v5403_v39  ;;  %v5328_v40 = vpop.f32.mrf.mxu1  ;;  %6057 = vmatpush.msra.mxu3 %v3328_v50 }
 0x504   : > { %5546 = vmatmul.f32.gmra.mxu0 %v12555_v3  ;;  %5700 = vmatmul.f32.gmra.mxu2 %v12556_v8  ;;  %v5329_v46 = vadd.f32 %v5328_v40, %v5252_v43  ;;  %v3292_v3 = vld [vmem:[%s7698_s25 + $0x1048] sm:$0xff] }
 0x505   : > { %6058 = vmatpush.msra.mxu3 %v3326_v55  ;;  %v12567_v8 = vld [vmem:[#allocation117_spill] sm:$0xff]  ;;  %5982 = vmatpush.msra.mxu2 %v3292_v3 }
 0x506   : > { %5623 = vmatmul.f32.gmra.mxu1 %v12557_v45  ;;  %v3228_v45 = vld [vmem:[%s7698_s25 + $0xe48] sm:$0xff] }
 0x507   : > { %5777 = vmatmul.f32.gmra.mxu3 %v12558_v41  ;;  %v5405_v27 = vpop.f32.mrf.mxu2  ;;  %v3324_v41 = vld [vmem:[%s7698_s25 + $0x1148] sm:$0xff]  ;;  %5828 = vmatpush.msra.mxu0 %v3228_v45 }
 0x508   : > { %v5406_v17 = vadd.f32 %v5405_v27, %v5329_v46  ;;  %v12568_v46 = vld [vmem:[#allocation196_spill] sm:$0xff]  ;;  %6059 = vmatpush.msra.mxu3 %v3324_v41  ;;  %v3256_v45 = vld [vmem:[%s7698_s25 + $0xf28] sm:$0xff] }
 0x509   : > { %v5254_v16 = vpop.f32.mrf.mxu0  ;;  %5829 = vmatpush.msra.mxu0 %v3226_v23  ;;  %v12579_v41 = vld [vmem:[#allocation129_spill] sm:$0xff]  ;;  %v12585_v23 = vld [vmem:[#allocation135_spill] sm:$0xff] }
 0x50a   : > { %v5255_v5 = vadd.f32 %v5254_v16, %v10205_v63  ;;  %v5482_v0 = vpop.f32.mrf.mxu3 }
 0x50b   : > { %v10400_v35 = vadd.f32 %v5482_v0, %v5406_v17  ;;  %v5331_v22 = vpop.f32.mrf.mxu1 }
 0x50c   : > { %5549 = vmatmul.f32.gmra.mxu0 %v12559_v1  ;;  %5703 = vmatmul.f32.gmra.mxu2 %v12560_v60  ;;  %v5332_v18 = vadd.f32 %v5331_v22, %v5255_v5  ;;  %v12571_v1 = vld [vmem:[#allocation121_spill] sm:$0xff]  ;;  %v12572_v60 = vld [vmem:[#allocation200_spill] sm:$0xff] }
 0x50e   : > { %5626 = vmatmul.f32.gmra.mxu1 %v12561_v20 }
 0x50f   : > { %5780 = vmatmul.f32.gmra.mxu3 %v12562_v21  ;;  %v5408_v34 = vpop.f32.mrf.mxu2  ;;  %v12573_v21 = vld [vmem:[#allocation123_spill] sm:$0xff] }
 0x510   : > { %v5409_v63 = vadd.f32 %v5408_v34, %v5332_v18  ;;  %v3290_v18 = vld [vmem:[%s7698_s25 + $0x1038] sm:$0xff]  ;;  %v12574_v34 = vld [vmem:[#allocation202_spill] sm:$0xff] }
 0x511   : > { %v5257_v54 = vpop.f32.mrf.mxu0  ;;  %5983 = vmatpush.msra.mxu2 %v3290_v18  ;;  %v3318_v18 = vld [vmem:[%s7698_s25 + $0x1118] sm:$0xff] }
 0x512   : > { %v5258_v11 = vadd.f32 %v5257_v54, %v10215_v52  ;;  %v5485_v14 = vpop.f32.mrf.mxu3  ;;  %v12566_v52 = vld [vmem:[#allocation194_spill] sm:$0xff]  ;;  %v3322_v54 = vld [vmem:[%s7698_s25 + $0x1138] sm:$0xff] }
 0x513   : > { %v10409_v49 = vadd.f32 %v5485_v14, %v5409_v63  ;;  %v5334_v26 = vpop.f32.mrf.mxu1  ;;  %6060 = vmatpush.msra.mxu3 %v3322_v54 }
 0x514   : > { %5552 = vmatmul.f32.gmra.mxu0 %v12563_v31  ;;  %5706 = vmatmul.f32.gmra.mxu2 %v12564_v6  ;;  %v5335_v4 = vadd.f32 %v5334_v26, %v5258_v11  ;;  %v3258_v11 = vld [vmem:[%s7698_s25 + $0xf38] sm:$0xff]  ;;  %v12575_v6 = vld [vmem:[#allocation125_spill] sm:$0xff] }
 0x515   : > { %5906 = vmatpush.msra.mxu1 %v3258_v11 }
 0x516   : > { %5629 = vmatmul.f32.gmra.mxu1 %v12565_v25  ;;  %v12577_v25 = vld [vmem:[#allocation127_spill] sm:$0xff] }
 0x517   : > { %5783 = vmatmul.f32.gmra.mxu3 %v12566_v52  ;;  %v5411_v58 = vpop.f32.mrf.mxu2  ;;  %v12578_v52 = vld [vmem:[#allocation206_spill] sm:$0xff]  ;;  %5907 = vmatpush.msra.mxu1 %v3256_v45 }
 0x518   : > { %v5412_v39 = vadd.f32 %v5411_v58, %v5335_v4 }
 0x519   : > { %v5260_v61 = vpop.f32.mrf.mxu0 }
 0x51a   : > { %v5261_v51 = vadd.f32 %v5260_v61, %v10226_v10  ;;  %v5488_v43 = vpop.f32.mrf.mxu3  ;;  %v12570_v10 = vld [vmem:[#allocation198_spill] sm:$0xff] }
 0x51b   : > { %v10419_v13 = vadd.f32 %v5488_v43, %v5412_v39  ;;  %v5337_v40 = vpop.f32.mrf.mxu1  ;;  %v3288_v39 = vld [vmem:[%s7698_s25 + $0x1028] sm:$0xff] }
 0x51c   : > { %5555 = vmatmul.f32.gmra.mxu0 %v12567_v8  ;;  %5709 = vmatmul.f32.gmra.mxu2 %v12568_v46  ;;  %v5338_v27 = vadd.f32 %v5337_v40, %v5261_v51  ;;  %v3224_v51 = vld [vmem:[%s7698_s25 + $0xe28] sm:$0xff] }
 0x51d   : > { %5984 = vmatpush.msra.mxu2 %v3288_v39  ;;  %5830 = vmatpush.msra.mxu0 %v3224_v51  ;;  %v12589_v39 = vld [vmem:[#allocation139_spill] sm:$0xff]  ;;  %v3252_v51 = vld [vmem:[%s7698_s25 + $0xf08] sm:$0xff] }
 0x51e   : > { %5632 = vmatmul.f32.gmra.mxu1 %v12569_v12 }
 0x51f   : > { %5786 = vmatmul.f32.gmra.mxu3 %v12570_v10  ;;  %v5414_v17 = vpop.f32.mrf.mxu2  ;;  %v12581_v10 = vld [vmem:[#allocation131_spill] sm:$0xff] }
 0x520   : > { %v5415_v50 = vadd.f32 %v5414_v17, %v5338_v27  ;;  %v12580_v27 = vld [vmem:[#allocation208_spill] sm:$0xff]  ;;  %v12582_v17 = vld [vmem:[#allocation210_spill] sm:$0xff] }
 0x521   : > { %v5263_v16 = vpop.f32.mrf.mxu0 }
 0x522   : > { %v5264_v5 = vadd.f32 %v5263_v16, %v10237_v62  ;;  %v5491_v0 = vpop.f32.mrf.mxu3 }
 0x523   : > { %v10430_v22 = vadd.f32 %v5491_v0, %v5415_v50  ;;  %v5340_v37 = vpop.f32.mrf.mxu1  ;;  %v3286_v50 = vld [vmem:[%s7698_s25 + $0x1018] sm:$0xff] }
 0x524   : > { %5558 = vmatmul.f32.gmra.mxu0 %v12571_v1  ;;  %5712 = vmatmul.f32.gmra.mxu2 %v12572_v60  ;;  %v5341_v20 = vadd.f32 %v5340_v37, %v5264_v5  ;;  %v3222_v60 = vld [vmem:[%s7698_s25 + $0xe18] sm:$0xff] }
 0x525   : > { %5985 = vmatpush.msra.mxu2 %v3286_v50  ;;  %5831 = vmatpush.msra.mxu0 %v3222_v60  ;;  %v12596_v60 = vld [vmem:[#allocation224_spill] sm:$0xff] }
 0x526   : > { %5635 = vmatmul.f32.gmra.mxu1 %v12573_v21  ;;  %v12584_v21 = vld [vmem:[#allocation212_spill] sm:$0xff] }
 0x527   : > { %5789 = vmatmul.f32.gmra.mxu3 %v12574_v34  ;;  %v5417_v63 = vpop.f32.mrf.mxu2  ;;  %v3254_v34 = vld [vmem:[%s7698_s25 + $0xf18] sm:$0xff] }
 0x528   : > { %v5418_v62 = vadd.f32 %v5417_v63, %v5341_v20  ;;  %v12583_v20 = vld [vmem:[#allocation133_spill] sm:$0xff]  ;;  %5908 = vmatpush.msra.mxu1 %v3254_v34 }
 0x529   : > { %v5266_v14 = vpop.f32.mrf.mxu0 }
 0x52a   : > { %v5267_v26 = vadd.f32 %v5266_v14, %v10247_v7  ;;  %v5494_v38 = vpop.f32.mrf.mxu3  ;;  %v3320_v7 = vld [vmem:[%s7698_s25 + $0x1128] sm:$0xff]  ;;  %5909 = vmatpush.msra.mxu1 %v3252_v51 }
 0x52b   : > { %v10441_v55 = vadd.f32 %v5494_v38, %v5418_v62  ;;  %v5343_v31 = vpop.f32.mrf.mxu1  ;;  %6061 = vmatpush.msra.mxu3 %v3320_v7 }
 0x52c   : > { %5561 = vmatmul.f32.gmra.mxu0 %v12575_v6  ;;  %5715 = vmatmul.f32.gmra.mxu2 %v12576_v59  ;;  %v5344_v4 = vadd.f32 %v5343_v31, %v5267_v26  ;;  %v3284_v6 = vld [vmem:[%s7698_s25 + $0x1008] sm:$0xff] }
 0x52d   : > { %6062 = vmatpush.msra.mxu3 %v3318_v18  ;;  %v12587_v59 = vld [vmem:[#allocation137_spill] sm:$0xff]  ;;  %5986 = vmatpush.msra.mxu2 %v3284_v6 }
 0x52e   : > { %5638 = vmatmul.f32.gmra.mxu1 %v12577_v25  ;;  %v3220_v25 = vld [vmem:[%s7698_s25 + $0xe08] sm:$0xff] }
 0x52f   : > { %5792 = vmatmul.f32.gmra.mxu3 %v12578_v52  ;;  %v5420_v58 = vpop.f32.mrf.mxu2  ;;  %v3316_v52 = vld [vmem:[%s7698_s25 + $0x1108] sm:$0xff]  ;;  %5832 = vmatpush.msra.mxu0 %v3220_v25 }
 0x530   : > { %v5421_v61 = vadd.f32 %v5420_v58, %v5344_v4  ;;  %v12588_v4 = vld [vmem:[#allocation216_spill] sm:$0xff]  ;;  %6063 = vmatpush.msra.mxu3 %v3316_v52 }
 0x531   : > { %v5269_v43 = vpop.f32.mrf.mxu0 }
 0x532   : > { %v5270_v40 = vadd.f32 %v5269_v43, %v10256_v15  ;;  %v5497_v3 = vpop.f32.mrf.mxu3 }
 0x533   : > { %v10451_v8 = vadd.f32 %v5497_v3, %v5421_v61  ;;  %v5346_v46 = vpop.f32.mrf.mxu1  ;;  %v12590_v61 = vld [vmem:[#allocation218_spill] sm:$0xff] }
 0x534   : > { %5564 = vmatmul.f32.gmra.mxu0 %v12579_v41  ;;  %5718 = vmatmul.f32.gmra.mxu2 %v12580_v27  ;;  %v5347_v12 = vadd.f32 %v5346_v46, %v5270_v40  ;;  %v12591_v41 = vld [vmem:[#allocation141_spill] sm:$0xff]  ;;  %v12592_v27 = vld [vmem:[#allocation220_spill] sm:$0xff] }
 0x536   : > { %5641 = vmatmul.f32.gmra.mxu1 %v12581_v10  ;;  %v12593_v10 = vld [vmem:[#allocation143_spill] sm:$0xff] }
 0x537   : > { %5795 = vmatmul.f32.gmra.mxu3 %v12582_v17  ;;  %v5423_v56 = vpop.f32.mrf.mxu2  ;;  %v12594_v17 = vld [vmem:[#allocation222_spill] sm:$0xff] }
 0x538   : > { %v5424_v15 = vadd.f32 %v5423_v56, %v5347_v12 }
 0x539   : > { %v5272_v16 = vpop.f32.mrf.mxu0 }
 0x53a   : > { %v5273_v5 = vadd.f32 %v5272_v16, %v10266_v53  ;;  %v5500_v0 = vpop.f32.mrf.mxu3  ;;  %v12586_v53 = vld [vmem:[#allocation214_spill] sm:$0xff] }
 0x53b   : > { %v10460_v37 = vadd.f32 %v5500_v0, %v5424_v15  ;;  %v5349_v1 = vpop.f32.mrf.mxu1 }
 0x53c   : > { %5567 = vmatmul.f32.gmra.mxu0 %v12583_v20  ;;  %5721 = vmatmul.f32.gmra.mxu2 %v12584_v21  ;;  %v5350_v63 = vadd.f32 %v5349_v1, %v5273_v5  ;;  %v12595_v1 = vld [vmem:[#allocation145_spill] sm:$0xff]  ;;  %v12597_v20 = vld [vmem:[#allocation147_spill] sm:$0xff]  ;;  %v12598_v21 = vld [vmem:[#allocation226_spill] sm:$0xff] }
 0x53e   : > { %5644 = vmatmul.f32.gmra.mxu1 %v12585_v23 }
 0x53f   : > { %5798 = vmatmul.f32.gmra.mxu3 %v12586_v53  ;;  %v5426_v54 = vpop.f32.mrf.mxu2 }
 0x540   : > { %v5427_v62 = vadd.f32 %v5426_v54, %v5350_v63 }
 0x541   : > { %v5275_v11 = vpop.f32.mrf.mxu0 }
 0x542   : > { %v5276_v14 = vadd.f32 %v5275_v11, %v10277_v42  ;;  %v5503_v26 = vpop.f32.mrf.mxu3  ;;  %v12599_v11 = vld [vmem:[#allocation149_spill] sm:$0xff] }
 0x543   : > { %v10470_v38 = vadd.f32 %v5503_v26, %v5427_v62  ;;  %v5352_v31 = vpop.f32.mrf.mxu1 }
 0x544   : > { %5570 = vmatmul.f32.gmra.mxu0 %v12587_v59  ;;  %5724 = vmatmul.f32.gmra.mxu2 %v12588_v4  ;;  %v5353_v58 = vadd.f32 %v5352_v31, %v5276_v14  ;;  %v12600_v14 = vld [vmem:[#allocation228_spill] sm:$0xff]  ;;  %v12601_v31 = vld [vmem:[#allocation151_spill] sm:$0xff] }
 0x546   : > { %5647 = vmatmul.f32.gmra.mxu1 %v12589_v39  ;;  %v12602_v39 = vld [vmem:[#allocation153_spill] sm:$0xff] }
 0x547   : > { %5801 = vmatmul.f32.gmra.mxu3 %v12590_v61  ;;  %v5429_v42 = vpop.f32.mrf.mxu2 }
 0x548   : > { %v5430_v7 = vadd.f32 %v5429_v42, %v5353_v58  ;;  %v12603_v42 = vld [vmem:[#allocation155_spill] sm:$0xff] }
 0x549   : > { %v5526_v43 = vpop.f32.mrf.mxu0 }
 0x54a   : > { %v5506_v40 = vpop.f32.mrf.mxu3  ;;  %v5527_v3 = vadd.f32 %v5526_v43, %v10288_v48 }
 0x54b   : > { %v10481_v46 = vadd.f32 %v5506_v40, %v5430_v7  ;;  %v5603_v45 = vpop.f32.mrf.mxu1 }
 0x54c   : > { %5573 = vmatmul.f32.gmra.mxu0 %v12591_v41  ;;  %5727 = vmatmul.f32.gmra.mxu2 %v12592_v27  ;;  %v5604_v12 = vadd.f32 %v5603_v45, %v5527_v3  ;;  %v12604_v45 = vld [vmem:[#allocation157_spill] sm:$0xff] }
 0x54d   : > { %v12605_v41 = vld [vmem:[#allocation233_spill] sm:$0xff] }
 0x54e   : > { %5650 = vmatmul.f32.gmra.mxu1 %v12593_v10 }
 0x54f   : > { %5804 = vmatmul.f32.gmra.mxu3 %v12594_v17  ;;  %v5680_v56 = vpop.f32.mrf.mxu2 }
 0x550   : > { %v5681_v15 = vadd.f32 %v5680_v56, %v5604_v12  ;;  %v12607_v12 = vld [vmem:[#allocation234_spill] sm:$0xff] }
 0x551   : > { %v5529_v50 = vpop.f32.mrf.mxu0 }
 0x552   : > { %v5530_v16 = vadd.f32 %v5529_v50, %v10298_v57  ;;  %v5757_v5 = vpop.f32.mrf.mxu3 }
 0x553   : > { %v10488_v0 = vadd.f32 %v5757_v5, %v5681_v15  ;;  %v5606_v48 = vpop.f32.mrf.mxu1  ;;  %v12609_v5 = vld [vmem:[#allocation235_spill] sm:$0xff] }
 0x554   : > { %5576 = vmatmul.f32.gmra.mxu0 %v12595_v1  ;;  %5730 = vmatmul.f32.gmra.mxu2 %v12596_v60  ;;  %v5607_v18 = vadd.f32 %v5606_v48, %v5530_v16  ;;  %v12608_v16 = vld [vmem:[#allocation161_spill] sm:$0xff]  ;;  %v12610_v1 = vld [vmem:[#allocation163_spill] sm:$0xff]  ;;  %v12611_v60 = vld [vmem:[#allocation236_spill] sm:$0xff] }
 0x556   : > { %5653 = vmatmul.f32.gmra.mxu1 %v12597_v20 }
 0x557   : > { %5807 = vmatmul.f32.gmra.mxu3 %v12598_v21  ;;  %v5683_v34 = vpop.f32.mrf.mxu2 }
 0x558   : > { %v5684_v63 = vadd.f32 %v5683_v34, %v5607_v18 }
 0x559   : > { %v5532_v23 = vpop.f32.mrf.mxu0 }
 0x55a   : > { %v5533_v53 = vadd.f32 %v5532_v23, %v10307_v36  ;;  %v5760_v54 = vpop.f32.mrf.mxu3 }
 0x55b   : > { %v10495_v57 = vadd.f32 %v5760_v54, %v5684_v63  ;;  %v5609_v62 = vpop.f32.mrf.mxu1  ;;  %v12613_v54 = vld [vmem:[#allocation237_spill] sm:$0xff] }
 0x55c   : > { %5579 = vmatmul.f32.gmra.mxu0 %v12599_v11  ;;  %5733 = vmatmul.f32.gmra.mxu2 %v12600_v14  ;;  %v5610_v26 = vadd.f32 %v5609_v62, %v5533_v53  ;;  %v12612_v53 = vld [vmem:[#allocation165_spill] sm:$0xff]  ;;  %v12614_v11 = vld [vmem:[#allocation167_spill] sm:$0xff]  ;;  %v12615_v14 = vld [vmem:[#allocation238_spill] sm:$0xff] }
 0x55e   : > { %5656 = vmatmul.f32.gmra.mxu1 %v12601_v31 }
 0x55f   : > { %5810 = vmatmul.f32.gmra.mxu3 %v9528_v33  ;;  %v5686_v6 = vpop.f32.mrf.mxu2 }
 0x560   : > { %v5687_v59 = vadd.f32 %v5686_v6, %v5610_v26 }
 0x561   : > { %v5535_v4 = vpop.f32.mrf.mxu0 }
 0x562   : > { %v5536_v25 = vadd.f32 %v5535_v4, %v10317_v2  ;;  %v5763_v52 = vpop.f32.mrf.mxu3 }
 0x563   : > { %v10502_v36 = vadd.f32 %v5763_v52, %v5687_v59  ;;  %v5612_v58 = vpop.f32.mrf.mxu1  ;;  %v12616_v52 = vld [vmem:[#allocation169_spill] sm:$0xff] }
 0x564   : > { %5582 = vmatmul.f32.gmra.mxu0 %v12602_v39  ;;  %5736 = vmatmul.f32.gmra.mxu2 %v9540_v24  ;;  %v5613_v61 = vadd.f32 %v5612_v58, %v5536_v25  ;;  %v12606_v24 = vld [vmem:[#allocation159_spill] sm:$0xff] }
 0x565   : > { %v12617_v58 = vld [vmem:[#allocation239_spill] sm:$0xff] }
 0x566   : > { %5659 = vmatmul.f32.gmra.mxu1 %v12603_v42  ;;  %v12619_v42 = vld [vmem:[#allocation240_spill] sm:$0xff] }
 0x567   : > { %5813 = vmatmul.f32.gmra.mxu3 %v9549_v9  ;;  %v5689_v51 = vpop.f32.mrf.mxu2 }
 0x568   : > { %v5690_v33 = vadd.f32 %v5689_v51, %v5613_v61  ;;  %v12618_v61 = vld [vmem:[#allocation171_spill] sm:$0xff] }
 0x569   : > { %v5538_v7 = vpop.f32.mrf.mxu0 }
 0x56a   : > { %v5539_v43 = vadd.f32 %v5538_v7, %v10328_v47  ;;  %v5766_v40 = vpop.f32.mrf.mxu3 }
 0x56b   : > { %v10509_v2 = vadd.f32 %v5766_v40, %v5690_v33  ;;  %v5615_v3 = vpop.f32.mrf.mxu1 }
 0x56c   : > { %5833 = vmatmul.f32.vlgmr.msra.gmra.mxu0 %v12604_v45  ;;  %5987 = vmatmul.f32.vlgmr.msra.gmra.mxu2 %v12605_v41  ;;  %v5616_v27 = vadd.f32 %v5615_v3, %v5539_v43  ;;  %v12620_v45 = vld [vmem:[#allocation173_spill] sm:$0xff] }
 0x56d   : > { %v12621_v41 = vld [vmem:[#allocation241_spill] sm:$0xff] }
 0x56e   : > { %5910 = vmatmul.f32.vlgmr.msra.gmra.mxu1 %v12606_v24  ;;  %v12622_v24 = vld [vmem:[#allocation175_spill] sm:$0xff] }
 0x56f   : > { %6064 = vmatmul.f32.vlgmr.msra.gmra.mxu3 %v12607_v12  ;;  %v5692_v10 = vpop.f32.mrf.mxu2  ;;  %v12623_v12 = vld [vmem:[#allocation242_spill] sm:$0xff] }
 0x570   : > { %v5693_v9 = vadd.f32 %v5692_v10, %v5616_v27 }
 0x571   : > { %v5541_v17 = vpop.f32.mrf.mxu0 }
 0x572   : > { %v5542_v56 = vadd.f32 %v5541_v17, %v10339_v32  ;;  %v5769_v15 = vpop.f32.mrf.mxu3 }
 0x573   : > { %v10516_v47 = vadd.f32 %v5769_v15, %v5693_v9  ;;  %v5618_v50 = vpop.f32.mrf.mxu1 }
 0x574   : > { %5836 = vmatmul.f32.gmra.mxu0 %v12608_v16  ;;  %5990 = vmatmul.f32.gmra.mxu2 %v12609_v5  ;;  %v5619_v48 = vadd.f32 %v5618_v50, %v5542_v56  ;;  %v12624_v16 = vld [vmem:[#allocation177_spill] sm:$0xff]  ;;  %v12625_v5 = vld [vmem:[#allocation243_spill] sm:$0xff] }
 0x576   : > { %5913 = vmatmul.f32.gmra.mxu1 %v12610_v1  ;;  %v12626_v1 = vld [vmem:[#allocation179_spill] sm:$0xff] }
 0x577   : > { %6067 = vmatmul.f32.gmra.mxu3 %v12611_v60  ;;  %v5695_v18 = vpop.f32.mrf.mxu2  ;;  %v12627_v60 = vld [vmem:[#allocation244_spill] sm:$0xff] }
 0x578   : > { %v5696_v20 = vadd.f32 %v5695_v18, %v5619_v48 }
 0x579   : > { %v5544_v21 = vpop.f32.mrf.mxu0 }
 0x57a   : > { %v5545_v34 = vadd.f32 %v5544_v21, %v10349_v19  ;;  %v5772_v63 = vpop.f32.mrf.mxu3 }
 0x57b   : > { %v10523_v32 = vadd.f32 %v5772_v63, %v5696_v20  ;;  %v5621_v23 = vpop.f32.mrf.mxu1 }
 0x57c   : > { %5839 = vmatmul.f32.gmra.mxu0 %v12612_v53  ;;  %5993 = vmatmul.f32.gmra.mxu2 %v12613_v54  ;;  %v5622_v62 = vadd.f32 %v5621_v23, %v5545_v34  ;;  %v12628_v53 = vld [vmem:[#allocation181_spill] sm:$0xff] }
 0x57d   : > { %v12629_v54 = vld [vmem:[#allocation245_spill] sm:$0xff] }
 0x57e   : > { %5916 = vmatmul.f32.gmra.mxu1 %v12614_v11  ;;  %v12630_v11 = vld [vmem:[#allocation183_spill] sm:$0xff] }
 0x57f   : > { %6070 = vmatmul.f32.gmra.mxu3 %v12615_v14  ;;  %v5698_v26 = vpop.f32.mrf.mxu2  ;;  %v12631_v14 = vld [vmem:[#allocation246_spill] sm:$0xff] }
 0x580   : > { %v5699_v31 = vadd.f32 %v5698_v26, %v5622_v62 }
 0x581   : > { %v5547_v6 = vpop.f32.mrf.mxu0 }
 0x582   : > { %v5548_v59 = vadd.f32 %v5547_v6, %v10358_v29  ;;  %v5775_v4 = vpop.f32.mrf.mxu3 }
 0x583   : > { %v10530_v19 = vadd.f32 %v5775_v4, %v5699_v31  ;;  %v5624_v25 = vpop.f32.mrf.mxu1 }
 0x584   : > { %5842 = vmatmul.f32.gmra.mxu0 %v12616_v52  ;;  %5996 = vmatmul.f32.gmra.mxu2 %v12617_v58  ;;  %v5625_v39 = vadd.f32 %v5624_v25, %v5548_v59  ;;  %v12632_v52 = vld [vmem:[#allocation185_spill] sm:$0xff]  ;;  %v12633_v58 = vld [vmem:[#allocation247_spill] sm:$0xff] }
 0x586   : > { %5919 = vmatmul.f32.gmra.mxu1 %v12618_v61  ;;  %v12634_v61 = vld [vmem:[#allocation187_spill] sm:$0xff] }
 0x587   : > { %6073 = vmatmul.f32.gmra.mxu3 %v12619_v42  ;;  %v5701_v51 = vpop.f32.mrf.mxu2  ;;  %v12635_v42 = vld [vmem:[#allocation248_spill] sm:$0xff] }
 0x588   : > { %v5702_v33 = vadd.f32 %v5701_v51, %v5625_v39 }
 0x589   : > { %v5550_v7 = vpop.f32.mrf.mxu0 }
 0x58a   : > { %v5551_v43 = vadd.f32 %v5550_v7, %v10368_v28  ;;  %v5778_v40 = vpop.f32.mrf.mxu3 }
 0x58b   : > { %v10537_v29 = vadd.f32 %v5778_v40, %v5702_v33  ;;  %v5627_v3 = vpop.f32.mrf.mxu1 }
 0x58c   : > { %5845 = vmatmul.f32.gmra.mxu0 %v12620_v45  ;;  %5999 = vmatmul.f32.gmra.mxu2 %v12621_v41  ;;  %v5628_v27 = vadd.f32 %v5627_v3, %v5551_v43  ;;  %v12636_v45 = vld [vmem:[#allocation189_spill] sm:$0xff] }
 0x58d   : > { %v12637_v41 = vld [vmem:[#allocation249_spill] sm:$0xff] }
 0x58e   : > { %5922 = vmatmul.f32.gmra.mxu1 %v12622_v24  ;;  %v12638_v24 = vld [vmem:[#allocation191_spill] sm:$0xff] }
 0x58f   : > { %6076 = vmatmul.f32.gmra.mxu3 %v12623_v12  ;;  %v5704_v10 = vpop.f32.mrf.mxu2  ;;  %v12639_v12 = vld [vmem:[#allocation250_spill] sm:$0xff] }
 0x590   : > { %v5705_v9 = vadd.f32 %v5704_v10, %v5628_v27 }
 0x591   : > { %v5553_v17 = vpop.f32.mrf.mxu0 }
 0x592   : > { %v5554_v56 = vadd.f32 %v5553_v17, %v10379_v30  ;;  %v5781_v15 = vpop.f32.mrf.mxu3 }
 0x593   : > { %v10544_v28 = vadd.f32 %v5781_v15, %v5705_v9  ;;  %v5630_v50 = vpop.f32.mrf.mxu1 }
 0x594   : > { %5848 = vmatmul.f32.gmra.mxu0 %v12624_v16  ;;  %6002 = vmatmul.f32.gmra.mxu2 %v12625_v5  ;;  %v5631_v48 = vadd.f32 %v5630_v50, %v5554_v56  ;;  %v12640_v16 = vld [vmem:[#allocation193_spill] sm:$0xff]  ;;  %v12641_v5 = vld [vmem:[#allocation251_spill] sm:$0xff] }
 0x596   : > { %5925 = vmatmul.f32.gmra.mxu1 %v12626_v1  ;;  %v12642_v1 = vld [vmem:[#allocation195_spill] sm:$0xff] }
 0x597   : > { %6079 = vmatmul.f32.gmra.mxu3 %v12627_v60  ;;  %v5707_v18 = vpop.f32.mrf.mxu2  ;;  %v12643_v60 = vld [vmem:[#allocation252_spill] sm:$0xff] }
 0x598   : > { %v5708_v20 = vadd.f32 %v5707_v18, %v5631_v48 }
 0x599   : > { %v5556_v21 = vpop.f32.mrf.mxu0 }
 0x59a   : > { %v5557_v34 = vadd.f32 %v5556_v21, %v10390_v44  ;;  %v5784_v63 = vpop.f32.mrf.mxu3 }
 0x59b   : > { %v10551_v30 = vadd.f32 %v5784_v63, %v5708_v20  ;;  %v5633_v23 = vpop.f32.mrf.mxu1 }
 0x59c   : > { %5851 = vmatmul.f32.gmra.mxu0 %v12628_v53  ;;  %6005 = vmatmul.f32.gmra.mxu2 %v12629_v54  ;;  %v5634_v62 = vadd.f32 %v5633_v23, %v5557_v34  ;;  %v12644_v53 = vld [vmem:[#allocation197_spill] sm:$0xff] }
 0x59d   : > { %v12645_v54 = vld [vmem:[#allocation253_spill] sm:$0xff] }
 0x59e   : > { %5928 = vmatmul.f32.gmra.mxu1 %v12630_v11  ;;  %v12646_v11 = vld [vmem:[#allocation199_spill] sm:$0xff] }
 0x59f   : > { %6082 = vmatmul.f32.gmra.mxu3 %v12631_v14  ;;  %v5710_v26 = vpop.f32.mrf.mxu2  ;;  %v12647_v14 = vld [vmem:[#allocation254_spill] sm:$0xff] }
 0x5a0   : > { %v5711_v31 = vadd.f32 %v5710_v26, %v5634_v62 }
 0x5a1   : > { %v5559_v6 = vpop.f32.mrf.mxu0 }
 0x5a2   : > { %v5560_v59 = vadd.f32 %v5559_v6, %v10400_v35  ;;  %v5787_v4 = vpop.f32.mrf.mxu3 }
 0x5a3   : > { %v10558_v44 = vadd.f32 %v5787_v4, %v5711_v31  ;;  %v5636_v25 = vpop.f32.mrf.mxu1 }
 0x5a4   : > { %5854 = vmatmul.f32.gmra.mxu0 %v12632_v52  ;;  %6008 = vmatmul.f32.gmra.mxu2 %v12633_v58  ;;  %v5637_v39 = vadd.f32 %v5636_v25, %v5560_v59  ;;  %v12648_v52 = vld [vmem:[#allocation201_spill] sm:$0xff]  ;;  %v12649_v58 = vld [vmem:[#allocation255_spill] sm:$0xff] }
 0x5a6   : > { %5931 = vmatmul.f32.gmra.mxu1 %v12634_v61  ;;  %v12650_v61 = vld [vmem:[#allocation203_spill] sm:$0xff] }
 0x5a7   : > { %6085 = vmatmul.f32.gmra.mxu3 %v12635_v42  ;;  %v5713_v51 = vpop.f32.mrf.mxu2  ;;  %v12651_v42 = vld [vmem:[#allocation256_spill] sm:$0xff] }
 0x5a8   : > { %v5714_v33 = vadd.f32 %v5713_v51, %v5637_v39 }
 0x5a9   : > { %v5562_v7 = vpop.f32.mrf.mxu0 }
 0x5aa   : > { %v5563_v43 = vadd.f32 %v5562_v7, %v10409_v49  ;;  %v5790_v40 = vpop.f32.mrf.mxu3 }
 0x5ab   : > { %v10565_v35 = vadd.f32 %v5790_v40, %v5714_v33  ;;  %v5639_v3 = vpop.f32.mrf.mxu1 }
 0x5ac   : > { %5857 = vmatmul.f32.gmra.mxu0 %v12636_v45  ;;  %6011 = vmatmul.f32.gmra.mxu2 %v12637_v41  ;;  %v5640_v27 = vadd.f32 %v5639_v3, %v5563_v43  ;;  %v12652_v41 = vld [vmem:[#allocation205_spill] sm:$0xff] }
 0x5ae   : > { %5934 = vmatmul.f32.gmra.mxu1 %v12638_v24  ;;  %v12654_v24 = vld [vmem:[#allocation207_spill] sm:$0xff] }
 0x5af   : > { %6088 = vmatmul.f32.gmra.mxu3 %v12639_v12  ;;  %v5716_v10 = vpop.f32.mrf.mxu2  ;;  %v12655_v12 = vld [vmem:[#allocation258_spill] sm:$0xff] }
 0x5b0   : > { %v5717_v9 = vadd.f32 %v5716_v10, %v5640_v27  ;;  %v12653_v27 = vld [vmem:[#allocation257_spill] sm:$0xff] }
 0x5b1   : > { %v5565_v17 = vpop.f32.mrf.mxu0 }
 0x5b2   : > { %v5566_v56 = vadd.f32 %v5565_v17, %v10419_v13  ;;  %v5793_v15 = vpop.f32.mrf.mxu3 }
 0x5b3   : > { %v10572_v49 = vadd.f32 %v5793_v15, %v5717_v9  ;;  %v5642_v50 = vpop.f32.mrf.mxu1 }
 0x5b4   : > { %5860 = vmatmul.f32.gmra.mxu0 %v12640_v16  ;;  %6014 = vmatmul.f32.gmra.mxu2 %v12641_v5  ;;  %v5643_v48 = vadd.f32 %v5642_v50, %v5566_v56  ;;  %v12656_v5 = vld [vmem:[#allocation209_spill] sm:$0xff] }
 0x5b6   : > { %5937 = vmatmul.f32.gmra.mxu1 %v12642_v1  ;;  %v12658_v1 = vld [vmem:[#allocation211_spill] sm:$0xff] }
 0x5b7   : > { %6091 = vmatmul.f32.gmra.mxu3 %v12643_v60  ;;  %v5719_v18 = vpop.f32.mrf.mxu2  ;;  %v12659_v60 = vld [vmem:[#allocation260_spill] sm:$0xff] }
 0x5b8   : > { %v5720_v20 = vadd.f32 %v5719_v18, %v5643_v48  ;;  %v12657_v48 = vld [vmem:[#allocation259_spill] sm:$0xff] }
 0x5b9   : > { %v5568_v21 = vpop.f32.mrf.mxu0 }
 0x5ba   : > { %v5569_v34 = vadd.f32 %v5568_v21, %v10430_v22  ;;  %v5796_v63 = vpop.f32.mrf.mxu3 }
 0x5bb   : > { %v10579_v13 = vadd.f32 %v5796_v63, %v5720_v20  ;;  %v5645_v23 = vpop.f32.mrf.mxu1 }
 0x5bc   : > { %5863 = vmatmul.f32.gmra.mxu0 %v12644_v53  ;;  %6017 = vmatmul.f32.gmra.mxu2 %v12645_v54  ;;  %v5646_v62 = vadd.f32 %v5645_v23, %v5569_v34  ;;  %v12660_v54 = vld [vmem:[#allocation213_spill] sm:$0xff] }
 0x5be   : > { %5940 = vmatmul.f32.gmra.mxu1 %v12646_v11  ;;  %v12662_v11 = vld [vmem:[#allocation215_spill] sm:$0xff] }
 0x5bf   : > { %6094 = vmatmul.f32.gmra.mxu3 %v12647_v14  ;;  %v5722_v26 = vpop.f32.mrf.mxu2  ;;  %v12663_v14 = vld [vmem:[#allocation262_spill] sm:$0xff] }
 0x5c0   : > { %v5723_v31 = vadd.f32 %v5722_v26, %v5646_v62  ;;  %v12661_v62 = vld [vmem:[#allocation261_spill] sm:$0xff] }
 0x5c1   : > { %v5571_v6 = vpop.f32.mrf.mxu0 }
 0x5c2   : > { %v5572_v59 = vadd.f32 %v5571_v6, %v10441_v55  ;;  %v5799_v4 = vpop.f32.mrf.mxu3 }
 0x5c3   : > { %v10586_v22 = vadd.f32 %v5799_v4, %v5723_v31  ;;  %v5648_v25 = vpop.f32.mrf.mxu1 }
 0x5c4   : > { %5866 = vmatmul.f32.gmra.mxu0 %v12648_v52  ;;  %6020 = vmatmul.f32.gmra.mxu2 %v12649_v58  ;;  %v5649_v39 = vadd.f32 %v5648_v25, %v5572_v59  ;;  %v12664_v58 = vld [vmem:[#allocation217_spill] sm:$0xff] }
 0x5c6   : > { %5943 = vmatmul.f32.gmra.mxu1 %v12650_v61  ;;  %v12666_v61 = vld [vmem:[#allocation219_spill] sm:$0xff] }
 0x5c7   : > { %6097 = vmatmul.f32.gmra.mxu3 %v12651_v42  ;;  %v5725_v51 = vpop.f32.mrf.mxu2  ;;  %v12667_v42 = vld [vmem:[#allocation264_spill] sm:$0xff] }
 0x5c8   : > { %v5726_v33 = vadd.f32 %v5725_v51, %v5649_v39  ;;  %v12665_v39 = vld [vmem:[#allocation263_spill] sm:$0xff] }
 0x5c9   : > { %v5574_v7 = vpop.f32.mrf.mxu0 }
 0x5ca   : > { %v5575_v43 = vadd.f32 %v5574_v7, %v10451_v8  ;;  %v5802_v40 = vpop.f32.mrf.mxu3 }
 0x5cb   : > { %v10593_v55 = vadd.f32 %v5802_v40, %v5726_v33  ;;  %v5651_v3 = vpop.f32.mrf.mxu1 }
 0x5cc   : > { %v5652_v45 = vadd.f32 %v5651_v3, %v5575_v43  ;;  %5869 = vmatmul.f32.gmra.mxu0 %v12652_v41  ;;  %6023 = vmatmul.f32.gmra.mxu2 %v12653_v27  ;;  %v12668_v41 = vld [vmem:[#allocation221_spill] sm:$0xff] }
 0x5cd   : > { %v12669_v27 = vld [vmem:[#allocation265_spill] sm:$0xff] }
 0x5ce   : > { %5946 = vmatmul.f32.gmra.mxu1 %v12654_v24  ;;  %v12670_v24 = vld [vmem:[#allocation223_spill] sm:$0xff] }
 0x5cf   : > { %6100 = vmatmul.f32.gmra.mxu3 %v12655_v12  ;;  %v5728_v10 = vpop.f32.mrf.mxu2  ;;  %v12671_v12 = vld [vmem:[#allocation266_spill] sm:$0xff] }
 0x5d0   : > { %v5729_v9 = vadd.f32 %v5728_v10, %v5652_v45 }
 0x5d1   : > { %v5577_v17 = vpop.f32.mrf.mxu0 }
 0x5d2   : > { %v5578_v56 = vadd.f32 %v5577_v17, %v10460_v37  ;;  %v5805_v15 = vpop.f32.mrf.mxu3 }
 0x5d3   : > { %v10600_v8 = vadd.f32 %v5805_v15, %v5729_v9  ;;  %v5654_v50 = vpop.f32.mrf.mxu1 }
 0x5d4   : > { %v5655_v16 = vadd.f32 %v5654_v50, %v5578_v56  ;;  %5872 = vmatmul.f32.gmra.mxu0 %v12656_v5  ;;  %6026 = vmatmul.f32.gmra.mxu2 %v12657_v48  ;;  %v12672_v5 = vld [vmem:[#allocation225_spill] sm:$0xff]  ;;  %v12673_v48 = vld [vmem:[#allocation268_spill] sm:$0xff] }
 0x5d6   : > { %5949 = vmatmul.f32.gmra.mxu1 %v12658_v1  ;;  %v12674_v1 = vld [vmem:[#allocation227_spill] sm:$0xff] }
 0x5d7   : > { %6103 = vmatmul.f32.gmra.mxu3 %v12659_v60  ;;  %v5731_v18 = vpop.f32.mrf.mxu2  ;;  %v12675_v60 = vld [vmem:[#allocation269_spill] sm:$0xff] }
 0x5d8   : > { %v5732_v20 = vadd.f32 %v5731_v18, %v5655_v16 }
 0x5d9   : > { %v5580_v21 = vpop.f32.mrf.mxu0 }
 0x5da   : > { %v5581_v34 = vadd.f32 %v5580_v21, %v10470_v38  ;;  %v5808_v63 = vpop.f32.mrf.mxu3 }
 0x5db   : > { %v10607_v37 = vadd.f32 %v5808_v63, %v5732_v20  ;;  %v5657_v23 = vpop.f32.mrf.mxu1 }
 0x5dc   : > { %v5658_v53 = vadd.f32 %v5657_v23, %v5581_v34  ;;  %5875 = vmatmul.f32.gmra.mxu0 %v12660_v54  ;;  %6029 = vmatmul.f32.gmra.mxu2 %v12661_v62  ;;  %v12676_v54 = vld [vmem:[#allocation229_spill] sm:$0xff]  ;;  %v12677_v62 = vld [vmem:[#allocation271_spill] sm:$0xff] }
 0x5de   : > { %5952 = vmatmul.f32.gmra.mxu1 %v12662_v11  ;;  %v12678_v11 = vld [vmem:[#allocation230_spill] sm:$0xff] }
 0x5df   : > { %6106 = vmatmul.f32.gmra.mxu3 %v12663_v14  ;;  %v5734_v26 = vpop.f32.mrf.mxu2  ;;  %v12679_v14 = vld [vmem:[#allocation272_spill] sm:$0xff] }
 0x5e0   : > { %v5735_v31 = vadd.f32 %v5734_v26, %v5658_v53 }
 0x5e1   : > { %v5583_v6 = vpop.f32.mrf.mxu0 }
 0x5e2   : > { %v5584_v59 = vadd.f32 %v5583_v6, %v10481_v46  ;;  %v5811_v4 = vpop.f32.mrf.mxu3 }
 0x5e3   : > { %v10614_v38 = vadd.f32 %v5811_v4, %v5735_v31  ;;  %v5660_v25 = vpop.f32.mrf.mxu1 }
 0x5e4   : > { %v5661_v52 = vadd.f32 %v5660_v25, %v5584_v59  ;;  %5878 = vmatmul.f32.gmra.mxu0 %v12664_v58  ;;  %6032 = vmatmul.f32.gmra.mxu2 %v12665_v39  ;;  %v12680_v58 = vld [vmem:[#allocation231_spill] sm:$0xff]  ;;  %v12681_v39 = vld [vmem:[#allocation274_spill] sm:$0xff] }
 0x5e6   : > { %5955 = vmatmul.f32.gmra.mxu1 %v12666_v61  ;;  %v12682_v61 = vld [vmem:[#allocation232_spill] sm:$0xff] }
 0x5e7   : > { %6109 = vmatmul.f32.gmra.mxu3 %v12667_v42  ;;  %v5737_v51 = vpop.f32.mrf.mxu2  ;;  %v12683_v42 = vld [vmem:[#allocation275_spill] sm:$0xff] }
 0x5e8   : > { %v5738_v33 = vadd.f32 %v5737_v51, %v5661_v52 }
 0x5e9   : > { %v5834_v7 = vpop.f32.mrf.mxu0 }
 0x5ea   : > { %v5814_v43 = vpop.f32.mrf.mxu3  ;;  %v5835_v40 = vadd.f32 %v5834_v7, %v10488_v0 }
 0x5eb   : > { %v10621_v46 = vadd.f32 %v5814_v43, %v5738_v33  ;;  %v5911_v3 = vpop.f32.mrf.mxu1 }
 0x5ec   : > { %v5912_v45 = vadd.f32 %v5911_v3, %v5835_v40  ;;  %5881 = vmatmul.f32.gmra.mxu0 %v12668_v41  ;;  %6035 = vmatmul.f32.gmra.mxu2 %v12669_v27 }
 0x5ee   : > { %5958 = vmatmul.f32.gmra.mxu1 %v12670_v24 }
 0x5ef   : > { %6112 = vmatmul.f32.gmra.mxu3 %v12671_v12  ;;  %v5988_v10 = vpop.f32.mrf.mxu2 }
 0x5f0   : > { %v5989_v9 = vadd.f32 %v5988_v10, %v5912_v45 }
 0x5f1   : > { %v5837_v17 = vpop.f32.mrf.mxu0 }
 0x5f2   : > { %v5838_v56 = vadd.f32 %v5837_v17, %v10495_v57  ;;  %v6065_v15 = vpop.f32.mrf.mxu3 }
 0x5f3   : > { %v10628_v50 = vadd.f32 %v6065_v15, %v5989_v9  ;;  %v5914_v0 = vpop.f32.mrf.mxu1 }
 0x5f4   : > { %v5915_v16 = vadd.f32 %v5914_v0, %v5838_v56  ;;  %5884 = vmatmul.f32.gmra.mxu0 %v12672_v5  ;;  %6038 = vmatmul.f32.gmra.mxu2 %v12673_v48 }
 0x5f6   : > { %5961 = vmatmul.f32.gmra.mxu1 %v12674_v1 }
 0x5f7   : > { %6115 = vmatmul.f32.gmra.mxu3 %v12675_v60  ;;  %v5991_v18 = vpop.f32.mrf.mxu2 }
 0x5f8   : > { %v5992_v20 = vadd.f32 %v5991_v18, %v5915_v16 }
 0x5f9   : > { %v5840_v21 = vpop.f32.mrf.mxu0 }
 0x5fa   : > { %v5841_v34 = vadd.f32 %v5840_v21, %v10502_v36  ;;  %v6068_v63 = vpop.f32.mrf.mxu3 }
 0x5fb   : > { %v10635_v57 = vadd.f32 %v6068_v63, %v5992_v20  ;;  %v5917_v23 = vpop.f32.mrf.mxu1 }
 0x5fc   : > { %v5918_v53 = vadd.f32 %v5917_v23, %v5841_v34  ;;  %5887 = vmatmul.f32.gmra.mxu0 %v12676_v54  ;;  %6041 = vmatmul.f32.gmra.mxu2 %v12677_v62 }
 0x5fe   : > { %5964 = vmatmul.f32.gmra.mxu1 %v12678_v11 }
 0x5ff   : > { %6118 = vmatmul.f32.gmra.mxu3 %v12679_v14  ;;  %v5994_v26 = vpop.f32.mrf.mxu2 }
 0x600   : > { %v5995_v31 = vadd.f32 %v5994_v26, %v5918_v53 }
 0x601   : > { %v5843_v6 = vpop.f32.mrf.mxu0 }
 0x602   : > { %v5844_v59 = vadd.f32 %v5843_v6, %v10509_v2  ;;  %v6071_v4 = vpop.f32.mrf.mxu3 }
 0x603   : > { %v10642_v36 = vadd.f32 %v6071_v4, %v5995_v31  ;;  %v5920_v25 = vpop.f32.mrf.mxu1 }
 0x604   : > { %v5921_v52 = vadd.f32 %v5920_v25, %v5844_v59  ;;  %5890 = vmatmul.f32.gmra.mxu0 %v12680_v58  ;;  %6044 = vmatmul.f32.gmra.mxu2 %v12681_v39 }
 0x606   : > { %5967 = vmatmul.f32.gmra.mxu1 %v12682_v61 }
 0x607   : > { %6121 = vmatmul.f32.gmra.mxu3 %v12683_v42  ;;  %v5997_v51 = vpop.f32.mrf.mxu2 }
 0x608   : > { %v5998_v33 = vadd.f32 %v5997_v51, %v5921_v52 }
 0x609   : > { %v5846_v7 = vpop.f32.mrf.mxu0 }
 0x60a   : > { %v5847_v43 = vadd.f32 %v5846_v7, %v10516_v47  ;;  %v6074_v40 = vpop.f32.mrf.mxu3 }
 0x60b   : > { %v10649_v2 = vadd.f32 %v6074_v40, %v5998_v33  ;;  %v5923_v3 = vpop.f32.mrf.mxu1 }
 0x60c   : > { %v5924_v45 = vadd.f32 %v5923_v3, %v5847_v43 }
 0x60f   : > { %v6000_v41 = vpop.f32.mrf.mxu2 }
 0x610   : > { %v6001_v27 = vadd.f32 %v6000_v41, %v5924_v45 }
 0x611   : > { %v5849_v24 = vpop.f32.mrf.mxu0 }
 0x612   : > { %v5850_v12 = vadd.f32 %v5849_v24, %v10523_v32  ;;  %v6077_v10 = vpop.f32.mrf.mxu3 }
 0x613   : > { %v10652_v9 = vadd.f32 %v6077_v10, %v6001_v27  ;;  %v5926_v17 = vpop.f32.mrf.mxu1 }
 0x614   : > { %v5927_v56 = vadd.f32 %v5926_v17, %v5850_v12 }
 0x617   : > { %v6003_v15 = vpop.f32.mrf.mxu2 }
 0x618   : > { %v6004_v0 = vadd.f32 %v6003_v15, %v5927_v56 }
 0x619   : > { %v5852_v16 = vpop.f32.mrf.mxu0 }
 0x61a   : > { %v5853_v47 = vadd.f32 %v5852_v16, %v10530_v19  ;;  %v6080_v5 = vpop.f32.mrf.mxu3 }
 0x61b   : > { %v10655_v48 = vadd.f32 %v6080_v5, %v6004_v0  ;;  %v5929_v1 = vpop.f32.mrf.mxu1 }
 0x61c   : > { %v5930_v60 = vadd.f32 %v5929_v1, %v5853_v47 }
 0x61f   : > { %v6006_v18 = vpop.f32.mrf.mxu2 }
 0x620   : > { %v6007_v20 = vadd.f32 %v6006_v18, %v5930_v60 }
 0x621   : > { %v5855_v21 = vpop.f32.mrf.mxu0 }
 0x622   : > { %v5856_v32 = vadd.f32 %v5855_v21, %v10537_v29  ;;  %v6083_v34 = vpop.f32.mrf.mxu3 }
 0x623   : > { %v10658_v63 = vadd.f32 %v6083_v34, %v6007_v20  ;;  %v5932_v23 = vpop.f32.mrf.mxu1 }
 0x624   : > { %v5933_v53 = vadd.f32 %v5932_v23, %v5856_v32 }
 0x627   : > { %v6009_v54 = vpop.f32.mrf.mxu2 }
 0x628   : > { %v6010_v62 = vadd.f32 %v6009_v54, %v5933_v53 }
 0x629   : > { %v5858_v11 = vpop.f32.mrf.mxu0 }
 0x62a   : > { %v5859_v19 = vadd.f32 %v5858_v11, %v10544_v28  ;;  %v6086_v14 = vpop.f32.mrf.mxu3 }
 0x62b   : > { %v10661_v26 = vadd.f32 %v6086_v14, %v6010_v62  ;;  %v5935_v31 = vpop.f32.mrf.mxu1 }
 0x62c   : > { %v5936_v6 = vadd.f32 %v5935_v31, %v5859_v19 }
 0x62f   : > { %v6012_v59 = vpop.f32.mrf.mxu2 }
 0x630   : > { %v6013_v4 = vadd.f32 %v6012_v59, %v5936_v6 }
 0x631   : > { %v5861_v25 = vpop.f32.mrf.mxu0 }
 0x632   : > { %v5862_v29 = vadd.f32 %v5861_v25, %v10551_v30  ;;  %v6089_v52 = vpop.f32.mrf.mxu3 }
 0x633   : > { %v10664_v58 = vadd.f32 %v6089_v52, %v6013_v4  ;;  %v5938_v39 = vpop.f32.mrf.mxu1 }
 0x634   : > { %v5939_v61 = vadd.f32 %v5938_v39, %v5862_v29 }
 0x637   : > { %v6015_v42 = vpop.f32.mrf.mxu2 }
 0x638   : > { %v6016_v51 = vadd.f32 %v6015_v42, %v5939_v61 }
 0x639   : > { %v5864_v33 = vpop.f32.mrf.mxu0 }
 0x63a   : > { %v5865_v28 = vadd.f32 %v5864_v33, %v10558_v44  ;;  %v6092_v7 = vpop.f32.mrf.mxu3 }
 0x63b   : > { %v10667_v43 = vadd.f32 %v6092_v7, %v6016_v51  ;;  %v5941_v40 = vpop.f32.mrf.mxu1 }
 0x63c   : > { %v5942_v3 = vadd.f32 %v5941_v40, %v5865_v28 }
 0x63f   : > { %v6018_v45 = vpop.f32.mrf.mxu2 }
 0x640   : > { %v6019_v41 = vadd.f32 %v6018_v45, %v5942_v3 }
 0x641   : > { %v5867_v27 = vpop.f32.mrf.mxu0 }
 0x642   : > { %v5868_v30 = vadd.f32 %v5867_v27, %v10565_v35  ;;  %v6095_v24 = vpop.f32.mrf.mxu3 }
 0x643   : > { %v10670_v12 = vadd.f32 %v6095_v24, %v6019_v41  ;;  %v5944_v10 = vpop.f32.mrf.mxu1 }
 0x644   : > { %v5945_v17 = vadd.f32 %v5944_v10, %v5868_v30 }
 0x647   : > { %v6021_v56 = vpop.f32.mrf.mxu2 }
 0x648   : > { %v6022_v15 = vadd.f32 %v6021_v56, %v5945_v17 }
 0x649   : > { %v5870_v0 = vpop.f32.mrf.mxu0 }
 0x64a   : > { %v5871_v44 = vadd.f32 %v5870_v0, %v10572_v49  ;;  %v6098_v16 = vpop.f32.mrf.mxu3 }
 0x64b   : > { %v10673_v47 = vadd.f32 %v6098_v16, %v6022_v15  ;;  %v5947_v5 = vpop.f32.mrf.mxu1 }
 0x64c   : > { %v5948_v1 = vadd.f32 %v5947_v5, %v5871_v44 }
 0x64f   : > { %v6024_v60 = vpop.f32.mrf.mxu2 }
 0x650   : > { %v6025_v18 = vadd.f32 %v6024_v60, %v5948_v1 }
 0x651   : > { %v5873_v20 = vpop.f32.mrf.mxu0 }
 0x652   : > { %v5874_v35 = vadd.f32 %v5873_v20, %v10579_v13  ;;  %v6101_v21 = vpop.f32.mrf.mxu3 }
 0x653   : > { %v10676_v32 = vadd.f32 %v6101_v21, %v6025_v18  ;;  %v5950_v34 = vpop.f32.mrf.mxu1 }
 0x654   : > { %v5951_v23 = vadd.f32 %v5950_v34, %v5874_v35 }
 0x657   : > { %v6027_v53 = vpop.f32.mrf.mxu2 }
 0x658   : > { %v6028_v54 = vadd.f32 %v6027_v53, %v5951_v23 }
 0x659   : > { %v5876_v62 = vpop.f32.mrf.mxu0 }
 0x65a   : > { %v5877_v49 = vadd.f32 %v5876_v62, %v10586_v22  ;;  %v6104_v11 = vpop.f32.mrf.mxu3 }
 0x65b   : > { %v10679_v19 = vadd.f32 %v6104_v11, %v6028_v54  ;;  %v5953_v14 = vpop.f32.mrf.mxu1 }
 0x65c   : > { %v5954_v31 = vadd.f32 %v5953_v14, %v5877_v49 }
 0x65f   : > { %v6030_v6 = vpop.f32.mrf.mxu2 }
 0x660   : > { %v6031_v59 = vadd.f32 %v6030_v6, %v5954_v31 }
 0x661   : > { %v5879_v4 = vpop.f32.mrf.mxu0 }
 0x662   : > { %v5880_v13 = vadd.f32 %v5879_v4, %v10593_v55  ;;  %v6107_v25 = vpop.f32.mrf.mxu3 }
 0x663   : > { %v10682_v29 = vadd.f32 %v6107_v25, %v6031_v59  ;;  %v5956_v52 = vpop.f32.mrf.mxu1 }
 0x664   : > { %v5957_v39 = vadd.f32 %v5956_v52, %v5880_v13 }
 0x667   : > { %v6033_v61 = vpop.f32.mrf.mxu2 }
 0x668   : > { %v6034_v42 = vadd.f32 %v6033_v61, %v5957_v39 }
 0x669   : > { %v5882_v51 = vpop.f32.mrf.mxu0 }
 0x66a   : > { %v5883_v22 = vadd.f32 %v5882_v51, %v10600_v8  ;;  %v6110_v33 = vpop.f32.mrf.mxu3 }
 0x66b   : > { %v10685_v28 = vadd.f32 %v6110_v33, %v6034_v42  ;;  %v5959_v7 = vpop.f32.mrf.mxu1 }
 0x66c   : > { %v5960_v40 = vadd.f32 %v5959_v7, %v5883_v22 }
 0x66f   : > { %v6036_v3 = vpop.f32.mrf.mxu2 }
 0x670   : > { %v6037_v45 = vadd.f32 %v6036_v3, %v5960_v40 }
 0x671   : > { %v5885_v41 = vpop.f32.mrf.mxu0 }
 0x672   : > { %v5886_v55 = vadd.f32 %v5885_v41, %v10607_v37  ;;  %v6113_v27 = vpop.f32.mrf.mxu3 }
 0x673   : > { %v10688_v30 = vadd.f32 %v6113_v27, %v6037_v45  ;;  %v5962_v24 = vpop.f32.mrf.mxu1 }
 0x674   : > { %v5963_v10 = vadd.f32 %v5962_v24, %v5886_v55 }
 0x677   : > { %v6039_v17 = vpop.f32.mrf.mxu2 }
 0x678   : > { %v6040_v56 = vadd.f32 %v6039_v17, %v5963_v10 }
 0x679   : > { %v5888_v15 = vpop.f32.mrf.mxu0 }
 0x67a   : > { %v5889_v8 = vadd.f32 %v5888_v15, %v10614_v38  ;;  %v6116_v0 = vpop.f32.mrf.mxu3 }
 0x67b   : > { %v10691_v44 = vadd.f32 %v6116_v0, %v6040_v56  ;;  %v5965_v16 = vpop.f32.mrf.mxu1 }
 0x67c   : > { %v5966_v5 = vadd.f32 %v5965_v16, %v5889_v8 }
 0x67f   : > { %v6042_v1 = vpop.f32.mrf.mxu2 }
 0x680   : > { %v6043_v60 = vadd.f32 %v6042_v1, %v5966_v5 }
 0x681   : > { %v5891_v18 = vpop.f32.mrf.mxu0 }
 0x682   : > { %v5892_v37 = vadd.f32 %v5891_v18, %v10621_v46  ;;  %v6119_v20 = vpop.f32.mrf.mxu3 }
 0x683   : > { %v10694_v35 = vadd.f32 %v6119_v20, %v6043_v60  ;;  %v5968_v21 = vpop.f32.mrf.mxu1 }
 0x684   : > { %v5969_v34 = vadd.f32 %v5968_v21, %v5892_v37 }
 0x687   : > { %v6045_v23 = vpop.f32.mrf.mxu2  ;;  %6128 = sbr.rel (%p7384_p5) target bundleno = 1852 (0x73c), region = 44 }
 0x688   : > { %v6046_v53 = vadd.f32 %v6045_v23, %v5969_v34 }
 0x68a   : > { %v6122_v54 = vpop.f32.mrf.mxu3 }
 0x68b   : > { %v10696_v62 = vadd.f32 %v6122_v54, %v6046_v53 }
 0x68c   : > { %v6173_v38 = vld [vmem:[%s11836_s3 + $0x20] sm:$0xff]  ;;  %v6171_v46 = vld [vmem:[%s11836_s3 + $0x10] sm:$0xff]  ;;  %v7652_v11 = vmov 0   ;;  %v6174_v14 = vld [vmem:[%s11836_s3 + $0x28] sm:$0xff]  ;;  %v6138_v27 = vmax.f32 %v10652_v9, 0.0  ;;  %v6140_v15 = vmax.f32 %v10655_v48, 0.0 }
 0x68d   : > { %v6169_v49 = vld [vmem:[%s11836_s3] sm:$0xff]  ;;  %7483 = vset.pattern.permute.xlu2 %v7652_v11  ;;  %7482 = vset.pattern.permute.xlu1 %v7652_v11  ;;  %v6172_v31 = vld [vmem:[%s11836_s3 + $0x18] sm:$0xff]  ;;  %v6170_v6 = vld [vmem:[%s11836_s3 + $0x8] sm:$0xff]  ;;  %v6130_v23 = vmax.f32 %v10628_v50, 0.0 }
 0x68e   : > { %7481 = vset.pattern.permute.xlu0 %v7652_v11  ;;  %6211 = vperm.xlu2 %7483, %v6173_v38   ;;  %v6177_v59 = vld [vmem:[%s11836_s3 + $0x40] sm:$0xff]  ;;  %v6176_v4 = vld [vmem:[%s11836_s3 + $0x38] sm:$0xff]  ;;  %v6175_v13 = vld [vmem:[%s11836_s3 + $0x30] sm:$0xff] }
 0x68f   : > { %6201 = vperm.xlu1 %7482, %v6171_v46   ;;  %6191 = vperm.xlu0 %7481, %v6169_v49   ;;  %v6180_v25 = vld [vmem:[%s11836_s3 + $0x58] sm:$0xff]  ;;  %v6179_v52 = vld [vmem:[%s11836_s3 + $0x50] sm:$0xff]  ;;  %v6178_v39 = vld [vmem:[%s11836_s3 + $0x48] sm:$0xff] }
 0x690   : > { %v6183_v61 = vld [vmem:[%s11836_s3 + $0x70] sm:$0xff]  ;;  %v6182_v42 = vld [vmem:[%s11836_s3 + $0x68] sm:$0xff]  ;;  %v6181_v51 = vld [vmem:[%s11836_s3 + $0x60] sm:$0xff] }
 0x691   : > { %v6186_v22 = vld [vmem:[%s11836_s3 + $0x88] sm:$0xff]  ;;  %v6185_v33 = vld [vmem:[%s11836_s3 + $0x80] sm:$0xff]  ;;  %v6184_v7 = vld [vmem:[%s11836_s3 + $0x78] sm:$0xff] }
 0x692   : > { %v6188_v40 = vld [vmem:[%s11836_s3 + $0x98] sm:$0xff]  ;;  %v6187_v3 = vld [vmem:[%s11836_s3 + $0x90] sm:$0xff]  ;;  %v12684_v41 = vld [vmem:[#allocation277_spill] sm:$0xff] }
 0x693   : > { %v6137_v55 = vmax.f32 %v12684_v41, 0.0  ;;  %v12685_v17 = vld [vmem:[#allocation278_spill] sm:$0xff]  ;;  %v12686_v21 = vld [vmem:[#allocation267_spill] sm:$0xff]  ;;  %v12687_v49 = vld [vmem:[#allocation273_spill] sm:$0xff] }
 0x694   : > { %v6139_v56 = vmax.f32 %v12685_v17, 0.0  ;;  %v6129_v34 = vmax.f32 %v12686_v21, 0.0  ;;  %v6133_v11 = vmax.f32 %v12687_v49, 0.0  ;;  %v12690_v41 = vld [vmem:[#allocation281_spill] sm:$0xff]  ;;  %v6144_v21 = vmax.f32 %v10661_v26, 0.0 }
 0x696   : > { %6216 = vperm.xlu2 %7483, %v6174_v14   ;;  %v6134_v14 = vmax.f32 %v10642_v36, 0.0 }
 0x697   : > { %6206 = vperm.xlu1 %7482, %v6172_v31   ;;  %6196 = vperm.xlu0 %7481, %v6170_v6  }
 0x69e   : > { %6231 = vperm.xlu2 %7483, %v6177_v59  }
 0x69f   : > { %6226 = vperm.xlu1 %7482, %v6176_v4   ;;  %6221 = vperm.xlu0 %7481, %v6175_v13   ;;  %v12688_v4 = vld [vmem:[#allocation276_spill] sm:$0xff] }
 0x6a0   : > { %v6135_v13 = vmax.f32 %v12688_v4, 0.0 }
 0x6a6   : > { %6246 = vperm.xlu2 %7483, %v6180_v25   ;;  %v6136_v25 = vmax.f32 %v10649_v2, 0.0 }
 0x6a7   : > { %6241 = vperm.xlu1 %7482, %v6179_v52   ;;  %6236 = vperm.xlu0 %7481, %v6178_v39   ;;  %v12689_v52 = vld [vmem:[#allocation270_spill] sm:$0xff] }
 0x6a8   : > { %v6131_v39 = vmax.f32 %v12689_v52, 0.0 }
 0x6ae   : > { %6261 = vperm.xlu2 %7483, %v6183_v61   ;;  %v6132_v61 = vmax.f32 %v10635_v57, 0.0 }
 0x6af   : > { %6256 = vperm.xlu1 %7482, %v6182_v42   ;;  %6251 = vperm.xlu0 %7481, %v6181_v51  }
 0x6b6   : > { %6276 = vperm.xlu2 %7483, %v6186_v22  }
 0x6b7   : > { %6271 = vperm.xlu1 %7482, %v6185_v33   ;;  %6266 = vperm.xlu0 %7481, %v6184_v7  }
 0x6bf   : > { %6286 = vperm.xlu1 %7482, %v6188_v40   ;;  %6281 = vperm.xlu0 %7481, %v6187_v3  }
 0x6e8   : > { %v6212_v45 = vpop.permute.xlu2 %6211 }
 0x6e9   : > { %v6297_v24 = vmul.f32 %v6212_v45, %v6137_v55  ;;  %v6298_v10 = vmul.f32 %v6212_v45, %v6138_v27  ;;  %v6145_v55 = vmax.f32 %v12690_v41, 0.0  ;;  %v6146_v27 = vmax.f32 %v10664_v58, 0.0 }
 0x6eb   : > { %v6363_v0 = vrot.slane %v6297_v24, 5  ;;  %v6365_v16 = vrot.slane %v6298_v10, 5 }
 0x6f0   : > { %v6217_v8 = vpop.permute.xlu2 %6216 }
 0x6f1   : > { %v10763_v5 = vmul.f32 %v6217_v8, %v6139_v56  ;;  %v10765_v1 = vmul.f32 %v6217_v8, %v6140_v15 }
 0x6f3   : > { %v6367_v60 = vrot.slane %v10763_v5, 5  ;;  %v6369_v18 = vrot.slane %v10765_v1, 5 }
 0x6f5   : > { %v6368_v37 = vsel %vm1152_vm4, %v6363_v0, %v6367_v60  ;;  %v6370_v20 = vsel %vm1152_vm4, %v6365_v16, %v6369_v18 }
 0x6f6   : > { %6419 = vst [vmem:[#allocation2 + $0x148] sm:$0xff] %v6368_v37  ;;  %v12691_v37 = vld [vmem:[#allocation280_spill] sm:$0xff] }
 0x6f7   : > { %6420 = vst [vmem:[#allocation2 + $0x100] sm:$0xff] %v6370_v20  ;;  %v6143_v20 = vmax.f32 %v12691_v37, 0.0 }
 0x6f8   : > { %v6232_v59 = vpop.permute.xlu2 %6231 }
 0x6f9   : > { %v10792_v49 = vmul.f32 %v6232_v59, %v6145_v55  ;;  %v12694_v55 = vld [vmem:[#allocation4_spill] sm:$0xff] }
 0x700   : > { %v6247_v4 = vpop.permute.xlu2 %6246 }
 0x701   : > { %v6202_v53 = vpop.permute.xlu1 %6201  ;;  %v6192_v54 = vpop.permute.xlu0 %6191 }
 0x702   : > { %v6289_v38 = vmul.f32 %v6192_v54, %v6129_v34  ;;  %v6290_v46 = vmul.f32 %v6192_v54, %v6130_v23  ;;  %v6293_v42 = vmul.f32 %v6202_v53, %v6133_v11  ;;  %v6294_v51 = vmul.f32 %v6202_v53, %v6134_v14  ;;  %v12692_v34 = vld [vmem:[#allocation279_spill] sm:$0xff] }
 0x703   : > { %v6141_v23 = vmax.f32 %v12692_v34, 0.0  ;;  %v10794_v11 = vmul.f32 %v6232_v59, %v6146_v27  ;;  %v6149_v27 = vmax.f32 %v12694_v55, 0.0 }
 0x704   : > { %v6349_v31 = vrot.slane %v6289_v38, 5  ;;  %v6350_v6 = vrot.slane %v6290_v46, 5  ;;  %v6355_v24 = vrot.slane %v6293_v42, 5  ;;  %v6357_v10 = vrot.slane %v6294_v51, 5 }
 0x705   : > { %v6142_v46 = vmax.f32 %v10658_v63, 0.0 }
 0x706   : > { %6409 = vst [vmem:[#allocation2 + $0x10] sm:$0xf8] %v6349_v31 }
 0x707   : > { %6410 = vst [vmem:[#allocation2 + $0x48] sm:$0xf8] %v6350_v6 }
 0x709   : > { %v6207_v22 = vpop.permute.xlu1 %6206  ;;  %v6197_v33 = vpop.permute.xlu0 %6196 }
 0x70a   : > { %v6295_v7 = vmul.f32 %v6207_v22, %v6135_v13  ;;  %v6296_v40 = vmul.f32 %v6207_v22, %v6136_v25  ;;  %v6291_v3 = vmul.f32 %v6197_v33, %v6131_v39  ;;  %v6292_v45 = vmul.f32 %v6197_v33, %v6132_v61  ;;  %v12693_v25 = vld [vmem:[#allocation35_spill] sm:$0xff] }
 0x70b   : > { %v6151_v52 = vmax.f32 %v12693_v25, 0.0 }
 0x70c   : > { %v6359_v17 = vrot.slane %v6295_v7, 5  ;;  %v6361_v56 = vrot.slane %v6296_v40, 5  ;;  %v6351_v15 = vrot.slane %v6291_v3, 5  ;;  %v6353_v8 = vrot.slane %v6292_v45, 5 }
 0x70d   : > { %v6381_v7 = vrot.slane %v10794_v11, 5 }
 0x70e   : > { %v6360_v53 = vsel %vm1152_vm4, %v6355_v24, %v6359_v17  ;;  %v6362_v54 = vsel %vm1152_vm4, %v6357_v10, %v6361_v56  ;;  %v6364_v38 = vsel %vm1152_vm4, %v6359_v17, %v6363_v0  ;;  %v6366_v14 = vsel %vm1152_vm4, %v6361_v56, %v6365_v16  ;;  %v12695_v17 = vld [vmem:[#allocation282_spill] sm:$0xff] }
 0x70f   : > { %6415 = vst [vmem:[#allocation2 + $0x108] sm:$0xff] %v6360_v53  ;;  %v6352_v13 = vsel %vm1152_vm4, %v6349_v31, %v6351_v15  ;;  %v6354_v39 = vsel %vm1152_vm4, %v6350_v6, %v6353_v8  ;;  %v6356_v0 = vsel %vm1152_vm4, %v6351_v15, %v6355_v24  ;;  %v6379_v16 = vrot.slane %v10792_v49, 5 }
 0x710   : > { %6416 = vst [vmem:[#allocation2 + $0x110] sm:$0xff] %v6362_v54  ;;  %v6152_v31 = vmax.f32 %v10673_v47, 0.0  ;;  %v6358_v40 = vsel %vm1152_vm4, %v6353_v8, %v6357_v10  ;;  %v6150_v24 = vmax.f32 %v10670_v12, 0.0  ;;  %v6147_v56 = vmax.f32 %v12695_v17, 0.0 }
 0x711   : > { %6417 = vst [vmem:[#allocation2 + $0x90] sm:$0xff] %v6364_v38  ;;  %v6227_v61 = vpop.permute.xlu1 %6226  ;;  %v6222_v42 = vpop.permute.xlu0 %6221  ;;  %v6148_v8 = vmax.f32 %v10667_v43, 0.0 }
 0x712   : > { %6418 = vst [vmem:[#allocation2 + $0x118] sm:$0xff] %v6366_v14  ;;  %v6303_v51 = vmul.f32 %v6227_v61, %v6143_v20  ;;  %v6304_v59 = vmul.f32 %v6227_v61, %v6144_v21  ;;  %v6301_v22 = vmul.f32 %v6222_v42, %v6141_v23  ;;  %v6302_v33 = vmul.f32 %v6222_v42, %v6142_v46  ;;  %v12697_v61 = vld [vmem:[#allocation36_spill] sm:$0xff] }
 0x713   : > { %6411 = vst [vmem:[#allocation2 + $0x160] sm:$0xff] %v6352_v13  ;;  %v10814_v20 = vmul.f32 %v6247_v4, %v6151_v52  ;;  %v10816_v21 = vmul.f32 %v6247_v4, %v6152_v31  ;;  %v12696_v4 = vld [vmem:[#allocation6_spill] sm:$0xff]  ;;  %v6158_v13 = vmax.f32 %v10682_v29, 0.0  ;;  %v6155_v42 = vmax.f32 %v12697_v61, 0.0 }
 0x714   : > { %6412 = vst [vmem:[#allocation2 + $0x128] sm:$0xff] %v6354_v39  ;;  %v6375_v6 = vrot.slane %v6303_v51, 5  ;;  %v6377_v3 = vrot.slane %v6304_v59, 5  ;;  %v6371_v45 = vrot.slane %v6301_v22, 5  ;;  %v6373_v41 = vrot.slane %v6302_v33, 5  ;;  %v12698_v33 = vld [vmem:[#allocation5_spill] sm:$0xff] }
 0x715   : > { %6413 = vst [vmem:[#allocation2 + $0x40] sm:$0xff] %v6356_v0  ;;  %v6453_v14 = vrot.slane %v10814_v20, 5  ;;  %v6455_v1 = vrot.slane %v10816_v21, 5  ;;  %v6156_v51 = vmax.f32 %v10679_v19, 0.0  ;;  %v6153_v31 = vmax.f32 %v12698_v33, 0.0 }
 0x716   : > { %6414 = vst [vmem:[#allocation2 + $0x178] sm:$0xff] %v6358_v40  ;;  %v6380_v15 = vsel %vm1152_vm4, %v6375_v6, %v6379_v16  ;;  %v6382_v37 = vsel %vm1152_vm4, %v6377_v3, %v6381_v7  ;;  %v6372_v10 = vsel %vm1152_vm4, %v6367_v60, %v6371_v45  ;;  %v6374_v34 = vsel %vm1152_vm4, %v6369_v18, %v6373_v41  ;;  %v6262_v60 = vpop.permute.xlu2 %6261 }
 0x717   : > { %6425 = vst [vmem:[#allocation2 + $0x138] sm:$0xff] %v6380_v15  ;;  %v6376_v23 = vsel %vm1152_vm4, %v6371_v45, %v6375_v6  ;;  %v6378_v53 = vsel %vm1152_vm4, %v6373_v41, %v6377_v3  ;;  %v6157_v18 = vmax.f32 %v12696_v4, 0.0  ;;  %v6154_v40 = vmax.f32 %v10676_v32, 0.0 }
 0x718   : > { %6426 = vst [vmem:[#allocation2 + $0x78] sm:$0xff] %v6382_v37  ;;  %v10835_v3 = vmul.f32 %v6262_v60, %v6158_v13  ;;  %v6164_v21 = vmax.f32 %v10691_v44, 0.0 }
 0x719   : > { %6421 = vst [vmem:[#allocation2 + $0x58] sm:$0xff] %v6372_v10  ;;  %v6242_v5 = vpop.permute.xlu1 %6241  ;;  %v6237_v54 = vpop.permute.xlu0 %6236  ;;  %v10833_v6 = vmul.f32 %v6262_v60, %v6157_v18  ;;  %v6162_v60 = vmax.f32 %v10688_v30, 0.0  ;;  %v6160_v18 = vmax.f32 %v10685_v28, 0.0 }
 0x71a   : > { %6422 = vst [vmem:[#allocation2 + $0xd8] sm:$0xff] %v6374_v34  ;;  %v6309_v38 = vmul.f32 %v6242_v5, %v6149_v27  ;;  %v6310_v46 = vmul.f32 %v6242_v5, %v6150_v24  ;;  %v6307_v49 = vmul.f32 %v6237_v54, %v6147_v56  ;;  %v6308_v11 = vmul.f32 %v6237_v54, %v6148_v8  ;;  %v12699_v8 = vld [vmem:[#allocation38_spill] sm:$0xff]  ;;  %v12700_v5 = vld [vmem:[#allocation7_spill] sm:$0xff] }
 0x71b   : > { %6423 = vst [vmem:[#allocation2 + $0x180] sm:$0xff] %v6376_v23  ;;  %v6465_v37 = vrot.slane %v10833_v6, 5  ;;  %v6467_v10 = vrot.slane %v10835_v3, 5  ;;  %v6163_v20 = vmax.f32 %v12699_v8, 0.0  ;;  %v6161_v54 = vmax.f32 %v12700_v5, 0.0 }
 0x71c   : > { %6424 = vst [vmem:[#allocation2 + $0x130] sm:$0xff] %v6378_v53  ;;  %v6451_v25 = vrot.slane %v6309_v38, 5  ;;  %v6452_v52 = vrot.slane %v6310_v46, 5  ;;  %v6383_v39 = vrot.slane %v6307_v49, 5  ;;  %v6385_v0 = vrot.slane %v6308_v11, 5  ;;  %v12701_v38 = vld [vmem:[#allocation37_spill] sm:$0xff] }
 0x71d   : > { %v6159_v46 = vmax.f32 %v12701_v38, 0.0  ;;  %v6166_v8 = vmax.f32 %v10694_v35, 0.0 }
 0x71e   : > { %v6454_v59 = vsel %vm1152_vm4, %v6451_v25, %v6453_v14  ;;  %v6456_v22 = vsel %vm1152_vm4, %v6452_v52, %v6455_v1  ;;  %6511 = vst [vmem:[#allocation2 + $0xb8] sm:$0xf8] %v6451_v25  ;;  %v6384_v45 = vsel %vm1152_vm4, %v6379_v16, %v6383_v39  ;;  %v6386_v41 = vsel %vm1152_vm4, %v6381_v7, %v6385_v0  ;;  %v6277_v16 = vpop.permute.xlu2 %6276 }
 0x71f   : > { %6512 = vst [vmem:[#allocation2 + $0x170] sm:$0xf8] %v6452_v52  ;;  %v6323_v13 = vmul.f32 %v6277_v16, %v6163_v20  ;;  %v6324_v25 = vmul.f32 %v6277_v16, %v6164_v21 }
 0x720   : > { %6513 = vst [vmem:[#allocation2 + $0xc0] sm:$0xff] %v6454_v59 }
 0x721   : > { %6514 = vst [vmem:[#allocation2 + $0x140] sm:$0xff] %v6456_v22  ;;  %v6257_v55 = vpop.permute.xlu1 %6256  ;;  %v6252_v27 = vpop.permute.xlu0 %6251  ;;  %v6477_v33 = vrot.slane %v6323_v13, 5 }
 0x722   : > { %6427 = vst [vmem:[#allocation2 + $0xa0] sm:$0xff] %v6384_v45  ;;  %v6315_v24 = vmul.f32 %v6257_v55, %v6155_v42  ;;  %v6316_v17 = vmul.f32 %v6257_v55, %v6156_v51  ;;  %v6313_v56 = vmul.f32 %v6252_v27, %v6153_v31  ;;  %v6314_v15 = vmul.f32 %v6252_v27, %v6154_v40  ;;  %v12702_v45 = vld [vmem:[#allocation39_spill] sm:$0xff]  ;;  %v12703_v27 = vld [vmem:[#allocation8_spill] sm:$0xff] }
 0x723   : > { %6428 = vst [vmem:[#allocation2] sm:$0xff] %v6386_v41  ;;  %v6479_v31 = vrot.slane %v6324_v25, 5  ;;  %v6167_v41 = vmax.f32 %v12702_v45, 0.0  ;;  %v6168_v55 = vmax.f32 %v10696_v62, 0.0 }
 0x724   : > { %6429 = vst [vmem:[#allocation2 + $0x20] sm:$0x7] %v6383_v39  ;;  %v6461_v7 = vrot.slane %v6315_v24, 5  ;;  %v6463_v34 = vrot.slane %v6316_v17, 5  ;;  %v6457_v23 = vrot.slane %v6313_v56, 5  ;;  %v6459_v53 = vrot.slane %v6314_v15, 5 }
 0x725   : > { %6430 = vst [vmem:[#allocation2 + $0xe0] sm:$0x7] %v6385_v0  ;;  %v6165_v24 = vmax.f32 %v12703_v27, 0.0 }
 0x726   : > { %v6466_v49 = vsel %vm1152_vm4, %v6461_v7, %v6465_v37  ;;  %v6468_v11 = vsel %vm1152_vm4, %v6463_v34, %v6467_v10  ;;  %v6458_v4 = vsel %vm1152_vm4, %v6453_v14, %v6457_v23  ;;  %v6460_v52 = vsel %vm1152_vm4, %v6455_v1, %v6459_v53 }
 0x727   : > { %6519 = vst [vmem:[#allocation2 + $0x60] sm:$0xff] %v6466_v49  ;;  %v6462_v39 = vsel %vm1152_vm4, %v6457_v23, %v6461_v7  ;;  %v6464_v0 = vsel %vm1152_vm4, %v6459_v53, %v6463_v34 }
 0x728   : > { %6520 = vst [vmem:[#allocation2 + $0x18] sm:$0xff] %v6468_v11 }
 0x729   : > { %6515 = vst [vmem:[#allocation2 + $0x50] sm:$0xff] %v6458_v4  ;;  %v6272_v61 = vpop.permute.xlu1 %6271  ;;  %v6267_v42 = vpop.permute.xlu0 %6266 }
 0x72a   : > { %6516 = vst [vmem:[#allocation2 + $0x168] sm:$0xff] %v6460_v52  ;;  %v6321_v51 = vmul.f32 %v6272_v61, %v6161_v54  ;;  %v6322_v59 = vmul.f32 %v6272_v61, %v6162_v60  ;;  %v6319_v22 = vmul.f32 %v6267_v42, %v6159_v46  ;;  %v6320_v14 = vmul.f32 %v6267_v42, %v6160_v18 }
 0x72b   : > { %6517 = vst [vmem:[#allocation2 + $0x190] sm:$0xff] %v6462_v39 }
 0x72c   : > { %6518 = vst [vmem:[#allocation2 + $0x38] sm:$0xff] %v6464_v0  ;;  %v6473_v40 = vrot.slane %v6321_v51, 5  ;;  %v6475_v6 = vrot.slane %v6322_v59, 5  ;;  %v6469_v1 = vrot.slane %v6319_v22, 5  ;;  %v6471_v3 = vrot.slane %v6320_v14, 5 }
 0x72e   : > { %v6478_v17 = vsel %vm1152_vm4, %v6473_v40, %v6477_v33  ;;  %v6480_v56 = vsel %vm1152_vm4, %v6475_v6, %v6479_v31  ;;  %v6470_v15 = vsel %vm1152_vm4, %v6465_v37, %v6469_v1  ;;  %v6472_v20 = vsel %vm1152_vm4, %v6467_v10, %v6471_v3 }
 0x72f   : > { %6525 = vst [vmem:[#allocation2 + $0x30] sm:$0xff] %v6478_v17  ;;  %v6474_v21 = vsel %vm1152_vm4, %v6469_v1, %v6473_v40  ;;  %v6476_v16 = vsel %vm1152_vm4, %v6471_v3, %v6475_v6 }
 0x730   : > { %6526 = vst [vmem:[#allocation2 + $0xc8] sm:$0xff] %v6480_v56 }
 0x731   : > { %6521 = vst [vmem:[#allocation2 + $0x158] sm:$0xff] %v6470_v15  ;;  %v6287_v7 = vpop.permute.xlu1 %6286  ;;  %v6282_v34 = vpop.permute.xlu0 %6281 }
 0x732   : > { %6522 = vst [vmem:[#allocation2 + $0x120] sm:$0xff] %v6472_v20  ;;  %v6327_v23 = vmul.f32 %v6287_v7, %v6167_v41  ;;  %v6328_v53 = vmul.f32 %v6287_v7, %v6168_v55  ;;  %v6325_v5 = vmul.f32 %v6282_v34, %v6165_v24  ;;  %v6326_v54 = vmul.f32 %v6282_v34, %v6166_v8 }
 0x733   : > { %6523 = vst [vmem:[#allocation2 + $0x198] sm:$0xff] %v6474_v21 }
 0x734   : > { %6524 = vst [vmem:[#allocation2 + $0x68] sm:$0xff] %v6476_v16  ;;  %v6485_v37 = vrot.slane %v6327_v23, 5  ;;  %v6487_v60 = vrot.slane %v6328_v53, 5  ;;  %v6481_v38 = vrot.slane %v6325_v5, 5  ;;  %v6483_v46 = vrot.slane %v6326_v54, 5 }
 0x736   : > { %6531 = vst [vmem:[#allocation2 + $0x98] sm:$0x7] %v6485_v37  ;;  %v6482_v10 = vsel %vm1152_vm4, %v6477_v33, %v6481_v38  ;;  %v6484_v49 = vsel %vm1152_vm4, %v6479_v31, %v6483_v46  ;;  %v6486_v11 = vsel %vm1152_vm4, %v6481_v38, %v6485_v37  ;;  %v6488_v4 = vsel %vm1152_vm4, %v6483_v46, %v6487_v60 }
 0x737   : > { %6532 = vst [vmem:[#allocation2 + $0x150] sm:$0x7] %v6487_v60 }
 0x738   : > { %6527 = vst [vmem:[#allocation2 + $0xf8] sm:$0xff] %v6482_v10 }
 0x739   : > { %6528 = vst [vmem:[#allocation2 + $0x28] sm:$0xff] %v6484_v49 }
 0x73a   : > { %6529 = vst [vmem:[#allocation2 + $0x8] sm:$0xff] %v6486_v11 }
 0x73b   : > { %6530 = vst [vmem:[#allocation2 + $0x80] sm:$0xff] %v6488_v4 }
 0x73c PF: > { %p7385_p6 = scmp.ne.s32.totalorder %s7684_s16, 4 }
 0x73e   : > { %6536 = sbr.rel (%p7385_p6) target bundleno = 2035 (0x7f3), region = 48 }
 0x743   : > { %v12704_v18 = vld [vmem:[#allocation267_spill] sm:$0xff]  ;;  %v7387_v25 = vmul.f32 -1.442695, %v10628_v50  ;;  %v12705_v52 = vld [vmem:[#allocation270_spill] sm:$0xff]  ;;  %v7389_v0 = vmul.f32 -1.442695, %v10635_v57 }
 0x744   : > { %v7386_v13 = vmul.f32 -1.442695, %v12704_v18  ;;  %v7388_v39 = vmul.f32 -1.442695, %v12705_v52  ;;  %v12706_v61 = vld [vmem:[#allocation273_spill] sm:$0xff]  ;;  %v12707_v59 = vld [vmem:[#allocation276_spill] sm:$0xff] }
 0x745   : > { %v7390_v42 = vmul.f32 -1.442695, %v12706_v61  ;;  %v7391_v51 = vmul.f32 -1.442695, %v10642_v36  ;;  %v7392_v22 = vmul.f32 -1.442695, %v12707_v59 }
 0x746   : > { %7484 = vpow2.f32 %v7386_v13  ;;  %v7393_v14 = vmul.f32 -1.442695, %v10649_v2  ;;  %v12708_v6 = vld [vmem:[#allocation277_spill] sm:$0xff]  ;;  %v10886_v41 = vmul.f32 -1.442695, %v10652_v9  ;;  %v12709_v55 = vld [vmem:[#allocation278_spill] sm:$0xff] }
 0x747   : > { %7486 = vpow2.f32 %v7387_v25  ;;  %v7394_v1 = vmul.f32 -1.442695, %v12708_v6  ;;  %v10889_v27 = vmul.f32 -1.442695, %v12709_v55  ;;  %v10901_v9 = vmul.f32 -1.442695, %v10655_v48 }
 0x748   : > { %7488 = vpow2.f32 %v7388_v39 }
 0x749   : > { %7490 = vpow2.f32 %v7389_v0 }
 0x74a   : > { %7492 = vpow2.f32 %v7390_v42 }
 0x74b   : > { %7494 = vpow2.f32 %v7391_v51 }
 0x74c   : > { %v7485_v33 = vpop.eup %7484  ;;  %7496 = vpow2.f32 %v7392_v22 }
 0x74d   : > { %v7487_v50 = vpop.eup %7486  ;;  %v10876_v31 = vadd.f32 1.0, %v7485_v33  ;;  %7498 = vpow2.f32 %v7393_v14 }
 0x74e   : > { %v7489_v57 = vpop.eup %7488  ;;  %v10878_v40 = vadd.f32 1.0, %v7487_v50 }
 0x74f   : > { %v7491_v36 = vpop.eup %7490  ;;  %7500 = vrcp.f32 %v10876_v31  ;;  %v6708_v3 = vand.u32 2147483648, %v10876_v31  ;;  %v6706_v2 = vand.u32 2147483647, %v10876_v31  ;;  %v10893_v15 = vadd.f32 1.0, %v7489_v57 }
 0x750   : > { %v7493_v45 = vpop.eup %7492  ;;  %7502 = vrcp.f32 %v10878_v40  ;;  %v6721_v17 = vand.u32 2147483647, %v10878_v40  ;;  %v6723_v56 = vand.u32 2147483648, %v10878_v40  ;;  %v10895_v8 = vadd.f32 1.0, %v7491_v36 }
 0x751   : > { %v7495_v24 = vpop.eup %7494  ;;  %vm6702_vm6 = vweird.f32 %v10876_v31  ;;  %v10898_v20 = vadd.f32 1.0, %v7493_v45  ;;  %7504 = vpow2.f32 %v7394_v1  ;;  %v6709_v16 = vor.u32 1.1754944e-38, %v6708_v3 }
 0x752   : > { %v7497_v21 = vpop.eup %7496  ;;  %vm6717_vm7 = vweird.f32 %v10878_v40  ;;  %7506 = vrcp.f32 %v10893_v15  ;;  %v6738_v7 = vand.u32 2147483648, %v10893_v15  ;;  %vm10906_vm8 = vcmp.eq.f32.partialorder %v6706_v2, 8.507059e+37 }
 0x753   : > { %v7499_v34 = vpop.eup %7498  ;;  %v6736_v53 = vand.u32 2147483647, %v10893_v15  ;;  %7508 = vrcp.f32 %v10895_v8  ;;  %v6753_v48 = vand.u32 2147483648, %v10895_v8  ;;  %v10913_v5 = vadd.f32 1.0, %v7495_v24 }
 0x754   : > { %vm10915_vm9 = vcmp.eq.f32.partialorder %v6721_v17, 8.507059e+37  ;;  %v6724_v60 = vor.u32 1.1754944e-38, %v6723_v56  ;;  %v6751_v38 = vand.u32 2147483647, %v10895_v8  ;;  %7510 = vrcp.f32 %v10898_v20 }
 0x755   : > { %v7501_v54 = vpop.eup %7500  ;;  %vm6732_vm10 = vweird.f32 %v10893_v15  ;;  %v10923_v49 = vor.u32 1.1754944e-38, %v6738_v7  ;;  %vm6747_vm11 = vweird.f32 %v10895_v8  ;;  %vm6762_vm12 = vweird.f32 %v10898_v20 }
 0x756   : > { %v7503_v46 = vpop.eup %7502  ;;  %v6698_v10 = vmul.f32 %v7501_v54, %v10876_v31  ;;  %v6766_v4 = vand.u32 2147483647, %v10898_v20  ;;  %v6768_v18 = vand.u32 2147483648, %v10898_v20  ;;  %vm6703_vm13 = vweird.f32 %v7501_v54 }
 0x757   : > { %v6713_v11 = vmul.f32 %v7503_v46, %v10878_v40  ;;  %v7505_v13 = vpop.eup %7504  ;;  %vm10930_vm14 = vcmp.eq.f32.partialorder %v6736_v53, 8.507059e+37  ;;  %v6754_v39 = vor.u32 1.1754944e-38, %v6753_v48  ;;  %7512 = vrcp.f32 %v10913_v5  ;;  %vm10949_vm3 = vmor %vm6702_vm6, %vm6703_vm13 }
 0x758   : > { %v6699_v25 = vsub.f32 1.0, %v6698_v10  ;;  %v7507_v0 = vpop.eup %7506  ;;  %vm6718_vm15 = vweird.f32 %v7503_v46  ;;  %vm10935_vm0 = vcmp.eq.f32.partialorder %v6751_v38, 8.507059e+37  ;;  %v6781_v51 = vand.u32 2147483647, %v10913_v5 }
 0x759   : > { %v6714_v61 = vsub.f32 1.0, %v6713_v11  ;;  %v7509_v59 = vpop.eup %7508  ;;  %v6728_v14 = vmul.f32 %v7507_v0, %v10893_v15  ;;  %vm10942_vm2 = vcmp.eq.f32.partialorder %v6766_v4, 8.507059e+37  ;;  %v6769_v50 = vor.u32 1.1754944e-38, %v6768_v18  ;;  %vm10958_vm5 = vmor %vm6717_vm7, %vm6718_vm15 }
 0x75a   : > { %v6700_v22 = vmul.f32 %v7501_v54, %v6699_v25  ;;  %v7511_v57 = vpop.eup %7510  ;;  %vm6733_vm4 = vweird.f32 %v7507_v0  ;;  %v6743_v36 = vmul.f32 %v7509_v59, %v10895_v8  ;;  %v6783_v3 = vand.u32 2147483648, %v10913_v5 }
 0x75b   : > { %v6715_v1 = vmul.f32 %v7503_v46, %v6714_v61  ;;  %v6729_v55 = vsub.f32 1.0, %v6728_v14  ;;  %vm6748_vm1 = vweird.f32 %v7509_v59  ;;  %v6758_v31 = vmul.f32 %v7511_v57, %v10898_v20  ;;  %vm10976_vm7 = vmor %vm6732_vm10, %vm6733_vm4 }
 0x75c   : > { %v6701_v45 = vadd.f32 %v7501_v54, %v6700_v22  ;;  %v6744_v17 = vsub.f32 1.0, %v6743_v36  ;;  %vm6763_vm6 = vweird.f32 %v7511_v57  ;;  %v10963_v56 = vadd.f32 1.0, %v7497_v21 }
 0x75d   : > { %v6716_v24 = vadd.f32 %v7503_v46, %v6715_v1  ;;  %v7513_v7 = vpop.eup %7512  ;;  %v6730_v48 = vmul.f32 %v7507_v0, %v6729_v55  ;;  %v6759_v38 = vsub.f32 1.0, %v6758_v31  ;;  %v10967_v40 = vadd.f32 1.0, %v7499_v34 }
 0x75e   : > { %v6705_v53 = vsel %vm10949_vm3, %v7501_v54, %v6701_v45  ;;  %v6745_v4 = vmul.f32 %v7509_v59, %v6744_v17  ;;  %v6773_v54 = vmul.f32 %v7513_v7, %v10913_v5  ;;  %vm6778_vm10 = vweird.f32 %v7513_v7  ;;  %v12736_v17 = vld [vmem:[#allocation280_spill] sm:$0xff] }
 0x75f   : > { %v6710_v10 = vsel %vm10906_vm8, %v6709_v16, %v6705_v53  ;;  %v6720_v11 = vsel %vm10958_vm5, %v7503_v46, %v6716_v24  ;;  %v6731_v34 = vadd.f32 %v7507_v0, %v6730_v48  ;;  %vm10989_vm8 = vmor %vm6747_vm11, %vm6748_vm1  ;;  %v6760_v23 = vmul.f32 %v7511_v57, %v6759_v38 }
 0x760   : > { %7297 = vst [vmem:[%s11837_s4] sm:$0xff] %v6710_v10  ;;  %v6725_v16 = vsel %vm10915_vm9, %v6724_v60, %v6720_v11  ;;  %v10993_v46 = vadd.f32 1.0, %v7505_v13  ;;  %v6746_v18 = vadd.f32 %v7509_v59, %v6745_v4  ;;  %vm11001_vm9 = vmor %vm6762_vm12, %vm6763_vm6  ;;  %v6774_v8 = vsub.f32 1.0, %v6773_v54 }
 0x761   : > { %7298 = vst [vmem:[%s11837_s4 + $0x8] sm:$0xff] %v6725_v16  ;;  %7514 = vrcp.f32 %v10963_v56  ;;  %v6735_v60 = vsel %vm10976_vm7, %v7507_v0, %v6731_v34  ;;  %v6761_v13 = vadd.f32 %v7511_v57, %v6760_v23  ;;  %v6796_v25 = vand.u32 2147483647, %v10963_v56 }
 0x762   : > { %v6798_v61 = vand.u32 2147483648, %v10963_v56  ;;  %v6740_v20 = vsel %vm10930_vm14, %v10923_v49, %v6735_v60  ;;  %v6750_v22 = vsel %vm10989_vm8, %v7509_v59, %v6746_v18  ;;  %v6775_v14 = vmul.f32 %v7513_v7, %v6774_v8  ;;  %v12733_v59 = vld [vmem:[#allocation279_spill] sm:$0xff] }
 0x763   : > { %7516 = vrcp.f32 %v10967_v40  ;;  %7299 = vst [vmem:[%s11837_s4 + $0x10] sm:$0xff] %v6740_v20  ;;  %v6755_v0 = vsel %vm10935_vm0, %v6754_v39, %v6750_v22  ;;  %v6765_v6 = vsel %vm11001_vm9, %v7511_v57, %v6761_v13  ;;  %vm12730_vm11 = vweird.f32 %v10913_v5  ;;  %v12746_v20 = vld [vmem:[#allocation282_spill] sm:$0xff] }
 0x764   : > { %vm11025_vm12 = vmor %vm12730_vm11, %vm6778_vm10  ;;  %v6784_v52 = vor.u32 1.1754944e-38, %v6783_v3  ;;  %v7398_v1 = vmul.f32 -1.442695, %v12733_v59  ;;  %7300 = vst [vmem:[%s11837_s4 + $0x18] sm:$0xff] %v6755_v0  ;;  %v6770_v42 = vsel %vm10942_vm2, %v6769_v50, %v6765_v6  ;;  %v6776_v39 = vadd.f32 %v7513_v7, %v6775_v14 }
 0x765   : > { %vm6782_vm13 = vcmp.eq.f32.partialorder %v6781_v51, 8.507059e+37  ;;  %v7399_v57 = vmul.f32 -1.442695, %v10658_v63  ;;  %7301 = vst [vmem:[%s11837_s4 + $0x20] sm:$0xff] %v6770_v42  ;;  %vm6792_vm14 = vweird.f32 %v10963_v56  ;;  %vm11040_vm15 = vcmp.eq.f32.partialorder %v6796_v25, 8.507059e+37 }
 0x766   : > { %v6799_v36 = vor.u32 1.1754944e-38, %v6798_v61  ;;  %7518 = vrcp.f32 %v10993_v46  ;;  %v6780_v33 = vsel %vm11025_vm12, %v7513_v7, %v6776_v39  ;;  %v6811_v51 = vand.u32 2147483647, %v10967_v40 }
 0x767   : > { %v7515_v3 = vpop.eup %7514  ;;  %v6813_v63 = vand.u32 2147483648, %v10967_v40  ;;  %7520 = vpow2.f32 %v10886_v41  ;;  %v6785_v50 = vsel %vm6782_vm13, %v6784_v52, %v6780_v33  ;;  %vm6807_vm0 = vweird.f32 %v10967_v40 }
 0x768   : > { %v6788_v45 = vmul.f32 %v7515_v3, %v10963_v56  ;;  %v6826_v2 = vand.u32 2147483647, %v10993_v46  ;;  %7302 = vst [vmem:[%s11837_s4 + $0x28] sm:$0xff] %v6785_v50  ;;  %vm6793_vm1 = vweird.f32 %v7515_v3  ;;  %vm6822_vm2 = vweird.f32 %v10993_v46 }
 0x769   : > { %v7517_v55 = vpop.eup %7516  ;;  %v6828_v31 = vand.u32 2147483648, %v10993_v46  ;;  %7522 = vpow2.f32 %v10889_v27  ;;  %v7400_v7 = vmul.f32 -1.442695, %v12736_v17  ;;  %vm11062_vm3 = vcmp.eq.f32.partialorder %v6811_v51, 8.507059e+37  ;;  %vm11074_vm6 = vmor %vm6792_vm14, %vm6793_vm1 }
 0x76a   : > { %v6789_v41 = vsub.f32 1.0, %v6788_v45  ;;  %v6803_v24 = vmul.f32 %v7517_v55, %v10967_v40  ;;  %7524 = vpow2.f32 %v10901_v9  ;;  %v6814_v48 = vor.u32 1.1754944e-38, %v6813_v63 }
 0x76b   : > { %7526 = vpow2.f32 %v7398_v1  ;;  %v7401_v38 = vmul.f32 -1.442695, %v10661_v26  ;;  %vm6808_vm4 = vweird.f32 %v7517_v55  ;;  %vm11067_vm5 = vcmp.eq.f32.partialorder %v6826_v2, 8.507059e+37  ;;  %v12743_v26 = vld [vmem:[#allocation281_spill] sm:$0xff] }
 0x76c   : > { %v7519_v10 = vpop.eup %7518  ;;  %v6790_v11 = vmul.f32 %v7515_v3, %v6789_v41  ;;  %v6804_v21 = vsub.f32 1.0, %v6803_v24  ;;  %v6829_v16 = vor.u32 1.1754944e-38, %v6828_v31  ;;  %7528 = vpow2.f32 %v7399_v57  ;;  %vm11084_vm7 = vmor %vm6807_vm0, %vm6808_vm4 }
 0x76d   : > { %v7521_v4 = vpop.eup %7520  ;;  %v6818_v54 = vmul.f32 %v7519_v10, %v10993_v46  ;;  %v7402_v34 = vmul.f32 -1.442695, %v12743_v26  ;;  %7530 = vpow2.f32 %v7400_v7  ;;  %vm6823_vm8 = vweird.f32 %v7519_v10 }
 0x76e   : > { %v6791_v15 = vadd.f32 %v7515_v3, %v6790_v11  ;;  %v6805_v23 = vmul.f32 %v7517_v55, %v6804_v21  ;;  %v11080_v18 = vadd.f32 1.0, %v7521_v4  ;;  %7532 = vpow2.f32 %v7401_v38  ;;  %vm11110_vm9 = vmor %vm6822_vm2, %vm6823_vm8 }
 0x76f   : > { %v7523_v37 = vpop.eup %7522  ;;  %v6819_v8 = vsub.f32 1.0, %v6818_v54  ;;  %v11089_v60 = vmul.f32 -1.442695, %v10664_v58  ;;  %v11095_v22 = vmul.f32 -1.442695, %v12746_v20 }
 0x770   : > { %v7525_v13 = vpop.eup %7524  ;;  %v6795_v25 = vsel %vm11074_vm6, %v7515_v3, %v6791_v15  ;;  %v6806_v61 = vadd.f32 %v7517_v55, %v6805_v23  ;;  %7534 = vrcp.f32 %v11080_v18  ;;  %v11100_v6 = vmul.f32 -1.442695, %v10667_v43 }
 0x771   : > { %v7527_v40 = vpop.eup %7526  ;;  %v6800_v14 = vsel %vm11040_vm15, %v6799_v36, %v6795_v25  ;;  %v6820_v0 = vmul.f32 %v7519_v10, %v6819_v8  ;;  %7536 = vpow2.f32 %v7402_v34  ;;  %v6841_v52 = vand.u32 2147483647, %v11080_v18  ;;  %v12749_v36 = vld [vmem:[#allocation4_spill] sm:$0xff] }
 0x772   : > { %7303 = vst [vmem:[%s11837_s4 + $0x30] sm:$0xff] %v6800_v14  ;;  %v6810_v58 = vsel %vm11084_vm7, %v7517_v55, %v6806_v61  ;;  %v11115_v59 = vadd.f32 1.0, %v7523_v37  ;;  %v11117_v43 = vadd.f32 1.0, %v7525_v13  ;;  %v7529_v1 = vpop.eup %7528  ;;  %v6843_v57 = vand.u32 2147483648, %v11080_v18 }
 0x773   : > { %v6815_v42 = vsel %vm11062_vm3, %v6814_v48, %v6810_v58  ;;  %v6821_v39 = vadd.f32 %v7519_v10, %v6820_v0  ;;  %v11122_v5 = vadd.f32 1.0, %v7527_v40  ;;  %v7531_v46 = vpop.eup %7530  ;;  %v11129_v3 = vmul.f32 -1.442695, %v12749_v36 }
 0x774   : > { %7304 = vst [vmem:[%s11837_s4 + $0x38] sm:$0xff] %v6815_v42  ;;  %7538 = vrcp.f32 %v11115_v59  ;;  %v11132_v33 = vmul.f32 -1.442695, %v10670_v12  ;;  %v7533_v51 = vpop.eup %7532  ;;  %vm6837_vm10 = vweird.f32 %v11080_v18  ;;  %v6856_v50 = vand.u32 2147483647, %v11115_v59 }
 0x775   : > { %v6825_v63 = vsel %vm11110_vm9, %v7519_v10, %v6821_v39  ;;  %7540 = vrcp.f32 %v11117_v43  ;;  %v6858_v55 = vand.u32 2147483648, %v11115_v59  ;;  %v6871_v31 = vand.u32 2147483647, %v11117_v43 }
 0x776   : > { %v7535_v45 = vpop.eup %7534  ;;  %v6830_v2 = vsel %vm11067_vm5, %v6829_v16, %v6825_v63  ;;  %v6873_v12 = vand.u32 2147483648, %v11117_v43  ;;  %vm11148_vm11 = vcmp.eq.f32.partialorder %v6841_v52, 8.507059e+37  ;;  %v6844_v7 = vor.u32 1.1754944e-38, %v6843_v57 }
 0x777   : > { %v7537_v41 = vpop.eup %7536  ;;  %7305 = vst [vmem:[%s11837_s4 + $0x40] sm:$0xff] %v6830_v2  ;;  %v6833_v24 = vmul.f32 %v7535_v45, %v11080_v18  ;;  %7542 = vrcp.f32 %v11122_v5  ;;  %vm6852_vm12 = vweird.f32 %v11115_v59  ;;  %vm6867_vm13 = vweird.f32 %v11117_v43 }
 0x778   : > { %v6886_v53 = vand.u32 2147483647, %v11122_v5  ;;  %v6888_v48 = vand.u32 2147483648, %v11122_v5  ;;  %vm6838_vm14 = vweird.f32 %v7535_v45  ;;  %v11157_v10 = vadd.f32 1.0, %v7529_v1 }
 0x779   : > { %v6834_v38 = vsub.f32 1.0, %v6833_v24  ;;  %v11159_v11 = vadd.f32 1.0, %v7531_v46  ;;  %vm11161_vm15 = vcmp.eq.f32.partialorder %v6856_v50, 8.507059e+37  ;;  %v6859_v4 = vor.u32 1.1754944e-38, %v6858_v55  ;;  %vm11174_vm2 = vmor %vm6837_vm10, %vm6838_vm14 }
 0x77a   : > { %v7539_v21 = vpop.eup %7538  ;;  %vm11165_vm0 = vcmp.eq.f32.partialorder %v6871_v31, 8.507059e+37  ;;  %v6874_v54 = vor.u32 1.1754944e-38, %v6873_v12  ;;  %vm6882_vm1 = vweird.f32 %v11122_v5  ;;  %7544 = vrcp.f32 %v11157_v10 }
 0x77b   : > { %v7541_v16 = vpop.eup %7540  ;;  %v6835_v26 = vmul.f32 %v7535_v45, %v6834_v38  ;;  %v6848_v34 = vmul.f32 %v7539_v21, %v11115_v59  ;;  %vm11179_vm3 = vcmp.eq.f32.partialorder %v6886_v53, 8.507059e+37  ;;  %v6889_v56 = vor.u32 1.1754944e-38, %v6888_v48 }
 0x77c   : > { %v6863_v23 = vmul.f32 %v7541_v16, %v11117_v43  ;;  %v11183_v8 = vadd.f32 1.0, %v7533_v51  ;;  %vm6853_vm4 = vweird.f32 %v7539_v21  ;;  %7546 = vrcp.f32 %v11159_v11 }
 0x77d   : > { %v7543_v13 = vpop.eup %7542  ;;  %v6836_v25 = vadd.f32 %v7535_v45, %v6835_v26  ;;  %v6849_v61 = vsub.f32 1.0, %v6848_v34  ;;  %vm6868_vm5 = vweird.f32 %v7541_v16  ;;  %v6901_v40 = vand.u32 2147483647, %v11157_v10  ;;  %vm11196_vm6 = vmor %vm6852_vm12, %vm6853_vm4 }
 0x77e   : > { %v6864_v18 = vsub.f32 1.0, %v6863_v23  ;;  %v6878_v20 = vmul.f32 %v7543_v13, %v11122_v5  ;;  %v6903_v58 = vand.u32 2147483648, %v11157_v10  ;;  %7548 = vpow2.f32 %v11089_v60  ;;  %vm11206_vm8 = vmor %vm6867_vm13, %vm6868_vm5 }
 0x77f   : > { %v6840_v14 = vsel %vm11174_vm2, %v7535_v45, %v6836_v25  ;;  %v6850_v0 = vmul.f32 %v7539_v21, %v6849_v61  ;;  %vm6883_vm7 = vweird.f32 %v7543_v13  ;;  %vm6897_vm9 = vweird.f32 %v11157_v10 }
 0x780   : > { %v6845_v49 = vsel %vm11148_vm11, %v6844_v7, %v6840_v14  ;;  %v6865_v1 = vmul.f32 %v7541_v16, %v6864_v18  ;;  %v6879_v42 = vsub.f32 1.0, %v6878_v20  ;;  %v7545_v39 = vpop.eup %7544  ;;  %7550 = vrcp.f32 %v11183_v8  ;;  %vm11223_vm11 = vmor %vm6882_vm1, %vm6883_vm7 }
 0x781   : > { %7306 = vst [vmem:[%s11837_s4 + $0x48] sm:$0xff] %v6845_v49  ;;  %v6851_v57 = vadd.f32 %v7539_v21, %v6850_v0  ;;  %v11212_v59 = vadd.f32 1.0, %v7537_v41  ;;  %v6893_v51 = vmul.f32 %v7545_v39, %v11157_v10  ;;  %vm11215_vm10 = vcmp.eq.f32.partialorder %v6901_v40, 8.507059e+37 }
 0x782   : > { %v6866_v46 = vadd.f32 %v7541_v16, %v6865_v1  ;;  %v6880_v36 = vmul.f32 %v7543_v13, %v6879_v42  ;;  %v7547_v50 = vpop.eup %7546  ;;  %vm6898_vm12 = vweird.f32 %v7545_v39  ;;  %v6904_v2 = vor.u32 1.1754944e-38, %v6903_v58  ;;  %v12780_v1 = vld [vmem:[#allocation35_spill] sm:$0xff] }
 0x783   : > { %v6855_v43 = vsel %vm11196_vm6, %v7539_v21, %v6851_v57  ;;  %vm6912_vm13 = vweird.f32 %v11159_v11  ;;  %v6894_v41 = vsub.f32 1.0, %v6893_v51  ;;  %v6908_v17 = vmul.f32 %v7547_v50, %v11159_v11 }
 0x784   : > { %v6860_v55 = vsel %vm11161_vm15, %v6859_v4, %v6855_v43  ;;  %v6870_v31 = vsel %vm11206_vm8, %v7541_v16, %v6866_v46  ;;  %v6881_v12 = vadd.f32 %v7543_v13, %v6880_v36  ;;  %v7549_v24 = vpop.eup %7548  ;;  %v6916_v7 = vand.u32 2147483647, %v11159_v11  ;;  %vm11252_vm15 = vmor %vm6897_vm9, %vm6898_vm12 }
 0x785   : > { %7307 = vst [vmem:[%s11837_s4 + $0x50] sm:$0xff] %v6860_v55  ;;  %v6875_v5 = vsel %vm11165_vm0, %v6874_v54, %v6870_v31  ;;  %v6918_v53 = vand.u32 2147483648, %v11159_v11  ;;  %v6895_v38 = vmul.f32 %v7545_v39, %v6894_v41  ;;  %vm6927_vm14 = vweird.f32 %v11183_v8 }
 0x786   : > { %7308 = vst [vmem:[%s11837_s4 + $0x58] sm:$0xff] %v6875_v5  ;;  %v6885_v48 = vsel %vm11223_vm11, %v7543_v13, %v6881_v12  ;;  %7552 = vrcp.f32 %v11212_v59  ;;  %v7551_v21 = vpop.eup %7550  ;;  %v6909_v9 = vsub.f32 1.0, %v6908_v17  ;;  %vm6913_vm0 = vweird.f32 %v7547_v50 }
 0x787   : > { %v6890_v27 = vsel %vm11179_vm3, %v6889_v56, %v6885_v48  ;;  %v6931_v54 = vand.u32 2147483647, %v11183_v8  ;;  %v6896_v16 = vadd.f32 %v7545_v39, %v6895_v38  ;;  %v6923_v26 = vmul.f32 %v7551_v21, %v11183_v8  ;;  %vm11273_vm2 = vmor %vm6912_vm13, %vm6913_vm0 }
 0x788   : > { %7309 = vst [vmem:[%s11837_s4 + $0x60] sm:$0xff] %v6890_v27  ;;  %v6933_v34 = vand.u32 2147483648, %v11183_v8  ;;  %v6946_v15 = vand.u32 2147483647, %v11212_v59  ;;  %v6910_v10 = vmul.f32 %v7547_v50, %v6909_v9  ;;  %vm11263_vm1 = vcmp.eq.f32.partialorder %v6916_v7, 8.507059e+37 }
 0x789   : > { %v6919_v37 = vor.u32 1.1754944e-38, %v6918_v53  ;;  %v11267_v56 = vadd.f32 1.0, %v7549_v24  ;;  %v6900_v13 = vsel %vm11252_vm15, %v7545_v39, %v6896_v16  ;;  %v6924_v61 = vsub.f32 1.0, %v6923_v26 }
 0x78a   : > { %vm6928_vm3 = vweird.f32 %v7551_v21  ;;  %7554 = vpow2.f32 %v11095_v22  ;;  %v6905_v18 = vsel %vm11215_vm10, %v6904_v2, %v6900_v13  ;;  %v6911_v20 = vadd.f32 %v7547_v50, %v6910_v10  ;;  %v12791_v13 = vld [vmem:[#allocation6_spill] sm:$0xff] }
 0x78b   : > { %vm11280_vm4 = vcmp.eq.f32.partialorder %v6931_v54, 8.507059e+37  ;;  %7556 = vrcp.f32 %v11267_v56  ;;  %7310 = vst [vmem:[%s11837_s4 + $0x68] sm:$0xff] %v6905_v18  ;;  %v6925_v11 = vmul.f32 %v7551_v21, %v6924_v61  ;;  %v6934_v0 = vor.u32 1.1754944e-38, %v6933_v34  ;;  %vm11297_vm7 = vmor %vm6927_vm14, %vm6928_vm3 }
 0x78c   : > { %v7553_v14 = vpop.eup %7552  ;;  %vm6942_vm5 = vweird.f32 %v11212_v59  ;;  %vm11289_vm6 = vcmp.eq.f32.partialorder %v6946_v15, 8.507059e+37  ;;  %v6915_v58 = vsel %vm11273_vm2, %v7547_v50, %v6911_v20  ;;  %7558 = vpow2.f32 %v11100_v6  ;;  %v12781_v50 = vld [vmem:[#allocation5_spill] sm:$0xff] }
 0x78d   : > { %v6938_v52 = vmul.f32 %v7553_v14, %v11212_v59  ;;  %v7408_v42 = vmul.f32 -1.442695, %v12780_v1  ;;  %v6920_v39 = vsel %vm11263_vm1, %v6919_v37, %v6915_v58  ;;  %v6926_v57 = vadd.f32 %v7551_v21, %v6925_v11 }
 0x78e   : > { %v6948_v60 = vand.u32 2147483648, %v11212_v59  ;;  %v6961_v46 = vand.u32 2147483647, %v11267_v56  ;;  %7311 = vst [vmem:[%s11837_s4 + $0x70] sm:$0xff] %v6920_v39  ;;  %vm6943_vm8 = vweird.f32 %v7553_v14  ;;  %v6963_v36 = vand.u32 2147483648, %v11267_v56 }
 0x78f   : > { %v6939_v8 = vsub.f32 1.0, %v6938_v52  ;;  %7560 = vpow2.f32 %v11129_v3  ;;  %v6930_v51 = vsel %vm11297_vm7, %v7551_v21, %v6926_v57  ;;  %v7409_v63 = vmul.f32 -1.442695, %v10673_v47  ;;  %vm11327_vm9 = vmor %vm6942_vm5, %vm6943_vm8 }
 0x790   : > { %v7555_v6 = vpop.eup %7554  ;;  %7562 = vpow2.f32 %v11132_v33  ;;  %v7410_v43 = vmul.f32 -1.442695, %v12781_v50  ;;  %v6935_v2 = vsel %vm11280_vm4, %v6934_v0, %v6930_v51  ;;  %v6949_v47 = vor.u32 1.1754944e-38, %v6948_v60 }
 0x791   : > { %v7557_v45 = vpop.eup %7556  ;;  %v6940_v55 = vmul.f32 %v7553_v14, %v6939_v8  ;;  %v11320_v31 = vadd.f32 1.0, %v7555_v6  ;;  %7564 = vpow2.f32 %v7408_v42  ;;  %7312 = vst [vmem:[%s11837_s4 + $0x78] sm:$0xff] %v6935_v2  ;;  %vm6957_vm10 = vweird.f32 %v11267_v56 }
 0x792   : > { %v6953_v33 = vmul.f32 %v7557_v45, %v11267_v56  ;;  %vm11333_vm11 = vcmp.eq.f32.partialorder %v6961_v46, 8.507059e+37  ;;  %v7559_v41 = vpop.eup %7558  ;;  %vm6958_vm12 = vweird.f32 %v7557_v45  ;;  %v7411_v59 = vmul.f32 -1.442695, %v10676_v32  ;;  %v12786_v32 = vld [vmem:[#allocation36_spill] sm:$0xff] }
 0x793   : > { %v6941_v24 = vadd.f32 %v7553_v14, %v6940_v55  ;;  %7566 = vrcp.f32 %v11320_v31  ;;  %v6976_v17 = vand.u32 2147483647, %v11320_v31  ;;  %v11340_v7 = vadd.f32 1.0, %v7559_v41  ;;  %vm11355_vm13 = vmor %vm6957_vm10, %vm6958_vm12 }
 0x794   : > { %v6954_v5 = vsub.f32 1.0, %v6953_v33  ;;  %7568 = vpow2.f32 %v7409_v63  ;;  %v6964_v38 = vor.u32 1.1754944e-38, %v6963_v36  ;;  %v6978_v21 = vand.u32 2147483648, %v11320_v31 }
 0x795   : > { %v7561_v53 = vpop.eup %7560  ;;  %v6945_v48 = vsel %vm11327_vm9, %v7553_v14, %v6941_v24  ;;  %7570 = vpow2.f32 %v7410_v43  ;;  %v7412_v54 = vmul.f32 -1.442695, %v12786_v32  ;;  %vm6972_vm14 = vweird.f32 %v11320_v31 }
 0x796   : > { %v7563_v27 = vpop.eup %7562  ;;  %v6950_v4 = vsel %vm11289_vm6, %v6949_v47, %v6945_v48  ;;  %v6955_v9 = vmul.f32 %v7557_v45, %v6954_v5  ;;  %7572 = vrcp.f32 %v11340_v7  ;;  %v11360_v34 = vadd.f32 1.0, %v7561_v53 }
 0x797   : > { %v7565_v16 = vpop.eup %7564  ;;  %7313 = vst [vmem:[%s11837_s4 + $0x80] sm:$0xff] %v6950_v4  ;;  %7574 = vpow2.f32 %v7411_v59  ;;  %v11363_v15 = vmul.f32 -1.442695, %v10679_v19  ;;  %vm11365_vm15 = vcmp.eq.f32.partialorder %v6976_v17, 8.507059e+37  ;;  %v6991_v37 = vand.u32 2147483647, %v11340_v7 }
 0x798   : > { %v6956_v10 = vadd.f32 %v7557_v45, %v6955_v9  ;;  %v11370_v56 = vadd.f32 1.0, %v7563_v27  ;;  %v11373_v25 = vmul.f32 -1.442695, %v12791_v13  ;;  %v6979_v18 = vor.u32 1.1754944e-38, %v6978_v21 }
 0x799   : > { %v7567_v61 = vpop.eup %7566  ;;  %v6993_v20 = vand.u32 2147483648, %v11340_v7  ;;  %7576 = vrcp.f32 %v11360_v34  ;;  %v11377_v19 = vadd.f32 1.0, %v7565_v16  ;;  %v7006_v0 = vand.u32 2147483647, %v11360_v34 }
 0x79a   : > { %v7569_v40 = vpop.eup %7568  ;;  %v6960_v14 = vsel %vm11355_vm13, %v7557_v45, %v6956_v10  ;;  %v6968_v11 = vmul.f32 %v7567_v61, %v11320_v31  ;;  %7578 = vpow2.f32 %v7412_v54  ;;  %vm6987_vm0 = vweird.f32 %v11340_v7 }
 0x79b   : > { %v7571_v22 = vpop.eup %7570  ;;  %v6965_v58 = vsel %vm11333_vm11, %v6964_v38, %v6960_v14  ;;  %v7008_v49 = vand.u32 2147483648, %v11360_v34  ;;  %7580 = vrcp.f32 %v11370_v56  ;;  %vm6973_vm1 = vweird.f32 %v7567_v61 }
 0x79c   : > { %v7573_v52 = vpop.eup %7572  ;;  %7314 = vst [vmem:[%s11837_s4 + $0x88] sm:$0xff] %v6965_v58  ;;  %v6969_v1 = vsub.f32 1.0, %v6968_v11  ;;  %vm11391_vm2 = vcmp.eq.f32.partialorder %v6991_v37, 8.507059e+37  ;;  %v7021_v39 = vand.u32 2147483647, %v11370_v56  ;;  %v6994_v46 = vor.u32 1.1754944e-38, %v6993_v20  ;;  %vm11409_vm6 = vmor %vm6972_vm14, %vm6973_vm1 }
 0x79d   : > { %v11396_v57 = vpop.eup %7574  ;;  %v6983_v60 = vmul.f32 %v7573_v52, %v11340_v7  ;;  %vm7002_vm3 = vweird.f32 %v11360_v34  ;;  %7582 = vrcp.f32 %v11377_v19  ;;  %vm11401_vm4 = vcmp.eq.f32.partialorder %v7006_v0, 8.507059e+37 }
 0x79e   : > { %v6970_v8 = vmul.f32 %v7567_v61, %v6969_v1  ;;  %vm7017_vm5 = vweird.f32 %v11370_v56  ;;  %v7023_v6 = vand.u32 2147483648, %v11370_v56  ;;  %vm6988_vm7 = vweird.f32 %v7573_v52 }
 0x79f   : > { %v7577_v51 = vpop.eup %7576  ;;  %v6984_v50 = vsub.f32 1.0, %v6983_v60  ;;  %v7009_v43 = vor.u32 1.1754944e-38, %v7008_v49  ;;  %v11413_v45 = vadd.f32 1.0, %v7569_v40  ;;  %vm11416_vm8 = vcmp.eq.f32.partialorder %v7021_v39, 8.507059e+37  ;;  %vm11429_vm10 = vmor %vm6987_vm0, %vm6988_vm7 }
 0x7a0   : > { %v7579_v2 = vpop.eup %7578  ;;  %v6971_v55 = vadd.f32 %v7567_v61, %v6970_v8  ;;  %v6998_v3 = vmul.f32 %v7577_v51, %v11360_v34  ;;  %vm7032_vm9 = vweird.f32 %v11377_v19  ;;  %v7036_v12 = vand.u32 2147483647, %v11377_v19 }
 0x7a1   : > { %v7581_v31 = vpop.eup %7580  ;;  %v6985_v33 = vmul.f32 %v7573_v52, %v6984_v50  ;;  %7584 = vrcp.f32 %v11413_v45  ;;  %v11423_v41 = vadd.f32 1.0, %v7571_v22  ;;  %vm7003_vm11 = vweird.f32 %v7577_v51 }
 0x7a2   : > { %v6975_v24 = vsel %vm11409_vm6, %v7567_v61, %v6971_v55  ;;  %v6999_v5 = vsub.f32 1.0, %v6998_v3  ;;  %v7013_v17 = vmul.f32 %v7581_v31, %v11370_v56  ;;  %vm7018_vm12 = vweird.f32 %v7581_v31  ;;  %vm11446_vm13 = vmor %vm7002_vm3, %vm7003_vm11 }
 0x7a3   : > { %v7583_v53 = vpop.eup %7582  ;;  %v6980_v48 = vsel %vm11365_vm15, %v6979_v18, %v6975_v24  ;;  %v6986_v38 = vadd.f32 %v7573_v52, %v6985_v33  ;;  %v7038_v21 = vand.u32 2147483648, %v11377_v19  ;;  %v7051_v9 = vand.u32 2147483647, %v11413_v45  ;;  %vm11460_vm15 = vmor %vm7017_vm5, %vm7018_vm12 }
 0x7a4   : > { %7315 = vst [vmem:[%s11837_s4 + $0x90] sm:$0xff] %v6980_v48  ;;  %v7000_v7 = vmul.f32 %v7577_v51, %v6999_v5  ;;  %v7014_v27 = vsub.f32 1.0, %v7013_v17  ;;  %v7028_v4 = vmul.f32 %v7583_v53, %v11377_v19  ;;  %vm7033_vm14 = vweird.f32 %v7583_v53  ;;  %v12816_v17 = vld [vmem:[#allocation37_spill] sm:$0xff] }
 0x7a5   : > { %v6990_v32 = vsel %vm11429_vm10, %v7573_v52, %v6986_v38  ;;  %v7053_v16 = vand.u32 2147483648, %v11413_v45  ;;  %7586 = vrcp.f32 %v11423_v41  ;;  %v7024_v61 = vor.u32 1.1754944e-38, %v7023_v6 }
 0x7a6   : > { %v6995_v26 = vsel %vm11391_vm2, %v6994_v46, %v6990_v32  ;;  %v7001_v10 = vadd.f32 %v7577_v51, %v7000_v7  ;;  %v7015_v23 = vmul.f32 %v7581_v31, %v7014_v27  ;;  %v7029_v37 = vsub.f32 1.0, %v7028_v4  ;;  %vm11477_vm2 = vmor %vm7032_vm9, %vm7033_vm14 }
 0x7a7   : > { %v7585_v13 = vpop.eup %7584  ;;  %7316 = vst [vmem:[%s11837_s4 + $0x98] sm:$0xff] %v6995_v26  ;;  %vm11464_vm0 = vcmp.eq.f32.partialorder %v7036_v12, 8.507059e+37  ;;  %v7039_v20 = vor.u32 1.1754944e-38, %v7038_v21  ;;  %vm7047_vm1 = vweird.f32 %v11413_v45  ;;  %vm11481_vm5 = vcmp.eq.f32.partialorder %v7051_v9, 8.507059e+37 }
 0x7a8   : > { %v7005_v40 = vsel %vm11446_vm13, %v7577_v51, %v7001_v10  ;;  %v7016_v14 = vadd.f32 %v7581_v31, %v7015_v23  ;;  %v7030_v11 = vmul.f32 %v7583_v53, %v7029_v37  ;;  %v7043_v0 = vmul.f32 %v7585_v13, %v11413_v45  ;;  %v12821_v10 = vld [vmem:[#allocation7_spill] sm:$0xff] }
 0x7a9   : > { %v7010_v56 = vsel %vm11401_vm4, %v7009_v43, %v7005_v40  ;;  %vm7048_vm3 = vweird.f32 %v7585_v13  ;;  %v7054_v49 = vor.u32 1.1754944e-38, %v7053_v16  ;;  %v11491_v19 = vadd.f32 1.0, %v11396_v57  ;;  %v12822_v40 = vld [vmem:[#allocation38_spill] sm:$0xff] }
 0x7aa   : > { %7317 = vst [vmem:[%s11837_s4 + $0xa0] sm:$0xff] %v7010_v56  ;;  %v7020_v52 = vsel %vm11460_vm15, %v7581_v31, %v7016_v14  ;;  %v7031_v1 = vadd.f32 %v7583_v53, %v7030_v11  ;;  %v7044_v42 = vsub.f32 1.0, %v7043_v0  ;;  %v7068_v46 = vand.u32 2147483648, %v11423_v41  ;;  %vm11511_vm6 = vmor %vm7047_vm1, %vm7048_vm3 }
 0x7ab   : > { %v7587_v39 = vpop.eup %7586  ;;  %v7025_v60 = vsel %vm11416_vm8, %v7024_v61, %v7020_v52  ;;  %v11496_v8 = vadd.f32 1.0, %v7579_v2  ;;  %7588 = vpow2.f32 %v11363_v15  ;;  %vm7062_vm4 = vweird.f32 %v11423_v41 }
 0x7ac   : > { %7318 = vst [vmem:[%s11837_s4 + $0xa8] sm:$0xff] %v7025_v60  ;;  %v7035_v36 = vsel %vm11477_vm2, %v7583_v53, %v7031_v1  ;;  %v7045_v6 = vmul.f32 %v7585_v13, %v7044_v42  ;;  %v7058_v57 = vmul.f32 %v7587_v39, %v11423_v41  ;;  %v7066_v63 = vand.u32 2147483647, %v11423_v41 }
 0x7ad   : > { %v7040_v51 = vsel %vm11464_vm0, %v7039_v20, %v7035_v36  ;;  %7590 = vrcp.f32 %v11491_v19  ;;  %v7415_v50 = vmul.f32 -1.442695, %v10682_v29  ;;  %vm7063_vm7 = vweird.f32 %v7587_v39 }
 0x7ae   : > { %7319 = vst [vmem:[%s11837_s4 + $0xb0] sm:$0xff] %v7040_v51  ;;  %v7046_v43 = vadd.f32 %v7585_v13, %v7045_v6  ;;  %v7059_v2 = vsub.f32 1.0, %v7058_v57  ;;  %7592 = vrcp.f32 %v11496_v8  ;;  %v7069_v45 = vor.u32 1.1754944e-38, %v7068_v46  ;;  %vm11531_vm8 = vmor %vm7062_vm4, %vm7063_vm7 }
 0x7af   : > { %v7081_v55 = vand.u32 2147483647, %v11491_v19  ;;  %v7083_v31 = vand.u32 2147483648, %v11491_v19  ;;  %7594 = vpow2.f32 %v11373_v25  ;;  %v7096_v24 = vand.u32 2147483647, %v11496_v8 }
 0x7b0   : > { %v7050_v3 = vsel %vm11511_vm6, %v7585_v13, %v7046_v43  ;;  %v7060_v47 = vmul.f32 %v7587_v39, %v7059_v2  ;;  %v7098_v59 = vand.u32 2147483648, %v11496_v8  ;;  %7596 = vpow2.f32 %v7415_v50 }
 0x7b1   : > { %v7589_v29 = vpop.eup %7588  ;;  %v7055_v33 = vsel %vm11481_vm5, %v7054_v49, %v7050_v3  ;;  %vm7067_vm9 = vcmp.eq.f32.partialorder %v7066_v63, 8.507059e+37  ;;  %v7416_v53 = vmul.f32 -1.442695, %v12816_v17  ;;  %vm7077_vm10 = vweird.f32 %v11491_v19 }
 0x7b2   : > { %7320 = vst [vmem:[%s11837_s4 + $0xb8] sm:$0xff] %v7055_v33  ;;  %v7061_v25 = vadd.f32 %v7587_v39, %v7060_v47  ;;  %v11540_v5 = vadd.f32 1.0, %v7589_v29  ;;  %vm11544_vm11 = vcmp.eq.f32.partialorder %v7081_v55, 8.507059e+37  ;;  %vm7092_vm12 = vweird.f32 %v11496_v8 }
 0x7b3   : > { %v7591_v41 = vpop.eup %7590  ;;  %v7417_v38 = vmul.f32 -1.442695, %v10685_v28  ;;  %v7084_v4 = vor.u32 1.1754944e-38, %v7083_v31  ;;  %vm11555_vm13 = vcmp.eq.f32.partialorder %v7096_v24, 8.507059e+37  ;;  %v7099_v16 = vor.u32 1.1754944e-38, %v7098_v59 }
 0x7b4   : > { %v7593_v21 = vpop.eup %7592  ;;  %v7065_v7 = vsel %vm11531_vm8, %v7587_v39, %v7061_v25  ;;  %v7073_v27 = vmul.f32 %v7591_v41, %v11491_v19  ;;  %7598 = vrcp.f32 %v11540_v5  ;;  %vm7078_vm14 = vweird.f32 %v7591_v41 }
 0x7b5   : > { %v7070_v9 = vsel %vm7067_vm9, %v7069_v45, %v7065_v7  ;;  %v7088_v32 = vmul.f32 %v7593_v21, %v11496_v8  ;;  %v7595_v26 = vpop.eup %7594  ;;  %7600 = vpow2.f32 %v7416_v53  ;;  %v7418_v23 = vmul.f32 -1.442695, %v12821_v10  ;;  %vm11573_vm0 = vmor %vm7077_vm10, %vm7078_vm14 }
 0x7b6   : > { %7321 = vst [vmem:[%s11837_s4 + $0xc0] sm:$0xff] %v7070_v9  ;;  %v7074_v28 = vsub.f32 1.0, %v7073_v27  ;;  %v7597_v37 = vpop.eup %7596  ;;  %vm7093_vm15 = vweird.f32 %v7593_v21  ;;  %v11563_v34 = vadd.f32 1.0, %v7595_v26  ;;  %7602 = vpow2.f32 %v7417_v38 }
 0x7b7   : > { %v7089_v13 = vsub.f32 1.0, %v7088_v32  ;;  %v11565_v18 = vadd.f32 1.0, %v7597_v37  ;;  %v7419_v20 = vmul.f32 -1.442695, %v10688_v30  ;;  %v11569_v14 = vmul.f32 -1.442695, %v12822_v40  ;;  %vm11582_vm2 = vmor %vm7092_vm12, %vm7093_vm15 }
 0x7b8   : > { %v7075_v61 = vmul.f32 %v7591_v41, %v7074_v28  ;;  %vm7107_vm1 = vweird.f32 %v11540_v5  ;;  %v7111_v56 = vand.u32 2147483647, %v11540_v5  ;;  %7604 = vrcp.f32 %v11563_v34  ;;  %v12837_v32 = vld [vmem:[#allocation8_spill] sm:$0xff] }
 0x7b9   : > { %v7090_v0 = vmul.f32 %v7593_v21, %v7089_v13  ;;  %v7113_v49 = vand.u32 2147483648, %v11540_v5  ;;  %7606 = vrcp.f32 %v11565_v18  ;;  %v11589_v52 = vmul.f32 -1.442695, %v10691_v44 }
 0x7ba   : > { %v7599_v22 = vpop.eup %7598  ;;  %v7076_v58 = vadd.f32 %v7591_v41, %v7075_v61  ;;  %v7126_v19 = vand.u32 2147483647, %v11563_v34  ;;  %v7128_v39 = vand.u32 2147483648, %v11563_v34  ;;  %v7141_v8 = vand.u32 2147483647, %v11565_v18 }
 0x7bb   : > { %v7091_v1 = vadd.f32 %v7593_v21, %v7090_v0  ;;  %v7103_v42 = vmul.f32 %v7599_v22, %v11540_v5  ;;  %v7601_v60 = vpop.eup %7600  ;;  %vm7108_vm3 = vweird.f32 %v7599_v22  ;;  %v7143_v36 = vand.u32 2147483648, %v11565_v18 }
 0x7bc   : > { %v7080_v46 = vsel %vm11573_vm0, %v7591_v41, %v7076_v58  ;;  %v7603_v6 = vpop.eup %7602  ;;  %v11602_v15 = vadd.f32 1.0, %v7601_v60  ;;  %vm11609_vm5 = vcmp.eq.f32.partialorder %v7111_v56, 8.507059e+37  ;;  %v7114_v43 = vor.u32 1.1754944e-38, %v7113_v49  ;;  %vm11624_vm7 = vmor %vm7107_vm1, %vm7108_vm3 }
 0x7bd   : > { %v7085_v44 = vsel %vm11544_vm11, %v7084_v4, %v7080_v46  ;;  %v7095_v57 = vsel %vm11582_vm2, %v7593_v21, %v7091_v1  ;;  %v7104_v51 = vsub.f32 1.0, %v7103_v42  ;;  %v11613_v2 = vadd.f32 1.0, %v7603_v6 }
 0x7be   : > { %7322 = vst [vmem:[%s11837_s4 + $0xc8] sm:$0xff] %v7085_v44  ;;  %v7100_v63 = vsel %vm11555_vm13, %v7099_v16, %v7095_v57  ;;  %v7605_v45 = vpop.eup %7604  ;;  %vm7122_vm4 = vweird.f32 %v11563_v34  ;;  %vm7137_vm6 = vweird.f32 %v11565_v18  ;;  %7608 = vrcp.f32 %v11602_v15 }
 0x7bf   : > { %7323 = vst [vmem:[%s11837_s4 + $0xd0] sm:$0xff] %v7100_v63  ;;  %v7105_v55 = vmul.f32 %v7599_v22, %v7104_v51  ;;  %v7607_v3 = vpop.eup %7606  ;;  %v7118_v31 = vmul.f32 %v7605_v45, %v11563_v34  ;;  %vm11629_vm8 = vcmp.eq.f32.partialorder %v7126_v19, 8.507059e+37  ;;  %v7129_v33 = vor.u32 1.1754944e-38, %v7128_v39 }
 0x7c0   : > { %7610 = vrcp.f32 %v11613_v2  ;;  %v7133_v24 = vmul.f32 %v7607_v3, %v11565_v18  ;;  %vm11635_vm9 = vcmp.eq.f32.partialorder %v7141_v8, 8.507059e+37  ;;  %v7144_v25 = vor.u32 1.1754944e-38, %v7143_v36 }
 0x7c1   : > { %v7106_v12 = vadd.f32 %v7599_v22, %v7105_v55  ;;  %v7119_v5 = vsub.f32 1.0, %v7118_v31  ;;  %vm7123_vm10 = vweird.f32 %v7605_v45  ;;  %vm7152_vm11 = vweird.f32 %v11602_v15 }
 0x7c2   : > { %v7156_v17 = vand.u32 2147483647, %v11602_v15  ;;  %v7134_v41 = vsub.f32 1.0, %v7133_v24  ;;  %vm7138_vm12 = vweird.f32 %v7607_v3  ;;  %7612 = vpow2.f32 %v7418_v23  ;;  %vm11651_vm13 = vmor %vm7122_vm4, %vm7123_vm10 }
 0x7c3   : > { %v7110_v53 = vsel %vm11624_vm7, %v7599_v22, %v7106_v12  ;;  %v7120_v38 = vmul.f32 %v7605_v45, %v7119_v5  ;;  %v7158_v21 = vand.u32 2147483648, %v11602_v15  ;;  %7614 = vpow2.f32 %v7419_v20  ;;  %vm11661_vm15 = vmor %vm7137_vm6, %vm7138_vm12 }
 0x7c4   : > { %v7115_v48 = vsel %vm11609_vm5, %v7114_v43, %v7110_v53  ;;  %v7609_v7 = vpop.eup %7608  ;;  %v7135_v4 = vmul.f32 %v7607_v3, %v7134_v41  ;;  %vm7167_vm14 = vweird.f32 %v11613_v2  ;;  %v7171_v9 = vand.u32 2147483647, %v11613_v2 }
 0x7c5   : > { %7324 = vst [vmem:[%s11837_s4 + $0xd8] sm:$0xff] %v7115_v48  ;;  %v7422_v54 = vmul.f32 -1.442695, %v12837_v32  ;;  %v7121_v26 = vadd.f32 %v7605_v45, %v7120_v38  ;;  %v7148_v10 = vmul.f32 %v7609_v7, %v11602_v15  ;;  %v7173_v23 = vand.u32 2147483648, %v11613_v2 }
 0x7c6   : > { %v7611_v16 = vpop.eup %7610  ;;  %7616 = vpow2.f32 %v11569_v14  ;;  %v7136_v37 = vadd.f32 %v7607_v3, %v7135_v4  ;;  %vm7153_vm0 = vweird.f32 %v7609_v7  ;;  %v7423_v18 = vmul.f32 -1.442695, %v10694_v35  ;;  %v12840_v35 = vld [vmem:[#allocation39_spill] sm:$0xff] }
 0x7c7   : > { %v7163_v13 = vmul.f32 %v7611_v16, %v11613_v2  ;;  %7618 = vpow2.f32 %v11589_v52  ;;  %v7125_v34 = vsel %vm11651_vm13, %v7605_v45, %v7121_v26  ;;  %v7149_v61 = vsub.f32 1.0, %v7148_v10  ;;  %vm11689_vm2 = vmor %vm7152_vm11, %vm7153_vm0 }
 0x7c8   : > { %vm7168_vm1 = vweird.f32 %v7611_v16  ;;  %v7613_v20 = vpop.eup %7612  ;;  %v7130_v40 = vsel %vm11629_vm8, %v7129_v33, %v7125_v34  ;;  %v7140_v14 = vsel %vm11661_vm15, %v7607_v3, %v7136_v37  ;;  %7620 = vpow2.f32 %v7422_v54 }
 0x7c9   : > { %v7164_v11 = vsub.f32 1.0, %v7163_v13  ;;  %v7615_v0 = vpop.eup %7614  ;;  %7325 = vst [vmem:[%s11837_s4 + $0xe0] sm:$0xff] %v7130_v40  ;;  %v7145_v56 = vsel %vm11635_vm9, %v7144_v25, %v7140_v14  ;;  %v7150_v22 = vmul.f32 %v7609_v7, %v7149_v61  ;;  %v6689_v58 = vadd.f32 1.0, %v7613_v20  ;;  %vm11696_vm5 = vmor %vm7167_vm14, %vm7168_vm1 }
 0x7ca   : > { %v7424_v30 = vmul.f32 -1.442695, %v12840_v35  ;;  %7326 = vst [vmem:[%s11837_s4 + $0xe8] sm:$0xff] %v7145_v56  ;;  %v7159_v52 = vor.u32 1.1754944e-38, %v7158_v21  ;;  %v6690_v42 = vadd.f32 1.0, %v7615_v0  ;;  %7622 = vpow2.f32 %v7423_v18 }
 0x7cb   : > { %v7165_v1 = vmul.f32 %v7611_v16, %v7164_v11  ;;  %v7151_v39 = vadd.f32 %v7609_v7, %v7150_v22  ;;  %vm7157_vm3 = vcmp.eq.f32.partialorder %v7156_v17, 8.507059e+37  ;;  %v7174_v46 = vor.u32 1.1754944e-38, %v7173_v23 }
 0x7cc   : > { %v7617_v19 = vpop.eup %7616  ;;  %7624 = vrcp.f32 %v6689_v58  ;;  %vm7172_vm4 = vcmp.eq.f32.partialorder %v7171_v9, 8.507059e+37  ;;  %v7186_v15 = vand.u32 2147483647, %v6689_v58  ;;  %v7188_v43 = vand.u32 2147483648, %v6689_v58 }
 0x7cd   : > { %v7619_v8 = vpop.eup %7618  ;;  %v7166_v36 = vadd.f32 %v7611_v16, %v7165_v1  ;;  %7626 = vrcp.f32 %v6690_v42  ;;  %v7155_v6 = vsel %vm11689_vm2, %v7609_v7, %v7151_v39  ;;  %v11704_v63 = vadd.f32 1.0, %v7617_v19 }
 0x7ce   : > { %7628 = vpow2.f32 %v7424_v30  ;;  %v7621_v44 = vpop.eup %7620  ;;  %v7160_v57 = vsel %vm7157_vm3, %v7159_v52, %v7155_v6  ;;  %v7201_v2 = vand.u32 2147483647, %v6690_v42  ;;  %v11709_v45 = vadd.f32 1.0, %v7619_v8 }
 0x7cf   : > { %v7170_v51 = vsel %vm11696_vm5, %v7611_v16, %v7166_v36  ;;  %7327 = vst [vmem:[%s11837_s4 + $0xf0] sm:$0xff] %v7160_v57  ;;  %v7203_v3 = vand.u32 2147483648, %v6690_v42  ;;  %7630 = vrcp.f32 %v11704_v63  ;;  %v7425_v31 = vmul.f32 -1.442695, %v10696_v62 }
 0x7d0   : > { %v7175_v50 = vsel %vm7172_vm4, %v7174_v46, %v7170_v51  ;;  %v7623_v55 = vpop.eup %7622  ;;  %7632 = vrcp.f32 %v11709_v45  ;;  %vm7182_vm6 = vweird.f32 %v6689_v58  ;;  %vm7197_vm7 = vweird.f32 %v6690_v42 }
 0x7d1   : > { %7328 = vst [vmem:[%s11837_s4 + $0xf8] sm:$0xff] %v7175_v50  ;;  %vm11717_vm8 = vcmp.eq.f32.partialorder %v7186_v15, 8.507059e+37  ;;  %v7189_v59 = vor.u32 1.1754944e-38, %v7188_v43  ;;  %vm11721_vm9 = vcmp.eq.f32.partialorder %v7201_v2, 8.507059e+37  ;;  %v7204_v53 = vor.u32 1.1754944e-38, %v7203_v3 }
 0x7d2   : > { %v7625_v47 = vpop.eup %7624  ;;  %v11725_v41 = vadd.f32 1.0, %v7621_v44  ;;  %v11727_v48 = vadd.f32 1.0, %v7623_v55  ;;  %7634 = vpow2.f32 %v7425_v31  ;;  %vm7212_vm12 = vweird.f32 %v11704_v63 }
 0x7d3   : > { %v7627_v29 = vpop.eup %7626  ;;  %v7178_v33 = vmul.f32 %v7625_v47, %v6689_v58  ;;  %vm7183_vm10 = vweird.f32 %v7625_v47  ;;  %v7216_v7 = vand.u32 2147483647, %v11704_v63  ;;  %v7218_v54 = vand.u32 2147483648, %v11704_v63 }
 0x7d4   : > { %v7629_v12 = vpop.eup %7628  ;;  %v7193_v25 = vmul.f32 %v7627_v29, %v6690_v42  ;;  %vm7198_vm11 = vweird.f32 %v7627_v29  ;;  %7636 = vrcp.f32 %v11725_v41  ;;  %vm11733_vm13 = vmor %vm7182_vm6, %vm7183_vm10  ;;  %vm7227_vm14 = vweird.f32 %v11709_v45 }
 0x7d5   : > { %v7179_v17 = vsub.f32 1.0, %v7178_v33  ;;  %v7631_v38 = vpop.eup %7630  ;;  %vm11742_vm15 = vmor %vm7197_vm7, %vm7198_vm11  ;;  %v7233_v10 = vand.u32 2147483648, %v11709_v45  ;;  %v11748_v23 = vadd.f32 1.0, %v7629_v12  ;;  %7638 = vrcp.f32 %v11727_v48 }
 0x7d6   : > { %v7194_v62 = vsub.f32 1.0, %v7193_v25  ;;  %v7633_v27 = vpop.eup %7632  ;;  %v7208_v32 = vmul.f32 %v7631_v38, %v11704_v63  ;;  %vm7213_vm0 = vweird.f32 %v7631_v38  ;;  %v7231_v18 = vand.u32 2147483647, %v11709_v45 }
 0x7d7   : > { %v7180_v21 = vmul.f32 %v7625_v47, %v7179_v17  ;;  %v7223_v28 = vmul.f32 %v7633_v27, %v11709_v45  ;;  %vm7228_vm1 = vweird.f32 %v7633_v27  ;;  %vm11758_vm2 = vcmp.eq.f32.partialorder %v7216_v7, 8.507059e+37  ;;  %vm11769_vm3 = vmor %vm7212_vm12, %vm7213_vm0 }
 0x7d8   : > { %v7195_v9 = vmul.f32 %v7627_v29, %v7194_v62  ;;  %v7209_v13 = vsub.f32 1.0, %v7208_v32  ;;  %v7635_v20 = vpop.eup %7634  ;;  %v7219_v35 = vor.u32 1.1754944e-38, %v7218_v54  ;;  %7640 = vrcp.f32 %v11748_v23  ;;  %vm11780_vm5 = vmor %vm7227_vm14, %vm7228_vm1 }
 0x7d9   : > { %v7181_v16 = vadd.f32 %v7625_v47, %v7180_v21  ;;  %v7224_v61 = vsub.f32 1.0, %v7223_v28  ;;  %v7234_v1 = vor.u32 1.1754944e-38, %v7233_v10  ;;  %v7248_v19 = vand.u32 2147483648, %v11725_v41 }
 0x7da   : > { %v7196_v37 = vadd.f32 %v7627_v29, %v7195_v9  ;;  %v7210_v11 = vmul.f32 %v7631_v38, %v7209_v13  ;;  %v7637_v56 = vpop.eup %7636  ;;  %vm7232_vm4 = vcmp.eq.f32.partialorder %v7231_v18, 8.507059e+37  ;;  %vm7242_vm6 = vweird.f32 %v11725_v41 }
 0x7db   : > { %v7185_v34 = vsel %vm11733_vm13, %v7625_v47, %v7181_v16  ;;  %v7225_v30 = vmul.f32 %v7633_v27, %v7224_v61  ;;  %v7238_v42 = vmul.f32 %v7637_v56, %v11725_v41  ;;  %v7246_v60 = vand.u32 2147483647, %v11725_v41  ;;  %v7639_v46 = vpop.eup %7638 }
 0x7dc   : > { %v7190_v40 = vsel %vm11717_vm8, %v7189_v59, %v7185_v34  ;;  %v7200_v14 = vsel %vm11742_vm15, %v7627_v29, %v7196_v37  ;;  %v7211_v49 = vadd.f32 %v7631_v38, %v7210_v11  ;;  %vm7243_vm7 = vweird.f32 %v7637_v56 }
 0x7dd   : > { %7329 = vst [vmem:[%s11837_s4 + $0x100] sm:$0xff] %v7190_v40  ;;  %v7205_v22 = vsel %vm11721_vm9, %v7204_v53, %v7200_v14  ;;  %v7226_v39 = vadd.f32 %v7633_v27, %v7225_v30  ;;  %v7239_v36 = vsub.f32 1.0, %v7238_v42  ;;  %v6696_v6 = vadd.f32 1.0, %v7635_v20  ;;  %vm11805_vm9 = vmor %vm7242_vm6, %vm7243_vm7 }
 0x7de   : > { %7330 = vst [vmem:[%s11837_s4 + $0x108] sm:$0xff] %v7205_v22  ;;  %v7215_v8 = vsel %vm11769_vm3, %v7631_v38, %v7211_v49  ;;  %v7253_v51 = vmul.f32 %v7639_v46, %v11727_v48  ;;  %v7263_v15 = vand.u32 2147483648, %v11727_v48  ;;  %v7249_v43 = vor.u32 1.1754944e-38, %v7248_v19  ;;  %v7641_v2 = vpop.eup %7640 }
 0x7df   : > { %v7220_v44 = vsel %vm11758_vm2, %v7219_v35, %v7215_v8  ;;  %v7230_v57 = vsel %vm11780_vm5, %v7633_v27, %v7226_v39  ;;  %v7240_v50 = vmul.f32 %v7637_v56, %v7239_v36  ;;  %vm7257_vm8 = vweird.f32 %v11727_v48 }
 0x7e0   : > { %7331 = vst [vmem:[%s11837_s4 + $0x110] sm:$0xff] %v7220_v44  ;;  %v7235_v63 = vsel %vm7232_vm4, %v7234_v1, %v7230_v57  ;;  %v7254_v55 = vsub.f32 1.0, %v7253_v51  ;;  %vm7258_vm10 = vweird.f32 %v7639_v46  ;;  %v7261_v3 = vand.u32 2147483647, %v11727_v48 }
 0x7e1   : > { %7332 = vst [vmem:[%s11837_s4 + $0x118] sm:$0xff] %v7235_v63  ;;  %7642 = vrcp.f32 %v6696_v6  ;;  %v7241_v47 = vadd.f32 %v7637_v56, %v7240_v50  ;;  %vm7247_vm11 = vcmp.eq.f32.partialorder %v7246_v60, 8.507059e+37  ;;  %v7268_v31 = vmul.f32 %v7641_v2, %v11748_v23  ;;  %vm7259_vm13 = vmor %vm7257_vm8, %vm7258_vm10 }
 0x7e2   : > { %v7255_v29 = vmul.f32 %v7639_v46, %v7254_v55  ;;  %v7264_v33 = vor.u32 1.1754944e-38, %v7263_v15  ;;  %vm7272_vm12 = vweird.f32 %v11748_v23  ;;  %v7278_v12 = vand.u32 2147483648, %v11748_v23 }
 0x7e3   : > { %v7245_v24 = vsel %vm11805_vm9, %v7637_v56, %v7241_v47  ;;  %v7269_v59 = vsub.f32 1.0, %v7268_v31  ;;  %vm7273_vm14 = vweird.f32 %v7641_v2  ;;  %v7276_v25 = vand.u32 2147483647, %v11748_v23 }
 0x7e4   : > { %v7250_v5 = vsel %vm7247_vm11, %v7249_v43, %v7245_v24  ;;  %v7256_v17 = vadd.f32 %v7639_v46, %v7255_v29  ;;  %vm7262_vm15 = vcmp.eq.f32.partialorder %v7261_v3, 8.507059e+37  ;;  %vm7274_vm0 = vmor %vm7272_vm12, %vm7273_vm14  ;;  %v7279_v38 = vor.u32 1.1754944e-38, %v7278_v12 }
 0x7e5   : > { %7333 = vst [vmem:[%s11837_s4 + $0x120] sm:$0xff] %v7250_v5  ;;  %v7270_v53 = vmul.f32 %v7641_v2, %v7269_v59  ;;  %vm7277_vm1 = vcmp.eq.f32.partialorder %v7276_v25, 8.507059e+37  ;;  %vm7287_vm2 = vweird.f32 %v6696_v6  ;;  %v7293_v27 = vand.u32 2147483648, %v6696_v6 }
 0x7e6   : > { %v7260_v62 = vsel %vm7259_vm13, %v7639_v46, %v7256_v17  ;;  %v7291_v32 = vand.u32 2147483647, %v6696_v6 }
 0x7e7   : > { %v7643_v41 = vpop.eup %7642  ;;  %v7265_v21 = vsel %vm7262_vm15, %v7264_v33, %v7260_v62  ;;  %v7271_v7 = vadd.f32 %v7641_v2, %v7270_v53  ;;  %v7294_v26 = vor.u32 1.1754944e-38, %v7293_v27 }
 0x7e8   : > { %v7283_v48 = vmul.f32 %v7643_v41, %v6696_v6  ;;  %7334 = vst [vmem:[%s11837_s4 + $0x128] sm:$0xff] %v7265_v21  ;;  %vm7288_vm3 = vweird.f32 %v7643_v41  ;;  %vm7292_vm4 = vcmp.eq.f32.partialorder %v7291_v32, 8.507059e+37 }
 0x7e9   : > { %v7275_v4 = vsel %vm7274_vm0, %v7641_v2, %v7271_v7  ;;  %vm7289_vm5 = vmor %vm7287_vm2, %vm7288_vm3 }
 0x7ea   : > { %v7284_v9 = vsub.f32 1.0, %v7283_v48  ;;  %v7280_v54 = vsel %vm7277_vm1, %v7279_v38, %v7275_v4 }
 0x7eb   : > { %7335 = vst [vmem:[%s11837_s4 + $0x130] sm:$0xff] %v7280_v54 }
 0x7ec   : > { %v7285_v16 = vmul.f32 %v7643_v41, %v7284_v9 }
 0x7ee   : > { %v7286_v28 = vadd.f32 %v7643_v41, %v7285_v16 }
 0x7f0   : > { %v7290_v10 = vsel %vm7289_vm5, %v7643_v41, %v7286_v28 }
 0x7f1   : > { %v7295_v23 = vsel %vm7292_vm4, %v7294_v26, %v7290_v10 }
 0x7f2   : > { %7336 = vst [vmem:[%s11837_s4 + $0x138] sm:$0xff] %v7295_v23 }
 0x7f3 PF: > { %s14_s15 = sadd.s32 1, %s7650_s15  }
 0x7f4   : > { %p11_p7 = scmp.ge.s32.totalorder %s14_s15, 7  }
 0x7f6   :  { %13 = sbr.rel (!%p11_p7) target bundleno = 1 (0x1), region = 78 }

</bundles_post_ra>
